<compile_context>
chip_gen: v5e
topology: v5e:2x2
jax: 0.10.0
libtpu: 0.0.40
codegen_flags: <defaults>
</compile_context>

<pallas_src>
import math
from functools import partial

import jax
import jax.numpy as jnp
from jax import lax
from jax.experimental import pallas as pl
from jax.experimental.pallas import tpu as pltpu


# ---------------------------------------------------------------------------
# Fused kernel: CLS/pos prologue + n_layers encoder layers + final LayerNorm
# ---------------------------------------------------------------------------

def _make_kernel(B, T, H, L):
    S = T + 1          # CLS + frames
    eps = 1e-5

    def kernel(fr_ref, cls_ref, pos_ref,
               wq, bq, wk, bk, wv, bv, wo, bo,
               w1, b1, w2, b2,
               n1g, n1b, n2g, n2b, fng, fnb,
               cls_out_ref, attn_ref):

        def layer_norm(h, g, b):
            mu = jnp.mean(h, axis=-1, keepdims=True)
            var = jnp.mean(jnp.square(h - mu), axis=-1, keepdims=True)
            return (h - mu) * lax.rsqrt(var + eps) * g + b

        pos = pos_ref[...]          # (S, E)
        cls_tok = cls_ref[...]      # (1, E)

        # Fused prologue: build the (B*S, E) working set (CLS + pos add).
        rows = []
        for b in range(B):
            rows.append(cls_tok + pos[0:1, :])
            rows.append(fr_ref[b] + pos[1:, :])
        x = jnp.concatenate(rows, axis=0)                       # (B*S, E)

        for l in range(L):                                      # static unroll
            # ---- self-attention: per-head weights, out-proj folded in ------
            attn_out = [None] * B          # per-video (S, E) accumulators
            attw = [None] * B              # per-video head-summed probs
            for h in range(H):
                # Per-head projections over ALL B*S rows at once; the head
                # split lives in the packed weights (no activation lane slice).
                q_h = jnp.dot(x, wq[l, h],
                              preferred_element_type=jnp.float32) + bq[l, h]
                k_h = jnp.dot(x, wk[l, h],
                              preferred_element_type=jnp.float32) + bk[l, h]
                v_h = jnp.dot(x, wv[l, h],
                              preferred_element_type=jnp.float32) + bv[l, h]
                # Fold the output projection: vo_h is full width (B*S, E), so
                # the per-head results accumulate without any lane concat.
                vo_h = jnp.dot(v_h, wo[l, h],
                               preferred_element_type=jnp.float32)
                for b in range(B):
                    r0 = b * S
                    qb = q_h[r0:r0 + S, :]                      # (S, Dh)
                    kb = k_h[r0:r0 + S, :]
                    # scores: contract last-vs-last (no K transpose)
                    s = lax.dot_general(qb, kb, (((1,), (1,)), ((), ())),
                                        preferred_element_type=jnp.float32)
                    m = jnp.max(s, axis=-1, keepdims=True)
                    e = jnp.exp(s - m)
                    p = e / jnp.sum(e, axis=-1, keepdims=True)  # exact softmax
                    contrib = jnp.dot(p, vo_h[r0:r0 + S, :],
                                      preferred_element_type=jnp.float32)
                    attn_out[b] = (contrib if attn_out[b] is None
                                   else attn_out[b] + contrib)
                    if l == L - 1:                              # last layer only
                        attw[b] = p if attw[b] is None else attw[b] + p

            attn_full = jnp.concatenate(attn_out, axis=0) + bo[l]   # (B*S, E)
            x = layer_norm(x + attn_full, n1g[l], n1b[l])           # norm1

            # FFN: linear2(relu(linear1(x))) on all B*S rows at once
            ff = jnp.maximum(
                jnp.dot(x, w1[l], preferred_element_type=jnp.float32) + b1[l],
                0.0)
            ff = jnp.dot(ff, w2[l], preferred_element_type=jnp.float32) + b2[l]
            x = layer_norm(x + ff, n2g[l], n2b[l])                  # norm2

            if l == L - 1:
                inv_h = 1.0 / H
                for b in range(B):
                    attn_ref[b] = attw[b] * inv_h               # head-averaged

        # final encoder LayerNorm, then gather the CLS row of every video
        x = layer_norm(x, fng[...], fnb[...])
        cls_out_ref[...] = jnp.concatenate(
            [x[b * S:b * S + 1, :] for b in range(B)], axis=0)  # (B, E)

    return kernel


def _fused_taggregate(frames, packed, *, nhead):
    """frames: (B, clip_length, E) f32.  Returns (cls_out (B,E), attn (B,S,S))."""
    B, T, E = frames.shape
    S = T + 1
    L = packed['wq'].shape[0]
    H = nhead

    kernel = _make_kernel(B, T, H, L)

    args = (frames, packed['cls_token'], packed['pos_embed'],
            packed['wq'], packed['bq'], packed['wk'], packed['bk'],
            packed['wv'], packed['bv'], packed['wo'], packed['bo'],
            packed['w1'], packed['b1'], packed['w2'], packed['b2'],
            packed['n1g'], packed['n1b'], packed['n2g'], packed['n2b'],
            packed['fng'], packed['fnb'])

    def full_spec(a):
        nd = a.ndim
        return pl.BlockSpec(a.shape, lambda i, _n=nd: (0,) * _n)

    cls_out, attn = pl.pallas_call(
        kernel,
        out_shape=(jax.ShapeDtypeStruct((B, E), jnp.float32),
                   jax.ShapeDtypeStruct((B, S, S), jnp.float32)),
        grid=(1,),                                   # single fused grid step
        in_specs=[full_spec(a) for a in args],
        out_specs=(pl.BlockSpec((B, E), lambda i: (0, 0)),
                   pl.BlockSpec((B, S, S), lambda i: (0, 0, 0))),
        compiler_params=pltpu.CompilerParams(
            dimension_semantics=("arbitrary",)),
    )(*args)
    return cls_out, attn


# ---------------------------------------------------------------------------
# TAggregate forward (eval mode)
# ---------------------------------------------------------------------------

def taggregate_forward(x, packed, *, clip_length, nhead=8, transformers_pos=True):
    """x: (nvids*clip_length, embed_dim). Returns (o[:, 0], attn_weight)."""
    E = x.shape[-1]
    B = x.shape[0] // clip_length
    frames = x.reshape(B, clip_length, E)
    if not transformers_pos:
        packed = dict(packed, pos_embed=jnp.zeros_like(packed['pos_embed']))
    return _fused_taggregate(frames, packed, nhead=nhead)


# ---------------------------------------------------------------------------
# Deterministic synthetic parameters (PyTorch layout) + one-time packing
# ---------------------------------------------------------------------------

def init_params(key, embed_dim, dim_ff, n_layers, clip_length):
    # NOTE: biases / LayerNorm params are randomized (the real module inits
    # them to 0 / 1) so that the reference comparison exercises every path.
    def nrm(k, shape, std=0.02):
        return (std * jax.random.normal(k, shape)).astype(jnp.float32)

    keys = jax.random.split(key, n_layers + 3)
    layers = []
    for li in range(n_layers):
        ks = jax.random.split(keys[li], 12)
        layers.append(dict(
            in_proj_w=nrm(ks[0], (3 * embed_dim, embed_dim)),   # (out, in)
            in_proj_b=nrm(ks[1], (3 * embed_dim,)),
            out_proj_w=nrm(ks[2], (embed_dim, embed_dim)),
            out_proj_b=nrm(ks[3], (embed_dim,)),
            lin1_w=nrm(ks[4], (dim_ff, embed_dim)),
            lin1_b=nrm(ks[5], (dim_ff,)),
            lin2_w=nrm(ks[6], (embed_dim, dim_ff)),
            lin2_b=nrm(ks[7], (embed_dim,)),
            norm1_g=(1.0 + nrm(ks[8], (embed_dim,))).astype(jnp.float32),
            norm1_b=nrm(ks[9], (embed_dim,)),
            norm2_g=(1.0 + nrm(ks[10], (embed_dim,))).astype(jnp.float32),
            norm2_b=nrm(ks[11], (embed_dim,)),
        ))
    return dict(
        layers=layers,
        final_g=jnp.ones((embed_dim,), jnp.float32),
        final_b=jnp.zeros((embed_dim,), jnp.float32),
        cls_token=nrm(keys[-2], (1, 1, embed_dim)),
        pos_embed=nrm(keys[-1], (1, clip_length + 1, embed_dim)),
    )


def pack_params(params, nhead):
    """One-time packing: stack per-layer weights over a leading L axis,
    pre-transpose to (in, out), split Q/K/V/out-proj per head and fold the
    1/sqrt(head_dim) scale into the Q weight/bias."""
    layers = params['layers']
    E = params['cls_token'].shape[-1]
    H = nhead
    Dh = E // H
    scale = 1.0 / math.sqrt(Dh)

    def head_split_T(w_out_in):            # (E_out, E_in) -> (H, E_in, Dh)
        return jnp.stack([w_out_in[h * Dh:(h + 1) * Dh, :].T for h in range(H)])

    def head_split_b(b_vec):               # (E,) -> (H, 1, Dh)
        return jnp.stack([b_vec[h * Dh:(h + 1) * Dh][None, :] for h in range(H)])

    wq, bq, wk, bk, wv, bv, wo, bo = [], [], [], [], [], [], [], []
    w1, b1, w2, b2 = [], [], [], []
    n1g, n1b, n2g, n2b = [], [], [], []
    for lp in layers:
        Wq = lp['in_proj_w'][:E]
        Wk = lp['in_proj_w'][E:2 * E]
        Wv = lp['in_proj_w'][2 * E:]
        Bq = lp['in_proj_b'][:E]
        Bk = lp['in_proj_b'][E:2 * E]
        Bv = lp['in_proj_b'][2 * E:]
        wq.append(head_split_T(Wq) * scale)          # scale folded into Q
        bq.append(head_split_b(Bq) * scale)
        wk.append(head_split_T(Wk))
        bk.append(head_split_b(Bk))
        wv.append(head_split_T(Wv))
        bv.append(head_split_b(Bv))
        # out proj: per-head rows of W_out.T -> (H, Dh, E)
        woT = lp['out_proj_w'].T
        wo.append(jnp.stack([woT[h * Dh:(h + 1) * Dh, :] for h in range(H)]))
        bo.append(lp['out_proj_b'][None, :])
        w1.append(lp['lin1_w'].T)                    # (E, F)
        b1.append(lp['lin1_b'][None, :])
        w2.append(lp['lin2_w'].T)                    # (F, E)
        b2.append(lp['lin2_b'][None, :])
        n1g.append(lp['norm1_g'][None, :]); n1b.append(lp['norm1_b'][None, :])
        n2g.append(lp['norm2_g'][None, :]); n2b.append(lp['norm2_b'][None, :])

    st = jnp.stack
    return dict(
        wq=st(wq), bq=st(bq), wk=st(wk), bk=st(bk), wv=st(wv), bv=st(bv),
        wo=st(wo), bo=st(bo), w1=st(w1), b1=st(b1), w2=st(w2), b2=st(b2),
        n1g=st(n1g), n1b=st(n1b), n2g=st(n2g), n2b=st(n2b),
        fng=params['final_g'][None, :], fnb=params['final_b'][None, :],
        cls_token=params['cls_token'][0],            # (1, E)
        pos_embed=params['pos_embed'][0],            # (S, E)
    )


# ---------------------------------------------------------------------------
# Pure-JAX reference (eval-mode PyTorch semantics) for correctness checking
# ---------------------------------------------------------------------------

def taggregate_reference(x, params, clip_length, nhead, transformers_pos=True):
    E = x.shape[-1]
    B = x.shape[0] // clip_length
    H = nhead
    Dh = E // H
    S = clip_length + 1
    scale = 1.0 / math.sqrt(Dh)
    hp = jax.lax.Precision.HIGHEST

    frames = x.reshape(B, clip_length, E)
    cls = jnp.broadcast_to(params['cls_token'], (B, 1, E))
    h = jnp.concatenate([cls, frames], axis=1)
    if transformers_pos:
        h = h + params['pos_embed']

    def ln(v, g, b, eps=1e-5):
        mu = v.mean(-1, keepdims=True)
        var = jnp.square(v - mu).mean(-1, keepdims=True)
        return (v - mu) * jax.lax.rsqrt(var + eps) * g + b

    attn_w = None
    for lp in params['layers']:
        qkv = jnp.einsum('bse,oe->bso', h, lp['in_proj_w'],
                         precision=hp) + lp['in_proj_b']
        q = (qkv[..., :E] * scale).reshape(B, S, H, Dh)
        k = qkv[..., E:2 * E].reshape(B, S, H, Dh)
        v = qkv[..., 2 * E:].reshape(B, S, H, Dh)
        s = jnp.einsum('bqhd,bkhd->bhqk', q, k, precision=hp)
        p = jax.nn.softmax(s, axis=-1)
        ctx = jnp.einsum('bhqk,bkhd->bqhd', p, v, precision=hp).reshape(B, S, E)
        attn_out = jnp.einsum('bse,oe->bso', ctx, lp['out_proj_w'],
                              precision=hp) + lp['out_proj_b']
        h = ln(h + attn_out, lp['norm1_g'], lp['norm1_b'])
        ff = jax.nn.relu(jnp.einsum('bse,fe->bsf', h, lp['lin1_w'],
                                    precision=hp) + lp['lin1_b'])
        ff = jnp.einsum('bsf,ef->bse', ff, lp['lin2_w'],
                        precision=hp) + lp['lin2_b']
        h = ln(h + ff, lp['norm2_g'], lp['norm2_b'])
        attn_w = p.mean(axis=1)                       # head-averaged (B, S, S)
    h = ln(h, params['final_g'], params['final_b'])
    return h[:, 0, :], attn_w


# ---------------------------------------------------------------------------
# main
# ---------------------------------------------------------------------------

if __name__ == "__main__":
    # Small shapes consistent with the module: nvids=2 videos, clip_length=8
    # frames, embed_dim=64, nhead=8 (head_dim=8), dim_feedforward=128, 2 layers.
    nvids = 2
    clip_length = 8
    embed_dim = 64
    dim_ff = 128
    n_layers = 2
    nhead = 8

    key = jax.random.PRNGKey(0)
    k_x, k_p = jax.random.split(key)
    x = jax.random.normal(k_x, (nvids * clip_length, embed_dim), dtype=jnp.float32)
    params = init_params(k_p, embed_dim, dim_ff, n_layers, clip_length)
    packed = pack_params(params, nhead)              # one-time pack / transpose

    fwd = jax.jit(partial(taggregate_forward, clip_length=clip_length,
                          nhead=nhead, transformers_pos=True))
    cls_out, attn_weight = fwd(x, packed)
    jax.block_until_ready((cls_out, attn_weight))

    # ---- structural checks ----
    assert cls_out.shape == (nvids, embed_dim)
    assert attn_weight.shape == (nvids, clip_length + 1, clip_length + 1)
    assert bool(jnp.all(jnp.isfinite(cls_out)))
    assert bool(jnp.all(jnp.isfinite(attn_weight)))
    # exact-division softmax: rows (head-averaged) sum to 1 to rounding
    assert bool(jnp.allclose(attn_weight.sum(-1), 1.0, atol=1e-4))

    # ---- pure-JAX reference comparison ----
    ref_fn = jax.jit(partial(taggregate_reference, clip_length=clip_length,
                             nhead=nhead, transformers_pos=True))
    ref_cls, ref_attn = ref_fn(x, params)
    jax.block_until_ready((ref_cls, ref_attn))
    # tolerance covers MXU bf16-pass differences for f32 matmul operands;
    # genuine packing/transposition bugs would show up as O(1) discrepancies.
    assert bool(jnp.allclose(cls_out, ref_cls, atol=3e-2, rtol=3e-2))
    assert bool(jnp.allclose(attn_weight, ref_attn, atol=3e-2, rtol=3e-2))

    print("KERNEL_OK")
</pallas_src>

<mosaic_0001>
module attributes {stable_mosaic.version = 11 : i64} {
  func.func @kernel(%arg0: i32, %arg1: memref<2x8x64xf32, #tpu.memory_space<vmem>>, %arg2: memref<1x64xf32, #tpu.memory_space<vmem>>, %arg3: memref<9x64xf32, #tpu.memory_space<vmem>>, %arg4: memref<2x8x64x8xf32, #tpu.memory_space<vmem>>, %arg5: memref<2x8x1x8xf32, #tpu.memory_space<vmem>>, %arg6: memref<2x8x64x8xf32, #tpu.memory_space<vmem>>, %arg7: memref<2x8x1x8xf32, #tpu.memory_space<vmem>>, %arg8: memref<2x8x64x8xf32, #tpu.memory_space<vmem>>, %arg9: memref<2x8x1x8xf32, #tpu.memory_space<vmem>>, %arg10: memref<2x8x8x64xf32, #tpu.memory_space<vmem>>, %arg11: memref<2x1x64xf32, #tpu.memory_space<vmem>>, %arg12: memref<2x64x128xf32, #tpu.memory_space<vmem>>, %arg13: memref<2x1x128xf32, #tpu.memory_space<vmem>>, %arg14: memref<2x128x64xf32, #tpu.memory_space<vmem>>, %arg15: memref<2x1x64xf32, #tpu.memory_space<vmem>>, %arg16: memref<2x1x64xf32, #tpu.memory_space<vmem>>, %arg17: memref<2x1x64xf32, #tpu.memory_space<vmem>>, %arg18: memref<2x1x64xf32, #tpu.memory_space<vmem>>, %arg19: memref<2x1x64xf32, #tpu.memory_space<vmem>>, %arg20: memref<1x64xf32, #tpu.memory_space<vmem>>, %arg21: memref<1x64xf32, #tpu.memory_space<vmem>>, %arg22: memref<2x64xf32, #tpu.memory_space<vmem>>, %arg23: memref<2x9x9xf32, #tpu.memory_space<vmem>>) attributes {dimension_semantics = [#tpu.dimension_semantics<arbitrary>], iteration_bounds = array<i64: 1>, scalar_prefetch = 0 : i64, scratch_operands = 0 : i64, tpu.core_type = #tpu.core_type<tc>, window_params = [{pipeline_mode = #tpu.pipeline_mode<synchronous>, transform_indices = @transform_0, window_bounds = array<i64: 2, 8, 64>}, {pipeline_mode = #tpu.pipeline_mode<synchronous>, transform_indices = @transform_1, window_bounds = array<i64: 1, 64>}, {pipeline_mode = #tpu.pipeline_mode<synchronous>, transform_indices = @transform_2, window_bounds = array<i64: 9, 64>}, {pipeline_mode = #tpu.pipeline_mode<synchronous>, transform_indices = @transform_3, window_bounds = array<i64: 2, 8, 64, 8>}, {pipeline_mode = #tpu.pipeline_mode<synchronous>, transform_indices = @transform_4, window_bounds = array<i64: 2, 8, 1, 8>}, {pipeline_mode = #tpu.pipeline_mode<synchronous>, transform_indices = @transform_5, window_bounds = array<i64: 2, 8, 64, 8>}, {pipeline_mode = #tpu.pipeline_mode<synchronous>, transform_indices = @transform_6, window_bounds = array<i64: 2, 8, 1, 8>}, {pipeline_mode = #tpu.pipeline_mode<synchronous>, transform_indices = @transform_7, window_bounds = array<i64: 2, 8, 64, 8>}, {pipeline_mode = #tpu.pipeline_mode<synchronous>, transform_indices = @transform_8, window_bounds = array<i64: 2, 8, 1, 8>}, {pipeline_mode = #tpu.pipeline_mode<synchronous>, transform_indices = @transform_9, window_bounds = array<i64: 2, 8, 8, 64>}, {pipeline_mode = #tpu.pipeline_mode<synchronous>, transform_indices = @transform_10, window_bounds = array<i64: 2, 1, 64>}, {pipeline_mode = #tpu.pipeline_mode<synchronous>, transform_indices = @transform_11, window_bounds = array<i64: 2, 64, 128>}, {pipeline_mode = #tpu.pipeline_mode<synchronous>, transform_indices = @transform_12, window_bounds = array<i64: 2, 1, 128>}, {pipeline_mode = #tpu.pipeline_mode<synchronous>, transform_indices = @transform_13, window_bounds = array<i64: 2, 128, 64>}, {pipeline_mode = #tpu.pipeline_mode<synchronous>, transform_indices = @transform_14, window_bounds = array<i64: 2, 1, 64>}, {pipeline_mode = #tpu.pipeline_mode<synchronous>, transform_indices = @transform_15, window_bounds = array<i64: 2, 1, 64>}, {pipeline_mode = #tpu.pipeline_mode<synchronous>, transform_indices = @transform_16, window_bounds = array<i64: 2, 1, 64>}, {pipeline_mode = #tpu.pipeline_mode<synchronous>, transform_indices = @transform_17, window_bounds = array<i64: 2, 1, 64>}, {pipeline_mode = #tpu.pipeline_mode<synchronous>, transform_indices = @transform_18, window_bounds = array<i64: 2, 1, 64>}, {pipeline_mode = #tpu.pipeline_mode<synchronous>, transform_indices = @transform_19, window_bounds = array<i64: 1, 64>}, {pipeline_mode = #tpu.pipeline_mode<synchronous>, transform_indices = @transform_20, window_bounds = array<i64: 1, 64>}, {pipeline_mode = #tpu.pipeline_mode<synchronous>, transform_indices = @transform_21, window_bounds = array<i64: 2, 64>}, {pipeline_mode = #tpu.pipeline_mode<synchronous>, transform_indices = @transform_22, window_bounds = array<i64: 2, 9, 9>}]} {
    %c0 = arith.constant 0 : index
    %c0_0 = arith.constant 0 : index
    %0 = vector.load %arg3[%c0, %c0_0] : memref<9x64xf32, #tpu.memory_space<vmem>>, vector<9x64xf32>
    %c0_1 = arith.constant 0 : index
    %c0_2 = arith.constant 0 : index
    %1 = vector.load %arg2[%c0_1, %c0_2] : memref<1x64xf32, #tpu.memory_space<vmem>>, vector<1x64xf32>
    %2 = vector.extract_strided_slice %0 {offsets = [0, 0], sizes = [1, 64], strides = [1, 1]} : vector<9x64xf32> to vector<1x64xf32>
    %3 = arith.addf %1, %2 : vector<1x64xf32>
    %c0_3 = arith.constant 0 : index
    %c0_4 = arith.constant 0 : index
    %c0_5 = arith.constant 0 : index
    %4 = vector.load %arg1[%c0_3, %c0_4, %c0_5] : memref<2x8x64xf32, #tpu.memory_space<vmem>>, vector<1x8x64xf32>
    %5 = vector.shape_cast %4 : vector<1x8x64xf32> to vector<8x64xf32>
    %6 = vector.extract_strided_slice %0 {offsets = [1, 0], sizes = [8, 64], strides = [1, 1]} : vector<9x64xf32> to vector<8x64xf32>
    %7 = arith.addf %5, %6 : vector<8x64xf32>
    %8 = vector.extract_strided_slice %0 {offsets = [0, 0], sizes = [1, 64], strides = [1, 1]} : vector<9x64xf32> to vector<1x64xf32>
    %9 = arith.addf %1, %8 : vector<1x64xf32>
    %c1 = arith.constant 1 : index
    %c0_6 = arith.constant 0 : index
    %c0_7 = arith.constant 0 : index
    %10 = vector.load %arg1[%c1, %c0_6, %c0_7] : memref<2x8x64xf32, #tpu.memory_space<vmem>>, vector<1x8x64xf32>
    %11 = vector.shape_cast %10 : vector<1x8x64xf32> to vector<8x64xf32>
    %12 = vector.extract_strided_slice %0 {offsets = [1, 0], sizes = [8, 64], strides = [1, 1]} : vector<9x64xf32> to vector<8x64xf32>
    %13 = arith.addf %11, %12 : vector<8x64xf32>
    %14 = tpu.concatenate %3, %7, %9, %13 in 0 : vector<1x64xf32>, vector<8x64xf32>, vector<1x64xf32>, vector<8x64xf32> -> vector<18x64xf32>
    %c0_8 = arith.constant 0 : index
    %c0_9 = arith.constant 0 : index
    %c0_10 = arith.constant 0 : index
    %c0_11 = arith.constant 0 : index
    %15 = vector.load %arg4[%c0_8, %c0_9, %c0_10, %c0_11] : memref<2x8x64x8xf32, #tpu.memory_space<vmem>>, vector<1x1x64x8xf32>
    %16 = vector.shape_cast %15 : vector<1x1x64x8xf32> to vector<64x8xf32>
    %cst = arith.constant dense<0.000000e+00> : vector<18x8xf32>
    %17 = tpu.matmul %14, %16, %cst {dimension_numbers = #tpu.dot_dimension_numbers<[1], [0], [0], [1], [0, 0, 1, 1], [], []>} : vector<18x64xf32>, vector<64x8xf32>, vector<18x8xf32> -> vector<18x8xf32>
    %c0_12 = arith.constant 0 : index
    %c0_13 = arith.constant 0 : index
    %c0_14 = arith.constant 0 : index
    %c0_15 = arith.constant 0 : index
    %18 = vector.load %arg5[%c0_12, %c0_13, %c0_14, %c0_15] : memref<2x8x1x8xf32, #tpu.memory_space<vmem>>, vector<1x1x1x8xf32>
    %19 = vector.shape_cast %18 : vector<1x1x1x8xf32> to vector<1x8xf32>
    %20 = vector.broadcast %19 : vector<1x8xf32> to vector<18x8xf32>
    %21 = arith.addf %17, %20 : vector<18x8xf32>
    %c0_16 = arith.constant 0 : index
    %c0_17 = arith.constant 0 : index
    %c0_18 = arith.constant 0 : index
    %c0_19 = arith.constant 0 : index
    %22 = vector.load %arg6[%c0_16, %c0_17, %c0_18, %c0_19] : memref<2x8x64x8xf32, #tpu.memory_space<vmem>>, vector<1x1x64x8xf32>
    %23 = vector.shape_cast %22 : vector<1x1x64x8xf32> to vector<64x8xf32>
    %cst_20 = arith.constant dense<0.000000e+00> : vector<18x8xf32>
    %24 = tpu.matmul %14, %23, %cst_20 {dimension_numbers = #tpu.dot_dimension_numbers<[1], [0], [0], [1], [0, 0, 1, 1], [], []>} : vector<18x64xf32>, vector<64x8xf32>, vector<18x8xf32> -> vector<18x8xf32>
    %c0_21 = arith.constant 0 : index
    %c0_22 = arith.constant 0 : index
    %c0_23 = arith.constant 0 : index
    %c0_24 = arith.constant 0 : index
    %25 = vector.load %arg7[%c0_21, %c0_22, %c0_23, %c0_24] : memref<2x8x1x8xf32, #tpu.memory_space<vmem>>, vector<1x1x1x8xf32>
    %26 = vector.shape_cast %25 : vector<1x1x1x8xf32> to vector<1x8xf32>
    %27 = vector.broadcast %26 : vector<1x8xf32> to vector<18x8xf32>
    %28 = arith.addf %24, %27 : vector<18x8xf32>
    %c0_25 = arith.constant 0 : index
    %c0_26 = arith.constant 0 : index
    %c0_27 = arith.constant 0 : index
    %c0_28 = arith.constant 0 : index
    %29 = vector.load %arg8[%c0_25, %c0_26, %c0_27, %c0_28] : memref<2x8x64x8xf32, #tpu.memory_space<vmem>>, vector<1x1x64x8xf32>
    %30 = vector.shape_cast %29 : vector<1x1x64x8xf32> to vector<64x8xf32>
    %cst_29 = arith.constant dense<0.000000e+00> : vector<18x8xf32>
    %31 = tpu.matmul %14, %30, %cst_29 {dimension_numbers = #tpu.dot_dimension_numbers<[1], [0], [0], [1], [0, 0, 1, 1], [], []>} : vector<18x64xf32>, vector<64x8xf32>, vector<18x8xf32> -> vector<18x8xf32>
    %c0_30 = arith.constant 0 : index
    %c0_31 = arith.constant 0 : index
    %c0_32 = arith.constant 0 : index
    %c0_33 = arith.constant 0 : index
    %32 = vector.load %arg9[%c0_30, %c0_31, %c0_32, %c0_33] : memref<2x8x1x8xf32, #tpu.memory_space<vmem>>, vector<1x1x1x8xf32>
    %33 = vector.shape_cast %32 : vector<1x1x1x8xf32> to vector<1x8xf32>
    %34 = vector.broadcast %33 : vector<1x8xf32> to vector<18x8xf32>
    %35 = arith.addf %31, %34 : vector<18x8xf32>
    %c0_34 = arith.constant 0 : index
    %c0_35 = arith.constant 0 : index
    %c0_36 = arith.constant 0 : index
    %c0_37 = arith.constant 0 : index
    %36 = vector.load %arg10[%c0_34, %c0_35, %c0_36, %c0_37] : memref<2x8x8x64xf32, #tpu.memory_space<vmem>>, vector<1x1x8x64xf32>
    %37 = vector.shape_cast %36 : vector<1x1x8x64xf32> to vector<8x64xf32>
    %cst_38 = arith.constant dense<0.000000e+00> : vector<18x64xf32>
    %38 = tpu.matmul %35, %37, %cst_38 {dimension_numbers = #tpu.dot_dimension_numbers<[1], [0], [0], [1], [0, 0, 1, 1], [], []>} : vector<18x8xf32>, vector<8x64xf32>, vector<18x64xf32> -> vector<18x64xf32>
    %39 = vector.extract_strided_slice %21 {offsets = [0, 0], sizes = [9, 8], strides = [1, 1]} : vector<18x8xf32> to vector<9x8xf32>
    %40 = vector.extract_strided_slice %28 {offsets = [0, 0], sizes = [9, 8], strides = [1, 1]} : vector<18x8xf32> to vector<9x8xf32>
    %cst_39 = arith.constant dense<0.000000e+00> : vector<9x9xf32>
    %41 = tpu.matmul %39, %40, %cst_39 {dimension_numbers = #tpu.dot_dimension_numbers<[1], [1], [0], [0], [0, 0, 1, 0], [], []>} : vector<9x8xf32>, vector<9x8xf32>, vector<9x9xf32> -> vector<9x9xf32>
    %cst_40 = arith.constant dense<0xFF800000> : vector<9xf32>
    %42 = vector.multi_reduction <maximumf>, %41, %cst_40 [1] : vector<9x9xf32> to vector<9xf32>
    %43 = vector.shape_cast %42 : vector<9xf32> to vector<9x1xf32>
    %44 = vector.broadcast %43 : vector<9x1xf32> to vector<9x9xf32>
    %45 = arith.subf %41, %44 : vector<9x9xf32>
    %46 = math.exp %45 : vector<9x9xf32>
    %cst_41 = arith.constant dense<0.000000e+00> : vector<9xf32>
    %47 = vector.multi_reduction <add>, %46, %cst_41 [1] : vector<9x9xf32> to vector<9xf32>
    %48 = vector.shape_cast %47 : vector<9xf32> to vector<9x1xf32>
    %49 = vector.broadcast %48 : vector<9x1xf32> to vector<9x9xf32>
    %50 = arith.divf %46, %49 : vector<9x9xf32>
    %51 = vector.extract_strided_slice %38 {offsets = [0, 0], sizes = [9, 64], strides = [1, 1]} : vector<18x64xf32> to vector<9x64xf32>
    %cst_42 = arith.constant dense<0.000000e+00> : vector<9x64xf32>
    %52 = tpu.matmul %50, %51, %cst_42 {dimension_numbers = #tpu.dot_dimension_numbers<[1], [0], [0], [1], [0, 0, 1, 1], [], []>} : vector<9x9xf32>, vector<9x64xf32>, vector<9x64xf32> -> vector<9x64xf32>
    %53 = vector.extract_strided_slice %21 {offsets = [9, 0], sizes = [9, 8], strides = [1, 1]} : vector<18x8xf32> to vector<9x8xf32>
    %54 = vector.extract_strided_slice %28 {offsets = [9, 0], sizes = [9, 8], strides = [1, 1]} : vector<18x8xf32> to vector<9x8xf32>
    %cst_43 = arith.constant dense<0.000000e+00> : vector<9x9xf32>
    %55 = tpu.matmul %53, %54, %cst_43 {dimension_numbers = #tpu.dot_dimension_numbers<[1], [1], [0], [0], [0, 0, 1, 0], [], []>} : vector<9x8xf32>, vector<9x8xf32>, vector<9x9xf32> -> vector<9x9xf32>
    %cst_44 = arith.constant dense<0xFF800000> : vector<9xf32>
    %56 = vector.multi_reduction <maximumf>, %55, %cst_44 [1] : vector<9x9xf32> to vector<9xf32>
    %57 = vector.shape_cast %56 : vector<9xf32> to vector<9x1xf32>
    %58 = vector.broadcast %57 : vector<9x1xf32> to vector<9x9xf32>
    %59 = arith.subf %55, %58 : vector<9x9xf32>
    %60 = math.exp %59 : vector<9x9xf32>
    %cst_45 = arith.constant dense<0.000000e+00> : vector<9xf32>
    %61 = vector.multi_reduction <add>, %60, %cst_45 [1] : vector<9x9xf32> to vector<9xf32>
    %62 = vector.shape_cast %61 : vector<9xf32> to vector<9x1xf32>
    %63 = vector.broadcast %62 : vector<9x1xf32> to vector<9x9xf32>
    %64 = arith.divf %60, %63 : vector<9x9xf32>
    %65 = vector.extract_strided_slice %38 {offsets = [9, 0], sizes = [9, 64], strides = [1, 1]} : vector<18x64xf32> to vector<9x64xf32>
    %cst_46 = arith.constant dense<0.000000e+00> : vector<9x64xf32>
    %66 = tpu.matmul %64, %65, %cst_46 {dimension_numbers = #tpu.dot_dimension_numbers<[1], [0], [0], [1], [0, 0, 1, 1], [], []>} : vector<9x9xf32>, vector<9x64xf32>, vector<9x64xf32> -> vector<9x64xf32>
    %c0_47 = arith.constant 0 : index
    %c1_48 = arith.constant 1 : index
    %c0_49 = arith.constant 0 : index
    %c0_50 = arith.constant 0 : index
    %67 = vector.load %arg4[%c0_47, %c1_48, %c0_49, %c0_50] : memref<2x8x64x8xf32, #tpu.memory_space<vmem>>, vector<1x1x64x8xf32>
    %68 = vector.shape_cast %67 : vector<1x1x64x8xf32> to vector<64x8xf32>
    %cst_51 = arith.constant dense<0.000000e+00> : vector<18x8xf32>
    %69 = tpu.matmul %14, %68, %cst_51 {dimension_numbers = #tpu.dot_dimension_numbers<[1], [0], [0], [1], [0, 0, 1, 1], [], []>} : vector<18x64xf32>, vector<64x8xf32>, vector<18x8xf32> -> vector<18x8xf32>
    %c0_52 = arith.constant 0 : index
    %c1_53 = arith.constant 1 : index
    %c0_54 = arith.constant 0 : index
    %c0_55 = arith.constant 0 : index
    %70 = vector.load %arg5[%c0_52, %c1_53, %c0_54, %c0_55] : memref<2x8x1x8xf32, #tpu.memory_space<vmem>>, vector<1x1x1x8xf32>
    %71 = vector.shape_cast %70 : vector<1x1x1x8xf32> to vector<1x8xf32>
    %72 = vector.broadcast %71 : vector<1x8xf32> to vector<18x8xf32>
    %73 = arith.addf %69, %72 : vector<18x8xf32>
    %c0_56 = arith.constant 0 : index
    %c1_57 = arith.constant 1 : index
    %c0_58 = arith.constant 0 : index
    %c0_59 = arith.constant 0 : index
    %74 = vector.load %arg6[%c0_56, %c1_57, %c0_58, %c0_59] : memref<2x8x64x8xf32, #tpu.memory_space<vmem>>, vector<1x1x64x8xf32>
    %75 = vector.shape_cast %74 : vector<1x1x64x8xf32> to vector<64x8xf32>
    %cst_60 = arith.constant dense<0.000000e+00> : vector<18x8xf32>
    %76 = tpu.matmul %14, %75, %cst_60 {dimension_numbers = #tpu.dot_dimension_numbers<[1], [0], [0], [1], [0, 0, 1, 1], [], []>} : vector<18x64xf32>, vector<64x8xf32>, vector<18x8xf32> -> vector<18x8xf32>
    %c0_61 = arith.constant 0 : index
    %c1_62 = arith.constant 1 : index
    %c0_63 = arith.constant 0 : index
    %c0_64 = arith.constant 0 : index
    %77 = vector.load %arg7[%c0_61, %c1_62, %c0_63, %c0_64] : memref<2x8x1x8xf32, #tpu.memory_space<vmem>>, vector<1x1x1x8xf32>
    %78 = vector.shape_cast %77 : vector<1x1x1x8xf32> to vector<1x8xf32>
    %79 = vector.broadcast %78 : vector<1x8xf32> to vector<18x8xf32>
    %80 = arith.addf %76, %79 : vector<18x8xf32>
    %c0_65 = arith.constant 0 : index
    %c1_66 = arith.constant 1 : index
    %c0_67 = arith.constant 0 : index
    %c0_68 = arith.constant 0 : index
    %81 = vector.load %arg8[%c0_65, %c1_66, %c0_67, %c0_68] : memref<2x8x64x8xf32, #tpu.memory_space<vmem>>, vector<1x1x64x8xf32>
    %82 = vector.shape_cast %81 : vector<1x1x64x8xf32> to vector<64x8xf32>
    %cst_69 = arith.constant dense<0.000000e+00> : vector<18x8xf32>
    %83 = tpu.matmul %14, %82, %cst_69 {dimension_numbers = #tpu.dot_dimension_numbers<[1], [0], [0], [1], [0, 0, 1, 1], [], []>} : vector<18x64xf32>, vector<64x8xf32>, vector<18x8xf32> -> vector<18x8xf32>
    %c0_70 = arith.constant 0 : index
    %c1_71 = arith.constant 1 : index
    %c0_72 = arith.constant 0 : index
    %c0_73 = arith.constant 0 : index
    %84 = vector.load %arg9[%c0_70, %c1_71, %c0_72, %c0_73] : memref<2x8x1x8xf32, #tpu.memory_space<vmem>>, vector<1x1x1x8xf32>
    %85 = vector.shape_cast %84 : vector<1x1x1x8xf32> to vector<1x8xf32>
    %86 = vector.broadcast %85 : vector<1x8xf32> to vector<18x8xf32>
    %87 = arith.addf %83, %86 : vector<18x8xf32>
    %c0_74 = arith.constant 0 : index
    %c1_75 = arith.constant 1 : index
    %c0_76 = arith.constant 0 : index
    %c0_77 = arith.constant 0 : index
    %88 = vector.load %arg10[%c0_74, %c1_75, %c0_76, %c0_77] : memref<2x8x8x64xf32, #tpu.memory_space<vmem>>, vector<1x1x8x64xf32>
    %89 = vector.shape_cast %88 : vector<1x1x8x64xf32> to vector<8x64xf32>
    %cst_78 = arith.constant dense<0.000000e+00> : vector<18x64xf32>
    %90 = tpu.matmul %87, %89, %cst_78 {dimension_numbers = #tpu.dot_dimension_numbers<[1], [0], [0], [1], [0, 0, 1, 1], [], []>} : vector<18x8xf32>, vector<8x64xf32>, vector<18x64xf32> -> vector<18x64xf32>
    %91 = vector.extract_strided_slice %73 {offsets = [0, 0], sizes = [9, 8], strides = [1, 1]} : vector<18x8xf32> to vector<9x8xf32>
    %92 = vector.extract_strided_slice %80 {offsets = [0, 0], sizes = [9, 8], strides = [1, 1]} : vector<18x8xf32> to vector<9x8xf32>
    %cst_79 = arith.constant dense<0.000000e+00> : vector<9x9xf32>
    %93 = tpu.matmul %91, %92, %cst_79 {dimension_numbers = #tpu.dot_dimension_numbers<[1], [1], [0], [0], [0, 0, 1, 0], [], []>} : vector<9x8xf32>, vector<9x8xf32>, vector<9x9xf32> -> vector<9x9xf32>
    %cst_80 = arith.constant dense<0xFF800000> : vector<9xf32>
    %94 = vector.multi_reduction <maximumf>, %93, %cst_80 [1] : vector<9x9xf32> to vector<9xf32>
    %95 = vector.shape_cast %94 : vector<9xf32> to vector<9x1xf32>
    %96 = vector.broadcast %95 : vector<9x1xf32> to vector<9x9xf32>
    %97 = arith.subf %93, %96 : vector<9x9xf32>
    %98 = math.exp %97 : vector<9x9xf32>
    %cst_81 = arith.constant dense<0.000000e+00> : vector<9xf32>
    %99 = vector.multi_reduction <add>, %98, %cst_81 [1] : vector<9x9xf32> to vector<9xf32>
    %100 = vector.shape_cast %99 : vector<9xf32> to vector<9x1xf32>
    %101 = vector.broadcast %100 : vector<9x1xf32> to vector<9x9xf32>
    %102 = arith.divf %98, %101 : vector<9x9xf32>
    %103 = vector.extract_strided_slice %90 {offsets = [0, 0], sizes = [9, 64], strides = [1, 1]} : vector<18x64xf32> to vector<9x64xf32>
    %cst_82 = arith.constant dense<0.000000e+00> : vector<9x64xf32>
    %104 = tpu.matmul %102, %103, %cst_82 {dimension_numbers = #tpu.dot_dimension_numbers<[1], [0], [0], [1], [0, 0, 1, 1], [], []>} : vector<9x9xf32>, vector<9x64xf32>, vector<9x64xf32> -> vector<9x64xf32>
    %105 = arith.addf %52, %104 : vector<9x64xf32>
    %106 = vector.extract_strided_slice %73 {offsets = [9, 0], sizes = [9, 8], strides = [1, 1]} : vector<18x8xf32> to vector<9x8xf32>
    %107 = vector.extract_strided_slice %80 {offsets = [9, 0], sizes = [9, 8], strides = [1, 1]} : vector<18x8xf32> to vector<9x8xf32>
    %cst_83 = arith.constant dense<0.000000e+00> : vector<9x9xf32>
    %108 = tpu.matmul %106, %107, %cst_83 {dimension_numbers = #tpu.dot_dimension_numbers<[1], [1], [0], [0], [0, 0, 1, 0], [], []>} : vector<9x8xf32>, vector<9x8xf32>, vector<9x9xf32> -> vector<9x9xf32>
    %cst_84 = arith.constant dense<0xFF800000> : vector<9xf32>
    %109 = vector.multi_reduction <maximumf>, %108, %cst_84 [1] : vector<9x9xf32> to vector<9xf32>
    %110 = vector.shape_cast %109 : vector<9xf32> to vector<9x1xf32>
    %111 = vector.broadcast %110 : vector<9x1xf32> to vector<9x9xf32>
    %112 = arith.subf %108, %111 : vector<9x9xf32>
    %113 = math.exp %112 : vector<9x9xf32>
    %cst_85 = arith.constant dense<0.000000e+00> : vector<9xf32>
    %114 = vector.multi_reduction <add>, %113, %cst_85 [1] : vector<9x9xf32> to vector<9xf32>
    %115 = vector.shape_cast %114 : vector<9xf32> to vector<9x1xf32>
    %116 = vector.broadcast %115 : vector<9x1xf32> to vector<9x9xf32>
    %117 = arith.divf %113, %116 : vector<9x9xf32>
    %118 = vector.extract_strided_slice %90 {offsets = [9, 0], sizes = [9, 64], strides = [1, 1]} : vector<18x64xf32> to vector<9x64xf32>
    %cst_86 = arith.constant dense<0.000000e+00> : vector<9x64xf32>
    %119 = tpu.matmul %117, %118, %cst_86 {dimension_numbers = #tpu.dot_dimension_numbers<[1], [0], [0], [1], [0, 0, 1, 1], [], []>} : vector<9x9xf32>, vector<9x64xf32>, vector<9x64xf32> -> vector<9x64xf32>
    %120 = arith.addf %66, %119 : vector<9x64xf32>
    %c0_87 = arith.constant 0 : index
    %c2 = arith.constant 2 : index
    %c0_88 = arith.constant 0 : index
    %c0_89 = arith.constant 0 : index
    %121 = vector.load %arg4[%c0_87, %c2, %c0_88, %c0_89] : memref<2x8x64x8xf32, #tpu.memory_space<vmem>>, vector<1x1x64x8xf32>
    %122 = vector.shape_cast %121 : vector<1x1x64x8xf32> to vector<64x8xf32>
    %cst_90 = arith.constant dense<0.000000e+00> : vector<18x8xf32>
    %123 = tpu.matmul %14, %122, %cst_90 {dimension_numbers = #tpu.dot_dimension_numbers<[1], [0], [0], [1], [0, 0, 1, 1], [], []>} : vector<18x64xf32>, vector<64x8xf32>, vector<18x8xf32> -> vector<18x8xf32>
    %c0_91 = arith.constant 0 : index
    %c2_92 = arith.constant 2 : index
    %c0_93 = arith.constant 0 : index
    %c0_94 = arith.constant 0 : index
    %124 = vector.load %arg5[%c0_91, %c2_92, %c0_93, %c0_94] : memref<2x8x1x8xf32, #tpu.memory_space<vmem>>, vector<1x1x1x8xf32>
    %125 = vector.shape_cast %124 : vector<1x1x1x8xf32> to vector<1x8xf32>
    %126 = vector.broadcast %125 : vector<1x8xf32> to vector<18x8xf32>
    %127 = arith.addf %123, %126 : vector<18x8xf32>
    %c0_95 = arith.constant 0 : index
    %c2_96 = arith.constant 2 : index
    %c0_97 = arith.constant 0 : index
    %c0_98 = arith.constant 0 : index
    %128 = vector.load %arg6[%c0_95, %c2_96, %c0_97, %c0_98] : memref<2x8x64x8xf32, #tpu.memory_space<vmem>>, vector<1x1x64x8xf32>
    %129 = vector.shape_cast %128 : vector<1x1x64x8xf32> to vector<64x8xf32>
    %cst_99 = arith.constant dense<0.000000e+00> : vector<18x8xf32>
    %130 = tpu.matmul %14, %129, %cst_99 {dimension_numbers = #tpu.dot_dimension_numbers<[1], [0], [0], [1], [0, 0, 1, 1], [], []>} : vector<18x64xf32>, vector<64x8xf32>, vector<18x8xf32> -> vector<18x8xf32>
    %c0_100 = arith.constant 0 : index
    %c2_101 = arith.constant 2 : index
    %c0_102 = arith.constant 0 : index
    %c0_103 = arith.constant 0 : index
    %131 = vector.load %arg7[%c0_100, %c2_101, %c0_102, %c0_103] : memref<2x8x1x8xf32, #tpu.memory_space<vmem>>, vector<1x1x1x8xf32>
    %132 = vector.shape_cast %131 : vector<1x1x1x8xf32> to vector<1x8xf32>
    %133 = vector.broadcast %132 : vector<1x8xf32> to vector<18x8xf32>
    %134 = arith.addf %130, %133 : vector<18x8xf32>
    %c0_104 = arith.constant 0 : index
    %c2_105 = arith.constant 2 : index
    %c0_106 = arith.constant 0 : index
    %c0_107 = arith.constant 0 : index
    %135 = vector.load %arg8[%c0_104, %c2_105, %c0_106, %c0_107] : memref<2x8x64x8xf32, #tpu.memory_space<vmem>>, vector<1x1x64x8xf32>
    %136 = vector.shape_cast %135 : vector<1x1x64x8xf32> to vector<64x8xf32>
    %cst_108 = arith.constant dense<0.000000e+00> : vector<18x8xf32>
    %137 = tpu.matmul %14, %136, %cst_108 {dimension_numbers = #tpu.dot_dimension_numbers<[1], [0], [0], [1], [0, 0, 1, 1], [], []>} : vector<18x64xf32>, vector<64x8xf32>, vector<18x8xf32> -> vector<18x8xf32>
    %c0_109 = arith.constant 0 : index
    %c2_110 = arith.constant 2 : index
    %c0_111 = arith.constant 0 : index
    %c0_112 = arith.constant 0 : index
    %138 = vector.load %arg9[%c0_109, %c2_110, %c0_111, %c0_112] : memref<2x8x1x8xf32, #tpu.memory_space<vmem>>, vector<1x1x1x8xf32>
    %139 = vector.shape_cast %138 : vector<1x1x1x8xf32> to vector<1x8xf32>
    %140 = vector.broadcast %139 : vector<1x8xf32> to vector<18x8xf32>
    %141 = arith.addf %137, %140 : vector<18x8xf32>
    %c0_113 = arith.constant 0 : index
    %c2_114 = arith.constant 2 : index
    %c0_115 = arith.constant 0 : index
    %c0_116 = arith.constant 0 : index
    %142 = vector.load %arg10[%c0_113, %c2_114, %c0_115, %c0_116] : memref<2x8x8x64xf32, #tpu.memory_space<vmem>>, vector<1x1x8x64xf32>
    %143 = vector.shape_cast %142 : vector<1x1x8x64xf32> to vector<8x64xf32>
    %cst_117 = arith.constant dense<0.000000e+00> : vector<18x64xf32>
    %144 = tpu.matmul %141, %143, %cst_117 {dimension_numbers = #tpu.dot_dimension_numbers<[1], [0], [0], [1], [0, 0, 1, 1], [], []>} : vector<18x8xf32>, vector<8x64xf32>, vector<18x64xf32> -> vector<18x64xf32>
    %145 = vector.extract_strided_slice %127 {offsets = [0, 0], sizes = [9, 8], strides = [1, 1]} : vector<18x8xf32> to vector<9x8xf32>
    %146 = vector.extract_strided_slice %134 {offsets = [0, 0], sizes = [9, 8], strides = [1, 1]} : vector<18x8xf32> to vector<9x8xf32>
    %cst_118 = arith.constant dense<0.000000e+00> : vector<9x9xf32>
    %147 = tpu.matmul %145, %146, %cst_118 {dimension_numbers = #tpu.dot_dimension_numbers<[1], [1], [0], [0], [0, 0, 1, 0], [], []>} : vector<9x8xf32>, vector<9x8xf32>, vector<9x9xf32> -> vector<9x9xf32>
    %cst_119 = arith.constant dense<0xFF800000> : vector<9xf32>
    %148 = vector.multi_reduction <maximumf>, %147, %cst_119 [1] : vector<9x9xf32> to vector<9xf32>
    %149 = vector.shape_cast %148 : vector<9xf32> to vector<9x1xf32>
    %150 = vector.broadcast %149 : vector<9x1xf32> to vector<9x9xf32>
    %151 = arith.subf %147, %150 : vector<9x9xf32>
    %152 = math.exp %151 : vector<9x9xf32>
    %cst_120 = arith.constant dense<0.000000e+00> : vector<9xf32>
    %153 = vector.multi_reduction <add>, %152, %cst_120 [1] : vector<9x9xf32> to vector<9xf32>
    %154 = vector.shape_cast %153 : vector<9xf32> to vector<9x1xf32>
    %155 = vector.broadcast %154 : vector<9x1xf32> to vector<9x9xf32>
    %156 = arith.divf %152, %155 : vector<9x9xf32>
    %157 = vector.extract_strided_slice %144 {offsets = [0, 0], sizes = [9, 64], strides = [1, 1]} : vector<18x64xf32> to vector<9x64xf32>
    %cst_121 = arith.constant dense<0.000000e+00> : vector<9x64xf32>
    %158 = tpu.matmul %156, %157, %cst_121 {dimension_numbers = #tpu.dot_dimension_numbers<[1], [0], [0], [1], [0, 0, 1, 1], [], []>} : vector<9x9xf32>, vector<9x64xf32>, vector<9x64xf32> -> vector<9x64xf32>
    %159 = arith.addf %105, %158 : vector<9x64xf32>
    %160 = vector.extract_strided_slice %127 {offsets = [9, 0], sizes = [9, 8], strides = [1, 1]} : vector<18x8xf32> to vector<9x8xf32>
    %161 = vector.extract_strided_slice %134 {offsets = [9, 0], sizes = [9, 8], strides = [1, 1]} : vector<18x8xf32> to vector<9x8xf32>
    %cst_122 = arith.constant dense<0.000000e+00> : vector<9x9xf32>
    %162 = tpu.matmul %160, %161, %cst_122 {dimension_numbers = #tpu.dot_dimension_numbers<[1], [1], [0], [0], [0, 0, 1, 0], [], []>} : vector<9x8xf32>, vector<9x8xf32>, vector<9x9xf32> -> vector<9x9xf32>
    %cst_123 = arith.constant dense<0xFF800000> : vector<9xf32>
    %163 = vector.multi_reduction <maximumf>, %162, %cst_123 [1] : vector<9x9xf32> to vector<9xf32>
    %164 = vector.shape_cast %163 : vector<9xf32> to vector<9x1xf32>
    %165 = vector.broadcast %164 : vector<9x1xf32> to vector<9x9xf32>
    %166 = arith.subf %162, %165 : vector<9x9xf32>
    %167 = math.exp %166 : vector<9x9xf32>
    %cst_124 = arith.constant dense<0.000000e+00> : vector<9xf32>
    %168 = vector.multi_reduction <add>, %167, %cst_124 [1] : vector<9x9xf32> to vector<9xf32>
    %169 = vector.shape_cast %168 : vector<9xf32> to vector<9x1xf32>
    %170 = vector.broadcast %169 : vector<9x1xf32> to vector<9x9xf32>
    %171 = arith.divf %167, %170 : vector<9x9xf32>
    %172 = vector.extract_strided_slice %144 {offsets = [9, 0], sizes = [9, 64], strides = [1, 1]} : vector<18x64xf32> to vector<9x64xf32>
    %cst_125 = arith.constant dense<0.000000e+00> : vector<9x64xf32>
    %173 = tpu.matmul %171, %172, %cst_125 {dimension_numbers = #tpu.dot_dimension_numbers<[1], [0], [0], [1], [0, 0, 1, 1], [], []>} : vector<9x9xf32>, vector<9x64xf32>, vector<9x64xf32> -> vector<9x64xf32>
    %174 = arith.addf %120, %173 : vector<9x64xf32>
    %c0_126 = arith.constant 0 : index
    %c3 = arith.constant 3 : index
    %c0_127 = arith.constant 0 : index
    %c0_128 = arith.constant 0 : index
    %175 = vector.load %arg4[%c0_126, %c3, %c0_127, %c0_128] : memref<2x8x64x8xf32, #tpu.memory_space<vmem>>, vector<1x1x64x8xf32>
    %176 = vector.shape_cast %175 : vector<1x1x64x8xf32> to vector<64x8xf32>
    %cst_129 = arith.constant dense<0.000000e+00> : vector<18x8xf32>
    %177 = tpu.matmul %14, %176, %cst_129 {dimension_numbers = #tpu.dot_dimension_numbers<[1], [0], [0], [1], [0, 0, 1, 1], [], []>} : vector<18x64xf32>, vector<64x8xf32>, vector<18x8xf32> -> vector<18x8xf32>
    %c0_130 = arith.constant 0 : index
    %c3_131 = arith.constant 3 : index
    %c0_132 = arith.constant 0 : index
    %c0_133 = arith.constant 0 : index
    %178 = vector.load %arg5[%c0_130, %c3_131, %c0_132, %c0_133] : memref<2x8x1x8xf32, #tpu.memory_space<vmem>>, vector<1x1x1x8xf32>
    %179 = vector.shape_cast %178 : vector<1x1x1x8xf32> to vector<1x8xf32>
    %180 = vector.broadcast %179 : vector<1x8xf32> to vector<18x8xf32>
    %181 = arith.addf %177, %180 : vector<18x8xf32>
    %c0_134 = arith.constant 0 : index
    %c3_135 = arith.constant 3 : index
    %c0_136 = arith.constant 0 : index
    %c0_137 = arith.constant 0 : index
    %182 = vector.load %arg6[%c0_134, %c3_135, %c0_136, %c0_137] : memref<2x8x64x8xf32, #tpu.memory_space<vmem>>, vector<1x1x64x8xf32>
    %183 = vector.shape_cast %182 : vector<1x1x64x8xf32> to vector<64x8xf32>
    %cst_138 = arith.constant dense<0.000000e+00> : vector<18x8xf32>
    %184 = tpu.matmul %14, %183, %cst_138 {dimension_numbers = #tpu.dot_dimension_numbers<[1], [0], [0], [1], [0, 0, 1, 1], [], []>} : vector<18x64xf32>, vector<64x8xf32>, vector<18x8xf32> -> vector<18x8xf32>
    %c0_139 = arith.constant 0 : index
    %c3_140 = arith.constant 3 : index
    %c0_141 = arith.constant 0 : index
    %c0_142 = arith.constant 0 : index
    %185 = vector.load %arg7[%c0_139, %c3_140, %c0_141, %c0_142] : memref<2x8x1x8xf32, #tpu.memory_space<vmem>>, vector<1x1x1x8xf32>
    %186 = vector.shape_cast %185 : vector<1x1x1x8xf32> to vector<1x8xf32>
    %187 = vector.broadcast %186 : vector<1x8xf32> to vector<18x8xf32>
    %188 = arith.addf %184, %187 : vector<18x8xf32>
    %c0_143 = arith.constant 0 : index
    %c3_144 = arith.constant 3 : index
    %c0_145 = arith.constant 0 : index
    %c0_146 = arith.constant 0 : index
    %189 = vector.load %arg8[%c0_143, %c3_144, %c0_145, %c0_146] : memref<2x8x64x8xf32, #tpu.memory_space<vmem>>, vector<1x1x64x8xf32>
    %190 = vector.shape_cast %189 : vector<1x1x64x8xf32> to vector<64x8xf32>
    %cst_147 = arith.constant dense<0.000000e+00> : vector<18x8xf32>
    %191 = tpu.matmul %14, %190, %cst_147 {dimension_numbers = #tpu.dot_dimension_numbers<[1], [0], [0], [1], [0, 0, 1, 1], [], []>} : vector<18x64xf32>, vector<64x8xf32>, vector<18x8xf32> -> vector<18x8xf32>
    %c0_148 = arith.constant 0 : index
    %c3_149 = arith.constant 3 : index
    %c0_150 = arith.constant 0 : index
    %c0_151 = arith.constant 0 : index
    %192 = vector.load %arg9[%c0_148, %c3_149, %c0_150, %c0_151] : memref<2x8x1x8xf32, #tpu.memory_space<vmem>>, vector<1x1x1x8xf32>
    %193 = vector.shape_cast %192 : vector<1x1x1x8xf32> to vector<1x8xf32>
    %194 = vector.broadcast %193 : vector<1x8xf32> to vector<18x8xf32>
    %195 = arith.addf %191, %194 : vector<18x8xf32>
    %c0_152 = arith.constant 0 : index
    %c3_153 = arith.constant 3 : index
    %c0_154 = arith.constant 0 : index
    %c0_155 = arith.constant 0 : index
    %196 = vector.load %arg10[%c0_152, %c3_153, %c0_154, %c0_155] : memref<2x8x8x64xf32, #tpu.memory_space<vmem>>, vector<1x1x8x64xf32>
    %197 = vector.shape_cast %196 : vector<1x1x8x64xf32> to vector<8x64xf32>
    %cst_156 = arith.constant dense<0.000000e+00> : vector<18x64xf32>
    %198 = tpu.matmul %195, %197, %cst_156 {dimension_numbers = #tpu.dot_dimension_numbers<[1], [0], [0], [1], [0, 0, 1, 1], [], []>} : vector<18x8xf32>, vector<8x64xf32>, vector<18x64xf32> -> vector<18x64xf32>
    %199 = vector.extract_strided_slice %181 {offsets = [0, 0], sizes = [9, 8], strides = [1, 1]} : vector<18x8xf32> to vector<9x8xf32>
    %200 = vector.extract_strided_slice %188 {offsets = [0, 0], sizes = [9, 8], strides = [1, 1]} : vector<18x8xf32> to vector<9x8xf32>
    %cst_157 = arith.constant dense<0.000000e+00> : vector<9x9xf32>
    %201 = tpu.matmul %199, %200, %cst_157 {dimension_numbers = #tpu.dot_dimension_numbers<[1], [1], [0], [0], [0, 0, 1, 0], [], []>} : vector<9x8xf32>, vector<9x8xf32>, vector<9x9xf32> -> vector<9x9xf32>
    %cst_158 = arith.constant dense<0xFF800000> : vector<9xf32>
    %202 = vector.multi_reduction <maximumf>, %201, %cst_158 [1] : vector<9x9xf32> to vector<9xf32>
    %203 = vector.shape_cast %202 : vector<9xf32> to vector<9x1xf32>
    %204 = vector.broadcast %203 : vector<9x1xf32> to vector<9x9xf32>
    %205 = arith.subf %201, %204 : vector<9x9xf32>
    %206 = math.exp %205 : vector<9x9xf32>
    %cst_159 = arith.constant dense<0.000000e+00> : vector<9xf32>
    %207 = vector.multi_reduction <add>, %206, %cst_159 [1] : vector<9x9xf32> to vector<9xf32>
    %208 = vector.shape_cast %207 : vector<9xf32> to vector<9x1xf32>
    %209 = vector.broadcast %208 : vector<9x1xf32> to vector<9x9xf32>
    %210 = arith.divf %206, %209 : vector<9x9xf32>
    %211 = vector.extract_strided_slice %198 {offsets = [0, 0], sizes = [9, 64], strides = [1, 1]} : vector<18x64xf32> to vector<9x64xf32>
    %cst_160 = arith.constant dense<0.000000e+00> : vector<9x64xf32>
    %212 = tpu.matmul %210, %211, %cst_160 {dimension_numbers = #tpu.dot_dimension_numbers<[1], [0], [0], [1], [0, 0, 1, 1], [], []>} : vector<9x9xf32>, vector<9x64xf32>, vector<9x64xf32> -> vector<9x64xf32>
    %213 = arith.addf %159, %212 : vector<9x64xf32>
    %214 = vector.extract_strided_slice %181 {offsets = [9, 0], sizes = [9, 8], strides = [1, 1]} : vector<18x8xf32> to vector<9x8xf32>
    %215 = vector.extract_strided_slice %188 {offsets = [9, 0], sizes = [9, 8], strides = [1, 1]} : vector<18x8xf32> to vector<9x8xf32>
    %cst_161 = arith.constant dense<0.000000e+00> : vector<9x9xf32>
    %216 = tpu.matmul %214, %215, %cst_161 {dimension_numbers = #tpu.dot_dimension_numbers<[1], [1], [0], [0], [0, 0, 1, 0], [], []>} : vector<9x8xf32>, vector<9x8xf32>, vector<9x9xf32> -> vector<9x9xf32>
    %cst_162 = arith.constant dense<0xFF800000> : vector<9xf32>
    %217 = vector.multi_reduction <maximumf>, %216, %cst_162 [1] : vector<9x9xf32> to vector<9xf32>
    %218 = vector.shape_cast %217 : vector<9xf32> to vector<9x1xf32>
    %219 = vector.broadcast %218 : vector<9x1xf32> to vector<9x9xf32>
    %220 = arith.subf %216, %219 : vector<9x9xf32>
    %221 = math.exp %220 : vector<9x9xf32>
    %cst_163 = arith.constant dense<0.000000e+00> : vector<9xf32>
    %222 = vector.multi_reduction <add>, %221, %cst_163 [1] : vector<9x9xf32> to vector<9xf32>
    %223 = vector.shape_cast %222 : vector<9xf32> to vector<9x1xf32>
    %224 = vector.broadcast %223 : vector<9x1xf32> to vector<9x9xf32>
    %225 = arith.divf %221, %224 : vector<9x9xf32>
    %226 = vector.extract_strided_slice %198 {offsets = [9, 0], sizes = [9, 64], strides = [1, 1]} : vector<18x64xf32> to vector<9x64xf32>
    %cst_164 = arith.constant dense<0.000000e+00> : vector<9x64xf32>
    %227 = tpu.matmul %225, %226, %cst_164 {dimension_numbers = #tpu.dot_dimension_numbers<[1], [0], [0], [1], [0, 0, 1, 1], [], []>} : vector<9x9xf32>, vector<9x64xf32>, vector<9x64xf32> -> vector<9x64xf32>
    %228 = arith.addf %174, %227 : vector<9x64xf32>
    %c0_165 = arith.constant 0 : index
    %c4 = arith.constant 4 : index
    %c0_166 = arith.constant 0 : index
    %c0_167 = arith.constant 0 : index
    %229 = vector.load %arg4[%c0_165, %c4, %c0_166, %c0_167] : memref<2x8x64x8xf32, #tpu.memory_space<vmem>>, vector<1x1x64x8xf32>
    %230 = vector.shape_cast %229 : vector<1x1x64x8xf32> to vector<64x8xf32>
    %cst_168 = arith.constant dense<0.000000e+00> : vector<18x8xf32>
    %231 = tpu.matmul %14, %230, %cst_168 {dimension_numbers = #tpu.dot_dimension_numbers<[1], [0], [0], [1], [0, 0, 1, 1], [], []>} : vector<18x64xf32>, vector<64x8xf32>, vector<18x8xf32> -> vector<18x8xf32>
    %c0_169 = arith.constant 0 : index
    %c4_170 = arith.constant 4 : index
    %c0_171 = arith.constant 0 : index
    %c0_172 = arith.constant 0 : index
    %232 = vector.load %arg5[%c0_169, %c4_170, %c0_171, %c0_172] : memref<2x8x1x8xf32, #tpu.memory_space<vmem>>, vector<1x1x1x8xf32>
    %233 = vector.shape_cast %232 : vector<1x1x1x8xf32> to vector<1x8xf32>
    %234 = vector.broadcast %233 : vector<1x8xf32> to vector<18x8xf32>
    %235 = arith.addf %231, %234 : vector<18x8xf32>
    %c0_173 = arith.constant 0 : index
    %c4_174 = arith.constant 4 : index
    %c0_175 = arith.constant 0 : index
    %c0_176 = arith.constant 0 : index
    %236 = vector.load %arg6[%c0_173, %c4_174, %c0_175, %c0_176] : memref<2x8x64x8xf32, #tpu.memory_space<vmem>>, vector<1x1x64x8xf32>
    %237 = vector.shape_cast %236 : vector<1x1x64x8xf32> to vector<64x8xf32>
    %cst_177 = arith.constant dense<0.000000e+00> : vector<18x8xf32>
    %238 = tpu.matmul %14, %237, %cst_177 {dimension_numbers = #tpu.dot_dimension_numbers<[1], [0], [0], [1], [0, 0, 1, 1], [], []>} : vector<18x64xf32>, vector<64x8xf32>, vector<18x8xf32> -> vector<18x8xf32>
    %c0_178 = arith.constant 0 : index
    %c4_179 = arith.constant 4 : index
    %c0_180 = arith.constant 0 : index
    %c0_181 = arith.constant 0 : index
    %239 = vector.load %arg7[%c0_178, %c4_179, %c0_180, %c0_181] : memref<2x8x1x8xf32, #tpu.memory_space<vmem>>, vector<1x1x1x8xf32>
    %240 = vector.shape_cast %239 : vector<1x1x1x8xf32> to vector<1x8xf32>
    %241 = vector.broadcast %240 : vector<1x8xf32> to vector<18x8xf32>
    %242 = arith.addf %238, %241 : vector<18x8xf32>
    %c0_182 = arith.constant 0 : index
    %c4_183 = arith.constant 4 : index
    %c0_184 = arith.constant 0 : index
    %c0_185 = arith.constant 0 : index
    %243 = vector.load %arg8[%c0_182, %c4_183, %c0_184, %c0_185] : memref<2x8x64x8xf32, #tpu.memory_space<vmem>>, vector<1x1x64x8xf32>
    %244 = vector.shape_cast %243 : vector<1x1x64x8xf32> to vector<64x8xf32>
    %cst_186 = arith.constant dense<0.000000e+00> : vector<18x8xf32>
    %245 = tpu.matmul %14, %244, %cst_186 {dimension_numbers = #tpu.dot_dimension_numbers<[1], [0], [0], [1], [0, 0, 1, 1], [], []>} : vector<18x64xf32>, vector<64x8xf32>, vector<18x8xf32> -> vector<18x8xf32>
    %c0_187 = arith.constant 0 : index
    %c4_188 = arith.constant 4 : index
    %c0_189 = arith.constant 0 : index
    %c0_190 = arith.constant 0 : index
    %246 = vector.load %arg9[%c0_187, %c4_188, %c0_189, %c0_190] : memref<2x8x1x8xf32, #tpu.memory_space<vmem>>, vector<1x1x1x8xf32>
    %247 = vector.shape_cast %246 : vector<1x1x1x8xf32> to vector<1x8xf32>
    %248 = vector.broadcast %247 : vector<1x8xf32> to vector<18x8xf32>
    %249 = arith.addf %245, %248 : vector<18x8xf32>
    %c0_191 = arith.constant 0 : index
    %c4_192 = arith.constant 4 : index
    %c0_193 = arith.constant 0 : index
    %c0_194 = arith.constant 0 : index
    %250 = vector.load %arg10[%c0_191, %c4_192, %c0_193, %c0_194] : memref<2x8x8x64xf32, #tpu.memory_space<vmem>>, vector<1x1x8x64xf32>
    %251 = vector.shape_cast %250 : vector<1x1x8x64xf32> to vector<8x64xf32>
    %cst_195 = arith.constant dense<0.000000e+00> : vector<18x64xf32>
    %252 = tpu.matmul %249, %251, %cst_195 {dimension_numbers = #tpu.dot_dimension_numbers<[1], [0], [0], [1], [0, 0, 1, 1], [], []>} : vector<18x8xf32>, vector<8x64xf32>, vector<18x64xf32> -> vector<18x64xf32>
    %253 = vector.extract_strided_slice %235 {offsets = [0, 0], sizes = [9, 8], strides = [1, 1]} : vector<18x8xf32> to vector<9x8xf32>
    %254 = vector.extract_strided_slice %242 {offsets = [0, 0], sizes = [9, 8], strides = [1, 1]} : vector<18x8xf32> to vector<9x8xf32>
    %cst_196 = arith.constant dense<0.000000e+00> : vector<9x9xf32>
    %255 = tpu.matmul %253, %254, %cst_196 {dimension_numbers = #tpu.dot_dimension_numbers<[1], [1], [0], [0], [0, 0, 1, 0], [], []>} : vector<9x8xf32>, vector<9x8xf32>, vector<9x9xf32> -> vector<9x9xf32>
    %cst_197 = arith.constant dense<0xFF800000> : vector<9xf32>
    %256 = vector.multi_reduction <maximumf>, %255, %cst_197 [1] : vector<9x9xf32> to vector<9xf32>
    %257 = vector.shape_cast %256 : vector<9xf32> to vector<9x1xf32>
    %258 = vector.broadcast %257 : vector<9x1xf32> to vector<9x9xf32>
    %259 = arith.subf %255, %258 : vector<9x9xf32>
    %260 = math.exp %259 : vector<9x9xf32>
    %cst_198 = arith.constant dense<0.000000e+00> : vector<9xf32>
    %261 = vector.multi_reduction <add>, %260, %cst_198 [1] : vector<9x9xf32> to vector<9xf32>
    %262 = vector.shape_cast %261 : vector<9xf32> to vector<9x1xf32>
    %263 = vector.broadcast %262 : vector<9x1xf32> to vector<9x9xf32>
    %264 = arith.divf %260, %263 : vector<9x9xf32>
    %265 = vector.extract_strided_slice %252 {offsets = [0, 0], sizes = [9, 64], strides = [1, 1]} : vector<18x64xf32> to vector<9x64xf32>
    %cst_199 = arith.constant dense<0.000000e+00> : vector<9x64xf32>
    %266 = tpu.matmul %264, %265, %cst_199 {dimension_numbers = #tpu.dot_dimension_numbers<[1], [0], [0], [1], [0, 0, 1, 1], [], []>} : vector<9x9xf32>, vector<9x64xf32>, vector<9x64xf32> -> vector<9x64xf32>
    %267 = arith.addf %213, %266 : vector<9x64xf32>
    %268 = vector.extract_strided_slice %235 {offsets = [9, 0], sizes = [9, 8], strides = [1, 1]} : vector<18x8xf32> to vector<9x8xf32>
    %269 = vector.extract_strided_slice %242 {offsets = [9, 0], sizes = [9, 8], strides = [1, 1]} : vector<18x8xf32> to vector<9x8xf32>
    %cst_200 = arith.constant dense<0.000000e+00> : vector<9x9xf32>
    %270 = tpu.matmul %268, %269, %cst_200 {dimension_numbers = #tpu.dot_dimension_numbers<[1], [1], [0], [0], [0, 0, 1, 0], [], []>} : vector<9x8xf32>, vector<9x8xf32>, vector<9x9xf32> -> vector<9x9xf32>
    %cst_201 = arith.constant dense<0xFF800000> : vector<9xf32>
    %271 = vector.multi_reduction <maximumf>, %270, %cst_201 [1] : vector<9x9xf32> to vector<9xf32>
    %272 = vector.shape_cast %271 : vector<9xf32> to vector<9x1xf32>
    %273 = vector.broadcast %272 : vector<9x1xf32> to vector<9x9xf32>
    %274 = arith.subf %270, %273 : vector<9x9xf32>
    %275 = math.exp %274 : vector<9x9xf32>
    %cst_202 = arith.constant dense<0.000000e+00> : vector<9xf32>
    %276 = vector.multi_reduction <add>, %275, %cst_202 [1] : vector<9x9xf32> to vector<9xf32>
    %277 = vector.shape_cast %276 : vector<9xf32> to vector<9x1xf32>
    %278 = vector.broadcast %277 : vector<9x1xf32> to vector<9x9xf32>
    %279 = arith.divf %275, %278 : vector<9x9xf32>
    %280 = vector.extract_strided_slice %252 {offsets = [9, 0], sizes = [9, 64], strides = [1, 1]} : vector<18x64xf32> to vector<9x64xf32>
    %cst_203 = arith.constant dense<0.000000e+00> : vector<9x64xf32>
    %281 = tpu.matmul %279, %280, %cst_203 {dimension_numbers = #tpu.dot_dimension_numbers<[1], [0], [0], [1], [0, 0, 1, 1], [], []>} : vector<9x9xf32>, vector<9x64xf32>, vector<9x64xf32> -> vector<9x64xf32>
    %282 = arith.addf %228, %281 : vector<9x64xf32>
    %c0_204 = arith.constant 0 : index
    %c5 = arith.constant 5 : index
    %c0_205 = arith.constant 0 : index
    %c0_206 = arith.constant 0 : index
    %283 = vector.load %arg4[%c0_204, %c5, %c0_205, %c0_206] : memref<2x8x64x8xf32, #tpu.memory_space<vmem>>, vector<1x1x64x8xf32>
    %284 = vector.shape_cast %283 : vector<1x1x64x8xf32> to vector<64x8xf32>
    %cst_207 = arith.constant dense<0.000000e+00> : vector<18x8xf32>
    %285 = tpu.matmul %14, %284, %cst_207 {dimension_numbers = #tpu.dot_dimension_numbers<[1], [0], [0], [1], [0, 0, 1, 1], [], []>} : vector<18x64xf32>, vector<64x8xf32>, vector<18x8xf32> -> vector<18x8xf32>
    %c0_208 = arith.constant 0 : index
    %c5_209 = arith.constant 5 : index
    %c0_210 = arith.constant 0 : index
    %c0_211 = arith.constant 0 : index
    %286 = vector.load %arg5[%c0_208, %c5_209, %c0_210, %c0_211] : memref<2x8x1x8xf32, #tpu.memory_space<vmem>>, vector<1x1x1x8xf32>
    %287 = vector.shape_cast %286 : vector<1x1x1x8xf32> to vector<1x8xf32>
    %288 = vector.broadcast %287 : vector<1x8xf32> to vector<18x8xf32>
    %289 = arith.addf %285, %288 : vector<18x8xf32>
    %c0_212 = arith.constant 0 : index
    %c5_213 = arith.constant 5 : index
    %c0_214 = arith.constant 0 : index
    %c0_215 = arith.constant 0 : index
    %290 = vector.load %arg6[%c0_212, %c5_213, %c0_214, %c0_215] : memref<2x8x64x8xf32, #tpu.memory_space<vmem>>, vector<1x1x64x8xf32>
    %291 = vector.shape_cast %290 : vector<1x1x64x8xf32> to vector<64x8xf32>
    %cst_216 = arith.constant dense<0.000000e+00> : vector<18x8xf32>
    %292 = tpu.matmul %14, %291, %cst_216 {dimension_numbers = #tpu.dot_dimension_numbers<[1], [0], [0], [1], [0, 0, 1, 1], [], []>} : vector<18x64xf32>, vector<64x8xf32>, vector<18x8xf32> -> vector<18x8xf32>
    %c0_217 = arith.constant 0 : index
    %c5_218 = arith.constant 5 : index
    %c0_219 = arith.constant 0 : index
    %c0_220 = arith.constant 0 : index
    %293 = vector.load %arg7[%c0_217, %c5_218, %c0_219, %c0_220] : memref<2x8x1x8xf32, #tpu.memory_space<vmem>>, vector<1x1x1x8xf32>
    %294 = vector.shape_cast %293 : vector<1x1x1x8xf32> to vector<1x8xf32>
    %295 = vector.broadcast %294 : vector<1x8xf32> to vector<18x8xf32>
    %296 = arith.addf %292, %295 : vector<18x8xf32>
    %c0_221 = arith.constant 0 : index
    %c5_222 = arith.constant 5 : index
    %c0_223 = arith.constant 0 : index
    %c0_224 = arith.constant 0 : index
    %297 = vector.load %arg8[%c0_221, %c5_222, %c0_223, %c0_224] : memref<2x8x64x8xf32, #tpu.memory_space<vmem>>, vector<1x1x64x8xf32>
    %298 = vector.shape_cast %297 : vector<1x1x64x8xf32> to vector<64x8xf32>
    %cst_225 = arith.constant dense<0.000000e+00> : vector<18x8xf32>
    %299 = tpu.matmul %14, %298, %cst_225 {dimension_numbers = #tpu.dot_dimension_numbers<[1], [0], [0], [1], [0, 0, 1, 1], [], []>} : vector<18x64xf32>, vector<64x8xf32>, vector<18x8xf32> -> vector<18x8xf32>
    %c0_226 = arith.constant 0 : index
    %c5_227 = arith.constant 5 : index
    %c0_228 = arith.constant 0 : index
    %c0_229 = arith.constant 0 : index
    %300 = vector.load %arg9[%c0_226, %c5_227, %c0_228, %c0_229] : memref<2x8x1x8xf32, #tpu.memory_space<vmem>>, vector<1x1x1x8xf32>
    %301 = vector.shape_cast %300 : vector<1x1x1x8xf32> to vector<1x8xf32>
    %302 = vector.broadcast %301 : vector<1x8xf32> to vector<18x8xf32>
    %303 = arith.addf %299, %302 : vector<18x8xf32>
    %c0_230 = arith.constant 0 : index
    %c5_231 = arith.constant 5 : index
    %c0_232 = arith.constant 0 : index
    %c0_233 = arith.constant 0 : index
    %304 = vector.load %arg10[%c0_230, %c5_231, %c0_232, %c0_233] : memref<2x8x8x64xf32, #tpu.memory_space<vmem>>, vector<1x1x8x64xf32>
    %305 = vector.shape_cast %304 : vector<1x1x8x64xf32> to vector<8x64xf32>
    %cst_234 = arith.constant dense<0.000000e+00> : vector<18x64xf32>
    %306 = tpu.matmul %303, %305, %cst_234 {dimension_numbers = #tpu.dot_dimension_numbers<[1], [0], [0], [1], [0, 0, 1, 1], [], []>} : vector<18x8xf32>, vector<8x64xf32>, vector<18x64xf32> -> vector<18x64xf32>
    %307 = vector.extract_strided_slice %289 {offsets = [0, 0], sizes = [9, 8], strides = [1, 1]} : vector<18x8xf32> to vector<9x8xf32>
    %308 = vector.extract_strided_slice %296 {offsets = [0, 0], sizes = [9, 8], strides = [1, 1]} : vector<18x8xf32> to vector<9x8xf32>
    %cst_235 = arith.constant dense<0.000000e+00> : vector<9x9xf32>
    %309 = tpu.matmul %307, %308, %cst_235 {dimension_numbers = #tpu.dot_dimension_numbers<[1], [1], [0], [0], [0, 0, 1, 0], [], []>} : vector<9x8xf32>, vector<9x8xf32>, vector<9x9xf32> -> vector<9x9xf32>
    %cst_236 = arith.constant dense<0xFF800000> : vector<9xf32>
    %310 = vector.multi_reduction <maximumf>, %309, %cst_236 [1] : vector<9x9xf32> to vector<9xf32>
    %311 = vector.shape_cast %310 : vector<9xf32> to vector<9x1xf32>
    %312 = vector.broadcast %311 : vector<9x1xf32> to vector<9x9xf32>
    %313 = arith.subf %309, %312 : vector<9x9xf32>
    %314 = math.exp %313 : vector<9x9xf32>
    %cst_237 = arith.constant dense<0.000000e+00> : vector<9xf32>
    %315 = vector.multi_reduction <add>, %314, %cst_237 [1] : vector<9x9xf32> to vector<9xf32>
    %316 = vector.shape_cast %315 : vector<9xf32> to vector<9x1xf32>
    %317 = vector.broadcast %316 : vector<9x1xf32> to vector<9x9xf32>
    %318 = arith.divf %314, %317 : vector<9x9xf32>
    %319 = vector.extract_strided_slice %306 {offsets = [0, 0], sizes = [9, 64], strides = [1, 1]} : vector<18x64xf32> to vector<9x64xf32>
    %cst_238 = arith.constant dense<0.000000e+00> : vector<9x64xf32>
    %320 = tpu.matmul %318, %319, %cst_238 {dimension_numbers = #tpu.dot_dimension_numbers<[1], [0], [0], [1], [0, 0, 1, 1], [], []>} : vector<9x9xf32>, vector<9x64xf32>, vector<9x64xf32> -> vector<9x64xf32>
    %321 = arith.addf %267, %320 : vector<9x64xf32>
    %322 = vector.extract_strided_slice %289 {offsets = [9, 0], sizes = [9, 8], strides = [1, 1]} : vector<18x8xf32> to vector<9x8xf32>
    %323 = vector.extract_strided_slice %296 {offsets = [9, 0], sizes = [9, 8], strides = [1, 1]} : vector<18x8xf32> to vector<9x8xf32>
    %cst_239 = arith.constant dense<0.000000e+00> : vector<9x9xf32>
    %324 = tpu.matmul %322, %323, %cst_239 {dimension_numbers = #tpu.dot_dimension_numbers<[1], [1], [0], [0], [0, 0, 1, 0], [], []>} : vector<9x8xf32>, vector<9x8xf32>, vector<9x9xf32> -> vector<9x9xf32>
    %cst_240 = arith.constant dense<0xFF800000> : vector<9xf32>
    %325 = vector.multi_reduction <maximumf>, %324, %cst_240 [1] : vector<9x9xf32> to vector<9xf32>
    %326 = vector.shape_cast %325 : vector<9xf32> to vector<9x1xf32>
    %327 = vector.broadcast %326 : vector<9x1xf32> to vector<9x9xf32>
    %328 = arith.subf %324, %327 : vector<9x9xf32>
    %329 = math.exp %328 : vector<9x9xf32>
    %cst_241 = arith.constant dense<0.000000e+00> : vector<9xf32>
    %330 = vector.multi_reduction <add>, %329, %cst_241 [1] : vector<9x9xf32> to vector<9xf32>
    %331 = vector.shape_cast %330 : vector<9xf32> to vector<9x1xf32>
    %332 = vector.broadcast %331 : vector<9x1xf32> to vector<9x9xf32>
    %333 = arith.divf %329, %332 : vector<9x9xf32>
    %334 = vector.extract_strided_slice %306 {offsets = [9, 0], sizes = [9, 64], strides = [1, 1]} : vector<18x64xf32> to vector<9x64xf32>
    %cst_242 = arith.constant dense<0.000000e+00> : vector<9x64xf32>
    %335 = tpu.matmul %333, %334, %cst_242 {dimension_numbers = #tpu.dot_dimension_numbers<[1], [0], [0], [1], [0, 0, 1, 1], [], []>} : vector<9x9xf32>, vector<9x64xf32>, vector<9x64xf32> -> vector<9x64xf32>
    %336 = arith.addf %282, %335 : vector<9x64xf32>
    %c0_243 = arith.constant 0 : index
    %c6 = arith.constant 6 : index
    %c0_244 = arith.constant 0 : index
    %c0_245 = arith.constant 0 : index
    %337 = vector.load %arg4[%c0_243, %c6, %c0_244, %c0_245] : memref<2x8x64x8xf32, #tpu.memory_space<vmem>>, vector<1x1x64x8xf32>
    %338 = vector.shape_cast %337 : vector<1x1x64x8xf32> to vector<64x8xf32>
    %cst_246 = arith.constant dense<0.000000e+00> : vector<18x8xf32>
    %339 = tpu.matmul %14, %338, %cst_246 {dimension_numbers = #tpu.dot_dimension_numbers<[1], [0], [0], [1], [0, 0, 1, 1], [], []>} : vector<18x64xf32>, vector<64x8xf32>, vector<18x8xf32> -> vector<18x8xf32>
    %c0_247 = arith.constant 0 : index
    %c6_248 = arith.constant 6 : index
    %c0_249 = arith.constant 0 : index
    %c0_250 = arith.constant 0 : index
    %340 = vector.load %arg5[%c0_247, %c6_248, %c0_249, %c0_250] : memref<2x8x1x8xf32, #tpu.memory_space<vmem>>, vector<1x1x1x8xf32>
    %341 = vector.shape_cast %340 : vector<1x1x1x8xf32> to vector<1x8xf32>
    %342 = vector.broadcast %341 : vector<1x8xf32> to vector<18x8xf32>
    %343 = arith.addf %339, %342 : vector<18x8xf32>
    %c0_251 = arith.constant 0 : index
    %c6_252 = arith.constant 6 : index
    %c0_253 = arith.constant 0 : index
    %c0_254 = arith.constant 0 : index
    %344 = vector.load %arg6[%c0_251, %c6_252, %c0_253, %c0_254] : memref<2x8x64x8xf32, #tpu.memory_space<vmem>>, vector<1x1x64x8xf32>
    %345 = vector.shape_cast %344 : vector<1x1x64x8xf32> to vector<64x8xf32>
    %cst_255 = arith.constant dense<0.000000e+00> : vector<18x8xf32>
    %346 = tpu.matmul %14, %345, %cst_255 {dimension_numbers = #tpu.dot_dimension_numbers<[1], [0], [0], [1], [0, 0, 1, 1], [], []>} : vector<18x64xf32>, vector<64x8xf32>, vector<18x8xf32> -> vector<18x8xf32>
    %c0_256 = arith.constant 0 : index
    %c6_257 = arith.constant 6 : index
    %c0_258 = arith.constant 0 : index
    %c0_259 = arith.constant 0 : index
    %347 = vector.load %arg7[%c0_256, %c6_257, %c0_258, %c0_259] : memref<2x8x1x8xf32, #tpu.memory_space<vmem>>, vector<1x1x1x8xf32>
    %348 = vector.shape_cast %347 : vector<1x1x1x8xf32> to vector<1x8xf32>
    %349 = vector.broadcast %348 : vector<1x8xf32> to vector<18x8xf32>
    %350 = arith.addf %346, %349 : vector<18x8xf32>
    %c0_260 = arith.constant 0 : index
    %c6_261 = arith.constant 6 : index
    %c0_262 = arith.constant 0 : index
    %c0_263 = arith.constant 0 : index
    %351 = vector.load %arg8[%c0_260, %c6_261, %c0_262, %c0_263] : memref<2x8x64x8xf32, #tpu.memory_space<vmem>>, vector<1x1x64x8xf32>
    %352 = vector.shape_cast %351 : vector<1x1x64x8xf32> to vector<64x8xf32>
    %cst_264 = arith.constant dense<0.000000e+00> : vector<18x8xf32>
    %353 = tpu.matmul %14, %352, %cst_264 {dimension_numbers = #tpu.dot_dimension_numbers<[1], [0], [0], [1], [0, 0, 1, 1], [], []>} : vector<18x64xf32>, vector<64x8xf32>, vector<18x8xf32> -> vector<18x8xf32>
    %c0_265 = arith.constant 0 : index
    %c6_266 = arith.constant 6 : index
    %c0_267 = arith.constant 0 : index
    %c0_268 = arith.constant 0 : index
    %354 = vector.load %arg9[%c0_265, %c6_266, %c0_267, %c0_268] : memref<2x8x1x8xf32, #tpu.memory_space<vmem>>, vector<1x1x1x8xf32>
    %355 = vector.shape_cast %354 : vector<1x1x1x8xf32> to vector<1x8xf32>
    %356 = vector.broadcast %355 : vector<1x8xf32> to vector<18x8xf32>
    %357 = arith.addf %353, %356 : vector<18x8xf32>
    %c0_269 = arith.constant 0 : index
    %c6_270 = arith.constant 6 : index
    %c0_271 = arith.constant 0 : index
    %c0_272 = arith.constant 0 : index
    %358 = vector.load %arg10[%c0_269, %c6_270, %c0_271, %c0_272] : memref<2x8x8x64xf32, #tpu.memory_space<vmem>>, vector<1x1x8x64xf32>
    %359 = vector.shape_cast %358 : vector<1x1x8x64xf32> to vector<8x64xf32>
    %cst_273 = arith.constant dense<0.000000e+00> : vector<18x64xf32>
    %360 = tpu.matmul %357, %359, %cst_273 {dimension_numbers = #tpu.dot_dimension_numbers<[1], [0], [0], [1], [0, 0, 1, 1], [], []>} : vector<18x8xf32>, vector<8x64xf32>, vector<18x64xf32> -> vector<18x64xf32>
    %361 = vector.extract_strided_slice %343 {offsets = [0, 0], sizes = [9, 8], strides = [1, 1]} : vector<18x8xf32> to vector<9x8xf32>
    %362 = vector.extract_strided_slice %350 {offsets = [0, 0], sizes = [9, 8], strides = [1, 1]} : vector<18x8xf32> to vector<9x8xf32>
    %cst_274 = arith.constant dense<0.000000e+00> : vector<9x9xf32>
    %363 = tpu.matmul %361, %362, %cst_274 {dimension_numbers = #tpu.dot_dimension_numbers<[1], [1], [0], [0], [0, 0, 1, 0], [], []>} : vector<9x8xf32>, vector<9x8xf32>, vector<9x9xf32> -> vector<9x9xf32>
    %cst_275 = arith.constant dense<0xFF800000> : vector<9xf32>
    %364 = vector.multi_reduction <maximumf>, %363, %cst_275 [1] : vector<9x9xf32> to vector<9xf32>
    %365 = vector.shape_cast %364 : vector<9xf32> to vector<9x1xf32>
    %366 = vector.broadcast %365 : vector<9x1xf32> to vector<9x9xf32>
    %367 = arith.subf %363, %366 : vector<9x9xf32>
    %368 = math.exp %367 : vector<9x9xf32>
    %cst_276 = arith.constant dense<0.000000e+00> : vector<9xf32>
    %369 = vector.multi_reduction <add>, %368, %cst_276 [1] : vector<9x9xf32> to vector<9xf32>
    %370 = vector.shape_cast %369 : vector<9xf32> to vector<9x1xf32>
    %371 = vector.broadcast %370 : vector<9x1xf32> to vector<9x9xf32>
    %372 = arith.divf %368, %371 : vector<9x9xf32>
    %373 = vector.extract_strided_slice %360 {offsets = [0, 0], sizes = [9, 64], strides = [1, 1]} : vector<18x64xf32> to vector<9x64xf32>
    %cst_277 = arith.constant dense<0.000000e+00> : vector<9x64xf32>
    %374 = tpu.matmul %372, %373, %cst_277 {dimension_numbers = #tpu.dot_dimension_numbers<[1], [0], [0], [1], [0, 0, 1, 1], [], []>} : vector<9x9xf32>, vector<9x64xf32>, vector<9x64xf32> -> vector<9x64xf32>
    %375 = arith.addf %321, %374 : vector<9x64xf32>
    %376 = vector.extract_strided_slice %343 {offsets = [9, 0], sizes = [9, 8], strides = [1, 1]} : vector<18x8xf32> to vector<9x8xf32>
    %377 = vector.extract_strided_slice %350 {offsets = [9, 0], sizes = [9, 8], strides = [1, 1]} : vector<18x8xf32> to vector<9x8xf32>
    %cst_278 = arith.constant dense<0.000000e+00> : vector<9x9xf32>
    %378 = tpu.matmul %376, %377, %cst_278 {dimension_numbers = #tpu.dot_dimension_numbers<[1], [1], [0], [0], [0, 0, 1, 0], [], []>} : vector<9x8xf32>, vector<9x8xf32>, vector<9x9xf32> -> vector<9x9xf32>
    %cst_279 = arith.constant dense<0xFF800000> : vector<9xf32>
    %379 = vector.multi_reduction <maximumf>, %378, %cst_279 [1] : vector<9x9xf32> to vector<9xf32>
    %380 = vector.shape_cast %379 : vector<9xf32> to vector<9x1xf32>
    %381 = vector.broadcast %380 : vector<9x1xf32> to vector<9x9xf32>
    %382 = arith.subf %378, %381 : vector<9x9xf32>
    %383 = math.exp %382 : vector<9x9xf32>
    %cst_280 = arith.constant dense<0.000000e+00> : vector<9xf32>
    %384 = vector.multi_reduction <add>, %383, %cst_280 [1] : vector<9x9xf32> to vector<9xf32>
    %385 = vector.shape_cast %384 : vector<9xf32> to vector<9x1xf32>
    %386 = vector.broadcast %385 : vector<9x1xf32> to vector<9x9xf32>
    %387 = arith.divf %383, %386 : vector<9x9xf32>
    %388 = vector.extract_strided_slice %360 {offsets = [9, 0], sizes = [9, 64], strides = [1, 1]} : vector<18x64xf32> to vector<9x64xf32>
    %cst_281 = arith.constant dense<0.000000e+00> : vector<9x64xf32>
    %389 = tpu.matmul %387, %388, %cst_281 {dimension_numbers = #tpu.dot_dimension_numbers<[1], [0], [0], [1], [0, 0, 1, 1], [], []>} : vector<9x9xf32>, vector<9x64xf32>, vector<9x64xf32> -> vector<9x64xf32>
    %390 = arith.addf %336, %389 : vector<9x64xf32>
    %c0_282 = arith.constant 0 : index
    %c7 = arith.constant 7 : index
    %c0_283 = arith.constant 0 : index
    %c0_284 = arith.constant 0 : index
    %391 = vector.load %arg4[%c0_282, %c7, %c0_283, %c0_284] : memref<2x8x64x8xf32, #tpu.memory_space<vmem>>, vector<1x1x64x8xf32>
    %392 = vector.shape_cast %391 : vector<1x1x64x8xf32> to vector<64x8xf32>
    %cst_285 = arith.constant dense<0.000000e+00> : vector<18x8xf32>
    %393 = tpu.matmul %14, %392, %cst_285 {dimension_numbers = #tpu.dot_dimension_numbers<[1], [0], [0], [1], [0, 0, 1, 1], [], []>} : vector<18x64xf32>, vector<64x8xf32>, vector<18x8xf32> -> vector<18x8xf32>
    %c0_286 = arith.constant 0 : index
    %c7_287 = arith.constant 7 : index
    %c0_288 = arith.constant 0 : index
    %c0_289 = arith.constant 0 : index
    %394 = vector.load %arg5[%c0_286, %c7_287, %c0_288, %c0_289] : memref<2x8x1x8xf32, #tpu.memory_space<vmem>>, vector<1x1x1x8xf32>
    %395 = vector.shape_cast %394 : vector<1x1x1x8xf32> to vector<1x8xf32>
    %396 = vector.broadcast %395 : vector<1x8xf32> to vector<18x8xf32>
    %397 = arith.addf %393, %396 : vector<18x8xf32>
    %c0_290 = arith.constant 0 : index
    %c7_291 = arith.constant 7 : index
    %c0_292 = arith.constant 0 : index
    %c0_293 = arith.constant 0 : index
    %398 = vector.load %arg6[%c0_290, %c7_291, %c0_292, %c0_293] : memref<2x8x64x8xf32, #tpu.memory_space<vmem>>, vector<1x1x64x8xf32>
    %399 = vector.shape_cast %398 : vector<1x1x64x8xf32> to vector<64x8xf32>
    %cst_294 = arith.constant dense<0.000000e+00> : vector<18x8xf32>
    %400 = tpu.matmul %14, %399, %cst_294 {dimension_numbers = #tpu.dot_dimension_numbers<[1], [0], [0], [1], [0, 0, 1, 1], [], []>} : vector<18x64xf32>, vector<64x8xf32>, vector<18x8xf32> -> vector<18x8xf32>
    %c0_295 = arith.constant 0 : index
    %c7_296 = arith.constant 7 : index
    %c0_297 = arith.constant 0 : index
    %c0_298 = arith.constant 0 : index
    %401 = vector.load %arg7[%c0_295, %c7_296, %c0_297, %c0_298] : memref<2x8x1x8xf32, #tpu.memory_space<vmem>>, vector<1x1x1x8xf32>
    %402 = vector.shape_cast %401 : vector<1x1x1x8xf32> to vector<1x8xf32>
    %403 = vector.broadcast %402 : vector<1x8xf32> to vector<18x8xf32>
    %404 = arith.addf %400, %403 : vector<18x8xf32>
    %c0_299 = arith.constant 0 : index
    %c7_300 = arith.constant 7 : index
    %c0_301 = arith.constant 0 : index
    %c0_302 = arith.constant 0 : index
    %405 = vector.load %arg8[%c0_299, %c7_300, %c0_301, %c0_302] : memref<2x8x64x8xf32, #tpu.memory_space<vmem>>, vector<1x1x64x8xf32>
    %406 = vector.shape_cast %405 : vector<1x1x64x8xf32> to vector<64x8xf32>
    %cst_303 = arith.constant dense<0.000000e+00> : vector<18x8xf32>
    %407 = tpu.matmul %14, %406, %cst_303 {dimension_numbers = #tpu.dot_dimension_numbers<[1], [0], [0], [1], [0, 0, 1, 1], [], []>} : vector<18x64xf32>, vector<64x8xf32>, vector<18x8xf32> -> vector<18x8xf32>
    %c0_304 = arith.constant 0 : index
    %c7_305 = arith.constant 7 : index
    %c0_306 = arith.constant 0 : index
    %c0_307 = arith.constant 0 : index
    %408 = vector.load %arg9[%c0_304, %c7_305, %c0_306, %c0_307] : memref<2x8x1x8xf32, #tpu.memory_space<vmem>>, vector<1x1x1x8xf32>
    %409 = vector.shape_cast %408 : vector<1x1x1x8xf32> to vector<1x8xf32>
    %410 = vector.broadcast %409 : vector<1x8xf32> to vector<18x8xf32>
    %411 = arith.addf %407, %410 : vector<18x8xf32>
    %c0_308 = arith.constant 0 : index
    %c7_309 = arith.constant 7 : index
    %c0_310 = arith.constant 0 : index
    %c0_311 = arith.constant 0 : index
    %412 = vector.load %arg10[%c0_308, %c7_309, %c0_310, %c0_311] : memref<2x8x8x64xf32, #tpu.memory_space<vmem>>, vector<1x1x8x64xf32>
    %413 = vector.shape_cast %412 : vector<1x1x8x64xf32> to vector<8x64xf32>
    %cst_312 = arith.constant dense<0.000000e+00> : vector<18x64xf32>
    %414 = tpu.matmul %411, %413, %cst_312 {dimension_numbers = #tpu.dot_dimension_numbers<[1], [0], [0], [1], [0, 0, 1, 1], [], []>} : vector<18x8xf32>, vector<8x64xf32>, vector<18x64xf32> -> vector<18x64xf32>
    %415 = vector.extract_strided_slice %397 {offsets = [0, 0], sizes = [9, 8], strides = [1, 1]} : vector<18x8xf32> to vector<9x8xf32>
    %416 = vector.extract_strided_slice %404 {offsets = [0, 0], sizes = [9, 8], strides = [1, 1]} : vector<18x8xf32> to vector<9x8xf32>
    %cst_313 = arith.constant dense<0.000000e+00> : vector<9x9xf32>
    %417 = tpu.matmul %415, %416, %cst_313 {dimension_numbers = #tpu.dot_dimension_numbers<[1], [1], [0], [0], [0, 0, 1, 0], [], []>} : vector<9x8xf32>, vector<9x8xf32>, vector<9x9xf32> -> vector<9x9xf32>
    %cst_314 = arith.constant dense<0xFF800000> : vector<9xf32>
    %418 = vector.multi_reduction <maximumf>, %417, %cst_314 [1] : vector<9x9xf32> to vector<9xf32>
    %419 = vector.shape_cast %418 : vector<9xf32> to vector<9x1xf32>
    %420 = vector.broadcast %419 : vector<9x1xf32> to vector<9x9xf32>
    %421 = arith.subf %417, %420 : vector<9x9xf32>
    %422 = math.exp %421 : vector<9x9xf32>
    %cst_315 = arith.constant dense<0.000000e+00> : vector<9xf32>
    %423 = vector.multi_reduction <add>, %422, %cst_315 [1] : vector<9x9xf32> to vector<9xf32>
    %424 = vector.shape_cast %423 : vector<9xf32> to vector<9x1xf32>
    %425 = vector.broadcast %424 : vector<9x1xf32> to vector<9x9xf32>
    %426 = arith.divf %422, %425 : vector<9x9xf32>
    %427 = vector.extract_strided_slice %414 {offsets = [0, 0], sizes = [9, 64], strides = [1, 1]} : vector<18x64xf32> to vector<9x64xf32>
    %cst_316 = arith.constant dense<0.000000e+00> : vector<9x64xf32>
    %428 = tpu.matmul %426, %427, %cst_316 {dimension_numbers = #tpu.dot_dimension_numbers<[1], [0], [0], [1], [0, 0, 1, 1], [], []>} : vector<9x9xf32>, vector<9x64xf32>, vector<9x64xf32> -> vector<9x64xf32>
    %429 = arith.addf %375, %428 : vector<9x64xf32>
    %430 = vector.extract_strided_slice %397 {offsets = [9, 0], sizes = [9, 8], strides = [1, 1]} : vector<18x8xf32> to vector<9x8xf32>
    %431 = vector.extract_strided_slice %404 {offsets = [9, 0], sizes = [9, 8], strides = [1, 1]} : vector<18x8xf32> to vector<9x8xf32>
    %cst_317 = arith.constant dense<0.000000e+00> : vector<9x9xf32>
    %432 = tpu.matmul %430, %431, %cst_317 {dimension_numbers = #tpu.dot_dimension_numbers<[1], [1], [0], [0], [0, 0, 1, 0], [], []>} : vector<9x8xf32>, vector<9x8xf32>, vector<9x9xf32> -> vector<9x9xf32>
    %cst_318 = arith.constant dense<0xFF800000> : vector<9xf32>
    %433 = vector.multi_reduction <maximumf>, %432, %cst_318 [1] : vector<9x9xf32> to vector<9xf32>
    %434 = vector.shape_cast %433 : vector<9xf32> to vector<9x1xf32>
    %435 = vector.broadcast %434 : vector<9x1xf32> to vector<9x9xf32>
    %436 = arith.subf %432, %435 : vector<9x9xf32>
    %437 = math.exp %436 : vector<9x9xf32>
    %cst_319 = arith.constant dense<0.000000e+00> : vector<9xf32>
    %438 = vector.multi_reduction <add>, %437, %cst_319 [1] : vector<9x9xf32> to vector<9xf32>
    %439 = vector.shape_cast %438 : vector<9xf32> to vector<9x1xf32>
    %440 = vector.broadcast %439 : vector<9x1xf32> to vector<9x9xf32>
    %441 = arith.divf %437, %440 : vector<9x9xf32>
    %442 = vector.extract_strided_slice %414 {offsets = [9, 0], sizes = [9, 64], strides = [1, 1]} : vector<18x64xf32> to vector<9x64xf32>
    %cst_320 = arith.constant dense<0.000000e+00> : vector<9x64xf32>
    %443 = tpu.matmul %441, %442, %cst_320 {dimension_numbers = #tpu.dot_dimension_numbers<[1], [0], [0], [1], [0, 0, 1, 1], [], []>} : vector<9x9xf32>, vector<9x64xf32>, vector<9x64xf32> -> vector<9x64xf32>
    %444 = arith.addf %390, %443 : vector<9x64xf32>
    %445 = tpu.concatenate %429, %444 in 0 : vector<9x64xf32>, vector<9x64xf32> -> vector<18x64xf32>
    %c0_321 = arith.constant 0 : index
    %c0_322 = arith.constant 0 : index
    %c0_323 = arith.constant 0 : index
    %446 = vector.load %arg11[%c0_321, %c0_322, %c0_323] : memref<2x1x64xf32, #tpu.memory_space<vmem>>, vector<1x1x64xf32>
    %447 = vector.shape_cast %446 : vector<1x1x64xf32> to vector<1x64xf32>
    %448 = vector.broadcast %447 : vector<1x64xf32> to vector<18x64xf32>
    %449 = arith.addf %445, %448 : vector<18x64xf32>
    %450 = arith.addf %14, %449 : vector<18x64xf32>
    %c0_324 = arith.constant 0 : index
    %c0_325 = arith.constant 0 : index
    %c0_326 = arith.constant 0 : index
    %451 = vector.load %arg16[%c0_324, %c0_325, %c0_326] : memref<2x1x64xf32, #tpu.memory_space<vmem>>, vector<1x1x64xf32>
    %452 = vector.shape_cast %451 : vector<1x1x64xf32> to vector<1x64xf32>
    %c0_327 = arith.constant 0 : index
    %c0_328 = arith.constant 0 : index
    %c0_329 = arith.constant 0 : index
    %453 = vector.load %arg17[%c0_327, %c0_328, %c0_329] : memref<2x1x64xf32, #tpu.memory_space<vmem>>, vector<1x1x64xf32>
    %454 = vector.shape_cast %453 : vector<1x1x64xf32> to vector<1x64xf32>
    %cst_330 = arith.constant dense<0.000000e+00> : vector<18xf32>
    %455 = vector.multi_reduction <add>, %450, %cst_330 [1] : vector<18x64xf32> to vector<18xf32>
    %456 = vector.shape_cast %455 : vector<18xf32> to vector<18x1xf32>
    %cst_331 = arith.constant 6.400000e+01 : f32
    %457 = vector.broadcast %cst_331 : f32 to vector<18x1xf32>
    %458 = arith.divf %456, %457 : vector<18x1xf32>
    %459 = vector.broadcast %458 : vector<18x1xf32> to vector<18x64xf32>
    %460 = arith.subf %450, %459 : vector<18x64xf32>
    %461 = arith.mulf %460, %460 : vector<18x64xf32>
    %cst_332 = arith.constant dense<0.000000e+00> : vector<18xf32>
    %462 = vector.multi_reduction <add>, %461, %cst_332 [1] : vector<18x64xf32> to vector<18xf32>
    %463 = vector.shape_cast %462 : vector<18xf32> to vector<18x1xf32>
    %cst_333 = arith.constant 6.400000e+01 : f32
    %464 = vector.broadcast %cst_333 : f32 to vector<18x1xf32>
    %465 = arith.divf %463, %464 : vector<18x1xf32>
    %466 = vector.broadcast %458 : vector<18x1xf32> to vector<18x64xf32>
    %467 = arith.subf %450, %466 : vector<18x64xf32>
    %cst_334 = arith.constant 9.99999974E-6 : f32
    %468 = vector.broadcast %cst_334 : f32 to vector<18x1xf32>
    %469 = arith.addf %465, %468 : vector<18x1xf32>
    %470 = math.rsqrt %469 : vector<18x1xf32>
    %471 = vector.broadcast %470 : vector<18x1xf32> to vector<18x64xf32>
    %472 = arith.mulf %467, %471 : vector<18x64xf32>
    %473 = vector.broadcast %452 : vector<1x64xf32> to vector<18x64xf32>
    %474 = arith.mulf %472, %473 : vector<18x64xf32>
    %475 = vector.broadcast %454 : vector<1x64xf32> to vector<18x64xf32>
    %476 = arith.addf %474, %475 : vector<18x64xf32>
    %c0_335 = arith.constant 0 : index
    %c0_336 = arith.constant 0 : index
    %c0_337 = arith.constant 0 : index
    %477 = vector.load %arg12[%c0_335, %c0_336, %c0_337] : memref<2x64x128xf32, #tpu.memory_space<vmem>>, vector<1x64x128xf32>
    %478 = vector.shape_cast %477 : vector<1x64x128xf32> to vector<64x128xf32>
    %cst_338 = arith.constant dense<0.000000e+00> : vector<18x128xf32>
    %479 = tpu.matmul %476, %478, %cst_338 {dimension_numbers = #tpu.dot_dimension_numbers<[1], [0], [0], [1], [0, 0, 1, 1], [], []>} : vector<18x64xf32>, vector<64x128xf32>, vector<18x128xf32> -> vector<18x128xf32>
    %c0_339 = arith.constant 0 : index
    %c0_340 = arith.constant 0 : index
    %c0_341 = arith.constant 0 : index
    %480 = vector.load %arg13[%c0_339, %c0_340, %c0_341] : memref<2x1x128xf32, #tpu.memory_space<vmem>>, vector<1x1x128xf32>
    %481 = vector.shape_cast %480 : vector<1x1x128xf32> to vector<1x128xf32>
    %482 = vector.broadcast %481 : vector<1x128xf32> to vector<18x128xf32>
    %483 = arith.addf %479, %482 : vector<18x128xf32>
    %cst_342 = arith.constant 0.000000e+00 : f32
    %484 = vector.broadcast %cst_342 : f32 to vector<18x128xf32>
    %485 = arith.maximumf %483, %484 : vector<18x128xf32>
    %c0_343 = arith.constant 0 : index
    %c0_344 = arith.constant 0 : index
    %c0_345 = arith.constant 0 : index
    %486 = vector.load %arg14[%c0_343, %c0_344, %c0_345] : memref<2x128x64xf32, #tpu.memory_space<vmem>>, vector<1x128x64xf32>
    %487 = vector.shape_cast %486 : vector<1x128x64xf32> to vector<128x64xf32>
    %cst_346 = arith.constant dense<0.000000e+00> : vector<18x64xf32>
    %488 = tpu.matmul %485, %487, %cst_346 {dimension_numbers = #tpu.dot_dimension_numbers<[1], [0], [0], [1], [0, 0, 1, 1], [], []>} : vector<18x128xf32>, vector<128x64xf32>, vector<18x64xf32> -> vector<18x64xf32>
    %c0_347 = arith.constant 0 : index
    %c0_348 = arith.constant 0 : index
    %c0_349 = arith.constant 0 : index
    %489 = vector.load %arg15[%c0_347, %c0_348, %c0_349] : memref<2x1x64xf32, #tpu.memory_space<vmem>>, vector<1x1x64xf32>
    %490 = vector.shape_cast %489 : vector<1x1x64xf32> to vector<1x64xf32>
    %491 = vector.broadcast %490 : vector<1x64xf32> to vector<18x64xf32>
    %492 = arith.addf %488, %491 : vector<18x64xf32>
    %493 = arith.addf %476, %492 : vector<18x64xf32>
    %c0_350 = arith.constant 0 : index
    %c0_351 = arith.constant 0 : index
    %c0_352 = arith.constant 0 : index
    %494 = vector.load %arg18[%c0_350, %c0_351, %c0_352] : memref<2x1x64xf32, #tpu.memory_space<vmem>>, vector<1x1x64xf32>
    %495 = vector.shape_cast %494 : vector<1x1x64xf32> to vector<1x64xf32>
    %c0_353 = arith.constant 0 : index
    %c0_354 = arith.constant 0 : index
    %c0_355 = arith.constant 0 : index
    %496 = vector.load %arg19[%c0_353, %c0_354, %c0_355] : memref<2x1x64xf32, #tpu.memory_space<vmem>>, vector<1x1x64xf32>
    %497 = vector.shape_cast %496 : vector<1x1x64xf32> to vector<1x64xf32>
    %cst_356 = arith.constant dense<0.000000e+00> : vector<18xf32>
    %498 = vector.multi_reduction <add>, %493, %cst_356 [1] : vector<18x64xf32> to vector<18xf32>
    %499 = vector.shape_cast %498 : vector<18xf32> to vector<18x1xf32>
    %cst_357 = arith.constant 6.400000e+01 : f32
    %500 = vector.broadcast %cst_357 : f32 to vector<18x1xf32>
    %501 = arith.divf %499, %500 : vector<18x1xf32>
    %502 = vector.broadcast %501 : vector<18x1xf32> to vector<18x64xf32>
    %503 = arith.subf %493, %502 : vector<18x64xf32>
    %504 = arith.mulf %503, %503 : vector<18x64xf32>
    %cst_358 = arith.constant dense<0.000000e+00> : vector<18xf32>
    %505 = vector.multi_reduction <add>, %504, %cst_358 [1] : vector<18x64xf32> to vector<18xf32>
    %506 = vector.shape_cast %505 : vector<18xf32> to vector<18x1xf32>
    %cst_359 = arith.constant 6.400000e+01 : f32
    %507 = vector.broadcast %cst_359 : f32 to vector<18x1xf32>
    %508 = arith.divf %506, %507 : vector<18x1xf32>
    %509 = vector.broadcast %501 : vector<18x1xf32> to vector<18x64xf32>
    %510 = arith.subf %493, %509 : vector<18x64xf32>
    %cst_360 = arith.constant 9.99999974E-6 : f32
    %511 = vector.broadcast %cst_360 : f32 to vector<18x1xf32>
    %512 = arith.addf %508, %511 : vector<18x1xf32>
    %513 = math.rsqrt %512 : vector<18x1xf32>
    %514 = vector.broadcast %513 : vector<18x1xf32> to vector<18x64xf32>
    %515 = arith.mulf %510, %514 : vector<18x64xf32>
    %516 = vector.broadcast %495 : vector<1x64xf32> to vector<18x64xf32>
    %517 = arith.mulf %515, %516 : vector<18x64xf32>
    %518 = vector.broadcast %497 : vector<1x64xf32> to vector<18x64xf32>
    %519 = arith.addf %517, %518 : vector<18x64xf32>
    %c1_361 = arith.constant 1 : index
    %c0_362 = arith.constant 0 : index
    %c0_363 = arith.constant 0 : index
    %c0_364 = arith.constant 0 : index
    %520 = vector.load %arg4[%c1_361, %c0_362, %c0_363, %c0_364] : memref<2x8x64x8xf32, #tpu.memory_space<vmem>>, vector<1x1x64x8xf32>
    %521 = vector.shape_cast %520 : vector<1x1x64x8xf32> to vector<64x8xf32>
    %cst_365 = arith.constant dense<0.000000e+00> : vector<18x8xf32>
    %522 = tpu.matmul %519, %521, %cst_365 {dimension_numbers = #tpu.dot_dimension_numbers<[1], [0], [0], [1], [0, 0, 1, 1], [], []>} : vector<18x64xf32>, vector<64x8xf32>, vector<18x8xf32> -> vector<18x8xf32>
    %c1_366 = arith.constant 1 : index
    %c0_367 = arith.constant 0 : index
    %c0_368 = arith.constant 0 : index
    %c0_369 = arith.constant 0 : index
    %523 = vector.load %arg5[%c1_366, %c0_367, %c0_368, %c0_369] : memref<2x8x1x8xf32, #tpu.memory_space<vmem>>, vector<1x1x1x8xf32>
    %524 = vector.shape_cast %523 : vector<1x1x1x8xf32> to vector<1x8xf32>
    %525 = vector.broadcast %524 : vector<1x8xf32> to vector<18x8xf32>
    %526 = arith.addf %522, %525 : vector<18x8xf32>
    %c1_370 = arith.constant 1 : index
    %c0_371 = arith.constant 0 : index
    %c0_372 = arith.constant 0 : index
    %c0_373 = arith.constant 0 : index
    %527 = vector.load %arg6[%c1_370, %c0_371, %c0_372, %c0_373] : memref<2x8x64x8xf32, #tpu.memory_space<vmem>>, vector<1x1x64x8xf32>
    %528 = vector.shape_cast %527 : vector<1x1x64x8xf32> to vector<64x8xf32>
    %cst_374 = arith.constant dense<0.000000e+00> : vector<18x8xf32>
    %529 = tpu.matmul %519, %528, %cst_374 {dimension_numbers = #tpu.dot_dimension_numbers<[1], [0], [0], [1], [0, 0, 1, 1], [], []>} : vector<18x64xf32>, vector<64x8xf32>, vector<18x8xf32> -> vector<18x8xf32>
    %c1_375 = arith.constant 1 : index
    %c0_376 = arith.constant 0 : index
    %c0_377 = arith.constant 0 : index
    %c0_378 = arith.constant 0 : index
    %530 = vector.load %arg7[%c1_375, %c0_376, %c0_377, %c0_378] : memref<2x8x1x8xf32, #tpu.memory_space<vmem>>, vector<1x1x1x8xf32>
    %531 = vector.shape_cast %530 : vector<1x1x1x8xf32> to vector<1x8xf32>
    %532 = vector.broadcast %531 : vector<1x8xf32> to vector<18x8xf32>
    %533 = arith.addf %529, %532 : vector<18x8xf32>
    %c1_379 = arith.constant 1 : index
    %c0_380 = arith.constant 0 : index
    %c0_381 = arith.constant 0 : index
    %c0_382 = arith.constant 0 : index
    %534 = vector.load %arg8[%c1_379, %c0_380, %c0_381, %c0_382] : memref<2x8x64x8xf32, #tpu.memory_space<vmem>>, vector<1x1x64x8xf32>
    %535 = vector.shape_cast %534 : vector<1x1x64x8xf32> to vector<64x8xf32>
    %cst_383 = arith.constant dense<0.000000e+00> : vector<18x8xf32>
    %536 = tpu.matmul %519, %535, %cst_383 {dimension_numbers = #tpu.dot_dimension_numbers<[1], [0], [0], [1], [0, 0, 1, 1], [], []>} : vector<18x64xf32>, vector<64x8xf32>, vector<18x8xf32> -> vector<18x8xf32>
    %c1_384 = arith.constant 1 : index
    %c0_385 = arith.constant 0 : index
    %c0_386 = arith.constant 0 : index
    %c0_387 = arith.constant 0 : index
    %537 = vector.load %arg9[%c1_384, %c0_385, %c0_386, %c0_387] : memref<2x8x1x8xf32, #tpu.memory_space<vmem>>, vector<1x1x1x8xf32>
    %538 = vector.shape_cast %537 : vector<1x1x1x8xf32> to vector<1x8xf32>
    %539 = vector.broadcast %538 : vector<1x8xf32> to vector<18x8xf32>
    %540 = arith.addf %536, %539 : vector<18x8xf32>
    %c1_388 = arith.constant 1 : index
    %c0_389 = arith.constant 0 : index
    %c0_390 = arith.constant 0 : index
    %c0_391 = arith.constant 0 : index
    %541 = vector.load %arg10[%c1_388, %c0_389, %c0_390, %c0_391] : memref<2x8x8x64xf32, #tpu.memory_space<vmem>>, vector<1x1x8x64xf32>
    %542 = vector.shape_cast %541 : vector<1x1x8x64xf32> to vector<8x64xf32>
    %cst_392 = arith.constant dense<0.000000e+00> : vector<18x64xf32>
    %543 = tpu.matmul %540, %542, %cst_392 {dimension_numbers = #tpu.dot_dimension_numbers<[1], [0], [0], [1], [0, 0, 1, 1], [], []>} : vector<18x8xf32>, vector<8x64xf32>, vector<18x64xf32> -> vector<18x64xf32>
    %544 = vector.extract_strided_slice %526 {offsets = [0, 0], sizes = [9, 8], strides = [1, 1]} : vector<18x8xf32> to vector<9x8xf32>
    %545 = vector.extract_strided_slice %533 {offsets = [0, 0], sizes = [9, 8], strides = [1, 1]} : vector<18x8xf32> to vector<9x8xf32>
    %cst_393 = arith.constant dense<0.000000e+00> : vector<9x9xf32>
    %546 = tpu.matmul %544, %545, %cst_393 {dimension_numbers = #tpu.dot_dimension_numbers<[1], [1], [0], [0], [0, 0, 1, 0], [], []>} : vector<9x8xf32>, vector<9x8xf32>, vector<9x9xf32> -> vector<9x9xf32>
    %cst_394 = arith.constant dense<0xFF800000> : vector<9xf32>
    %547 = vector.multi_reduction <maximumf>, %546, %cst_394 [1] : vector<9x9xf32> to vector<9xf32>
    %548 = vector.shape_cast %547 : vector<9xf32> to vector<9x1xf32>
    %549 = vector.broadcast %548 : vector<9x1xf32> to vector<9x9xf32>
    %550 = arith.subf %546, %549 : vector<9x9xf32>
    %551 = math.exp %550 : vector<9x9xf32>
    %cst_395 = arith.constant dense<0.000000e+00> : vector<9xf32>
    %552 = vector.multi_reduction <add>, %551, %cst_395 [1] : vector<9x9xf32> to vector<9xf32>
    %553 = vector.shape_cast %552 : vector<9xf32> to vector<9x1xf32>
    %554 = vector.broadcast %553 : vector<9x1xf32> to vector<9x9xf32>
    %555 = arith.divf %551, %554 : vector<9x9xf32>
    %556 = vector.extract_strided_slice %543 {offsets = [0, 0], sizes = [9, 64], strides = [1, 1]} : vector<18x64xf32> to vector<9x64xf32>
    %cst_396 = arith.constant dense<0.000000e+00> : vector<9x64xf32>
    %557 = tpu.matmul %555, %556, %cst_396 {dimension_numbers = #tpu.dot_dimension_numbers<[1], [0], [0], [1], [0, 0, 1, 1], [], []>} : vector<9x9xf32>, vector<9x64xf32>, vector<9x64xf32> -> vector<9x64xf32>
    %558 = vector.extract_strided_slice %526 {offsets = [9, 0], sizes = [9, 8], strides = [1, 1]} : vector<18x8xf32> to vector<9x8xf32>
    %559 = vector.extract_strided_slice %533 {offsets = [9, 0], sizes = [9, 8], strides = [1, 1]} : vector<18x8xf32> to vector<9x8xf32>
    %cst_397 = arith.constant dense<0.000000e+00> : vector<9x9xf32>
    %560 = tpu.matmul %558, %559, %cst_397 {dimension_numbers = #tpu.dot_dimension_numbers<[1], [1], [0], [0], [0, 0, 1, 0], [], []>} : vector<9x8xf32>, vector<9x8xf32>, vector<9x9xf32> -> vector<9x9xf32>
    %cst_398 = arith.constant dense<0xFF800000> : vector<9xf32>
    %561 = vector.multi_reduction <maximumf>, %560, %cst_398 [1] : vector<9x9xf32> to vector<9xf32>
    %562 = vector.shape_cast %561 : vector<9xf32> to vector<9x1xf32>
    %563 = vector.broadcast %562 : vector<9x1xf32> to vector<9x9xf32>
    %564 = arith.subf %560, %563 : vector<9x9xf32>
    %565 = math.exp %564 : vector<9x9xf32>
    %cst_399 = arith.constant dense<0.000000e+00> : vector<9xf32>
    %566 = vector.multi_reduction <add>, %565, %cst_399 [1] : vector<9x9xf32> to vector<9xf32>
    %567 = vector.shape_cast %566 : vector<9xf32> to vector<9x1xf32>
    %568 = vector.broadcast %567 : vector<9x1xf32> to vector<9x9xf32>
    %569 = arith.divf %565, %568 : vector<9x9xf32>
    %570 = vector.extract_strided_slice %543 {offsets = [9, 0], sizes = [9, 64], strides = [1, 1]} : vector<18x64xf32> to vector<9x64xf32>
    %cst_400 = arith.constant dense<0.000000e+00> : vector<9x64xf32>
    %571 = tpu.matmul %569, %570, %cst_400 {dimension_numbers = #tpu.dot_dimension_numbers<[1], [0], [0], [1], [0, 0, 1, 1], [], []>} : vector<9x9xf32>, vector<9x64xf32>, vector<9x64xf32> -> vector<9x64xf32>
    %c1_401 = arith.constant 1 : index
    %c1_402 = arith.constant 1 : index
    %c0_403 = arith.constant 0 : index
    %c0_404 = arith.constant 0 : index
    %572 = vector.load %arg4[%c1_401, %c1_402, %c0_403, %c0_404] : memref<2x8x64x8xf32, #tpu.memory_space<vmem>>, vector<1x1x64x8xf32>
    %573 = vector.shape_cast %572 : vector<1x1x64x8xf32> to vector<64x8xf32>
    %cst_405 = arith.constant dense<0.000000e+00> : vector<18x8xf32>
    %574 = tpu.matmul %519, %573, %cst_405 {dimension_numbers = #tpu.dot_dimension_numbers<[1], [0], [0], [1], [0, 0, 1, 1], [], []>} : vector<18x64xf32>, vector<64x8xf32>, vector<18x8xf32> -> vector<18x8xf32>
    %c1_406 = arith.constant 1 : index
    %c1_407 = arith.constant 1 : index
    %c0_408 = arith.constant 0 : index
    %c0_409 = arith.constant 0 : index
    %575 = vector.load %arg5[%c1_406, %c1_407, %c0_408, %c0_409] : memref<2x8x1x8xf32, #tpu.memory_space<vmem>>, vector<1x1x1x8xf32>
    %576 = vector.shape_cast %575 : vector<1x1x1x8xf32> to vector<1x8xf32>
    %577 = vector.broadcast %576 : vector<1x8xf32> to vector<18x8xf32>
    %578 = arith.addf %574, %577 : vector<18x8xf32>
    %c1_410 = arith.constant 1 : index
    %c1_411 = arith.constant 1 : index
    %c0_412 = arith.constant 0 : index
    %c0_413 = arith.constant 0 : index
    %579 = vector.load %arg6[%c1_410, %c1_411, %c0_412, %c0_413] : memref<2x8x64x8xf32, #tpu.memory_space<vmem>>, vector<1x1x64x8xf32>
    %580 = vector.shape_cast %579 : vector<1x1x64x8xf32> to vector<64x8xf32>
    %cst_414 = arith.constant dense<0.000000e+00> : vector<18x8xf32>
    %581 = tpu.matmul %519, %580, %cst_414 {dimension_numbers = #tpu.dot_dimension_numbers<[1], [0], [0], [1], [0, 0, 1, 1], [], []>} : vector<18x64xf32>, vector<64x8xf32>, vector<18x8xf32> -> vector<18x8xf32>
    %c1_415 = arith.constant 1 : index
    %c1_416 = arith.constant 1 : index
    %c0_417 = arith.constant 0 : index
    %c0_418 = arith.constant 0 : index
    %582 = vector.load %arg7[%c1_415, %c1_416, %c0_417, %c0_418] : memref<2x8x1x8xf32, #tpu.memory_space<vmem>>, vector<1x1x1x8xf32>
    %583 = vector.shape_cast %582 : vector<1x1x1x8xf32> to vector<1x8xf32>
    %584 = vector.broadcast %583 : vector<1x8xf32> to vector<18x8xf32>
    %585 = arith.addf %581, %584 : vector<18x8xf32>
    %c1_419 = arith.constant 1 : index
    %c1_420 = arith.constant 1 : index
    %c0_421 = arith.constant 0 : index
    %c0_422 = arith.constant 0 : index
    %586 = vector.load %arg8[%c1_419, %c1_420, %c0_421, %c0_422] : memref<2x8x64x8xf32, #tpu.memory_space<vmem>>, vector<1x1x64x8xf32>
    %587 = vector.shape_cast %586 : vector<1x1x64x8xf32> to vector<64x8xf32>
    %cst_423 = arith.constant dense<0.000000e+00> : vector<18x8xf32>
    %588 = tpu.matmul %519, %587, %cst_423 {dimension_numbers = #tpu.dot_dimension_numbers<[1], [0], [0], [1], [0, 0, 1, 1], [], []>} : vector<18x64xf32>, vector<64x8xf32>, vector<18x8xf32> -> vector<18x8xf32>
    %c1_424 = arith.constant 1 : index
    %c1_425 = arith.constant 1 : index
    %c0_426 = arith.constant 0 : index
    %c0_427 = arith.constant 0 : index
    %589 = vector.load %arg9[%c1_424, %c1_425, %c0_426, %c0_427] : memref<2x8x1x8xf32, #tpu.memory_space<vmem>>, vector<1x1x1x8xf32>
    %590 = vector.shape_cast %589 : vector<1x1x1x8xf32> to vector<1x8xf32>
    %591 = vector.broadcast %590 : vector<1x8xf32> to vector<18x8xf32>
    %592 = arith.addf %588, %591 : vector<18x8xf32>
    %c1_428 = arith.constant 1 : index
    %c1_429 = arith.constant 1 : index
    %c0_430 = arith.constant 0 : index
    %c0_431 = arith.constant 0 : index
    %593 = vector.load %arg10[%c1_428, %c1_429, %c0_430, %c0_431] : memref<2x8x8x64xf32, #tpu.memory_space<vmem>>, vector<1x1x8x64xf32>
    %594 = vector.shape_cast %593 : vector<1x1x8x64xf32> to vector<8x64xf32>
    %cst_432 = arith.constant dense<0.000000e+00> : vector<18x64xf32>
    %595 = tpu.matmul %592, %594, %cst_432 {dimension_numbers = #tpu.dot_dimension_numbers<[1], [0], [0], [1], [0, 0, 1, 1], [], []>} : vector<18x8xf32>, vector<8x64xf32>, vector<18x64xf32> -> vector<18x64xf32>
    %596 = vector.extract_strided_slice %578 {offsets = [0, 0], sizes = [9, 8], strides = [1, 1]} : vector<18x8xf32> to vector<9x8xf32>
    %597 = vector.extract_strided_slice %585 {offsets = [0, 0], sizes = [9, 8], strides = [1, 1]} : vector<18x8xf32> to vector<9x8xf32>
    %cst_433 = arith.constant dense<0.000000e+00> : vector<9x9xf32>
    %598 = tpu.matmul %596, %597, %cst_433 {dimension_numbers = #tpu.dot_dimension_numbers<[1], [1], [0], [0], [0, 0, 1, 0], [], []>} : vector<9x8xf32>, vector<9x8xf32>, vector<9x9xf32> -> vector<9x9xf32>
    %cst_434 = arith.constant dense<0xFF800000> : vector<9xf32>
    %599 = vector.multi_reduction <maximumf>, %598, %cst_434 [1] : vector<9x9xf32> to vector<9xf32>
    %600 = vector.shape_cast %599 : vector<9xf32> to vector<9x1xf32>
    %601 = vector.broadcast %600 : vector<9x1xf32> to vector<9x9xf32>
    %602 = arith.subf %598, %601 : vector<9x9xf32>
    %603 = math.exp %602 : vector<9x9xf32>
    %cst_435 = arith.constant dense<0.000000e+00> : vector<9xf32>
    %604 = vector.multi_reduction <add>, %603, %cst_435 [1] : vector<9x9xf32> to vector<9xf32>
    %605 = vector.shape_cast %604 : vector<9xf32> to vector<9x1xf32>
    %606 = vector.broadcast %605 : vector<9x1xf32> to vector<9x9xf32>
    %607 = arith.divf %603, %606 : vector<9x9xf32>
    %608 = vector.extract_strided_slice %595 {offsets = [0, 0], sizes = [9, 64], strides = [1, 1]} : vector<18x64xf32> to vector<9x64xf32>
    %cst_436 = arith.constant dense<0.000000e+00> : vector<9x64xf32>
    %609 = tpu.matmul %607, %608, %cst_436 {dimension_numbers = #tpu.dot_dimension_numbers<[1], [0], [0], [1], [0, 0, 1, 1], [], []>} : vector<9x9xf32>, vector<9x64xf32>, vector<9x64xf32> -> vector<9x64xf32>
    %610 = arith.addf %557, %609 : vector<9x64xf32>
    %611 = arith.addf %555, %607 : vector<9x9xf32>
    %612 = vector.extract_strided_slice %578 {offsets = [9, 0], sizes = [9, 8], strides = [1, 1]} : vector<18x8xf32> to vector<9x8xf32>
    %613 = vector.extract_strided_slice %585 {offsets = [9, 0], sizes = [9, 8], strides = [1, 1]} : vector<18x8xf32> to vector<9x8xf32>
    %cst_437 = arith.constant dense<0.000000e+00> : vector<9x9xf32>
    %614 = tpu.matmul %612, %613, %cst_437 {dimension_numbers = #tpu.dot_dimension_numbers<[1], [1], [0], [0], [0, 0, 1, 0], [], []>} : vector<9x8xf32>, vector<9x8xf32>, vector<9x9xf32> -> vector<9x9xf32>
    %cst_438 = arith.constant dense<0xFF800000> : vector<9xf32>
    %615 = vector.multi_reduction <maximumf>, %614, %cst_438 [1] : vector<9x9xf32> to vector<9xf32>
    %616 = vector.shape_cast %615 : vector<9xf32> to vector<9x1xf32>
    %617 = vector.broadcast %616 : vector<9x1xf32> to vector<9x9xf32>
    %618 = arith.subf %614, %617 : vector<9x9xf32>
    %619 = math.exp %618 : vector<9x9xf32>
    %cst_439 = arith.constant dense<0.000000e+00> : vector<9xf32>
    %620 = vector.multi_reduction <add>, %619, %cst_439 [1] : vector<9x9xf32> to vector<9xf32>
    %621 = vector.shape_cast %620 : vector<9xf32> to vector<9x1xf32>
    %622 = vector.broadcast %621 : vector<9x1xf32> to vector<9x9xf32>
    %623 = arith.divf %619, %622 : vector<9x9xf32>
    %624 = vector.extract_strided_slice %595 {offsets = [9, 0], sizes = [9, 64], strides = [1, 1]} : vector<18x64xf32> to vector<9x64xf32>
    %cst_440 = arith.constant dense<0.000000e+00> : vector<9x64xf32>
    %625 = tpu.matmul %623, %624, %cst_440 {dimension_numbers = #tpu.dot_dimension_numbers<[1], [0], [0], [1], [0, 0, 1, 1], [], []>} : vector<9x9xf32>, vector<9x64xf32>, vector<9x64xf32> -> vector<9x64xf32>
    %626 = arith.addf %571, %625 : vector<9x64xf32>
    %627 = arith.addf %569, %623 : vector<9x9xf32>
    %c1_441 = arith.constant 1 : index
    %c2_442 = arith.constant 2 : index
    %c0_443 = arith.constant 0 : index
    %c0_444 = arith.constant 0 : index
    %628 = vector.load %arg4[%c1_441, %c2_442, %c0_443, %c0_444] : memref<2x8x64x8xf32, #tpu.memory_space<vmem>>, vector<1x1x64x8xf32>
    %629 = vector.shape_cast %628 : vector<1x1x64x8xf32> to vector<64x8xf32>
    %cst_445 = arith.constant dense<0.000000e+00> : vector<18x8xf32>
    %630 = tpu.matmul %519, %629, %cst_445 {dimension_numbers = #tpu.dot_dimension_numbers<[1], [0], [0], [1], [0, 0, 1, 1], [], []>} : vector<18x64xf32>, vector<64x8xf32>, vector<18x8xf32> -> vector<18x8xf32>
    %c1_446 = arith.constant 1 : index
    %c2_447 = arith.constant 2 : index
    %c0_448 = arith.constant 0 : index
    %c0_449 = arith.constant 0 : index
    %631 = vector.load %arg5[%c1_446, %c2_447, %c0_448, %c0_449] : memref<2x8x1x8xf32, #tpu.memory_space<vmem>>, vector<1x1x1x8xf32>
    %632 = vector.shape_cast %631 : vector<1x1x1x8xf32> to vector<1x8xf32>
    %633 = vector.broadcast %632 : vector<1x8xf32> to vector<18x8xf32>
    %634 = arith.addf %630, %633 : vector<18x8xf32>
    %c1_450 = arith.constant 1 : index
    %c2_451 = arith.constant 2 : index
    %c0_452 = arith.constant 0 : index
    %c0_453 = arith.constant 0 : index
    %635 = vector.load %arg6[%c1_450, %c2_451, %c0_452, %c0_453] : memref<2x8x64x8xf32, #tpu.memory_space<vmem>>, vector<1x1x64x8xf32>
    %636 = vector.shape_cast %635 : vector<1x1x64x8xf32> to vector<64x8xf32>
    %cst_454 = arith.constant dense<0.000000e+00> : vector<18x8xf32>
    %637 = tpu.matmul %519, %636, %cst_454 {dimension_numbers = #tpu.dot_dimension_numbers<[1], [0], [0], [1], [0, 0, 1, 1], [], []>} : vector<18x64xf32>, vector<64x8xf32>, vector<18x8xf32> -> vector<18x8xf32>
    %c1_455 = arith.constant 1 : index
    %c2_456 = arith.constant 2 : index
    %c0_457 = arith.constant 0 : index
    %c0_458 = arith.constant 0 : index
    %638 = vector.load %arg7[%c1_455, %c2_456, %c0_457, %c0_458] : memref<2x8x1x8xf32, #tpu.memory_space<vmem>>, vector<1x1x1x8xf32>
    %639 = vector.shape_cast %638 : vector<1x1x1x8xf32> to vector<1x8xf32>
    %640 = vector.broadcast %639 : vector<1x8xf32> to vector<18x8xf32>
    %641 = arith.addf %637, %640 : vector<18x8xf32>
    %c1_459 = arith.constant 1 : index
    %c2_460 = arith.constant 2 : index
    %c0_461 = arith.constant 0 : index
    %c0_462 = arith.constant 0 : index
    %642 = vector.load %arg8[%c1_459, %c2_460, %c0_461, %c0_462] : memref<2x8x64x8xf32, #tpu.memory_space<vmem>>, vector<1x1x64x8xf32>
    %643 = vector.shape_cast %642 : vector<1x1x64x8xf32> to vector<64x8xf32>
    %cst_463 = arith.constant dense<0.000000e+00> : vector<18x8xf32>
    %644 = tpu.matmul %519, %643, %cst_463 {dimension_numbers = #tpu.dot_dimension_numbers<[1], [0], [0], [1], [0, 0, 1, 1], [], []>} : vector<18x64xf32>, vector<64x8xf32>, vector<18x8xf32> -> vector<18x8xf32>
    %c1_464 = arith.constant 1 : index
    %c2_465 = arith.constant 2 : index
    %c0_466 = arith.constant 0 : index
    %c0_467 = arith.constant 0 : index
    %645 = vector.load %arg9[%c1_464, %c2_465, %c0_466, %c0_467] : memref<2x8x1x8xf32, #tpu.memory_space<vmem>>, vector<1x1x1x8xf32>
    %646 = vector.shape_cast %645 : vector<1x1x1x8xf32> to vector<1x8xf32>
    %647 = vector.broadcast %646 : vector<1x8xf32> to vector<18x8xf32>
    %648 = arith.addf %644, %647 : vector<18x8xf32>
    %c1_468 = arith.constant 1 : index
    %c2_469 = arith.constant 2 : index
    %c0_470 = arith.constant 0 : index
    %c0_471 = arith.constant 0 : index
    %649 = vector.load %arg10[%c1_468, %c2_469, %c0_470, %c0_471] : memref<2x8x8x64xf32, #tpu.memory_space<vmem>>, vector<1x1x8x64xf32>
    %650 = vector.shape_cast %649 : vector<1x1x8x64xf32> to vector<8x64xf32>
    %cst_472 = arith.constant dense<0.000000e+00> : vector<18x64xf32>
    %651 = tpu.matmul %648, %650, %cst_472 {dimension_numbers = #tpu.dot_dimension_numbers<[1], [0], [0], [1], [0, 0, 1, 1], [], []>} : vector<18x8xf32>, vector<8x64xf32>, vector<18x64xf32> -> vector<18x64xf32>
    %652 = vector.extract_strided_slice %634 {offsets = [0, 0], sizes = [9, 8], strides = [1, 1]} : vector<18x8xf32> to vector<9x8xf32>
    %653 = vector.extract_strided_slice %641 {offsets = [0, 0], sizes = [9, 8], strides = [1, 1]} : vector<18x8xf32> to vector<9x8xf32>
    %cst_473 = arith.constant dense<0.000000e+00> : vector<9x9xf32>
    %654 = tpu.matmul %652, %653, %cst_473 {dimension_numbers = #tpu.dot_dimension_numbers<[1], [1], [0], [0], [0, 0, 1, 0], [], []>} : vector<9x8xf32>, vector<9x8xf32>, vector<9x9xf32> -> vector<9x9xf32>
    %cst_474 = arith.constant dense<0xFF800000> : vector<9xf32>
    %655 = vector.multi_reduction <maximumf>, %654, %cst_474 [1] : vector<9x9xf32> to vector<9xf32>
    %656 = vector.shape_cast %655 : vector<9xf32> to vector<9x1xf32>
    %657 = vector.broadcast %656 : vector<9x1xf32> to vector<9x9xf32>
    %658 = arith.subf %654, %657 : vector<9x9xf32>
    %659 = math.exp %658 : vector<9x9xf32>
    %cst_475 = arith.constant dense<0.000000e+00> : vector<9xf32>
    %660 = vector.multi_reduction <add>, %659, %cst_475 [1] : vector<9x9xf32> to vector<9xf32>
    %661 = vector.shape_cast %660 : vector<9xf32> to vector<9x1xf32>
    %662 = vector.broadcast %661 : vector<9x1xf32> to vector<9x9xf32>
    %663 = arith.divf %659, %662 : vector<9x9xf32>
    %664 = vector.extract_strided_slice %651 {offsets = [0, 0], sizes = [9, 64], strides = [1, 1]} : vector<18x64xf32> to vector<9x64xf32>
    %cst_476 = arith.constant dense<0.000000e+00> : vector<9x64xf32>
    %665 = tpu.matmul %663, %664, %cst_476 {dimension_numbers = #tpu.dot_dimension_numbers<[1], [0], [0], [1], [0, 0, 1, 1], [], []>} : vector<9x9xf32>, vector<9x64xf32>, vector<9x64xf32> -> vector<9x64xf32>
    %666 = arith.addf %610, %665 : vector<9x64xf32>
    %667 = arith.addf %611, %663 : vector<9x9xf32>
    %668 = vector.extract_strided_slice %634 {offsets = [9, 0], sizes = [9, 8], strides = [1, 1]} : vector<18x8xf32> to vector<9x8xf32>
    %669 = vector.extract_strided_slice %641 {offsets = [9, 0], sizes = [9, 8], strides = [1, 1]} : vector<18x8xf32> to vector<9x8xf32>
    %cst_477 = arith.constant dense<0.000000e+00> : vector<9x9xf32>
    %670 = tpu.matmul %668, %669, %cst_477 {dimension_numbers = #tpu.dot_dimension_numbers<[1], [1], [0], [0], [0, 0, 1, 0], [], []>} : vector<9x8xf32>, vector<9x8xf32>, vector<9x9xf32> -> vector<9x9xf32>
    %cst_478 = arith.constant dense<0xFF800000> : vector<9xf32>
    %671 = vector.multi_reduction <maximumf>, %670, %cst_478 [1] : vector<9x9xf32> to vector<9xf32>
    %672 = vector.shape_cast %671 : vector<9xf32> to vector<9x1xf32>
    %673 = vector.broadcast %672 : vector<9x1xf32> to vector<9x9xf32>
    %674 = arith.subf %670, %673 : vector<9x9xf32>
    %675 = math.exp %674 : vector<9x9xf32>
    %cst_479 = arith.constant dense<0.000000e+00> : vector<9xf32>
    %676 = vector.multi_reduction <add>, %675, %cst_479 [1] : vector<9x9xf32> to vector<9xf32>
    %677 = vector.shape_cast %676 : vector<9xf32> to vector<9x1xf32>
    %678 = vector.broadcast %677 : vector<9x1xf32> to vector<9x9xf32>
    %679 = arith.divf %675, %678 : vector<9x9xf32>
    %680 = vector.extract_strided_slice %651 {offsets = [9, 0], sizes = [9, 64], strides = [1, 1]} : vector<18x64xf32> to vector<9x64xf32>
    %cst_480 = arith.constant dense<0.000000e+00> : vector<9x64xf32>
    %681 = tpu.matmul %679, %680, %cst_480 {dimension_numbers = #tpu.dot_dimension_numbers<[1], [0], [0], [1], [0, 0, 1, 1], [], []>} : vector<9x9xf32>, vector<9x64xf32>, vector<9x64xf32> -> vector<9x64xf32>
    %682 = arith.addf %626, %681 : vector<9x64xf32>
    %683 = arith.addf %627, %679 : vector<9x9xf32>
    %c1_481 = arith.constant 1 : index
    %c3_482 = arith.constant 3 : index
    %c0_483 = arith.constant 0 : index
    %c0_484 = arith.constant 0 : index
    %684 = vector.load %arg4[%c1_481, %c3_482, %c0_483, %c0_484] : memref<2x8x64x8xf32, #tpu.memory_space<vmem>>, vector<1x1x64x8xf32>
    %685 = vector.shape_cast %684 : vector<1x1x64x8xf32> to vector<64x8xf32>
    %cst_485 = arith.constant dense<0.000000e+00> : vector<18x8xf32>
    %686 = tpu.matmul %519, %685, %cst_485 {dimension_numbers = #tpu.dot_dimension_numbers<[1], [0], [0], [1], [0, 0, 1, 1], [], []>} : vector<18x64xf32>, vector<64x8xf32>, vector<18x8xf32> -> vector<18x8xf32>
    %c1_486 = arith.constant 1 : index
    %c3_487 = arith.constant 3 : index
    %c0_488 = arith.constant 0 : index
    %c0_489 = arith.constant 0 : index
    %687 = vector.load %arg5[%c1_486, %c3_487, %c0_488, %c0_489] : memref<2x8x1x8xf32, #tpu.memory_space<vmem>>, vector<1x1x1x8xf32>
    %688 = vector.shape_cast %687 : vector<1x1x1x8xf32> to vector<1x8xf32>
    %689 = vector.broadcast %688 : vector<1x8xf32> to vector<18x8xf32>
    %690 = arith.addf %686, %689 : vector<18x8xf32>
    %c1_490 = arith.constant 1 : index
    %c3_491 = arith.constant 3 : index
    %c0_492 = arith.constant 0 : index
    %c0_493 = arith.constant 0 : index
    %691 = vector.load %arg6[%c1_490, %c3_491, %c0_492, %c0_493] : memref<2x8x64x8xf32, #tpu.memory_space<vmem>>, vector<1x1x64x8xf32>
    %692 = vector.shape_cast %691 : vector<1x1x64x8xf32> to vector<64x8xf32>
    %cst_494 = arith.constant dense<0.000000e+00> : vector<18x8xf32>
    %693 = tpu.matmul %519, %692, %cst_494 {dimension_numbers = #tpu.dot_dimension_numbers<[1], [0], [0], [1], [0, 0, 1, 1], [], []>} : vector<18x64xf32>, vector<64x8xf32>, vector<18x8xf32> -> vector<18x8xf32>
    %c1_495 = arith.constant 1 : index
    %c3_496 = arith.constant 3 : index
    %c0_497 = arith.constant 0 : index
    %c0_498 = arith.constant 0 : index
    %694 = vector.load %arg7[%c1_495, %c3_496, %c0_497, %c0_498] : memref<2x8x1x8xf32, #tpu.memory_space<vmem>>, vector<1x1x1x8xf32>
    %695 = vector.shape_cast %694 : vector<1x1x1x8xf32> to vector<1x8xf32>
    %696 = vector.broadcast %695 : vector<1x8xf32> to vector<18x8xf32>
    %697 = arith.addf %693, %696 : vector<18x8xf32>
    %c1_499 = arith.constant 1 : index
    %c3_500 = arith.constant 3 : index
    %c0_501 = arith.constant 0 : index
    %c0_502 = arith.constant 0 : index
    %698 = vector.load %arg8[%c1_499, %c3_500, %c0_501, %c0_502] : memref<2x8x64x8xf32, #tpu.memory_space<vmem>>, vector<1x1x64x8xf32>
    %699 = vector.shape_cast %698 : vector<1x1x64x8xf32> to vector<64x8xf32>
    %cst_503 = arith.constant dense<0.000000e+00> : vector<18x8xf32>
    %700 = tpu.matmul %519, %699, %cst_503 {dimension_numbers = #tpu.dot_dimension_numbers<[1], [0], [0], [1], [0, 0, 1, 1], [], []>} : vector<18x64xf32>, vector<64x8xf32>, vector<18x8xf32> -> vector<18x8xf32>
    %c1_504 = arith.constant 1 : index
    %c3_505 = arith.constant 3 : index
    %c0_506 = arith.constant 0 : index
    %c0_507 = arith.constant 0 : index
    %701 = vector.load %arg9[%c1_504, %c3_505, %c0_506, %c0_507] : memref<2x8x1x8xf32, #tpu.memory_space<vmem>>, vector<1x1x1x8xf32>
    %702 = vector.shape_cast %701 : vector<1x1x1x8xf32> to vector<1x8xf32>
    %703 = vector.broadcast %702 : vector<1x8xf32> to vector<18x8xf32>
    %704 = arith.addf %700, %703 : vector<18x8xf32>
    %c1_508 = arith.constant 1 : index
    %c3_509 = arith.constant 3 : index
    %c0_510 = arith.constant 0 : index
    %c0_511 = arith.constant 0 : index
    %705 = vector.load %arg10[%c1_508, %c3_509, %c0_510, %c0_511] : memref<2x8x8x64xf32, #tpu.memory_space<vmem>>, vector<1x1x8x64xf32>
    %706 = vector.shape_cast %705 : vector<1x1x8x64xf32> to vector<8x64xf32>
    %cst_512 = arith.constant dense<0.000000e+00> : vector<18x64xf32>
    %707 = tpu.matmul %704, %706, %cst_512 {dimension_numbers = #tpu.dot_dimension_numbers<[1], [0], [0], [1], [0, 0, 1, 1], [], []>} : vector<18x8xf32>, vector<8x64xf32>, vector<18x64xf32> -> vector<18x64xf32>
    %708 = vector.extract_strided_slice %690 {offsets = [0, 0], sizes = [9, 8], strides = [1, 1]} : vector<18x8xf32> to vector<9x8xf32>
    %709 = vector.extract_strided_slice %697 {offsets = [0, 0], sizes = [9, 8], strides = [1, 1]} : vector<18x8xf32> to vector<9x8xf32>
    %cst_513 = arith.constant dense<0.000000e+00> : vector<9x9xf32>
    %710 = tpu.matmul %708, %709, %cst_513 {dimension_numbers = #tpu.dot_dimension_numbers<[1], [1], [0], [0], [0, 0, 1, 0], [], []>} : vector<9x8xf32>, vector<9x8xf32>, vector<9x9xf32> -> vector<9x9xf32>
    %cst_514 = arith.constant dense<0xFF800000> : vector<9xf32>
    %711 = vector.multi_reduction <maximumf>, %710, %cst_514 [1] : vector<9x9xf32> to vector<9xf32>
    %712 = vector.shape_cast %711 : vector<9xf32> to vector<9x1xf32>
    %713 = vector.broadcast %712 : vector<9x1xf32> to vector<9x9xf32>
    %714 = arith.subf %710, %713 : vector<9x9xf32>
    %715 = math.exp %714 : vector<9x9xf32>
    %cst_515 = arith.constant dense<0.000000e+00> : vector<9xf32>
    %716 = vector.multi_reduction <add>, %715, %cst_515 [1] : vector<9x9xf32> to vector<9xf32>
    %717 = vector.shape_cast %716 : vector<9xf32> to vector<9x1xf32>
    %718 = vector.broadcast %717 : vector<9x1xf32> to vector<9x9xf32>
    %719 = arith.divf %715, %718 : vector<9x9xf32>
    %720 = vector.extract_strided_slice %707 {offsets = [0, 0], sizes = [9, 64], strides = [1, 1]} : vector<18x64xf32> to vector<9x64xf32>
    %cst_516 = arith.constant dense<0.000000e+00> : vector<9x64xf32>
    %721 = tpu.matmul %719, %720, %cst_516 {dimension_numbers = #tpu.dot_dimension_numbers<[1], [0], [0], [1], [0, 0, 1, 1], [], []>} : vector<9x9xf32>, vector<9x64xf32>, vector<9x64xf32> -> vector<9x64xf32>
    %722 = arith.addf %666, %721 : vector<9x64xf32>
    %723 = arith.addf %667, %719 : vector<9x9xf32>
    %724 = vector.extract_strided_slice %690 {offsets = [9, 0], sizes = [9, 8], strides = [1, 1]} : vector<18x8xf32> to vector<9x8xf32>
    %725 = vector.extract_strided_slice %697 {offsets = [9, 0], sizes = [9, 8], strides = [1, 1]} : vector<18x8xf32> to vector<9x8xf32>
    %cst_517 = arith.constant dense<0.000000e+00> : vector<9x9xf32>
    %726 = tpu.matmul %724, %725, %cst_517 {dimension_numbers = #tpu.dot_dimension_numbers<[1], [1], [0], [0], [0, 0, 1, 0], [], []>} : vector<9x8xf32>, vector<9x8xf32>, vector<9x9xf32> -> vector<9x9xf32>
    %cst_518 = arith.constant dense<0xFF800000> : vector<9xf32>
    %727 = vector.multi_reduction <maximumf>, %726, %cst_518 [1] : vector<9x9xf32> to vector<9xf32>
    %728 = vector.shape_cast %727 : vector<9xf32> to vector<9x1xf32>
    %729 = vector.broadcast %728 : vector<9x1xf32> to vector<9x9xf32>
    %730 = arith.subf %726, %729 : vector<9x9xf32>
    %731 = math.exp %730 : vector<9x9xf32>
    %cst_519 = arith.constant dense<0.000000e+00> : vector<9xf32>
    %732 = vector.multi_reduction <add>, %731, %cst_519 [1] : vector<9x9xf32> to vector<9xf32>
    %733 = vector.shape_cast %732 : vector<9xf32> to vector<9x1xf32>
    %734 = vector.broadcast %733 : vector<9x1xf32> to vector<9x9xf32>
    %735 = arith.divf %731, %734 : vector<9x9xf32>
    %736 = vector.extract_strided_slice %707 {offsets = [9, 0], sizes = [9, 64], strides = [1, 1]} : vector<18x64xf32> to vector<9x64xf32>
    %cst_520 = arith.constant dense<0.000000e+00> : vector<9x64xf32>
    %737 = tpu.matmul %735, %736, %cst_520 {dimension_numbers = #tpu.dot_dimension_numbers<[1], [0], [0], [1], [0, 0, 1, 1], [], []>} : vector<9x9xf32>, vector<9x64xf32>, vector<9x64xf32> -> vector<9x64xf32>
    %738 = arith.addf %682, %737 : vector<9x64xf32>
    %739 = arith.addf %683, %735 : vector<9x9xf32>
    %c1_521 = arith.constant 1 : index
    %c4_522 = arith.constant 4 : index
    %c0_523 = arith.constant 0 : index
    %c0_524 = arith.constant 0 : index
    %740 = vector.load %arg4[%c1_521, %c4_522, %c0_523, %c0_524] : memref<2x8x64x8xf32, #tpu.memory_space<vmem>>, vector<1x1x64x8xf32>
    %741 = vector.shape_cast %740 : vector<1x1x64x8xf32> to vector<64x8xf32>
    %cst_525 = arith.constant dense<0.000000e+00> : vector<18x8xf32>
    %742 = tpu.matmul %519, %741, %cst_525 {dimension_numbers = #tpu.dot_dimension_numbers<[1], [0], [0], [1], [0, 0, 1, 1], [], []>} : vector<18x64xf32>, vector<64x8xf32>, vector<18x8xf32> -> vector<18x8xf32>
    %c1_526 = arith.constant 1 : index
    %c4_527 = arith.constant 4 : index
    %c0_528 = arith.constant 0 : index
    %c0_529 = arith.constant 0 : index
    %743 = vector.load %arg5[%c1_526, %c4_527, %c0_528, %c0_529] : memref<2x8x1x8xf32, #tpu.memory_space<vmem>>, vector<1x1x1x8xf32>
    %744 = vector.shape_cast %743 : vector<1x1x1x8xf32> to vector<1x8xf32>
    %745 = vector.broadcast %744 : vector<1x8xf32> to vector<18x8xf32>
    %746 = arith.addf %742, %745 : vector<18x8xf32>
    %c1_530 = arith.constant 1 : index
    %c4_531 = arith.constant 4 : index
    %c0_532 = arith.constant 0 : index
    %c0_533 = arith.constant 0 : index
    %747 = vector.load %arg6[%c1_530, %c4_531, %c0_532, %c0_533] : memref<2x8x64x8xf32, #tpu.memory_space<vmem>>, vector<1x1x64x8xf32>
    %748 = vector.shape_cast %747 : vector<1x1x64x8xf32> to vector<64x8xf32>
    %cst_534 = arith.constant dense<0.000000e+00> : vector<18x8xf32>
    %749 = tpu.matmul %519, %748, %cst_534 {dimension_numbers = #tpu.dot_dimension_numbers<[1], [0], [0], [1], [0, 0, 1, 1], [], []>} : vector<18x64xf32>, vector<64x8xf32>, vector<18x8xf32> -> vector<18x8xf32>
    %c1_535 = arith.constant 1 : index
    %c4_536 = arith.constant 4 : index
    %c0_537 = arith.constant 0 : index
    %c0_538 = arith.constant 0 : index
    %750 = vector.load %arg7[%c1_535, %c4_536, %c0_537, %c0_538] : memref<2x8x1x8xf32, #tpu.memory_space<vmem>>, vector<1x1x1x8xf32>
    %751 = vector.shape_cast %750 : vector<1x1x1x8xf32> to vector<1x8xf32>
    %752 = vector.broadcast %751 : vector<1x8xf32> to vector<18x8xf32>
    %753 = arith.addf %749, %752 : vector<18x8xf32>
    %c1_539 = arith.constant 1 : index
    %c4_540 = arith.constant 4 : index
    %c0_541 = arith.constant 0 : index
    %c0_542 = arith.constant 0 : index
    %754 = vector.load %arg8[%c1_539, %c4_540, %c0_541, %c0_542] : memref<2x8x64x8xf32, #tpu.memory_space<vmem>>, vector<1x1x64x8xf32>
    %755 = vector.shape_cast %754 : vector<1x1x64x8xf32> to vector<64x8xf32>
    %cst_543 = arith.constant dense<0.000000e+00> : vector<18x8xf32>
    %756 = tpu.matmul %519, %755, %cst_543 {dimension_numbers = #tpu.dot_dimension_numbers<[1], [0], [0], [1], [0, 0, 1, 1], [], []>} : vector<18x64xf32>, vector<64x8xf32>, vector<18x8xf32> -> vector<18x8xf32>
    %c1_544 = arith.constant 1 : index
    %c4_545 = arith.constant 4 : index
    %c0_546 = arith.constant 0 : index
    %c0_547 = arith.constant 0 : index
    %757 = vector.load %arg9[%c1_544, %c4_545, %c0_546, %c0_547] : memref<2x8x1x8xf32, #tpu.memory_space<vmem>>, vector<1x1x1x8xf32>
    %758 = vector.shape_cast %757 : vector<1x1x1x8xf32> to vector<1x8xf32>
    %759 = vector.broadcast %758 : vector<1x8xf32> to vector<18x8xf32>
    %760 = arith.addf %756, %759 : vector<18x8xf32>
    %c1_548 = arith.constant 1 : index
    %c4_549 = arith.constant 4 : index
    %c0_550 = arith.constant 0 : index
    %c0_551 = arith.constant 0 : index
    %761 = vector.load %arg10[%c1_548, %c4_549, %c0_550, %c0_551] : memref<2x8x8x64xf32, #tpu.memory_space<vmem>>, vector<1x1x8x64xf32>
    %762 = vector.shape_cast %761 : vector<1x1x8x64xf32> to vector<8x64xf32>
    %cst_552 = arith.constant dense<0.000000e+00> : vector<18x64xf32>
    %763 = tpu.matmul %760, %762, %cst_552 {dimension_numbers = #tpu.dot_dimension_numbers<[1], [0], [0], [1], [0, 0, 1, 1], [], []>} : vector<18x8xf32>, vector<8x64xf32>, vector<18x64xf32> -> vector<18x64xf32>
    %764 = vector.extract_strided_slice %746 {offsets = [0, 0], sizes = [9, 8], strides = [1, 1]} : vector<18x8xf32> to vector<9x8xf32>
    %765 = vector.extract_strided_slice %753 {offsets = [0, 0], sizes = [9, 8], strides = [1, 1]} : vector<18x8xf32> to vector<9x8xf32>
    %cst_553 = arith.constant dense<0.000000e+00> : vector<9x9xf32>
    %766 = tpu.matmul %764, %765, %cst_553 {dimension_numbers = #tpu.dot_dimension_numbers<[1], [1], [0], [0], [0, 0, 1, 0], [], []>} : vector<9x8xf32>, vector<9x8xf32>, vector<9x9xf32> -> vector<9x9xf32>
    %cst_554 = arith.constant dense<0xFF800000> : vector<9xf32>
    %767 = vector.multi_reduction <maximumf>, %766, %cst_554 [1] : vector<9x9xf32> to vector<9xf32>
    %768 = vector.shape_cast %767 : vector<9xf32> to vector<9x1xf32>
    %769 = vector.broadcast %768 : vector<9x1xf32> to vector<9x9xf32>
    %770 = arith.subf %766, %769 : vector<9x9xf32>
    %771 = math.exp %770 : vector<9x9xf32>
    %cst_555 = arith.constant dense<0.000000e+00> : vector<9xf32>
    %772 = vector.multi_reduction <add>, %771, %cst_555 [1] : vector<9x9xf32> to vector<9xf32>
    %773 = vector.shape_cast %772 : vector<9xf32> to vector<9x1xf32>
    %774 = vector.broadcast %773 : vector<9x1xf32> to vector<9x9xf32>
    %775 = arith.divf %771, %774 : vector<9x9xf32>
    %776 = vector.extract_strided_slice %763 {offsets = [0, 0], sizes = [9, 64], strides = [1, 1]} : vector<18x64xf32> to vector<9x64xf32>
    %cst_556 = arith.constant dense<0.000000e+00> : vector<9x64xf32>
    %777 = tpu.matmul %775, %776, %cst_556 {dimension_numbers = #tpu.dot_dimension_numbers<[1], [0], [0], [1], [0, 0, 1, 1], [], []>} : vector<9x9xf32>, vector<9x64xf32>, vector<9x64xf32> -> vector<9x64xf32>
    %778 = arith.addf %722, %777 : vector<9x64xf32>
    %779 = arith.addf %723, %775 : vector<9x9xf32>
    %780 = vector.extract_strided_slice %746 {offsets = [9, 0], sizes = [9, 8], strides = [1, 1]} : vector<18x8xf32> to vector<9x8xf32>
    %781 = vector.extract_strided_slice %753 {offsets = [9, 0], sizes = [9, 8], strides = [1, 1]} : vector<18x8xf32> to vector<9x8xf32>
    %cst_557 = arith.constant dense<0.000000e+00> : vector<9x9xf32>
    %782 = tpu.matmul %780, %781, %cst_557 {dimension_numbers = #tpu.dot_dimension_numbers<[1], [1], [0], [0], [0, 0, 1, 0], [], []>} : vector<9x8xf32>, vector<9x8xf32>, vector<9x9xf32> -> vector<9x9xf32>
    %cst_558 = arith.constant dense<0xFF800000> : vector<9xf32>
    %783 = vector.multi_reduction <maximumf>, %782, %cst_558 [1] : vector<9x9xf32> to vector<9xf32>
    %784 = vector.shape_cast %783 : vector<9xf32> to vector<9x1xf32>
    %785 = vector.broadcast %784 : vector<9x1xf32> to vector<9x9xf32>
    %786 = arith.subf %782, %785 : vector<9x9xf32>
    %787 = math.exp %786 : vector<9x9xf32>
    %cst_559 = arith.constant dense<0.000000e+00> : vector<9xf32>
    %788 = vector.multi_reduction <add>, %787, %cst_559 [1] : vector<9x9xf32> to vector<9xf32>
    %789 = vector.shape_cast %788 : vector<9xf32> to vector<9x1xf32>
    %790 = vector.broadcast %789 : vector<9x1xf32> to vector<9x9xf32>
    %791 = arith.divf %787, %790 : vector<9x9xf32>
    %792 = vector.extract_strided_slice %763 {offsets = [9, 0], sizes = [9, 64], strides = [1, 1]} : vector<18x64xf32> to vector<9x64xf32>
    %cst_560 = arith.constant dense<0.000000e+00> : vector<9x64xf32>
    %793 = tpu.matmul %791, %792, %cst_560 {dimension_numbers = #tpu.dot_dimension_numbers<[1], [0], [0], [1], [0, 0, 1, 1], [], []>} : vector<9x9xf32>, vector<9x64xf32>, vector<9x64xf32> -> vector<9x64xf32>
    %794 = arith.addf %738, %793 : vector<9x64xf32>
    %795 = arith.addf %739, %791 : vector<9x9xf32>
    %c1_561 = arith.constant 1 : index
    %c5_562 = arith.constant 5 : index
    %c0_563 = arith.constant 0 : index
    %c0_564 = arith.constant 0 : index
    %796 = vector.load %arg4[%c1_561, %c5_562, %c0_563, %c0_564] : memref<2x8x64x8xf32, #tpu.memory_space<vmem>>, vector<1x1x64x8xf32>
    %797 = vector.shape_cast %796 : vector<1x1x64x8xf32> to vector<64x8xf32>
    %cst_565 = arith.constant dense<0.000000e+00> : vector<18x8xf32>
    %798 = tpu.matmul %519, %797, %cst_565 {dimension_numbers = #tpu.dot_dimension_numbers<[1], [0], [0], [1], [0, 0, 1, 1], [], []>} : vector<18x64xf32>, vector<64x8xf32>, vector<18x8xf32> -> vector<18x8xf32>
    %c1_566 = arith.constant 1 : index
    %c5_567 = arith.constant 5 : index
    %c0_568 = arith.constant 0 : index
    %c0_569 = arith.constant 0 : index
    %799 = vector.load %arg5[%c1_566, %c5_567, %c0_568, %c0_569] : memref<2x8x1x8xf32, #tpu.memory_space<vmem>>, vector<1x1x1x8xf32>
    %800 = vector.shape_cast %799 : vector<1x1x1x8xf32> to vector<1x8xf32>
    %801 = vector.broadcast %800 : vector<1x8xf32> to vector<18x8xf32>
    %802 = arith.addf %798, %801 : vector<18x8xf32>
    %c1_570 = arith.constant 1 : index
    %c5_571 = arith.constant 5 : index
    %c0_572 = arith.constant 0 : index
    %c0_573 = arith.constant 0 : index
    %803 = vector.load %arg6[%c1_570, %c5_571, %c0_572, %c0_573] : memref<2x8x64x8xf32, #tpu.memory_space<vmem>>, vector<1x1x64x8xf32>
    %804 = vector.shape_cast %803 : vector<1x1x64x8xf32> to vector<64x8xf32>
    %cst_574 = arith.constant dense<0.000000e+00> : vector<18x8xf32>
    %805 = tpu.matmul %519, %804, %cst_574 {dimension_numbers = #tpu.dot_dimension_numbers<[1], [0], [0], [1], [0, 0, 1, 1], [], []>} : vector<18x64xf32>, vector<64x8xf32>, vector<18x8xf32> -> vector<18x8xf32>
    %c1_575 = arith.constant 1 : index
    %c5_576 = arith.constant 5 : index
    %c0_577 = arith.constant 0 : index
    %c0_578 = arith.constant 0 : index
    %806 = vector.load %arg7[%c1_575, %c5_576, %c0_577, %c0_578] : memref<2x8x1x8xf32, #tpu.memory_space<vmem>>, vector<1x1x1x8xf32>
    %807 = vector.shape_cast %806 : vector<1x1x1x8xf32> to vector<1x8xf32>
    %808 = vector.broadcast %807 : vector<1x8xf32> to vector<18x8xf32>
    %809 = arith.addf %805, %808 : vector<18x8xf32>
    %c1_579 = arith.constant 1 : index
    %c5_580 = arith.constant 5 : index
    %c0_581 = arith.constant 0 : index
    %c0_582 = arith.constant 0 : index
    %810 = vector.load %arg8[%c1_579, %c5_580, %c0_581, %c0_582] : memref<2x8x64x8xf32, #tpu.memory_space<vmem>>, vector<1x1x64x8xf32>
    %811 = vector.shape_cast %810 : vector<1x1x64x8xf32> to vector<64x8xf32>
    %cst_583 = arith.constant dense<0.000000e+00> : vector<18x8xf32>
    %812 = tpu.matmul %519, %811, %cst_583 {dimension_numbers = #tpu.dot_dimension_numbers<[1], [0], [0], [1], [0, 0, 1, 1], [], []>} : vector<18x64xf32>, vector<64x8xf32>, vector<18x8xf32> -> vector<18x8xf32>
    %c1_584 = arith.constant 1 : index
    %c5_585 = arith.constant 5 : index
    %c0_586 = arith.constant 0 : index
    %c0_587 = arith.constant 0 : index
    %813 = vector.load %arg9[%c1_584, %c5_585, %c0_586, %c0_587] : memref<2x8x1x8xf32, #tpu.memory_space<vmem>>, vector<1x1x1x8xf32>
    %814 = vector.shape_cast %813 : vector<1x1x1x8xf32> to vector<1x8xf32>
    %815 = vector.broadcast %814 : vector<1x8xf32> to vector<18x8xf32>
    %816 = arith.addf %812, %815 : vector<18x8xf32>
    %c1_588 = arith.constant 1 : index
    %c5_589 = arith.constant 5 : index
    %c0_590 = arith.constant 0 : index
    %c0_591 = arith.constant 0 : index
    %817 = vector.load %arg10[%c1_588, %c5_589, %c0_590, %c0_591] : memref<2x8x8x64xf32, #tpu.memory_space<vmem>>, vector<1x1x8x64xf32>
    %818 = vector.shape_cast %817 : vector<1x1x8x64xf32> to vector<8x64xf32>
    %cst_592 = arith.constant dense<0.000000e+00> : vector<18x64xf32>
    %819 = tpu.matmul %816, %818, %cst_592 {dimension_numbers = #tpu.dot_dimension_numbers<[1], [0], [0], [1], [0, 0, 1, 1], [], []>} : vector<18x8xf32>, vector<8x64xf32>, vector<18x64xf32> -> vector<18x64xf32>
    %820 = vector.extract_strided_slice %802 {offsets = [0, 0], sizes = [9, 8], strides = [1, 1]} : vector<18x8xf32> to vector<9x8xf32>
    %821 = vector.extract_strided_slice %809 {offsets = [0, 0], sizes = [9, 8], strides = [1, 1]} : vector<18x8xf32> to vector<9x8xf32>
    %cst_593 = arith.constant dense<0.000000e+00> : vector<9x9xf32>
    %822 = tpu.matmul %820, %821, %cst_593 {dimension_numbers = #tpu.dot_dimension_numbers<[1], [1], [0], [0], [0, 0, 1, 0], [], []>} : vector<9x8xf32>, vector<9x8xf32>, vector<9x9xf32> -> vector<9x9xf32>
    %cst_594 = arith.constant dense<0xFF800000> : vector<9xf32>
    %823 = vector.multi_reduction <maximumf>, %822, %cst_594 [1] : vector<9x9xf32> to vector<9xf32>
    %824 = vector.shape_cast %823 : vector<9xf32> to vector<9x1xf32>
    %825 = vector.broadcast %824 : vector<9x1xf32> to vector<9x9xf32>
    %826 = arith.subf %822, %825 : vector<9x9xf32>
    %827 = math.exp %826 : vector<9x9xf32>
    %cst_595 = arith.constant dense<0.000000e+00> : vector<9xf32>
    %828 = vector.multi_reduction <add>, %827, %cst_595 [1] : vector<9x9xf32> to vector<9xf32>
    %829 = vector.shape_cast %828 : vector<9xf32> to vector<9x1xf32>
    %830 = vector.broadcast %829 : vector<9x1xf32> to vector<9x9xf32>
    %831 = arith.divf %827, %830 : vector<9x9xf32>
    %832 = vector.extract_strided_slice %819 {offsets = [0, 0], sizes = [9, 64], strides = [1, 1]} : vector<18x64xf32> to vector<9x64xf32>
    %cst_596 = arith.constant dense<0.000000e+00> : vector<9x64xf32>
    %833 = tpu.matmul %831, %832, %cst_596 {dimension_numbers = #tpu.dot_dimension_numbers<[1], [0], [0], [1], [0, 0, 1, 1], [], []>} : vector<9x9xf32>, vector<9x64xf32>, vector<9x64xf32> -> vector<9x64xf32>
    %834 = arith.addf %778, %833 : vector<9x64xf32>
    %835 = arith.addf %779, %831 : vector<9x9xf32>
    %836 = vector.extract_strided_slice %802 {offsets = [9, 0], sizes = [9, 8], strides = [1, 1]} : vector<18x8xf32> to vector<9x8xf32>
    %837 = vector.extract_strided_slice %809 {offsets = [9, 0], sizes = [9, 8], strides = [1, 1]} : vector<18x8xf32> to vector<9x8xf32>
    %cst_597 = arith.constant dense<0.000000e+00> : vector<9x9xf32>
    %838 = tpu.matmul %836, %837, %cst_597 {dimension_numbers = #tpu.dot_dimension_numbers<[1], [1], [0], [0], [0, 0, 1, 0], [], []>} : vector<9x8xf32>, vector<9x8xf32>, vector<9x9xf32> -> vector<9x9xf32>
    %cst_598 = arith.constant dense<0xFF800000> : vector<9xf32>
    %839 = vector.multi_reduction <maximumf>, %838, %cst_598 [1] : vector<9x9xf32> to vector<9xf32>
    %840 = vector.shape_cast %839 : vector<9xf32> to vector<9x1xf32>
    %841 = vector.broadcast %840 : vector<9x1xf32> to vector<9x9xf32>
    %842 = arith.subf %838, %841 : vector<9x9xf32>
    %843 = math.exp %842 : vector<9x9xf32>
    %cst_599 = arith.constant dense<0.000000e+00> : vector<9xf32>
    %844 = vector.multi_reduction <add>, %843, %cst_599 [1] : vector<9x9xf32> to vector<9xf32>
    %845 = vector.shape_cast %844 : vector<9xf32> to vector<9x1xf32>
    %846 = vector.broadcast %845 : vector<9x1xf32> to vector<9x9xf32>
    %847 = arith.divf %843, %846 : vector<9x9xf32>
    %848 = vector.extract_strided_slice %819 {offsets = [9, 0], sizes = [9, 64], strides = [1, 1]} : vector<18x64xf32> to vector<9x64xf32>
    %cst_600 = arith.constant dense<0.000000e+00> : vector<9x64xf32>
    %849 = tpu.matmul %847, %848, %cst_600 {dimension_numbers = #tpu.dot_dimension_numbers<[1], [0], [0], [1], [0, 0, 1, 1], [], []>} : vector<9x9xf32>, vector<9x64xf32>, vector<9x64xf32> -> vector<9x64xf32>
    %850 = arith.addf %794, %849 : vector<9x64xf32>
    %851 = arith.addf %795, %847 : vector<9x9xf32>
    %c1_601 = arith.constant 1 : index
    %c6_602 = arith.constant 6 : index
    %c0_603 = arith.constant 0 : index
    %c0_604 = arith.constant 0 : index
    %852 = vector.load %arg4[%c1_601, %c6_602, %c0_603, %c0_604] : memref<2x8x64x8xf32, #tpu.memory_space<vmem>>, vector<1x1x64x8xf32>
    %853 = vector.shape_cast %852 : vector<1x1x64x8xf32> to vector<64x8xf32>
    %cst_605 = arith.constant dense<0.000000e+00> : vector<18x8xf32>
    %854 = tpu.matmul %519, %853, %cst_605 {dimension_numbers = #tpu.dot_dimension_numbers<[1], [0], [0], [1], [0, 0, 1, 1], [], []>} : vector<18x64xf32>, vector<64x8xf32>, vector<18x8xf32> -> vector<18x8xf32>
    %c1_606 = arith.constant 1 : index
    %c6_607 = arith.constant 6 : index
    %c0_608 = arith.constant 0 : index
    %c0_609 = arith.constant 0 : index
    %855 = vector.load %arg5[%c1_606, %c6_607, %c0_608, %c0_609] : memref<2x8x1x8xf32, #tpu.memory_space<vmem>>, vector<1x1x1x8xf32>
    %856 = vector.shape_cast %855 : vector<1x1x1x8xf32> to vector<1x8xf32>
    %857 = vector.broadcast %856 : vector<1x8xf32> to vector<18x8xf32>
    %858 = arith.addf %854, %857 : vector<18x8xf32>
    %c1_610 = arith.constant 1 : index
    %c6_611 = arith.constant 6 : index
    %c0_612 = arith.constant 0 : index
    %c0_613 = arith.constant 0 : index
    %859 = vector.load %arg6[%c1_610, %c6_611, %c0_612, %c0_613] : memref<2x8x64x8xf32, #tpu.memory_space<vmem>>, vector<1x1x64x8xf32>
    %860 = vector.shape_cast %859 : vector<1x1x64x8xf32> to vector<64x8xf32>
    %cst_614 = arith.constant dense<0.000000e+00> : vector<18x8xf32>
    %861 = tpu.matmul %519, %860, %cst_614 {dimension_numbers = #tpu.dot_dimension_numbers<[1], [0], [0], [1], [0, 0, 1, 1], [], []>} : vector<18x64xf32>, vector<64x8xf32>, vector<18x8xf32> -> vector<18x8xf32>
    %c1_615 = arith.constant 1 : index
    %c6_616 = arith.constant 6 : index
    %c0_617 = arith.constant 0 : index
    %c0_618 = arith.constant 0 : index
    %862 = vector.load %arg7[%c1_615, %c6_616, %c0_617, %c0_618] : memref<2x8x1x8xf32, #tpu.memory_space<vmem>>, vector<1x1x1x8xf32>
    %863 = vector.shape_cast %862 : vector<1x1x1x8xf32> to vector<1x8xf32>
    %864 = vector.broadcast %863 : vector<1x8xf32> to vector<18x8xf32>
    %865 = arith.addf %861, %864 : vector<18x8xf32>
    %c1_619 = arith.constant 1 : index
    %c6_620 = arith.constant 6 : index
    %c0_621 = arith.constant 0 : index
    %c0_622 = arith.constant 0 : index
    %866 = vector.load %arg8[%c1_619, %c6_620, %c0_621, %c0_622] : memref<2x8x64x8xf32, #tpu.memory_space<vmem>>, vector<1x1x64x8xf32>
    %867 = vector.shape_cast %866 : vector<1x1x64x8xf32> to vector<64x8xf32>
    %cst_623 = arith.constant dense<0.000000e+00> : vector<18x8xf32>
    %868 = tpu.matmul %519, %867, %cst_623 {dimension_numbers = #tpu.dot_dimension_numbers<[1], [0], [0], [1], [0, 0, 1, 1], [], []>} : vector<18x64xf32>, vector<64x8xf32>, vector<18x8xf32> -> vector<18x8xf32>
    %c1_624 = arith.constant 1 : index
    %c6_625 = arith.constant 6 : index
    %c0_626 = arith.constant 0 : index
    %c0_627 = arith.constant 0 : index
    %869 = vector.load %arg9[%c1_624, %c6_625, %c0_626, %c0_627] : memref<2x8x1x8xf32, #tpu.memory_space<vmem>>, vector<1x1x1x8xf32>
    %870 = vector.shape_cast %869 : vector<1x1x1x8xf32> to vector<1x8xf32>
    %871 = vector.broadcast %870 : vector<1x8xf32> to vector<18x8xf32>
    %872 = arith.addf %868, %871 : vector<18x8xf32>
    %c1_628 = arith.constant 1 : index
    %c6_629 = arith.constant 6 : index
    %c0_630 = arith.constant 0 : index
    %c0_631 = arith.constant 0 : index
    %873 = vector.load %arg10[%c1_628, %c6_629, %c0_630, %c0_631] : memref<2x8x8x64xf32, #tpu.memory_space<vmem>>, vector<1x1x8x64xf32>
    %874 = vector.shape_cast %873 : vector<1x1x8x64xf32> to vector<8x64xf32>
    %cst_632 = arith.constant dense<0.000000e+00> : vector<18x64xf32>
    %875 = tpu.matmul %872, %874, %cst_632 {dimension_numbers = #tpu.dot_dimension_numbers<[1], [0], [0], [1], [0, 0, 1, 1], [], []>} : vector<18x8xf32>, vector<8x64xf32>, vector<18x64xf32> -> vector<18x64xf32>
    %876 = vector.extract_strided_slice %858 {offsets = [0, 0], sizes = [9, 8], strides = [1, 1]} : vector<18x8xf32> to vector<9x8xf32>
    %877 = vector.extract_strided_slice %865 {offsets = [0, 0], sizes = [9, 8], strides = [1, 1]} : vector<18x8xf32> to vector<9x8xf32>
    %cst_633 = arith.constant dense<0.000000e+00> : vector<9x9xf32>
    %878 = tpu.matmul %876, %877, %cst_633 {dimension_numbers = #tpu.dot_dimension_numbers<[1], [1], [0], [0], [0, 0, 1, 0], [], []>} : vector<9x8xf32>, vector<9x8xf32>, vector<9x9xf32> -> vector<9x9xf32>
    %cst_634 = arith.constant dense<0xFF800000> : vector<9xf32>
    %879 = vector.multi_reduction <maximumf>, %878, %cst_634 [1] : vector<9x9xf32> to vector<9xf32>
    %880 = vector.shape_cast %879 : vector<9xf32> to vector<9x1xf32>
    %881 = vector.broadcast %880 : vector<9x1xf32> to vector<9x9xf32>
    %882 = arith.subf %878, %881 : vector<9x9xf32>
    %883 = math.exp %882 : vector<9x9xf32>
    %cst_635 = arith.constant dense<0.000000e+00> : vector<9xf32>
    %884 = vector.multi_reduction <add>, %883, %cst_635 [1] : vector<9x9xf32> to vector<9xf32>
    %885 = vector.shape_cast %884 : vector<9xf32> to vector<9x1xf32>
    %886 = vector.broadcast %885 : vector<9x1xf32> to vector<9x9xf32>
    %887 = arith.divf %883, %886 : vector<9x9xf32>
    %888 = vector.extract_strided_slice %875 {offsets = [0, 0], sizes = [9, 64], strides = [1, 1]} : vector<18x64xf32> to vector<9x64xf32>
    %cst_636 = arith.constant dense<0.000000e+00> : vector<9x64xf32>
    %889 = tpu.matmul %887, %888, %cst_636 {dimension_numbers = #tpu.dot_dimension_numbers<[1], [0], [0], [1], [0, 0, 1, 1], [], []>} : vector<9x9xf32>, vector<9x64xf32>, vector<9x64xf32> -> vector<9x64xf32>
    %890 = arith.addf %834, %889 : vector<9x64xf32>
    %891 = arith.addf %835, %887 : vector<9x9xf32>
    %892 = vector.extract_strided_slice %858 {offsets = [9, 0], sizes = [9, 8], strides = [1, 1]} : vector<18x8xf32> to vector<9x8xf32>
    %893 = vector.extract_strided_slice %865 {offsets = [9, 0], sizes = [9, 8], strides = [1, 1]} : vector<18x8xf32> to vector<9x8xf32>
    %cst_637 = arith.constant dense<0.000000e+00> : vector<9x9xf32>
    %894 = tpu.matmul %892, %893, %cst_637 {dimension_numbers = #tpu.dot_dimension_numbers<[1], [1], [0], [0], [0, 0, 1, 0], [], []>} : vector<9x8xf32>, vector<9x8xf32>, vector<9x9xf32> -> vector<9x9xf32>
    %cst_638 = arith.constant dense<0xFF800000> : vector<9xf32>
    %895 = vector.multi_reduction <maximumf>, %894, %cst_638 [1] : vector<9x9xf32> to vector<9xf32>
    %896 = vector.shape_cast %895 : vector<9xf32> to vector<9x1xf32>
    %897 = vector.broadcast %896 : vector<9x1xf32> to vector<9x9xf32>
    %898 = arith.subf %894, %897 : vector<9x9xf32>
    %899 = math.exp %898 : vector<9x9xf32>
    %cst_639 = arith.constant dense<0.000000e+00> : vector<9xf32>
    %900 = vector.multi_reduction <add>, %899, %cst_639 [1] : vector<9x9xf32> to vector<9xf32>
    %901 = vector.shape_cast %900 : vector<9xf32> to vector<9x1xf32>
    %902 = vector.broadcast %901 : vector<9x1xf32> to vector<9x9xf32>
    %903 = arith.divf %899, %902 : vector<9x9xf32>
    %904 = vector.extract_strided_slice %875 {offsets = [9, 0], sizes = [9, 64], strides = [1, 1]} : vector<18x64xf32> to vector<9x64xf32>
    %cst_640 = arith.constant dense<0.000000e+00> : vector<9x64xf32>
    %905 = tpu.matmul %903, %904, %cst_640 {dimension_numbers = #tpu.dot_dimension_numbers<[1], [0], [0], [1], [0, 0, 1, 1], [], []>} : vector<9x9xf32>, vector<9x64xf32>, vector<9x64xf32> -> vector<9x64xf32>
    %906 = arith.addf %850, %905 : vector<9x64xf32>
    %907 = arith.addf %851, %903 : vector<9x9xf32>
    %c1_641 = arith.constant 1 : index
    %c7_642 = arith.constant 7 : index
    %c0_643 = arith.constant 0 : index
    %c0_644 = arith.constant 0 : index
    %908 = vector.load %arg4[%c1_641, %c7_642, %c0_643, %c0_644] : memref<2x8x64x8xf32, #tpu.memory_space<vmem>>, vector<1x1x64x8xf32>
    %909 = vector.shape_cast %908 : vector<1x1x64x8xf32> to vector<64x8xf32>
    %cst_645 = arith.constant dense<0.000000e+00> : vector<18x8xf32>
    %910 = tpu.matmul %519, %909, %cst_645 {dimension_numbers = #tpu.dot_dimension_numbers<[1], [0], [0], [1], [0, 0, 1, 1], [], []>} : vector<18x64xf32>, vector<64x8xf32>, vector<18x8xf32> -> vector<18x8xf32>
    %c1_646 = arith.constant 1 : index
    %c7_647 = arith.constant 7 : index
    %c0_648 = arith.constant 0 : index
    %c0_649 = arith.constant 0 : index
    %911 = vector.load %arg5[%c1_646, %c7_647, %c0_648, %c0_649] : memref<2x8x1x8xf32, #tpu.memory_space<vmem>>, vector<1x1x1x8xf32>
    %912 = vector.shape_cast %911 : vector<1x1x1x8xf32> to vector<1x8xf32>
    %913 = vector.broadcast %912 : vector<1x8xf32> to vector<18x8xf32>
    %914 = arith.addf %910, %913 : vector<18x8xf32>
    %c1_650 = arith.constant 1 : index
    %c7_651 = arith.constant 7 : index
    %c0_652 = arith.constant 0 : index
    %c0_653 = arith.constant 0 : index
    %915 = vector.load %arg6[%c1_650, %c7_651, %c0_652, %c0_653] : memref<2x8x64x8xf32, #tpu.memory_space<vmem>>, vector<1x1x64x8xf32>
    %916 = vector.shape_cast %915 : vector<1x1x64x8xf32> to vector<64x8xf32>
    %cst_654 = arith.constant dense<0.000000e+00> : vector<18x8xf32>
    %917 = tpu.matmul %519, %916, %cst_654 {dimension_numbers = #tpu.dot_dimension_numbers<[1], [0], [0], [1], [0, 0, 1, 1], [], []>} : vector<18x64xf32>, vector<64x8xf32>, vector<18x8xf32> -> vector<18x8xf32>
    %c1_655 = arith.constant 1 : index
    %c7_656 = arith.constant 7 : index
    %c0_657 = arith.constant 0 : index
    %c0_658 = arith.constant 0 : index
    %918 = vector.load %arg7[%c1_655, %c7_656, %c0_657, %c0_658] : memref<2x8x1x8xf32, #tpu.memory_space<vmem>>, vector<1x1x1x8xf32>
    %919 = vector.shape_cast %918 : vector<1x1x1x8xf32> to vector<1x8xf32>
    %920 = vector.broadcast %919 : vector<1x8xf32> to vector<18x8xf32>
    %921 = arith.addf %917, %920 : vector<18x8xf32>
    %c1_659 = arith.constant 1 : index
    %c7_660 = arith.constant 7 : index
    %c0_661 = arith.constant 0 : index
    %c0_662 = arith.constant 0 : index
    %922 = vector.load %arg8[%c1_659, %c7_660, %c0_661, %c0_662] : memref<2x8x64x8xf32, #tpu.memory_space<vmem>>, vector<1x1x64x8xf32>
    %923 = vector.shape_cast %922 : vector<1x1x64x8xf32> to vector<64x8xf32>
    %cst_663 = arith.constant dense<0.000000e+00> : vector<18x8xf32>
    %924 = tpu.matmul %519, %923, %cst_663 {dimension_numbers = #tpu.dot_dimension_numbers<[1], [0], [0], [1], [0, 0, 1, 1], [], []>} : vector<18x64xf32>, vector<64x8xf32>, vector<18x8xf32> -> vector<18x8xf32>
    %c1_664 = arith.constant 1 : index
    %c7_665 = arith.constant 7 : index
    %c0_666 = arith.constant 0 : index
    %c0_667 = arith.constant 0 : index
    %925 = vector.load %arg9[%c1_664, %c7_665, %c0_666, %c0_667] : memref<2x8x1x8xf32, #tpu.memory_space<vmem>>, vector<1x1x1x8xf32>
    %926 = vector.shape_cast %925 : vector<1x1x1x8xf32> to vector<1x8xf32>
    %927 = vector.broadcast %926 : vector<1x8xf32> to vector<18x8xf32>
    %928 = arith.addf %924, %927 : vector<18x8xf32>
    %c1_668 = arith.constant 1 : index
    %c7_669 = arith.constant 7 : index
    %c0_670 = arith.constant 0 : index
    %c0_671 = arith.constant 0 : index
    %929 = vector.load %arg10[%c1_668, %c7_669, %c0_670, %c0_671] : memref<2x8x8x64xf32, #tpu.memory_space<vmem>>, vector<1x1x8x64xf32>
    %930 = vector.shape_cast %929 : vector<1x1x8x64xf32> to vector<8x64xf32>
    %cst_672 = arith.constant dense<0.000000e+00> : vector<18x64xf32>
    %931 = tpu.matmul %928, %930, %cst_672 {dimension_numbers = #tpu.dot_dimension_numbers<[1], [0], [0], [1], [0, 0, 1, 1], [], []>} : vector<18x8xf32>, vector<8x64xf32>, vector<18x64xf32> -> vector<18x64xf32>
    %932 = vector.extract_strided_slice %914 {offsets = [0, 0], sizes = [9, 8], strides = [1, 1]} : vector<18x8xf32> to vector<9x8xf32>
    %933 = vector.extract_strided_slice %921 {offsets = [0, 0], sizes = [9, 8], strides = [1, 1]} : vector<18x8xf32> to vector<9x8xf32>
    %cst_673 = arith.constant dense<0.000000e+00> : vector<9x9xf32>
    %934 = tpu.matmul %932, %933, %cst_673 {dimension_numbers = #tpu.dot_dimension_numbers<[1], [1], [0], [0], [0, 0, 1, 0], [], []>} : vector<9x8xf32>, vector<9x8xf32>, vector<9x9xf32> -> vector<9x9xf32>
    %cst_674 = arith.constant dense<0xFF800000> : vector<9xf32>
    %935 = vector.multi_reduction <maximumf>, %934, %cst_674 [1] : vector<9x9xf32> to vector<9xf32>
    %936 = vector.shape_cast %935 : vector<9xf32> to vector<9x1xf32>
    %937 = vector.broadcast %936 : vector<9x1xf32> to vector<9x9xf32>
    %938 = arith.subf %934, %937 : vector<9x9xf32>
    %939 = math.exp %938 : vector<9x9xf32>
    %cst_675 = arith.constant dense<0.000000e+00> : vector<9xf32>
    %940 = vector.multi_reduction <add>, %939, %cst_675 [1] : vector<9x9xf32> to vector<9xf32>
    %941 = vector.shape_cast %940 : vector<9xf32> to vector<9x1xf32>
    %942 = vector.broadcast %941 : vector<9x1xf32> to vector<9x9xf32>
    %943 = arith.divf %939, %942 : vector<9x9xf32>
    %944 = vector.extract_strided_slice %931 {offsets = [0, 0], sizes = [9, 64], strides = [1, 1]} : vector<18x64xf32> to vector<9x64xf32>
    %cst_676 = arith.constant dense<0.000000e+00> : vector<9x64xf32>
    %945 = tpu.matmul %943, %944, %cst_676 {dimension_numbers = #tpu.dot_dimension_numbers<[1], [0], [0], [1], [0, 0, 1, 1], [], []>} : vector<9x9xf32>, vector<9x64xf32>, vector<9x64xf32> -> vector<9x64xf32>
    %946 = arith.addf %890, %945 : vector<9x64xf32>
    %947 = arith.addf %891, %943 : vector<9x9xf32>
    %948 = vector.extract_strided_slice %914 {offsets = [9, 0], sizes = [9, 8], strides = [1, 1]} : vector<18x8xf32> to vector<9x8xf32>
    %949 = vector.extract_strided_slice %921 {offsets = [9, 0], sizes = [9, 8], strides = [1, 1]} : vector<18x8xf32> to vector<9x8xf32>
    %cst_677 = arith.constant dense<0.000000e+00> : vector<9x9xf32>
    %950 = tpu.matmul %948, %949, %cst_677 {dimension_numbers = #tpu.dot_dimension_numbers<[1], [1], [0], [0], [0, 0, 1, 0], [], []>} : vector<9x8xf32>, vector<9x8xf32>, vector<9x9xf32> -> vector<9x9xf32>
    %cst_678 = arith.constant dense<0xFF800000> : vector<9xf32>
    %951 = vector.multi_reduction <maximumf>, %950, %cst_678 [1] : vector<9x9xf32> to vector<9xf32>
    %952 = vector.shape_cast %951 : vector<9xf32> to vector<9x1xf32>
    %953 = vector.broadcast %952 : vector<9x1xf32> to vector<9x9xf32>
    %954 = arith.subf %950, %953 : vector<9x9xf32>
    %955 = math.exp %954 : vector<9x9xf32>
    %cst_679 = arith.constant dense<0.000000e+00> : vector<9xf32>
    %956 = vector.multi_reduction <add>, %955, %cst_679 [1] : vector<9x9xf32> to vector<9xf32>
    %957 = vector.shape_cast %956 : vector<9xf32> to vector<9x1xf32>
    %958 = vector.broadcast %957 : vector<9x1xf32> to vector<9x9xf32>
    %959 = arith.divf %955, %958 : vector<9x9xf32>
    %960 = vector.extract_strided_slice %931 {offsets = [9, 0], sizes = [9, 64], strides = [1, 1]} : vector<18x64xf32> to vector<9x64xf32>
    %cst_680 = arith.constant dense<0.000000e+00> : vector<9x64xf32>
    %961 = tpu.matmul %959, %960, %cst_680 {dimension_numbers = #tpu.dot_dimension_numbers<[1], [0], [0], [1], [0, 0, 1, 1], [], []>} : vector<9x9xf32>, vector<9x64xf32>, vector<9x64xf32> -> vector<9x64xf32>
    %962 = arith.addf %906, %961 : vector<9x64xf32>
    %963 = arith.addf %907, %959 : vector<9x9xf32>
    %964 = tpu.concatenate %946, %962 in 0 : vector<9x64xf32>, vector<9x64xf32> -> vector<18x64xf32>
    %c1_681 = arith.constant 1 : index
    %c0_682 = arith.constant 0 : index
    %c0_683 = arith.constant 0 : index
    %965 = vector.load %arg11[%c1_681, %c0_682, %c0_683] : memref<2x1x64xf32, #tpu.memory_space<vmem>>, vector<1x1x64xf32>
    %966 = vector.shape_cast %965 : vector<1x1x64xf32> to vector<1x64xf32>
    %967 = vector.broadcast %966 : vector<1x64xf32> to vector<18x64xf32>
    %968 = arith.addf %964, %967 : vector<18x64xf32>
    %969 = arith.addf %519, %968 : vector<18x64xf32>
    %c1_684 = arith.constant 1 : index
    %c0_685 = arith.constant 0 : index
    %c0_686 = arith.constant 0 : index
    %970 = vector.load %arg16[%c1_684, %c0_685, %c0_686] : memref<2x1x64xf32, #tpu.memory_space<vmem>>, vector<1x1x64xf32>
    %971 = vector.shape_cast %970 : vector<1x1x64xf32> to vector<1x64xf32>
    %c1_687 = arith.constant 1 : index
    %c0_688 = arith.constant 0 : index
    %c0_689 = arith.constant 0 : index
    %972 = vector.load %arg17[%c1_687, %c0_688, %c0_689] : memref<2x1x64xf32, #tpu.memory_space<vmem>>, vector<1x1x64xf32>
    %973 = vector.shape_cast %972 : vector<1x1x64xf32> to vector<1x64xf32>
    %cst_690 = arith.constant dense<0.000000e+00> : vector<18xf32>
    %974 = vector.multi_reduction <add>, %969, %cst_690 [1] : vector<18x64xf32> to vector<18xf32>
    %975 = vector.shape_cast %974 : vector<18xf32> to vector<18x1xf32>
    %cst_691 = arith.constant 6.400000e+01 : f32
    %976 = vector.broadcast %cst_691 : f32 to vector<18x1xf32>
    %977 = arith.divf %975, %976 : vector<18x1xf32>
    %978 = vector.broadcast %977 : vector<18x1xf32> to vector<18x64xf32>
    %979 = arith.subf %969, %978 : vector<18x64xf32>
    %980 = arith.mulf %979, %979 : vector<18x64xf32>
    %cst_692 = arith.constant dense<0.000000e+00> : vector<18xf32>
    %981 = vector.multi_reduction <add>, %980, %cst_692 [1] : vector<18x64xf32> to vector<18xf32>
    %982 = vector.shape_cast %981 : vector<18xf32> to vector<18x1xf32>
    %cst_693 = arith.constant 6.400000e+01 : f32
    %983 = vector.broadcast %cst_693 : f32 to vector<18x1xf32>
    %984 = arith.divf %982, %983 : vector<18x1xf32>
    %985 = vector.broadcast %977 : vector<18x1xf32> to vector<18x64xf32>
    %986 = arith.subf %969, %985 : vector<18x64xf32>
    %cst_694 = arith.constant 9.99999974E-6 : f32
    %987 = vector.broadcast %cst_694 : f32 to vector<18x1xf32>
    %988 = arith.addf %984, %987 : vector<18x1xf32>
    %989 = math.rsqrt %988 : vector<18x1xf32>
    %990 = vector.broadcast %989 : vector<18x1xf32> to vector<18x64xf32>
    %991 = arith.mulf %986, %990 : vector<18x64xf32>
    %992 = vector.broadcast %971 : vector<1x64xf32> to vector<18x64xf32>
    %993 = arith.mulf %991, %992 : vector<18x64xf32>
    %994 = vector.broadcast %973 : vector<1x64xf32> to vector<18x64xf32>
    %995 = arith.addf %993, %994 : vector<18x64xf32>
    %c1_695 = arith.constant 1 : index
    %c0_696 = arith.constant 0 : index
    %c0_697 = arith.constant 0 : index
    %996 = vector.load %arg12[%c1_695, %c0_696, %c0_697] : memref<2x64x128xf32, #tpu.memory_space<vmem>>, vector<1x64x128xf32>
    %997 = vector.shape_cast %996 : vector<1x64x128xf32> to vector<64x128xf32>
    %cst_698 = arith.constant dense<0.000000e+00> : vector<18x128xf32>
    %998 = tpu.matmul %995, %997, %cst_698 {dimension_numbers = #tpu.dot_dimension_numbers<[1], [0], [0], [1], [0, 0, 1, 1], [], []>} : vector<18x64xf32>, vector<64x128xf32>, vector<18x128xf32> -> vector<18x128xf32>
    %c1_699 = arith.constant 1 : index
    %c0_700 = arith.constant 0 : index
    %c0_701 = arith.constant 0 : index
    %999 = vector.load %arg13[%c1_699, %c0_700, %c0_701] : memref<2x1x128xf32, #tpu.memory_space<vmem>>, vector<1x1x128xf32>
    %1000 = vector.shape_cast %999 : vector<1x1x128xf32> to vector<1x128xf32>
    %1001 = vector.broadcast %1000 : vector<1x128xf32> to vector<18x128xf32>
    %1002 = arith.addf %998, %1001 : vector<18x128xf32>
    %cst_702 = arith.constant 0.000000e+00 : f32
    %1003 = vector.broadcast %cst_702 : f32 to vector<18x128xf32>
    %1004 = arith.maximumf %1002, %1003 : vector<18x128xf32>
    %c1_703 = arith.constant 1 : index
    %c0_704 = arith.constant 0 : index
    %c0_705 = arith.constant 0 : index
    %1005 = vector.load %arg14[%c1_703, %c0_704, %c0_705] : memref<2x128x64xf32, #tpu.memory_space<vmem>>, vector<1x128x64xf32>
    %1006 = vector.shape_cast %1005 : vector<1x128x64xf32> to vector<128x64xf32>
    %cst_706 = arith.constant dense<0.000000e+00> : vector<18x64xf32>
    %1007 = tpu.matmul %1004, %1006, %cst_706 {dimension_numbers = #tpu.dot_dimension_numbers<[1], [0], [0], [1], [0, 0, 1, 1], [], []>} : vector<18x128xf32>, vector<128x64xf32>, vector<18x64xf32> -> vector<18x64xf32>
    %c1_707 = arith.constant 1 : index
    %c0_708 = arith.constant 0 : index
    %c0_709 = arith.constant 0 : index
    %1008 = vector.load %arg15[%c1_707, %c0_708, %c0_709] : memref<2x1x64xf32, #tpu.memory_space<vmem>>, vector<1x1x64xf32>
    %1009 = vector.shape_cast %1008 : vector<1x1x64xf32> to vector<1x64xf32>
    %1010 = vector.broadcast %1009 : vector<1x64xf32> to vector<18x64xf32>
    %1011 = arith.addf %1007, %1010 : vector<18x64xf32>
    %1012 = arith.addf %995, %1011 : vector<18x64xf32>
    %c1_710 = arith.constant 1 : index
    %c0_711 = arith.constant 0 : index
    %c0_712 = arith.constant 0 : index
    %1013 = vector.load %arg18[%c1_710, %c0_711, %c0_712] : memref<2x1x64xf32, #tpu.memory_space<vmem>>, vector<1x1x64xf32>
    %1014 = vector.shape_cast %1013 : vector<1x1x64xf32> to vector<1x64xf32>
    %c1_713 = arith.constant 1 : index
    %c0_714 = arith.constant 0 : index
    %c0_715 = arith.constant 0 : index
    %1015 = vector.load %arg19[%c1_713, %c0_714, %c0_715] : memref<2x1x64xf32, #tpu.memory_space<vmem>>, vector<1x1x64xf32>
    %1016 = vector.shape_cast %1015 : vector<1x1x64xf32> to vector<1x64xf32>
    %cst_716 = arith.constant dense<0.000000e+00> : vector<18xf32>
    %1017 = vector.multi_reduction <add>, %1012, %cst_716 [1] : vector<18x64xf32> to vector<18xf32>
    %1018 = vector.shape_cast %1017 : vector<18xf32> to vector<18x1xf32>
    %cst_717 = arith.constant 6.400000e+01 : f32
    %1019 = vector.broadcast %cst_717 : f32 to vector<18x1xf32>
    %1020 = arith.divf %1018, %1019 : vector<18x1xf32>
    %1021 = vector.broadcast %1020 : vector<18x1xf32> to vector<18x64xf32>
    %1022 = arith.subf %1012, %1021 : vector<18x64xf32>
    %1023 = arith.mulf %1022, %1022 : vector<18x64xf32>
    %cst_718 = arith.constant dense<0.000000e+00> : vector<18xf32>
    %1024 = vector.multi_reduction <add>, %1023, %cst_718 [1] : vector<18x64xf32> to vector<18xf32>
    %1025 = vector.shape_cast %1024 : vector<18xf32> to vector<18x1xf32>
    %cst_719 = arith.constant 6.400000e+01 : f32
    %1026 = vector.broadcast %cst_719 : f32 to vector<18x1xf32>
    %1027 = arith.divf %1025, %1026 : vector<18x1xf32>
    %1028 = vector.broadcast %1020 : vector<18x1xf32> to vector<18x64xf32>
    %1029 = arith.subf %1012, %1028 : vector<18x64xf32>
    %cst_720 = arith.constant 9.99999974E-6 : f32
    %1030 = vector.broadcast %cst_720 : f32 to vector<18x1xf32>
    %1031 = arith.addf %1027, %1030 : vector<18x1xf32>
    %1032 = math.rsqrt %1031 : vector<18x1xf32>
    %1033 = vector.broadcast %1032 : vector<18x1xf32> to vector<18x64xf32>
    %1034 = arith.mulf %1029, %1033 : vector<18x64xf32>
    %1035 = vector.broadcast %1014 : vector<1x64xf32> to vector<18x64xf32>
    %1036 = arith.mulf %1034, %1035 : vector<18x64xf32>
    %1037 = vector.broadcast %1016 : vector<1x64xf32> to vector<18x64xf32>
    %1038 = arith.addf %1036, %1037 : vector<18x64xf32>
    %cst_721 = arith.constant 1.250000e-01 : f32
    %1039 = vector.broadcast %cst_721 : f32 to vector<9x9xf32>
    %1040 = arith.mulf %947, %1039 : vector<9x9xf32>
    %c0_722 = arith.constant 0 : index
    %c0_723 = arith.constant 0 : index
    %c0_724 = arith.constant 0 : index
    %1041 = vector.load %arg23[%c0_722, %c0_723, %c0_724] : memref<2x9x9xf32, #tpu.memory_space<vmem>>, vector<1x9x9xf32>
    %1042 = vector.shape_cast %1041 : vector<1x9x9xf32> to vector<9x9xf32>
    %1043 = vector.shape_cast %1040 : vector<9x9xf32> to vector<1x9x9xf32>
    tpu.vector_store %arg23[%c0_722, %c0_723, %c0_724], %1043 {strides = array<i32>} : memref<2x9x9xf32, #tpu.memory_space<vmem>>, vector<1x9x9xf32>,
    %cst_725 = arith.constant 1.250000e-01 : f32
    %1044 = vector.broadcast %cst_725 : f32 to vector<9x9xf32>
    %1045 = arith.mulf %963, %1044 : vector<9x9xf32>
    %c1_726 = arith.constant 1 : index
    %c0_727 = arith.constant 0 : index
    %c0_728 = arith.constant 0 : index
    %1046 = vector.load %arg23[%c1_726, %c0_727, %c0_728] : memref<2x9x9xf32, #tpu.memory_space<vmem>>, vector<1x9x9xf32>
    %1047 = vector.shape_cast %1046 : vector<1x9x9xf32> to vector<9x9xf32>
    %1048 = vector.shape_cast %1045 : vector<9x9xf32> to vector<1x9x9xf32>
    tpu.vector_store %arg23[%c1_726, %c0_727, %c0_728], %1048 {strides = array<i32>} : memref<2x9x9xf32, #tpu.memory_space<vmem>>, vector<1x9x9xf32>,
    %c0_729 = arith.constant 0 : index
    %c0_730 = arith.constant 0 : index
    %1049 = vector.load %arg20[%c0_729, %c0_730] : memref<1x64xf32, #tpu.memory_space<vmem>>, vector<1x64xf32>
    %c0_731 = arith.constant 0 : index
    %c0_732 = arith.constant 0 : index
    %1050 = vector.load %arg21[%c0_731, %c0_732] : memref<1x64xf32, #tpu.memory_space<vmem>>, vector<1x64xf32>
    %cst_733 = arith.constant dense<0.000000e+00> : vector<18xf32>
    %1051 = vector.multi_reduction <add>, %1038, %cst_733 [1] : vector<18x64xf32> to vector<18xf32>
    %1052 = vector.shape_cast %1051 : vector<18xf32> to vector<18x1xf32>
    %cst_734 = arith.constant 6.400000e+01 : f32
    %1053 = vector.broadcast %cst_734 : f32 to vector<18x1xf32>
    %1054 = arith.divf %1052, %1053 : vector<18x1xf32>
    %1055 = vector.broadcast %1054 : vector<18x1xf32> to vector<18x64xf32>
    %1056 = arith.subf %1038, %1055 : vector<18x64xf32>
    %1057 = arith.mulf %1056, %1056 : vector<18x64xf32>
    %cst_735 = arith.constant dense<0.000000e+00> : vector<18xf32>
    %1058 = vector.multi_reduction <add>, %1057, %cst_735 [1] : vector<18x64xf32> to vector<18xf32>
    %1059 = vector.shape_cast %1058 : vector<18xf32> to vector<18x1xf32>
    %cst_736 = arith.constant 6.400000e+01 : f32
    %1060 = vector.broadcast %cst_736 : f32 to vector<18x1xf32>
    %1061 = arith.divf %1059, %1060 : vector<18x1xf32>
    %1062 = vector.broadcast %1054 : vector<18x1xf32> to vector<18x64xf32>
    %1063 = arith.subf %1038, %1062 : vector<18x64xf32>
    %cst_737 = arith.constant 9.99999974E-6 : f32
    %1064 = vector.broadcast %cst_737 : f32 to vector<18x1xf32>
    %1065 = arith.addf %1061, %1064 : vector<18x1xf32>
    %1066 = math.rsqrt %1065 : vector<18x1xf32>
    %1067 = vector.broadcast %1066 : vector<18x1xf32> to vector<18x64xf32>
    %1068 = arith.mulf %1063, %1067 : vector<18x64xf32>
    %1069 = vector.broadcast %1049 : vector<1x64xf32> to vector<18x64xf32>
    %1070 = arith.mulf %1068, %1069 : vector<18x64xf32>
    %1071 = vector.broadcast %1050 : vector<1x64xf32> to vector<18x64xf32>
    %1072 = arith.addf %1070, %1071 : vector<18x64xf32>
    %1073 = vector.extract_strided_slice %1072 {offsets = [0, 0], sizes = [1, 64], strides = [1, 1]} : vector<18x64xf32> to vector<1x64xf32>
    %1074 = vector.extract_strided_slice %1072 {offsets = [9, 0], sizes = [1, 64], strides = [1, 1]} : vector<18x64xf32> to vector<1x64xf32>
    %1075 = tpu.concatenate %1073, %1074 in 0 : vector<1x64xf32>, vector<1x64xf32> -> vector<2x64xf32>
    %c0_738 = arith.constant 0 : index
    %c0_739 = arith.constant 0 : index
    %1076 = vector.load %arg22[%c0_738, %c0_739] : memref<2x64xf32, #tpu.memory_space<vmem>>, vector<2x64xf32>
    tpu.vector_store %arg22[%c0_738, %c0_739], %1075 {strides = array<i32>} : memref<2x64xf32, #tpu.memory_space<vmem>>, vector<2x64xf32>,
    return
  }
  func.func @transform_0(%arg0: i32) -> (i32, i32, i32) {
    %c0_i32 = arith.constant 0 : i32
    %c0_i32_0 = arith.constant 0 : i32
    %c0_i32_1 = arith.constant 0 : i32
    %c0_i32_2 = arith.constant 0 : i32
    return %c0_i32, %c0_i32_0, %c0_i32_1 : i32, i32, i32
  }
  func.func @transform_1(%arg0: i32) -> (i32, i32) {
    %c0_i32 = arith.constant 0 : i32
    %c0_i32_0 = arith.constant 0 : i32
    %c0_i32_1 = arith.constant 0 : i32
    return %c0_i32, %c0_i32_0 : i32, i32
  }
  func.func @transform_2(%arg0: i32) -> (i32, i32) {
    %c0_i32 = arith.constant 0 : i32
    %c0_i32_0 = arith.constant 0 : i32
    %c0_i32_1 = arith.constant 0 : i32
    return %c0_i32, %c0_i32_0 : i32, i32
  }
  func.func @transform_3(%arg0: i32) -> (i32, i32, i32, i32) {
    %c0_i32 = arith.constant 0 : i32
    %c0_i32_0 = arith.constant 0 : i32
    %c0_i32_1 = arith.constant 0 : i32
    %c0_i32_2 = arith.constant 0 : i32
    %c0_i32_3 = arith.constant 0 : i32
    return %c0_i32, %c0_i32_0, %c0_i32_1, %c0_i32_2 : i32, i32, i32, i32
  }
  func.func @transform_4(%arg0: i32) -> (i32, i32, i32, i32) {
    %c0_i32 = arith.constant 0 : i32
    %c0_i32_0 = arith.constant 0 : i32
    %c0_i32_1 = arith.constant 0 : i32
    %c0_i32_2 = arith.constant 0 : i32
    %c0_i32_3 = arith.constant 0 : i32
    return %c0_i32, %c0_i32_0, %c0_i32_1, %c0_i32_2 : i32, i32, i32, i32
  }
  func.func @transform_5(%arg0: i32) -> (i32, i32, i32, i32) {
    %c0_i32 = arith.constant 0 : i32
    %c0_i32_0 = arith.constant 0 : i32
    %c0_i32_1 = arith.constant 0 : i32
    %c0_i32_2 = arith.constant 0 : i32
    %c0_i32_3 = arith.constant 0 : i32
    return %c0_i32, %c0_i32_0, %c0_i32_1, %c0_i32_2 : i32, i32, i32, i32
  }
  func.func @transform_6(%arg0: i32) -> (i32, i32, i32, i32) {
    %c0_i32 = arith.constant 0 : i32
    %c0_i32_0 = arith.constant 0 : i32
    %c0_i32_1 = arith.constant 0 : i32
    %c0_i32_2 = arith.constant 0 : i32
    %c0_i32_3 = arith.constant 0 : i32
    return %c0_i32, %c0_i32_0, %c0_i32_1, %c0_i32_2 : i32, i32, i32, i32
  }
  func.func @transform_7(%arg0: i32) -> (i32, i32, i32, i32) {
    %c0_i32 = arith.constant 0 : i32
    %c0_i32_0 = arith.constant 0 : i32
    %c0_i32_1 = arith.constant 0 : i32
    %c0_i32_2 = arith.constant 0 : i32
    %c0_i32_3 = arith.constant 0 : i32
    return %c0_i32, %c0_i32_0, %c0_i32_1, %c0_i32_2 : i32, i32, i32, i32
  }
  func.func @transform_8(%arg0: i32) -> (i32, i32, i32, i32) {
    %c0_i32 = arith.constant 0 : i32
    %c0_i32_0 = arith.constant 0 : i32
    %c0_i32_1 = arith.constant 0 : i32
    %c0_i32_2 = arith.constant 0 : i32
    %c0_i32_3 = arith.constant 0 : i32
    return %c0_i32, %c0_i32_0, %c0_i32_1, %c0_i32_2 : i32, i32, i32, i32
  }
  func.func @transform_9(%arg0: i32) -> (i32, i32, i32, i32) {
    %c0_i32 = arith.constant 0 : i32
    %c0_i32_0 = arith.constant 0 : i32
    %c0_i32_1 = arith.constant 0 : i32
    %c0_i32_2 = arith.constant 0 : i32
    %c0_i32_3 = arith.constant 0 : i32
    return %c0_i32, %c0_i32_0, %c0_i32_1, %c0_i32_2 : i32, i32, i32, i32
  }
  func.func @transform_10(%arg0: i32) -> (i32, i32, i32) {
    %c0_i32 = arith.constant 0 : i32
    %c0_i32_0 = arith.constant 0 : i32
    %c0_i32_1 = arith.constant 0 : i32
    %c0_i32_2 = arith.constant 0 : i32
    return %c0_i32, %c0_i32_0, %c0_i32_1 : i32, i32, i32
  }
  func.func @transform_11(%arg0: i32) -> (i32, i32, i32) {
    %c0_i32 = arith.constant 0 : i32
    %c0_i32_0 = arith.constant 0 : i32
    %c0_i32_1 = arith.constant 0 : i32
    %c0_i32_2 = arith.constant 0 : i32
    return %c0_i32, %c0_i32_0, %c0_i32_1 : i32, i32, i32
  }
  func.func @transform_12(%arg0: i32) -> (i32, i32, i32) {
    %c0_i32 = arith.constant 0 : i32
    %c0_i32_0 = arith.constant 0 : i32
    %c0_i32_1 = arith.constant 0 : i32
    %c0_i32_2 = arith.constant 0 : i32
    return %c0_i32, %c0_i32_0, %c0_i32_1 : i32, i32, i32
  }
  func.func @transform_13(%arg0: i32) -> (i32, i32, i32) {
    %c0_i32 = arith.constant 0 : i32
    %c0_i32_0 = arith.constant 0 : i32
    %c0_i32_1 = arith.constant 0 : i32
    %c0_i32_2 = arith.constant 0 : i32
    return %c0_i32, %c0_i32_0, %c0_i32_1 : i32, i32, i32
  }
  func.func @transform_14(%arg0: i32) -> (i32, i32, i32) {
    %c0_i32 = arith.constant 0 : i32
    %c0_i32_0 = arith.constant 0 : i32
    %c0_i32_1 = arith.constant 0 : i32
    %c0_i32_2 = arith.constant 0 : i32
    return %c0_i32, %c0_i32_0, %c0_i32_1 : i32, i32, i32
  }
  func.func @transform_15(%arg0: i32) -> (i32, i32, i32) {
    %c0_i32 = arith.constant 0 : i32
    %c0_i32_0 = arith.constant 0 : i32
    %c0_i32_1 = arith.constant 0 : i32
    %c0_i32_2 = arith.constant 0 : i32
    return %c0_i32, %c0_i32_0, %c0_i32_1 : i32, i32, i32
  }
  func.func @transform_16(%arg0: i32) -> (i32, i32, i32) {
    %c0_i32 = arith.constant 0 : i32
    %c0_i32_0 = arith.constant 0 : i32
    %c0_i32_1 = arith.constant 0 : i32
    %c0_i32_2 = arith.constant 0 : i32
    return %c0_i32, %c0_i32_0, %c0_i32_1 : i32, i32, i32
  }
  func.func @transform_17(%arg0: i32) -> (i32, i32, i32) {
    %c0_i32 = arith.constant 0 : i32
    %c0_i32_0 = arith.constant 0 : i32
    %c0_i32_1 = arith.constant 0 : i32
    %c0_i32_2 = arith.constant 0 : i32
    return %c0_i32, %c0_i32_0, %c0_i32_1 : i32, i32, i32
  }
  func.func @transform_18(%arg0: i32) -> (i32, i32, i32) {
    %c0_i32 = arith.constant 0 : i32
    %c0_i32_0 = arith.constant 0 : i32
    %c0_i32_1 = arith.constant 0 : i32
    %c0_i32_2 = arith.constant 0 : i32
    return %c0_i32, %c0_i32_0, %c0_i32_1 : i32, i32, i32
  }
  func.func @transform_19(%arg0: i32) -> (i32, i32) {
    %c0_i32 = arith.constant 0 : i32
    %c0_i32_0 = arith.constant 0 : i32
    %c0_i32_1 = arith.constant 0 : i32
    return %c0_i32, %c0_i32_0 : i32, i32
  }
  func.func @transform_20(%arg0: i32) -> (i32, i32) {
    %c0_i32 = arith.constant 0 : i32
    %c0_i32_0 = arith.constant 0 : i32
    %c0_i32_1 = arith.constant 0 : i32
    return %c0_i32, %c0_i32_0 : i32, i32
  }
  func.func @transform_21(%arg0: i32) -> (i32, i32) {
    %c0_i32 = arith.constant 0 : i32
    %c0_i32_0 = arith.constant 0 : i32
    %c0_i32_1 = arith.constant 0 : i32
    return %c0_i32, %c0_i32_0 : i32, i32
  }
  func.func @transform_22(%arg0: i32) -> (i32, i32, i32) {
    %c0_i32 = arith.constant 0 : i32
    %c0_i32_0 = arith.constant 0 : i32
    %c0_i32_1 = arith.constant 0 : i32
    %c0_i32_2 = arith.constant 0 : i32
    return %c0_i32, %c0_i32_0, %c0_i32_1 : i32, i32, i32
  }
}

</mosaic_0001>

<bundles_post_ra>
// kernel: taggregate_forward.1
= control target key start
LH: loop header
LB: loop body
LE: loop exit
PB: predicated region body
PF: predicated region fallthrough
CT: control target
= control target key end

     0   :  { %s11588_s0 = inlined_call_operand.vmem [shape: f32[2,8,64], index: 0, kind: input, shape index: {}]   ;;  %s11589_s1 = inlined_call_operand.vmem [shape: f32[1,64], index: 1, kind: input, shape index: {}]   ;;  %s11590_s2 = inlined_call_operand.vmem [shape: f32[9,64], index: 2, kind: input, shape index: {}]   ;;  %s11591_s3 = inlined_call_operand.vmem [shape: f32[2,8,64,8], index: 3, kind: input, shape index: {}]   ;;  %s11592_s4 = inlined_call_operand.vmem [shape: f32[2,8,1,8], index: 4, kind: input, shape index: {}]   ;;  %s11593_s5 = inlined_call_operand.vmem [shape: f32[2,8,64,8], index: 5, kind: input, shape index: {}]   ;;  %s11594_s6 = inlined_call_operand.vmem [shape: f32[2,8,1,8], index: 6, kind: input, shape index: {}]   ;;  %s11595_s7 = inlined_call_operand.vmem [shape: f32[2,8,64,8], index: 7, kind: input, shape index: {}]   ;;  %s11596_s8 = inlined_call_operand.vmem [shape: f32[2,8,1,8], index: 8, kind: input, shape index: {}]   ;;  %s11597_s9 = inlined_call_operand.vmem [shape: f32[2,8,8,64], index: 9, kind: input, shape index: {}]   ;;  %s11598_s10 = inlined_call_operand.vmem [shape: f32[2,1,64], index: 10, kind: input, shape index: {}]   ;;  %s11599_s11 = inlined_call_operand.vmem [shape: f32[2,64,128], index: 11, kind: input, shape index: {}]   ;;  %s11600_s12 = inlined_call_operand.vmem [shape: f32[2,1,128], index: 12, kind: input, shape index: {}]   ;;  %s11601_s13 = inlined_call_operand.vmem [shape: f32[2,128,64], index: 13, kind: input, shape index: {}]   ;;  %s11602_s14 = inlined_call_operand.vmem [shape: f32[2,1,64], index: 14, kind: input, shape index: {}]   ;;  %s11603_s15 = inlined_call_operand.vmem [shape: f32[2,1,64], index: 15, kind: input, shape index: {}]   ;;  %s11604_s16 = inlined_call_operand.vmem [shape: f32[2,1,64], index: 16, kind: input, shape index: {}]   ;;  %s11605_s17 = inlined_call_operand.vmem [shape: f32[2,1,64], index: 17, kind: input, shape index: {}]   ;;  %s11606_s18 = inlined_call_operand.vmem [shape: f32[2,1,64], index: 18, kind: input, shape index: {}]   ;;  %s11607_s19 = inlined_call_operand.vmem [shape: f32[1,64], index: 19, kind: input, shape index: {}]   ;;  %s11608_s20 = inlined_call_operand.vmem [shape: f32[1,64], index: 20, kind: input, shape index: {}]   ;;  %s11609_s21 = inlined_call_operand.hbm [shape: f32[2,64], index: 21, kind: output, shape index: {0}]   ;;  %s11610_s22 = inlined_call_operand.vmem [shape: f32[2,9,9], index: 22, kind: output, shape index: {1}]  }
   0x1   :  { %11617 = sst [smem:[#allocation5_spill]] %s11588_s0 }
   0x2   :  { %11618 = sst [smem:[#allocation6_spill]] %s11589_s1 }
   0x3   :  { %11619 = sst [smem:[#allocation7_spill]] %s11590_s2 }
   0x4   :  { %11620 = sst [smem:[#allocation8_spill]] %s11591_s3 }
   0x5   :  { %11621 = sst [smem:[#allocation9_spill]] %s11592_s4 }
   0x6   :  { %11622 = sst [smem:[#allocation10_spill]] %s11593_s5 }
   0x7   :  { %11623 = sst [smem:[#allocation11_spill]] %s11594_s6 }
   0x8   :  { %v193_v0 = vld [vmem:[%s11595_s7 + $0x38] sm:$0xff]  ;;  %v192_v1 = vld [vmem:[%s11595_s7 + $0x30] sm:$0xff]  ;;  %s11624_s23 = sld [smem:[#allocation10_spill]]  ;;  %v191_v4 = vld [vmem:[%s11595_s7 + $0x28] sm:$0xff]  ;;  %vm78_vm0 = vcmask 1046528   ;;  %vm96_vm1 = vcmask 1040384  }
   0x9   :  { %206 = vmatpush.msra.mxu2 %v193_v0  ;;  %v190_v6 = vld [vmem:[%s11595_s7 + $0x20] sm:$0xff]  ;;  %v189_v7 = vld [vmem:[%s11595_s7 + $0x18] sm:$0xff]  ;;  %s11625_s1 = sld [smem:[#allocation7_spill]]  ;;  %v188_v19 = vld [vmem:[%s11595_s7 + $0x10] sm:$0xff]  ;;  %vm113_vm2 = vcmask 523264   ;;  %vm99_vm3 = vcmask 1041408  }
   0xa   :  { %s11626_s26 = sld [smem:[#allocation6_spill]]  ;;  %v187_v20 = vld [vmem:[%s11595_s7 + $0x8] sm:$0xff]  ;;  %v186_v28 = vld [vmem:[%s11595_s7] sm:$0xff] }
   0xb   :  { %207 = vmatpush.msra.mxu2 %v192_v1  ;;  %s11627_s29 = sld [smem:[#allocation5_spill]] }
   0xc   :  { %s11628_s5 = sld [smem:[#allocation8_spill]] }
   0xd   :  { %208 = vmatpush.msra.mxu2 %v191_v4 }
   0xe   :  { %v155_v2 = vld [vmem:[%s11624_s23 + $0x38] sm:$0xff]  ;;  %v154_v3 = vld [vmem:[%s11624_s23 + $0x30] sm:$0xff]  ;;  %v153_v5 = vld [vmem:[%s11624_s23 + $0x28] sm:$0xff] }
   0xf   :  { %168 = vmatpush.msra.mxu1 %v155_v2  ;;  %v152_v8 = vld [vmem:[%s11624_s23 + $0x20] sm:$0xff]  ;;  %v72_v10 = vld [vmem:[%s11625_s1 + $0x8] sm:$0x1]  ;;  %v151_v12 = vld [vmem:[%s11624_s23 + $0x18] sm:$0xff]  ;;  %209 = vmatpush.msra.mxu2 %v190_v6 }
  0x10   :  { %v71_v9 = vld [vmem:[%s11625_s1] sm:$0xff]  ;;  %v80_v15 = vrot.slane %v72_v10, 1  ;;  %v150_v21 = vld [vmem:[%s11624_s23 + $0x10] sm:$0xff]  ;;  %v149_v24 = vld [vmem:[%s11624_s23 + $0x8] sm:$0xff] }
  0x11   :  { %169 = vmatpush.msra.mxu1 %v154_v3  ;;  %v73_v11 = vld [vmem:[%s11626_s26] sm:$0x1]  ;;  %v79_v14 = vrot.slane %v71_v9, 1  ;;  %v7143_v16 = vld [vmem:[%s11627_s29 + $0x8] sm:$0xff]  ;;  %210 = vmatpush.msra.mxu2 %v189_v7 }
  0x12   :  { %v75_v13 = vld [vmem:[%s11627_s29] sm:$0xff]  ;;  %v108_v17 = vld [vmem:[%s11628_s5 + $0x38] sm:$0xff]  ;;  %v107_v18 = vld [vmem:[%s11628_s5 + $0x30] sm:$0xff]  ;;  %v74_v22 = vadd.f32 %v73_v11, %v71_v9 }
  0x13   :  { %170 = vmatpush.msra.mxu1 %v153_v5  ;;  %v81_v23 = vsel %vm78_vm0, %v79_v14, %v80_v15  ;;  %130 = vmatpush.msra.mxu0 %v108_v17  ;;  %v106_v27 = vld [vmem:[%s11628_s5 + $0x28] sm:$0xff]  ;;  %v148_v30 = vld [vmem:[%s11624_s23] sm:$0xff]  ;;  %v104_v34 = vld [vmem:[%s11628_s5 + $0x18] sm:$0xff] }
  0x14   :  { %v83_v25 = vadd.f32 %v81_v23, %v75_v13  ;;  %v86_v26 = vadd.f32 %v7143_v16, %v81_v23  ;;  %v91_v29 = vperm.slane %v74_v22, 0  ;;  %v105_v31 = vld [vmem:[%s11628_s5 + $0x20] sm:$0xff]  ;;  %211 = vmatpush.msra.mxu2 %v188_v19  ;;  %v103_v36 = vld [vmem:[%s11628_s5 + $0x10] sm:$0xff]  ;;  %v102_v37 = vld [vmem:[%s11628_s5 + $0x8] sm:$0xff] }
  0x15   :  { %171 = vmatpush.msra.mxu1 %v152_v8  ;;  %131 = vmatpush.msra.mxu0 %v107_v18  ;;  %v101_v39 = vld [vmem:[%s11628_s5] sm:$0xff] }
  0x16   :  { %v88_v32 = vrot.slane %v83_v25, 7  ;;  %v8590_v33 = vrot.slane %v86_v26, 6  ;;  %212 = vmatpush.msra.mxu2 %v187_v20 }
  0x17   :  { %172 = vmatpush.msra.mxu1 %v151_v12  ;;  %132 = vmatpush.msra.mxu0 %v106_v27 }
  0x18   :  { %v8596_v35 = vsel %vm96_vm1, %v74_v22, %v88_v32  ;;  %213 = vmatpush.msra.mxu2 %v186_v28  ;;  %v98_v38 = vsel %vm96_vm1, %v88_v32, %v91_v29 }
  0x19   :  { %173 = vmatpush.msra.mxu1 %v150_v21  ;;  %133 = vmatpush.msra.mxu0 %v105_v31  ;;  %v8614_v40 = vsel %vm99_vm3, %v98_v38, %v8590_v33 }
  0x1a   :  { %7150 = vmatmul.msk.f32.vlgmr.msra.gmra.mxu2 %vm113_vm2, %v8596_v35 }
  0x1b   :  { %174 = vmatpush.msra.mxu1 %v149_v24  ;;  %134 = vmatpush.msra.mxu0 %v104_v34 }
  0x1d   :  { %175 = vmatpush.msra.mxu1 %v148_v30  ;;  %135 = vmatpush.msra.mxu0 %v103_v36 }
  0x1e   :  { %7147 = vmatmul.msk.f32.vlgmr.msra.gmra.mxu1 %vm113_vm2, %v8596_v35 }
  0x1f   :  { %136 = vmatpush.msra.mxu0 %v102_v37 }
  0x21   :  { %137 = vmatpush.msra.mxu0 %v101_v39 }
  0x22   :  { %7151 = vmatmul.msk.f32.gmra.mxu2 %vm113_vm2, %v8614_v40  ;;  %7144 = vmatmul.msk.f32.vlgmr.msra.gmra.mxu0 %vm113_vm2, %v8596_v35 }
  0x26   :  { %7148 = vmatmul.msk.f32.gmra.mxu1 %vm113_vm2, %v8614_v40 }
  0x27   :  { %28 = vsyncpa [#allocation3], 0  ;;  %v224_v41 = vld [vmem:[%s11597_s9] sm:$0xff]  ;;  %v7183_v43 = vld [vmem:[%s11624_s23 + $0x78] sm:$0xff]  ;;  %s11629_s6 = sld [smem:[#allocation11_spill]]  ;;  %vm225_vm4 = vcmask 64512  }
  0x28   :  { %250 = vmatpush.msra.mxu3 %v224_v41  ;;  %495 = vmatpush.msrb.mxu2 %v7183_v43  ;;  %v7182_v44 = vld [vmem:[%s11624_s23 + $0x70] sm:$0xff]  ;;  %v7181_v45 = vld [vmem:[%s11624_s23 + $0x68] sm:$0xff]  ;;  %v8024_v46 = vld [vmem:[%s11596_s8] ss:$0 sm:$0xff]  ;;  %s11630_s3 = sld [smem:[#allocation9_spill]]  ;;  %vm296_vm5 = vcmask 72704  }
  0x29   :  { %v7180_v47 = vld [vmem:[%s11624_s23 + $0x60] sm:$0xff]  ;;  %v7179_v52 = vld [vmem:[%s11624_s23 + $0x58] sm:$0xff]  ;;  %v7178_v55 = vld [vmem:[%s11624_s23 + $0x50] sm:$0xff]  ;;  %vm300_vm6 = vcmask 65536   ;;  %s8398_s4 = smov [#allocation2]  }
  0x2a   :  { %7152 = vmatmul.msk.f32.gmra.mxu2 %vm113_vm2, %v8590_v33  ;;  %7145 = vmatmul.msk.f32.gmra.mxu0 %vm113_vm2, %v8614_v40  ;;  %v7171_v56 = vld [vmem:[%s11628_s5 + $0x78] sm:$0xff]  ;;  %v7177_v57 = vld [vmem:[%s11624_s23 + $0x48] sm:$0xff]  ;;  %v7170_v59 = vld [vmem:[%s11628_s5 + $0x70] sm:$0xff]  ;;  %s7128_s0 = sshll.u32 %s8398_s4, 4  ;;  %s7129_s0 = int_to_ptr.vmem [resolvable:$true] %s7128_s0 }
  0x2b   :  { %496 = vmatpush.msrb.mxu2 %v7182_v44  ;;  %455 = vmatpush.msrb.mxu1 %v7171_v56  ;;  %v7176_v60 = vld [vmem:[%s11624_s23 + $0x40] sm:$0xff]  ;;  %v7195_v61 = vld [vmem:[%s11595_s7 + $0x78] sm:$0xff]  ;;  %v7169_v63 = vld [vmem:[%s11628_s5 + $0x68] sm:$0xff] }
  0x2c   :  { %v7194_v1 = vld [vmem:[%s11595_s7 + $0x70] sm:$0xff]  ;;  %v7193_v5 = vld [vmem:[%s11595_s7 + $0x68] sm:$0xff]  ;;  %v7168_v6 = vld [vmem:[%s11628_s5 + $0x60] sm:$0xff] }
  0x2d   :  { %v8023_v48 = vld [vmem:[%s11629_s6] ss:$0 sm:$0xff]  ;;  %497 = vmatpush.msrb.mxu2 %v7181_v45  ;;  %456 = vmatpush.msrb.mxu1 %v7170_v59  ;;  %v7167_v8 = vld [vmem:[%s11628_s5 + $0x58] sm:$0xff]  ;;  %v7166_v12 = vld [vmem:[%s11628_s5 + $0x50] sm:$0xff] }
  0x2e   :  { %7149 = vmatmul.msk.f32.gmra.mxu1 %vm113_vm2, %v8590_v33  ;;  %v7192_v10 = vld [vmem:[%s11595_s7 + $0x60] sm:$0xff]  ;;  %v7191_v13 = vld [vmem:[%s11595_s7 + $0x58] sm:$0xff]  ;;  %v7190_v18 = vld [vmem:[%s11595_s7 + $0x50] sm:$0xff] }
  0x2f   :  { %498 = vmatpush.msrb.mxu2 %v7180_v47  ;;  %457 = vmatpush.msrb.mxu1 %v7169_v63  ;;  %v8025_v11 = vld [vmem:[%s11630_s3] ss:$0 sm:$0xff]  ;;  %v7165_v19 = vld [vmem:[%s11628_s5 + $0x48] sm:$0xff]  ;;  %v8026_v34 = vld [vmem:[%s11629_s6 + $0x1] ss:$0 sm:$0xff] }
  0x30   :  { %v7189_v21 = vld [vmem:[%s11595_s7 + $0x48] sm:$0xff]  ;;  %v7164_v22 = vld [vmem:[%s11628_s5 + $0x40] sm:$0xff] }
  0x31   :  { %499 = vmatpush.msrb.mxu2 %v7179_v52  ;;  %458 = vmatpush.msrb.mxu1 %v7168_v6  ;;  %v7188_v25 = vld [vmem:[%s11595_s7 + $0x40] sm:$0xff]  ;;  %v7200_v32 = vld [vmem:[%s11597_s9 + $0x8] sm:$0xff] }
  0x32   :  { %7146 = vmatmul.msk.f32.gmra.mxu0 %vm113_vm2, %v8590_v33  ;;  %v8028_v41 = vld [vmem:[%s11630_s3 + $0x1] ss:$0 sm:$0xff] }
  0x33   :  { %500 = vmatpush.msrb.mxu2 %v7178_v55  ;;  %459 = vmatpush.msrb.mxu1 %v7167_v8  ;;  %v8027_v55 = vld [vmem:[%s11596_s8 + $0x1] ss:$0 sm:$0xff] }
  0x35   :  { %501 = vmatpush.msrb.mxu2 %v7177_v57  ;;  %460 = vmatpush.msrb.mxu1 %v7166_v12 }
  0x37   :  { %502 = vmatpush.msrb.mxu2 %v7176_v60  ;;  %461 = vmatpush.msrb.mxu1 %v7165_v19 }
  0x38   :  { %7185 = vmatmul.msk.f32.vlgmr.msrb.gmra.mxu2 %vm113_vm2, %v8596_v35 }
  0x39   :  { %462 = vmatpush.msrb.mxu1 %v7164_v22 }
  0x3a   :  { %7173 = vmatmul.msk.f32.vlgmr.msrb.gmra.mxu1 %vm113_vm2, %v8596_v35 }
  0x40   :  { %7186 = vmatmul.msk.f32.gmra.mxu2 %vm113_vm2, %v8614_v40 }
  0x42   :  { %7174 = vmatmul.msk.f32.gmra.mxu1 %vm113_vm2, %v8614_v40 }
  0x48   :  { %7187 = vmatmul.msk.f32.gmra.mxu2 %vm113_vm2, %v8590_v33 }
  0x4a   :  { %7175 = vmatmul.msk.f32.gmra.mxu1 %vm113_vm2, %v8590_v33 }
  0x9b   :  { %v177_v42 = vpop.f32.mrf.mxu1 }
  0x9c   :  { %v178_v58 = vadd.f32 %v8023_v48, %v177_v42 }
  0x9d   :  { %v215_v49 = vpop.f32.mrf.mxu2 }
  0x9e   :  { %v216_v50 = vadd.f32 %v8024_v46, %v215_v49 }
  0x9f   :  { %v8655_v54 = vpop.f32.mrf.mxu0 }
  0xa0   :  { %7153 = vmatmul.msk.f32.vlgmr.msra.gmra.mxu3 %vm225_vm4, %v216_v50  ;;  %v140_v27 = vadd.f32 %v8025_v11, %v8655_v54 }
  0xa3   :  { %v180_v51 = vpop.f32.mrf.mxu1 }
  0xa4   :  { %v181_v53 = vadd.f32 %v8023_v48, %v180_v51 }
  0xa5   :  { %v218_v62 = vpop.f32.mrf.mxu2 }
  0xa6   :  { %7156 = vmatpush.xpose.msk.msrb.mxu3 %vm225_vm4, %v181_v53  ;;  %v219_v0 = vadd.f32 %v8024_v46, %v218_v62  ;;  %v351_v7 = vrot.slane %v181_v53, 1 }
  0xa7   :  { %v142_v4 = vpop.f32.mrf.mxu0 }
  0xa8   :  { %7154 = vmatmul.msk.f32.gmra.mxu3 %vm225_vm4, %v219_v0  ;;  %v143_v16 = vadd.f32 %v8025_v11, %v142_v4 }
  0xaa   :  { %7157 = vmatpush.xpose.msk.msrb.mxu3 %vm225_vm4, %v178_v58  ;;  %v347_v23 = vrot.slane %v143_v16, 1 }
  0xab   :  { %v183_v2 = vpop.f32.mrf.mxu1 }
  0xac   :  { %v184_v3 = vadd.f32 %v8023_v48, %v183_v2 }
  0xad   :  { %v221_v14 = vpop.f32.mrf.mxu2 }
  0xae   :  { %535 = vmatpush.msra.mxu3 %v7195_v61  ;;  %v352_v9 = vrot.slane %v184_v3, 1  ;;  %v222_v17 = vadd.f32 %v8024_v46, %v221_v14 }
  0xaf   :  { %v145_v20 = vpop.f32.mrf.mxu0 }
  0xb0   :  { %536 = vmatpush.msra.mxu3 %v7194_v1  ;;  %7160 = vmatpush.xpose.msk.msrb.mxu0 %vm225_vm4, %v352_v9  ;;  %v353_v15 = vsel %vm78_vm0, %v351_v7, %v352_v9  ;;  %v146_v24 = vadd.f32 %v8025_v11, %v145_v20 }
  0xb1   :  { %7155 = vmatmul.msk.f32.gmra.mxu3 %vm225_vm4, %v222_v17 }
  0xb2   :  { %537 = vmatpush.msra.mxu3 %v7193_v5  ;;  %v348_v26 = vrot.slane %v146_v24, 1 }
  0xb4   :  { %538 = vmatpush.msra.mxu3 %v7192_v10  ;;  %7161 = vmatpush.xpose.msk.msrb.mxu0 %vm225_vm4, %v353_v15  ;;  %v349_v28 = vsel %vm78_vm0, %v347_v23, %v348_v26 }
  0xb6   :  { %539 = vmatpush.msra.mxu3 %v7191_v13 }
  0xb7   :  { %7162 = vmatmul.msk.f32.vlgmr.msrb.gmra.mxu0 %vm225_vm4, %v349_v28  ;;  %v464_v42 = vpop.f32.mrf.mxu1 }
  0xb8   :  { %540 = vmatpush.msra.mxu3 %v7190_v18  ;;  %579 = vmatpush.msra.mxu0 %v7200_v32  ;;  %v465_v43 = vadd.f32 %v8028_v41, %v464_v42  ;;  %v7242_v32 = vld [vmem:[%s11624_s23 + $0xb0] sm:$0xff]  ;;  %v7231_v42 = vld [vmem:[%s11628_s5 + $0xb8] sm:$0xff] }
  0xb9   :  { %7158 = vmatmul.msk.f32.vlgmr.msrb.gmra.mxu3 %vm225_vm4, %v140_v27 }
  0xba   :  { %541 = vmatpush.msra.mxu3 %v7189_v21 }
  0xbb   :  { %v504_v30 = vpop.f32.mrf.mxu2 }
  0xbc   :  { %542 = vmatpush.msra.mxu3 %v7188_v25  ;;  %v505_v39 = vadd.f32 %v8026_v34, %v504_v30 }
  0xbf   :  { %7163 = vmatmul.msk.f32.gmra.mxu0 %vm225_vm4, %v348_v26  ;;  %v467_v51 = vpop.f32.mrf.mxu1 }
  0xc0   :  { %v468_v52 = vadd.f32 %v8028_v41, %v467_v51 }
  0xc1   :  { %7159 = vmatmul.msk.f32.gmra.mxu3 %vm225_vm4, %v143_v16 }
  0xc2   :  { %v738_v0 = vrot.slane %v468_v52, 1 }
  0xc3   :  { %v507_v36 = vpop.f32.mrf.mxu2 }
  0xc4   :  { %v508_v38 = vadd.f32 %v8026_v34, %v507_v36  ;;  %v7240_v36 = vld [vmem:[%s11624_s23 + $0xa0] sm:$0xff] }
  0xc6   :  { %7204 = vmatpush.xpose.msk.msra.mxu1 %vm225_vm4, %v508_v38  ;;  %v742_v48 = vrot.slane %v508_v38, 1  ;;  %v7238_v38 = vld [vmem:[%s11624_s23 + $0x90] sm:$0xff] }
  0xc7   :  { %v470_v60 = vpop.f32.mrf.mxu1 }
  0xc8   :  { %v471_v62 = vadd.f32 %v8028_v41, %v470_v60  ;;  %v7236_v41 = vld [vmem:[%s11624_s23 + $0x80] sm:$0xff] }
  0xc9   :  { %7197 = vmatmul.msk.f32.vlgmr.msra.gmra.mxu3 %vm113_vm2, %v8596_v35 }
  0xca   :  { %7205 = vmatpush.xpose.msk.msra.mxu1 %vm225_vm4, %v505_v39  ;;  %v739_v1 = vrot.slane %v471_v62, 1  ;;  %v7237_v39 = vld [vmem:[%s11624_s23 + $0x88] sm:$0xff] }
  0xcb   :  { %v510_v44 = vpop.f32.mrf.mxu2 }
  0xcc   :  { %v511_v46 = vadd.f32 %v8026_v34, %v510_v44  ;;  %v740_v2 = vsel %vm78_vm0, %v738_v0, %v739_v1  ;;  %v7241_v34 = vld [vmem:[%s11624_s23 + $0xa8] sm:$0xff] }
  0xcd   :  { %7206 = vmatmul.msk.f32.vlgmr.msra.gmra.mxu1 %vm225_vm4, %v465_v43  ;;  %v7230_v43 = vld [vmem:[%s11628_s5 + $0xb0] sm:$0xff]  ;;  %v7229_v44 = vld [vmem:[%s11628_s5 + $0xa8] sm:$0xff] }
  0xce   :  { %v743_v49 = vrot.slane %v511_v46, 1  ;;  %v7227_v46 = vld [vmem:[%s11628_s5 + $0x98] sm:$0xff] }
  0xd0   :  { %7214 = vmatpush.xpose.msk.msrb.mxu0 %vm225_vm4, %v743_v49  ;;  %v744_v50 = vsel %vm78_vm0, %v742_v48, %v743_v49  ;;  %v7225_v48 = vld [vmem:[%s11628_s5 + $0x88] sm:$0xff] }
  0xd1   :  { %7198 = vmatmul.msk.f32.gmra.mxu3 %vm113_vm2, %v8614_v40 }
  0xd4   :  { %7215 = vmatpush.xpose.msk.msrb.mxu0 %vm225_vm4, %v744_v50  ;;  %v7224_v50 = vld [vmem:[%s11628_s5 + $0x80] sm:$0xff] }
  0xd5   :  { %7207 = vmatmul.msk.f32.gmra.mxu1 %vm225_vm4, %v468_v52 }
  0xd9   :  { %7199 = vmatmul.msk.f32.gmra.mxu3 %vm113_vm2, %v8590_v33 }
 0x123   :  { %v252_v29 = vpop.f32.mrf.mxu3 }
 0x12b   :  { %v8748_v31 = vpop.f32.mrf.mxu3 }
 0x12c   :  { %7211 = vmatpush.msk.msrb.mxu3 %vm96_vm1, %v8748_v31  ;;  %v861_v18 = vrot.slane %v8748_v31, 1  ;;  %v7243_v31 = vld [vmem:[%s11624_s23 + $0xb8] sm:$0xff] }
 0x12e   :  { %729 = vmatpush.msrb.mxu3 %v252_v29 }
 0x130   :  { %918 = vmatpush.msra.mxu3 %v7231_v42 }
 0x132   :  { %919 = vmatpush.msra.mxu3 %v7230_v43 }
 0x134   :  { %v8758_v37 = vpop.f32.mrf.mxu3  ;;  %v8781_v7 = vpop.f32.mrf.mxu0  ;;  %920 = vmatpush.msra.mxu3 %v7229_v44 }
 0x135   :  { %v862_v17 = vrot.slane %v8758_v37, 1  ;;  %v7239_v37 = vld [vmem:[%s11624_s23 + $0x98] sm:$0xff] }
 0x137   :  { %v863_v19 = vsel %vm78_vm0, %v861_v18, %v862_v17 }
 0x13c   :  { %v290_v45 = vpop.f32.mrf.mxu3  ;;  %v8787_v12 = vpop.f32.mrf.mxu0 }
 0x13d   :  { %v297_v47 = vsel %vm296_vm5, %v290_v45, -inf  ;;  %v388_v30 = vsel %vm300_vm6, %v8787_v12, -inf }
 0x13e   :  { %298 = vmax.xlane.f32.xlu0 %v297_v47  ;;  %v7226_v47 = vld [vmem:[%s11628_s5 + $0x90] sm:$0xff] }
 0x144   :  { %v293_v53 = vpop.f32.mrf.mxu3 }
 0x145   :  { %v301_v54 = vsel %vm300_vm6, %v293_v53, -inf }
 0x146   :  { %302 = vmax.xlane.f32.xlu0 %v301_v54 }
 0x14a   :  { %v8808_v28 = vpop.f32.mrf.mxu1 }
 0x14b   :  { %v625_v29 = vsel %vm296_vm5, %v8808_v28, -inf }
 0x14c   :  { %v544_v56 = vpop.f32.mrf.mxu3 }
 0x14d   :  { %v545_v57 = vadd.f32 %v8027_v55, %v544_v56 }
 0x14f   :  { %7201 = vmatmul.msk.f32.vlgmr.msra.gmra.mxu0 %vm225_vm4, %v545_v57 }
 0x150   :  { %958 = vmatpush.msra.mxu0 %v7243_v31 }
 0x152   :  { %959 = vmatpush.msra.mxu0 %v7242_v32  ;;  %v385_v32 = vsel %vm296_vm5, %v8781_v7, -inf }
 0x154   :  { %v547_v58 = vpop.f32.mrf.mxu3  ;;  %960 = vmatpush.msra.mxu0 %v7241_v34 }
 0x155   :  { %v548_v59 = vadd.f32 %v8027_v55, %v547_v58 }
 0x156   :  { %961 = vmatpush.msra.mxu0 %v7240_v36 }
 0x157   :  { %7202 = vmatmul.msk.f32.gmra.mxu0 %vm225_vm4, %v548_v59 }
 0x158   :  { %962 = vmatpush.msra.mxu0 %v7239_v37 }
 0x15a   :  { %963 = vmatpush.msra.mxu0 %v7238_v38 }
 0x15c   :  { %v550_v61 = vpop.f32.mrf.mxu3  ;;  %964 = vmatpush.msra.mxu0 %v7237_v39 }
 0x15d   :  { %v551_v63 = vadd.f32 %v8027_v55, %v550_v61 }
 0x15e   :  { %965 = vmatpush.msra.mxu0 %v7236_v41 }
 0x15f   :  { %7203 = vmatmul.msk.f32.gmra.mxu0 %vm225_vm4, %v551_v63 }
 0x167   :  { %7216 = vmatmul.msk.f32.vlgmr.msrb.gmra.mxu0 %vm225_vm4, %v740_v2 }
 0x16f   :  { %7217 = vmatmul.msk.f32.gmra.mxu0 %vm225_vm4, %v739_v1 }
 0x177   :  { %7245 = vmatmul.msk.f32.vlgmr.msra.gmra.mxu0 %vm113_vm2, %v8596_v35 }
 0x17f   :  { %7246 = vmatmul.msk.f32.gmra.mxu0 %vm113_vm2, %v8614_v40 }
 0x187   :  { %7247 = vmatmul.msk.f32.gmra.mxu0 %vm113_vm2, %v8590_v33 }
 0x1b1   :  { %v299_v3 = vpop.xlane.xlu0 %298 }
 0x1b2   :  { %v304_v4 = vsub.f32 %v290_v45, %v299_v3  ;;  %v7228_v45 = vld [vmem:[%s11628_s5 + $0xa0] sm:$0xff] }
 0x1b3   :  { %921 = vmatpush.msra.mxu3 %v7228_v45 }
 0x1b4   :  { %v306_v5 = vmul.f32 1.442695, %v304_v4 }
 0x1b5   :  { %922 = vmatpush.msra.mxu3 %v7227_v46 }
 0x1b6   :  { %8087 = vpow2.f32 %v306_v5 }
 0x1b7   :  { %923 = vmatpush.msra.mxu3 %v7226_v47  ;;  %v7255_v47 = vld [vmem:[%s11595_s7 + $0xb8] sm:$0xff] }
 0x1b9   :  { %v303_v6 = vpop.xlane.xlu0 %302  ;;  %924 = vmatpush.msra.mxu3 %v7225_v48  ;;  %v7254_v48 = vld [vmem:[%s11595_s7 + $0xb0] sm:$0xff] }
 0x1ba   :  { %v305_v8 = vsub.f32 %v293_v53, %v303_v6 }
 0x1bb   :  { %925 = vmatpush.msra.mxu3 %v7224_v50  ;;  %v7252_v50 = vld [vmem:[%s11595_s7 + $0xa0] sm:$0xff] }
 0x1bc   :  { %v8783_v9 = vpop.eup %8087  ;;  %v308_v10 = vmul.f32 1.442695, %v305_v8 }
 0x1bd   :  { %v310_v11 = vsel %vm296_vm5, %v8783_v9, 0.0 }
 0x1be   :  { %8089 = vpow2.f32 %v308_v10  ;;  %311 = vadd.xlane.f32.xlu1 %v310_v11 }
 0x1c4   :  { %v8789_v13 = vpop.eup %8089 }
 0x1c5   :  { %v313_v14 = vsel %vm300_vm6, %v8789_v13, 0.0 }
 0x1c6   :  { %314 = vadd.xlane.f32.xlu1 %v313_v14 }
 0x1cc   :  { %v581_v15 = vpop.f32.mrf.mxu0 }
 0x1d4   :  { %v584_v16 = vpop.f32.mrf.mxu0 }
 0x1d5   :  { %7208 = vmatpush.msk.msra.mxu2 %vm96_vm1, %v584_v16  ;;  %v825_v20 = vrot.slane %v584_v16, 1 }
 0x1d7   :  { %697 = vmatpush.msra.mxu2 %v581_v15 }
 0x1d9   :  { %7221 = vmatpush.msk.msrb.mxu2 %vm96_vm1, %v862_v17 }
 0x1db   :  { %888 = vmatpush.msrb.mxu2 %v863_v19 }
 0x1dc   :  { %v587_v21 = vpop.f32.mrf.mxu0 }
 0x1dd   :  { %v826_v22 = vrot.slane %v587_v21, 1  ;;  %v8884_v21 = vpop.f32.mrf.mxu1 }
 0x1df   :  { %7218 = vmatpush.msk.msrb.mxu1 %vm96_vm1, %v826_v22  ;;  %v827_v23 = vsel %vm78_vm0, %v825_v20, %v826_v22 }
 0x1e1   :  { %852 = vmatpush.msrb.mxu1 %v827_v23 }
 0x1e3   :  { %998 = vmatpush.msra.mxu1 %v7255_v47 }
 0x1e4   :  { %v8800_v24 = vpop.f32.mrf.mxu0 }
 0x1e5   :  { %v776_v25 = vsel %vm296_vm5, %v8800_v24, -inf  ;;  %999 = vmatpush.msra.mxu1 %v7254_v48 }
 0x1e6   :  { %777 = vmax.xlane.f32.xlu2 %v776_v25  ;;  %v628_v25 = vsel %vm300_vm6, %v8884_v21, -inf }
 0x1ec   :  { %v8804_v26 = vpop.f32.mrf.mxu0 }
 0x1ed   :  { %v779_v27 = vsel %vm300_vm6, %v8804_v26, -inf }
 0x1ee   :  { %780 = vmax.xlane.f32.xlu2 %v779_v27 }
 0x1f4   :  { %v967_v37 = vpop.f32.mrf.mxu0 }
 0x1f6   :  { %626 = vmax.xlane.f32.xlu2 %v625_v29 }
 0x1fc   :  { %v970_v38 = vpop.f32.mrf.mxu0 }
 0x1fe   :  { %389 = vmax.xlane.f32.xlu2 %v388_v30 }
 0x204   :  { %v973_v42 = vpop.f32.mrf.mxu0 }
 0x231   :  { %v312_v49 = vpop.xlane.xlu1 %311 }
 0x232   :  { %8091 = vrcp.f32 %v312_v49  ;;  %v327_v55 = vand.u32 2147483648, %v312_v49  ;;  %v325_v57 = vand.u32 2147483647, %v312_v49  ;;  %vm321_vm8 = vweird.f32 %v312_v49 }
 0x234   :  { %v328_v60 = vor.u32 1.1754944e-38, %v327_v55  ;;  %vm326_vm10 = vcmp.eq.f32.partialorder %v325_v57, 8.507059e+37  ;;  %v7248_v55 = vld [vmem:[%s11595_s7 + $0x80] sm:$0xff] }
 0x235   :  { %v8948_v57 = vld [vmem:[%s11630_s3 + $0x2] ss:$0 sm:$0xff] }
 0x238   :  { %v8092_v51 = vpop.eup %8091 }
 0x239   :  { %v317_v52 = vmul.f32 %v8092_v51, %v312_v49  ;;  %v315_v53 = vpop.xlane.xlu1 %314  ;;  %vm322_vm7 = vweird.f32 %v8092_v51  ;;  %v7253_v49 = vld [vmem:[%s11595_s7 + $0xa8] sm:$0xff] }
 0x23a   :  { %8093 = vrcp.f32 %v315_v53  ;;  %vm323_vm9 = vmor %vm321_vm8, %vm322_vm7  ;;  %v342_v2 = vand.u32 2147483648, %v315_v53  ;;  %v340_v4 = vand.u32 2147483647, %v315_v53  ;;  %vm336_vm12 = vweird.f32 %v315_v53  ;;  %1000 = vmatpush.msra.mxu1 %v7253_v49 }
 0x23b   :  { %v318_v54 = vsub.f32 1.0, %v317_v52  ;;  %v7250_v52 = vld [vmem:[%s11595_s7 + $0x90] sm:$0xff] }
 0x23c   :  { %v343_v6 = vor.u32 1.1754944e-38, %v342_v2  ;;  %vm341_vm14 = vcmp.eq.f32.partialorder %v340_v4, 8.507059e+37  ;;  %1001 = vmatpush.msra.mxu1 %v7252_v50 }
 0x23d   :  { %v319_v56 = vmul.f32 %v8092_v51, %v318_v54  ;;  %v7249_v54 = vld [vmem:[%s11595_s7 + $0x88] sm:$0xff] }
 0x23f   :  { %v320_v58 = vadd.f32 %v8092_v51, %v319_v56 }
 0x240   :  { %v8094_v59 = vpop.eup %8093 }
 0x241   :  { %v324_v61 = vsel %vm323_vm9, %v8092_v51, %v320_v58  ;;  %v332_v62 = vmul.f32 %v8094_v59, %v315_v53  ;;  %vm337_vm11 = vweird.f32 %v8094_v59  ;;  %v7251_v51 = vld [vmem:[%s11595_s7 + $0x98] sm:$0xff] }
 0x242   :  { %v329_v63 = vsel %vm326_vm10, %v328_v60, %v324_v61  ;;  %vm338_vm13 = vmor %vm336_vm12, %vm337_vm11  ;;  %1002 = vmatpush.msra.mxu1 %v7251_v51 }
 0x243   :  { %v333_v0 = vsub.f32 1.0, %v332_v62  ;;  %v330_v1 = vmul.f32 %v8783_v9, %v329_v63 }
 0x244   :  { %1003 = vmatpush.msra.mxu1 %v7250_v52 }
 0x245   :  { %7212 = vmatmul.msk.f32.vlgmr.msrb.gmra.mxu3 %vm296_vm5, %v330_v1  ;;  %v334_v3 = vmul.f32 %v8094_v59, %v333_v0 }
 0x246   :  { %1004 = vmatpush.msra.mxu1 %v7249_v54 }
 0x247   :  { %v335_v5 = vadd.f32 %v8094_v59, %v334_v3 }
 0x248   :  { %1005 = vmatpush.msra.mxu1 %v7248_v55 }
 0x249   :  { %v339_v8 = vsel %vm338_vm13, %v8094_v59, %v335_v5 }
 0x24a   :  { %v344_v10 = vsel %vm341_vm14, %v343_v6, %v339_v8 }
 0x24b   :  { %v345_v11 = vmul.f32 %v8789_v13, %v344_v10 }
 0x24d   :  { %7213 = vmatmul.msk.f32.gmra.mxu3 %vm296_vm5, %v345_v11 }
 0x255   :  { %7233 = vmatmul.msk.f32.vlgmr.msra.gmra.mxu3 %vm113_vm2, %v8596_v35 }
 0x259   :  { %v778_v9 = vpop.xlane.xlu2 %777 }
 0x25a   :  { %v782_v14 = vsub.f32 %v8800_v24, %v778_v9 }
 0x25c   :  { %v784_v15 = vmul.f32 1.442695, %v782_v14 }
 0x25d   :  { %7234 = vmatmul.msk.f32.gmra.mxu3 %vm113_vm2, %v8614_v40 }
 0x25e   :  { %8095 = vpow2.f32 %v784_v15 }
 0x261   :  { %v781_v16 = vpop.xlane.xlu2 %780 }
 0x262   :  { %v783_v17 = vsub.f32 %v8804_v26, %v781_v16 }
 0x264   :  { %v8878_v18 = vpop.eup %8095  ;;  %v786_v19 = vmul.f32 1.442695, %v783_v17 }
 0x265   :  { %7235 = vmatmul.msk.f32.gmra.mxu3 %vm113_vm2, %v8590_v33  ;;  %v788_v13 = vsel %vm296_vm5, %v8878_v18, 0.0 }
 0x266   :  { %8097 = vpow2.f32 %v786_v19  ;;  %789 = vadd.xlane.f32.xlu0 %v788_v13 }
 0x269   :  { %v627_v20 = vpop.xlane.xlu2 %626 }
 0x26a   :  { %v631_v22 = vsub.f32 %v8808_v28, %v627_v20 }
 0x26c   :  { %v8887_v23 = vpop.eup %8097  ;;  %v633_v24 = vmul.f32 1.442695, %v631_v22 }
 0x26d   :  { %v791_v26 = vsel %vm300_vm6, %v8887_v23, 0.0 }
 0x26e   :  { %8099 = vpow2.f32 %v633_v24  ;;  %629 = vmax.xlane.f32.xlu0 %v628_v25  ;;  %792 = vadd.xlane.f32.xlu1 %v791_v26 }
 0x271   :  { %v390_v27 = vpop.xlane.xlu2 %389 }
 0x272   :  { %v392_v29 = vsub.f32 %v8787_v12, %v390_v27  ;;  %v8029_v12 = vld [vmem:[%s11629_s6 + $0x2] ss:$0 sm:$0xff] }
 0x273   :  { %v971_v39 = vadd.f32 %v8029_v12, %v970_v38  ;;  %v968_v41 = vadd.f32 %v8029_v12, %v967_v37  ;;  %v8909_v43 = vadd.f32 %v8029_v12, %v973_v42 }
 0x274   :  { %v8894_v30 = vpop.eup %8099  ;;  %v395_v31 = vmul.f32 1.442695, %v392_v29 }
 0x275   :  { %v637_v28 = vsel %vm296_vm5, %v8894_v30, 0.0  ;;  %7264 = vmatpush.xpose.msk.msrb.mxu3 %vm225_vm4, %v971_v39  ;;  %v1175_v44 = vrot.slane %v971_v39, 1  ;;  %v1176_v45 = vrot.slane %v8909_v43, 1 }
 0x276   :  { %8101 = vpow2.f32 %v395_v31  ;;  %638 = vadd.xlane.f32.xlu0 %v637_v28  ;;  %386 = vmax.xlane.f32.xlu1 %v385_v32 }
 0x277   :  { %v8915_v46 = vsel %vm78_vm0, %v1175_v44, %v1176_v45 }
 0x279   :  { %7265 = vmatpush.xpose.msk.msrb.mxu3 %vm225_vm4, %v968_v41 }
 0x27c   :  { %v8900_v34 = vpop.eup %8101 }
 0x27d   :  { %v400_v36 = vsel %vm300_vm6, %v8900_v34, 0.0 }
 0x27e   :  { %401 = vadd.xlane.f32.xlu0 %v400_v36 }
 0x2c8   :  { %v8935_v53 = vpop.f32.mrf.mxu3 }
 0x2d0   :  { %v8943_v56 = vpop.f32.mrf.mxu3 }
 0x2d8   :  { %v927_v58 = vpop.f32.mrf.mxu3 }
 0x2d9   :  { %v928_v59 = vadd.f32 %v8948_v57, %v927_v58  ;;  %v790_v60 = vpop.xlane.xlu0 %789 }
 0x2da   :  { %8103 = vrcp.f32 %v790_v60  ;;  %v805_v8 = vand.u32 2147483648, %v790_v60  ;;  %v803_v10 = vand.u32 2147483647, %v790_v60  ;;  %vm799_vm3 = vweird.f32 %v790_v60 }
 0x2db   :  { %7266 = vmatmul.msk.f32.vlgmr.msrb.gmra.mxu3 %vm225_vm4, %v928_v59 }
 0x2dc   :  { %v806_v15 = vor.u32 1.1754944e-38, %v805_v8  ;;  %vm804_vm8 = vcmp.eq.f32.partialorder %v803_v10, 8.507059e+37 }
 0x2e0   :  { %v8104_v61 = vpop.eup %8103  ;;  %v930_v62 = vpop.f32.mrf.mxu3 }
 0x2e1   :  { %v795_v63 = vmul.f32 %v8104_v61, %v790_v60  ;;  %v8953_v0 = vadd.f32 %v8948_v57, %v930_v62  ;;  %v793_v1 = vpop.xlane.xlu1 %792  ;;  %v630_v2 = vpop.xlane.xlu0 %629  ;;  %vm800_vm15 = vweird.f32 %v8104_v61 }
 0x2e2   :  { %8105 = vrcp.f32 %v793_v1  ;;  %v632_v3 = vsub.f32 %v8884_v21, %v630_v2  ;;  %vm801_vm7 = vmor %vm799_vm3, %vm800_vm15  ;;  %v820_v24 = vand.u32 2147483648, %v793_v1  ;;  %v818_v31 = vand.u32 2147483647, %v793_v1 }
 0x2e3   :  { %v796_v4 = vsub.f32 1.0, %v795_v63  ;;  %7267 = vmatmul.msk.f32.gmra.mxu3 %vm225_vm4, %v8953_v0  ;;  %vm814_vm10 = vweird.f32 %v793_v1  ;;  %v1171_v52 = vrot.slane %v8953_v0, 1 }
 0x2e4   :  { %v635_v5 = vmul.f32 1.442695, %v632_v3  ;;  %v821_v32 = vor.u32 1.1754944e-38, %v820_v24  ;;  %vm819_vm12 = vcmp.eq.f32.partialorder %v818_v31, 8.507059e+37 }
 0x2e5   :  { %v797_v6 = vmul.f32 %v8104_v61, %v796_v4 }
 0x2e6   :  { %8107 = vpow2.f32 %v635_v5 }
 0x2e7   :  { %v798_v11 = vadd.f32 %v8104_v61, %v797_v6 }
 0x2e8   :  { %v8106_v9 = vpop.eup %8105  ;;  %v933_v49 = vpop.f32.mrf.mxu3 }
 0x2e9   :  { %v802_v14 = vsel %vm801_vm7, %v8104_v61, %v798_v11  ;;  %v810_v16 = vmul.f32 %v8106_v9, %v793_v1  ;;  %v387_v17 = vpop.xlane.xlu1 %386  ;;  %v639_v19 = vpop.xlane.xlu0 %638  ;;  %vm815_vm9 = vweird.f32 %v8106_v9  ;;  %v934_v50 = vadd.f32 %v8948_v57, %v933_v49 }
 0x2ea   :  { %v391_v13 = vsub.f32 %v8781_v7, %v387_v17  ;;  %8109 = vrcp.f32 %v639_v19  ;;  %v807_v21 = vsel %vm804_vm8, %v806_v15, %v802_v14  ;;  %vm816_vm11 = vmor %vm814_vm10, %vm815_vm9  ;;  %v654_v41 = vand.u32 2147483648, %v639_v19 }
 0x2eb   :  { %v811_v20 = vsub.f32 1.0, %v810_v16  ;;  %v808_v26 = vmul.f32 %v8878_v18, %v807_v21  ;;  %v652_v43 = vand.u32 2147483647, %v639_v19  ;;  %vm648_vm14 = vweird.f32 %v639_v19 }
 0x2ec   :  { %v8959_v22 = vpop.eup %8107  ;;  %v393_v25 = vmul.f32 1.442695, %v391_v13  ;;  %v655_v47 = vor.u32 1.1754944e-38, %v654_v41  ;;  %v1172_v51 = vrot.slane %v934_v50, 1 }
 0x2ed   :  { %v812_v27 = vmul.f32 %v8106_v9, %v811_v20  ;;  %v640_v29 = vsel %vm300_vm6, %v8959_v22, 0.0  ;;  %7219 = vmatmul.msk.f32.vlgmr.msrb.gmra.mxu1 %vm296_vm5, %v808_v26  ;;  %vm653_vm3 = vcmp.eq.f32.partialorder %v652_v43, 8.507059e+37  ;;  %v7260_v26 = vld [vmem:[%s11597_s9 + $0x10] sm:$0xff]  ;;  %v8031_v43 = vld [vmem:[%s11596_s8 + $0x2] ss:$0 sm:$0xff] }
 0x2ee   :  { %8111 = vpow2.f32 %v393_v25  ;;  %641 = vadd.xlane.f32.xlu1 %v640_v29  ;;  %7271 = vmatpush.xpose.msk.msrb.mxu1 %vm225_vm4, %v1176_v45  ;;  %v1173_v54 = vsel %vm78_vm0, %v1171_v52, %v1172_v51 }
 0x2ef   :  { %v813_v7 = vadd.f32 %v8106_v9, %v812_v27 }
 0x2f0   :  { %v8110_v28 = vpop.eup %8109 }
 0x2f1   :  { %v644_v18 = vmul.f32 %v8110_v28, %v639_v19  ;;  %v817_v36 = vsel %vm816_vm11, %v8106_v9, %v813_v7  ;;  %vm649_vm13 = vweird.f32 %v8110_v28  ;;  %v402_v58 = vpop.xlane.xlu0 %401 }
 0x2f2   :  { %v822_v37 = vsel %vm819_vm12, %v821_v32, %v817_v36  ;;  %7272 = vmatpush.xpose.msk.msrb.mxu1 %vm225_vm4, %v8915_v46  ;;  %vm650_vm15 = vmor %vm648_vm14, %vm649_vm13  ;;  %v427_v36 = vand.u32 2147483647, %v402_v58 }
 0x2f3   :  { %v645_v12 = vsub.f32 1.0, %v644_v18  ;;  %v823_v38 = vmul.f32 %v8887_v23, %v822_v37 }
 0x2f4   :  { %v8971_v39 = vpop.eup %8111 }
 0x2f5   :  { %v646_v42 = vmul.f32 %v8110_v28, %v645_v12  ;;  %v397_v44 = vsel %vm296_vm5, %v8971_v39, 0.0  ;;  %7220 = vmatmul.msk.f32.gmra.mxu1 %vm296_vm5, %v823_v38 }
 0x2f6   :  { %398 = vadd.xlane.f32.xlu2 %v397_v44 }
 0x2f7   :  { %v647_v45 = vadd.f32 %v8110_v28, %v646_v42 }
 0x2f9   :  { %v651_v48 = vsel %vm650_vm15, %v8110_v28, %v647_v45 }
 0x2fa   :  { %v656_v46 = vsel %vm653_vm3, %v655_v47, %v651_v48  ;;  %vm423_vm3 = vweird.f32 %v402_v58 }
 0x2fb   :  { %v657_v23 = vmul.f32 %v8894_v30, %v656_v46 }
 0x2fd   :  { %7209 = vmatmul.msk.f32.vlgmr.msra.gmra.mxu2 %vm296_vm5, %v657_v23  ;;  %7257 = vmatmul.msk.f32.vlgmr.msra.gmra.mxu1 %vm113_vm2, %v8596_v35 }
 0x2fe   :  { %1042 = vmatpush.msra.mxu2 %v7260_v26  ;;  %v7293_v26 = vld [vmem:[%s11624_s23 + $0xd8] sm:$0xff] }
 0x305   :  { %7258 = vmatmul.msk.f32.gmra.mxu1 %vm113_vm2, %v8614_v40 }
 0x30d   :  { %7259 = vmatmul.msk.f32.gmra.mxu1 %vm113_vm2, %v8590_v33 }
 0x315   :  { %7273 = vmatmul.msk.f32.vlgmr.msrb.gmra.mxu1 %vm225_vm4, %v1173_v54 }
 0x31d   :  { %7274 = vmatmul.msk.f32.gmra.mxu1 %vm225_vm4, %v1172_v51 }
 0x35e   :  { %v8989_v30 = vpop.f32.mrf.mxu3 }
 0x35f   :  { %v1088_v55 = vsel %vm296_vm5, %v8989_v30, -inf }
 0x360   :  { %1089 = vmax.xlane.f32.xlu1 %v1088_v55 }
 0x361   :  { %v642_v57 = vpop.xlane.xlu1 %641 }
 0x362   :  { %8113 = vrcp.f32 %v642_v57  ;;  %v669_v3 = vand.u32 2147483648, %v642_v57  ;;  %v667_v6 = vand.u32 2147483647, %v642_v57  ;;  %vm663_vm8 = vweird.f32 %v642_v57 }
 0x363   :  { %8115 = vrcp.f32 %v402_v58 }
 0x364   :  { %v670_v11 = vor.u32 1.1754944e-38, %v669_v3  ;;  %vm668_vm10 = vcmp.eq.f32.partialorder %v667_v6, 8.507059e+37 }
 0x366   :  { %v8993_v59 = vpop.f32.mrf.mxu3 }
 0x367   :  { %v1091_v60 = vsel %vm300_vm6, %v8993_v59, -inf }
 0x368   :  { %v8114_v61 = vpop.eup %8113  ;;  %1092 = vmax.xlane.f32.xlu2 %v1091_v60 }
 0x369   :  { %v659_v62 = vmul.f32 %v8114_v61, %v642_v57  ;;  %v399_v63 = vpop.xlane.xlu2 %398  ;;  %v8116_v0 = vpop.eup %8115  ;;  %vm664_vm7 = vweird.f32 %v8114_v61 }
 0x36a   :  { %8117 = vrcp.f32 %v399_v63  ;;  %v8997_v2 = vpop.f32.mrf.mxu1  ;;  %v419_v4 = vmul.f32 %v8116_v0, %v402_v58  ;;  %vm665_vm9 = vmor %vm663_vm8, %vm664_vm7  ;;  %v414_v20 = vand.u32 2147483648, %v399_v63  ;;  %v412_v25 = vand.u32 2147483647, %v399_v63 }
 0x36b   :  { %v660_v1 = vsub.f32 1.0, %v659_v62  ;;  %vm408_vm12 = vweird.f32 %v399_v63  ;;  %vm424_vm15 = vweird.f32 %v8116_v0  ;;  %vm428_vm8 = vcmp.eq.f32.partialorder %v427_v36, 8.507059e+37 }
 0x36c   :  { %v420_v9 = vsub.f32 1.0, %v419_v4  ;;  %v415_v29 = vor.u32 1.1754944e-38, %v414_v20  ;;  %vm413_vm14 = vcmp.eq.f32.partialorder %v412_v25, 8.507059e+37  ;;  %vm425_vm7 = vmor %vm423_vm3, %vm424_vm15  ;;  %v7295_v20 = vld [vmem:[%s11624_s23 + $0xe8] sm:$0xff]  ;;  %v7282_v25 = vld [vmem:[%s11628_s5 + $0xe0] sm:$0xff] }
 0x36d   :  { %v661_v5 = vmul.f32 %v8114_v61, %v660_v1 }
 0x36e   :  { %v421_v21 = vmul.f32 %v8116_v0, %v420_v9 }
 0x36f   :  { %v662_v8 = vadd.f32 %v8114_v61, %v661_v5 }
 0x370   :  { %v8118_v10 = vpop.eup %8117  ;;  %v422_v7 = vadd.f32 %v8116_v0, %v421_v21  ;;  %v7283_v21 = vld [vmem:[%s11628_s5 + $0xe8] sm:$0xff] }
 0x371   :  { %v404_v14 = vmul.f32 %v8118_v10, %v399_v63  ;;  %v666_v15 = vsel %vm665_vm9, %v8114_v61, %v662_v8  ;;  %vm409_vm11 = vweird.f32 %v8118_v10 }
 0x372   :  { %v671_v16 = vsel %vm668_vm10, %v670_v11, %v666_v15  ;;  %v8999_v19 = vpop.f32.mrf.mxu1  ;;  %vm410_vm13 = vmor %vm408_vm12, %vm409_vm11  ;;  %v426_v37 = vsel %vm425_vm7, %v8116_v0, %v422_v7  ;;  %v7297_v15 = vld [vmem:[%s11624_s23 + $0xf8] sm:$0xff]  ;;  %v7291_v7 = vld [vmem:[%s11624_s23 + $0xc8] sm:$0xff] }
 0x373   :  { %v405_v17 = vsub.f32 1.0, %v404_v14  ;;  %v672_v13 = vmul.f32 %v8959_v22, %v671_v16  ;;  %v429_v22 = vand.u32 2147483648, %v402_v58  ;;  %v7285_v16 = vld [vmem:[%s11628_s5 + $0xf8] sm:$0xff] }
 0x374   :  { %1317 = vmatpush.msra.mxu3 %v7285_v16 }
 0x375   :  { %v406_v24 = vmul.f32 %v8118_v10, %v405_v17  ;;  %7210 = vmatmul.msk.f32.gmra.mxu2 %vm296_vm5, %v672_v13  ;;  %v430_v12 = vor.u32 1.1754944e-38, %v429_v22  ;;  %v7296_v17 = vld [vmem:[%s11624_s23 + $0xf0] sm:$0xff] }
 0x376   :  { %v7284_v13 = vld [vmem:[%s11628_s5 + $0xf0] sm:$0xff] }
 0x377   :  { %v407_v27 = vadd.f32 %v8118_v10, %v406_v24  ;;  %v431_v38 = vsel %vm428_vm8, %v430_v12, %v426_v37  ;;  %1318 = vmatpush.msra.mxu3 %v7284_v13  ;;  %v7294_v24 = vld [vmem:[%s11624_s23 + $0xe0] sm:$0xff] }
 0x378   :  { %v432_v42 = vmul.f32 %v8900_v34, %v431_v38 }
 0x379   :  { %v411_v31 = vsel %vm410_vm13, %v8118_v10, %v407_v27  ;;  %1319 = vmatpush.msra.mxu3 %v7283_v21  ;;  %v7281_v27 = vld [vmem:[%s11628_s5 + $0xd8] sm:$0xff] }
 0x37a   :  { %v416_v28 = vsel %vm413_vm14, %v415_v29, %v411_v31  ;;  %v1007_v32 = vpop.f32.mrf.mxu1  ;;  %v7292_v29 = vld [vmem:[%s11624_s23 + $0xd0] sm:$0xff]  ;;  %v7309_v21 = vld [vmem:[%s11595_s7 + $0xf8] sm:$0xff] }
 0x37b   :  { %v417_v18 = vmul.f32 %v8971_v39, %v416_v28  ;;  %v1008_v44 = vadd.f32 %v8031_v43, %v1007_v32  ;;  %1320 = vmatpush.msra.mxu3 %v7282_v25  ;;  %v7280_v31 = vld [vmem:[%s11628_s5 + $0xd0] sm:$0xff]  ;;  %v7279_v28 = vld [vmem:[%s11628_s5 + $0xc8] sm:$0xff]  ;;  %v7290_v32 = vld [vmem:[%s11624_s23 + $0xc0] sm:$0xff]  ;;  %1397 = vmatpush.msra.mxu1 %v7309_v21 }
 0x37c   :  { %v7307_v25 = vld [vmem:[%s11595_s7 + $0xe8] sm:$0xff] }
 0x37d   :  { %7222 = vmatmul.msk.f32.vlgmr.msrb.gmra.mxu2 %vm296_vm5, %v417_v18  ;;  %1321 = vmatpush.msra.mxu3 %v7281_v27  ;;  %v7278_v18 = vld [vmem:[%s11628_s5 + $0xc0] sm:$0xff]  ;;  %v7304_v27 = vld [vmem:[%s11595_s7 + $0xd0] sm:$0xff] }
 0x37f   :  { %1322 = vmatpush.msra.mxu3 %v7280_v31  ;;  %v7302_v31 = vld [vmem:[%s11595_s7 + $0xc0] sm:$0xff] }
 0x380   :  { %v9031_v63 = vpop.f32.mrf.mxu2 }
 0x381   :  { %1323 = vmatpush.msra.mxu3 %v7279_v28 }
 0x382   :  { %v1010_v41 = vpop.f32.mrf.mxu1 }
 0x383   :  { %v1011_v39 = vadd.f32 %v8031_v43, %v1010_v41  ;;  %1324 = vmatpush.msra.mxu3 %v7278_v18 }
 0x384   :  { %7287 = vmatmul.msk.f32.vlgmr.msra.gmra.mxu3 %vm113_vm2, %v8596_v35 }
 0x385   :  { %7223 = vmatmul.msk.f32.gmra.mxu2 %vm296_vm5, %v432_v42 }
 0x38a   :  { %v1013_v45 = vpop.f32.mrf.mxu1 }
 0x38b   :  { %v1014_v46 = vadd.f32 %v8031_v43, %v1013_v45 }
 0x38c   :  { %7288 = vmatmul.msk.f32.gmra.mxu3 %vm113_vm2, %v8614_v40 }
 0x38d   :  { %7261 = vmatmul.msk.f32.vlgmr.msra.gmra.mxu2 %vm225_vm4, %v1008_v44 }
 0x392   :  { %v1203_v47 = vpop.f32.mrf.mxu1 }
 0x393   :  { %v1209_v48 = vsel %vm296_vm5, %v1203_v47, -inf }
 0x394   :  { %1210 = vmax.xlane.f32.xlu2 %v1209_v48  ;;  %7289 = vmatmul.msk.f32.gmra.mxu3 %vm113_vm2, %v8590_v33 }
 0x395   :  { %7262 = vmatmul.msk.f32.gmra.mxu2 %vm225_vm4, %v1011_v39 }
 0x39a   :  { %v9023_v58 = vpop.f32.mrf.mxu1 }
 0x39b   :  { %v1212_v60 = vsel %vm300_vm6, %v9023_v58, -inf }
 0x39d   :  { %7263 = vmatmul.msk.f32.gmra.mxu2 %vm225_vm4, %v1014_v46 }
 0x3d3   :  { %v1090_v34 = vpop.xlane.xlu1 %1089 }
 0x3d4   :  { %v1094_v23 = vsub.f32 %v8989_v30, %v1090_v34 }
 0x3d6   :  { %v1096_v49 = vmul.f32 1.442695, %v1094_v23 }
 0x3d8   :  { %8119 = vpow2.f32 %v1096_v49 }
 0x3db   :  { %v1093_v50 = vpop.xlane.xlu2 %1092 }
 0x3dc   :  { %v1095_v51 = vsub.f32 %v8993_v59, %v1093_v50 }
 0x3de   :  { %v9019_v52 = vpop.eup %8119  ;;  %v1098_v54 = vmul.f32 1.442695, %v1095_v51 }
 0x3df   :  { %v1100_v55 = vsel %vm296_vm5, %v9019_v52, 0.0 }
 0x3e0   :  { %8121 = vpow2.f32 %v1098_v54  ;;  %1101 = vadd.xlane.f32.xlu0 %v1100_v55 }
 0x3e6   :  { %v9025_v57 = vpop.eup %8121 }
 0x3e7   :  { %v1103_v30 = vsel %vm300_vm6, %v9025_v57, 0.0 }
 0x3e8   :  { %1104 = vadd.xlane.f32.xlu1 %v1103_v30  ;;  %1213 = vmax.xlane.f32.xlu0 %v1212_v60 }
 0x3f8   :  { %v9037_v3 = vpop.f32.mrf.mxu2 }
 0x400   :  { %v9039_v4 = vpop.f32.mrf.mxu2 }
 0x407   :  { %v1211_v59 = vpop.xlane.xlu2 %1210 }
 0x408   :  { %v1215_v61 = vsub.f32 %v1203_v47, %v1211_v59  ;;  %v9041_v5 = vpop.f32.mrf.mxu2 }
 0x40a   :  { %v1217_v62 = vmul.f32 1.442695, %v1215_v61 }
 0x40c   :  { %8123 = vpow2.f32 %v1217_v62 }
 0x410   :  { %v1044_v6 = vpop.f32.mrf.mxu2 }
 0x412   :  { %v9033_v0 = vpop.eup %8123 }
 0x413   :  { %v1221_v1 = vsel %vm296_vm5, %v9033_v0, 0.0 }
 0x414   :  { %1222 = vadd.xlane.f32.xlu1 %v1221_v1 }
 0x418   :  { %v1047_v8 = vpop.f32.mrf.mxu2 }
 0x419   :  { %7268 = vmatpush.msk.msrb.mxu0 %vm96_vm1, %v1047_v8  ;;  %v1258_v10 = vrot.slane %v1047_v8, 1 }
 0x41b   :  { %1160 = vmatpush.msrb.mxu0 %v1044_v6 }
 0x41d   :  { %1357 = vmatpush.msra.mxu0 %v7297_v15 }
 0x41f   :  { %1358 = vmatpush.msra.mxu0 %v7296_v17 }
 0x420   :  { %v1050_v11 = vpop.f32.mrf.mxu2 }
 0x421   :  { %v1259_v9 = vrot.slane %v1050_v11, 1  ;;  %1359 = vmatpush.msra.mxu0 %v7295_v20 }
 0x423   :  { %7275 = vmatpush.msk.msrb.mxu2 %vm96_vm1, %v1259_v9  ;;  %v1260_v14 = vsel %vm78_vm0, %v1258_v10, %v1259_v9  ;;  %1360 = vmatpush.msra.mxu0 %v7294_v24  ;;  %v7308_v24 = vld [vmem:[%s11595_s7 + $0xf0] sm:$0xff] }
 0x424   :  { %1398 = vmatpush.msra.mxu1 %v7308_v24 }
 0x425   :  { %1285 = vmatpush.msrb.mxu2 %v1260_v14  ;;  %1361 = vmatpush.msra.mxu0 %v7293_v26  ;;  %v7305_v26 = vld [vmem:[%s11595_s7 + $0xd8] sm:$0xff] }
 0x426   :  { %1399 = vmatpush.msra.mxu1 %v7307_v25 }
 0x427   :  { %1362 = vmatpush.msra.mxu0 %v7292_v29  ;;  %v7303_v29 = vld [vmem:[%s11595_s7 + $0xc8] sm:$0xff] }
 0x429   :  { %1363 = vmatpush.msra.mxu0 %v7291_v7 }
 0x42b   :  { %1364 = vmatpush.msra.mxu0 %v7290_v32 }
 0x453   :  { %v1102_v22 = vpop.xlane.xlu0 %1101 }
 0x454   :  { %8125 = vrcp.f32 %v1102_v22  ;;  %v1117_v43 = vand.u32 2147483648, %v1102_v22  ;;  %v1115_v39 = vand.u32 2147483647, %v1102_v22  ;;  %vm1111_vm10 = vweird.f32 %v1102_v22 }
 0x456   :  { %v1118_v46 = vor.u32 1.1754944e-38, %v1117_v43  ;;  %vm1116_vm12 = vcmp.eq.f32.partialorder %v1115_v39, 8.507059e+37  ;;  %v1326_v39 = vpop.f32.mrf.mxu3 }
 0x45a   :  { %v8126_v36 = vpop.eup %8125 }
 0x45b   :  { %v1107_v37 = vmul.f32 %v8126_v36, %v1102_v22  ;;  %v1105_v12 = vpop.xlane.xlu1 %1104  ;;  %v1214_v38 = vpop.xlane.xlu0 %1213  ;;  %vm1112_vm9 = vweird.f32 %v8126_v36 }
 0x45c   :  { %8127 = vrcp.f32 %v1105_v12  ;;  %v1216_v41 = vsub.f32 %v9023_v58, %v1214_v38  ;;  %vm1113_vm11 = vmor %vm1111_vm10, %vm1112_vm9  ;;  %v1132_v55 = vand.u32 2147483648, %v1105_v12  ;;  %v1130_v60 = vand.u32 2147483647, %v1105_v12 }
 0x45d   :  { %v1108_v42 = vsub.f32 1.0, %v1107_v37  ;;  %vm1126_vm14 = vweird.f32 %v1105_v12 }
 0x45e   :  { %v1219_v44 = vmul.f32 1.442695, %v1216_v41  ;;  %v1133_v61 = vor.u32 1.1754944e-38, %v1132_v55  ;;  %vm1131_vm3 = vcmp.eq.f32.partialorder %v1130_v60, 8.507059e+37 }
 0x45f   :  { %v1109_v45 = vmul.f32 %v8126_v36, %v1108_v42 }
 0x460   :  { %8129 = vpow2.f32 %v1219_v44 }
 0x461   :  { %v1110_v47 = vadd.f32 %v8126_v36, %v1109_v45 }
 0x462   :  { %v8128_v48 = vpop.eup %8127 }
 0x463   :  { %v1114_v34 = vsel %vm1113_vm11, %v8126_v36, %v1110_v47  ;;  %v1122_v23 = vmul.f32 %v8128_v48, %v1105_v12  ;;  %vm1127_vm13 = vweird.f32 %v8128_v48 }
 0x464   :  { %v1119_v49 = vsel %vm1116_vm12, %v1118_v46, %v1114_v34  ;;  %vm1128_vm15 = vmor %vm1126_vm14, %vm1127_vm13  ;;  %v8032_v46 = vld [vmem:[%s11629_s6 + $0x3] ss:$0 sm:$0xff] }
 0x465   :  { %v1123_v50 = vsub.f32 1.0, %v1122_v23  ;;  %v1120_v51 = vmul.f32 %v9019_v52, %v1119_v49  ;;  %v8033_v49 = vld [vmem:[%s11630_s3 + $0x3] ss:$0 sm:$0xff] }
 0x466   :  { %v9100_v54 = vpop.eup %8129 }
 0x467   :  { %v1124_v58 = vmul.f32 %v8128_v48, %v1123_v50  ;;  %7269 = vmatmul.msk.f32.vlgmr.msrb.gmra.mxu0 %vm296_vm5, %v1120_v51  ;;  %v1224_v30 = vsel %vm300_vm6, %v9100_v54, 0.0  ;;  %v1327_v51 = vadd.f32 %v8033_v49, %v1326_v39 }
 0x468   :  { %1225 = vadd.xlane.f32.xlu2 %v1224_v30 }
 0x469   :  { %v1125_v59 = vadd.f32 %v8128_v48, %v1124_v58 }
 0x46b   :  { %v1129_v52 = vsel %vm1128_vm15, %v8128_v48, %v1125_v59  ;;  %v1329_v48 = vpop.f32.mrf.mxu3 }
 0x46c   :  { %v1134_v62 = vsel %vm1131_vm3, %v1133_v61, %v1129_v52  ;;  %v1330_v58 = vadd.f32 %v8033_v49, %v1329_v48 }
 0x46d   :  { %v1135_v1 = vmul.f32 %v9025_v57, %v1134_v62 }
 0x46e   :  { %v1570_v61 = vrot.slane %v1330_v58, 1 }
 0x46f   :  { %7270 = vmatmul.msk.f32.gmra.mxu0 %vm296_vm5, %v1135_v1 }
 0x477   :  { %7299 = vmatmul.msk.f32.vlgmr.msra.gmra.mxu0 %vm113_vm2, %v8596_v35 }
 0x47f   :  { %7300 = vmatmul.msk.f32.gmra.mxu0 %vm113_vm2, %v8614_v40 }
 0x487   :  { %7301 = vmatmul.msk.f32.gmra.mxu0 %vm113_vm2, %v8590_v33  ;;  %v1223_v6 = vpop.xlane.xlu1 %1222 }
 0x488   :  { %8131 = vrcp.f32 %v1223_v6  ;;  %v1238_v9 = vand.u32 2147483648, %v1223_v6  ;;  %v1236_v57 = vand.u32 2147483647, %v1223_v6  ;;  %vm1232_vm8 = vweird.f32 %v1223_v6 }
 0x48a   :  { %v1239_v16 = vor.u32 1.1754944e-38, %v1238_v9  ;;  %vm1237_vm10 = vcmp.eq.f32.partialorder %v1236_v57, 8.507059e+37  ;;  %v7314_v9 = vld [vmem:[%s11597_s9 + $0x18] sm:$0xff] }
 0x48b   :  { %1441 = vmatpush.msra.mxu2 %v7314_v9  ;;  %v7344_v9 = vld [vmem:[%s11624_s23 + $0x100] sm:$0xff] }
 0x48e   :  { %v8132_v8 = vpop.eup %8131 }
 0x48f   :  { %v1228_v10 = vmul.f32 %v8132_v8, %v1223_v6  ;;  %vm1233_vm7 = vweird.f32 %v8132_v8 }
 0x490   :  { %vm1234_vm9 = vmor %vm1232_vm8, %vm1233_vm7 }
 0x491   :  { %v1229_v11 = vsub.f32 1.0, %v1228_v10  ;;  %v8034_v10 = vld [vmem:[%s11596_s8 + $0x3] ss:$0 sm:$0xff] }
 0x493   :  { %v1230_v14 = vmul.f32 %v8132_v8, %v1229_v11 }
 0x495   :  { %v1231_v15 = vadd.f32 %v8132_v8, %v1230_v14 }
 0x497   :  { %v1235_v17 = vsel %vm1234_vm9, %v8132_v8, %v1231_v15 }
 0x498   :  { %v1240_v13 = vsel %vm1237_vm10, %v1239_v16, %v1235_v17 }
 0x499   :  { %v1241_v20 = vmul.f32 %v9033_v0, %v1240_v13  ;;  %v7306_v0 = vld [vmem:[%s11595_s7 + $0xe0] sm:$0xff] }
 0x49a   :  { %1400 = vmatpush.msra.mxu1 %v7306_v0 }
 0x49b   :  { %7276 = vmatmul.msk.f32.vlgmr.msrb.gmra.mxu2 %vm296_vm5, %v1241_v20 }
 0x49c   :  { %1401 = vmatpush.msra.mxu1 %v7305_v26 }
 0x49e   :  { %1402 = vmatpush.msra.mxu1 %v7304_v27 }
 0x4a0   :  { %1403 = vmatpush.msra.mxu1 %v7303_v29 }
 0x4a2   :  { %1404 = vmatpush.msra.mxu1 %v7302_v31 }
 0x4a3   :  { %7311 = vmatmul.msk.f32.vlgmr.msra.gmra.mxu1 %vm113_vm2, %v8596_v35 }
 0x4ab   :  { %7312 = vmatmul.msk.f32.gmra.mxu1 %vm113_vm2, %v8614_v40 }
 0x4b3   :  { %7313 = vmatmul.msk.f32.gmra.mxu1 %vm113_vm2, %v8590_v33 }
 0x4db   :  { %v1226_v7 = vpop.xlane.xlu2 %1225 }
 0x4dc   :  { %8133 = vrcp.f32 %v1226_v7  ;;  %v1253_v36 = vand.u32 2147483648, %v1226_v7  ;;  %v1251_v12 = vand.u32 2147483647, %v1226_v7  ;;  %vm1247_vm12 = vweird.f32 %v1226_v7 }
 0x4de   :  { %v1254_v41 = vor.u32 1.1754944e-38, %v1253_v36  ;;  %vm1252_vm14 = vcmp.eq.f32.partialorder %v1251_v12, 8.507059e+37 }
 0x4e2   :  { %v8134_v22 = vpop.eup %8133 }
 0x4e3   :  { %v1243_v28 = vmul.f32 %v8134_v22, %v1226_v7  ;;  %vm1248_vm11 = vweird.f32 %v8134_v22 }
 0x4e4   :  { %v9145_v32 = vpop.f32.mrf.mxu0  ;;  %vm1249_vm13 = vmor %vm1247_vm12, %vm1248_vm11 }
 0x4e5   :  { %v1244_v18 = vsub.f32 1.0, %v1243_v28 }
 0x4e7   :  { %v1245_v37 = vmul.f32 %v8134_v22, %v1244_v18 }
 0x4e9   :  { %v1246_v38 = vadd.f32 %v8134_v22, %v1245_v37 }
 0x4eb   :  { %v1250_v42 = vsel %vm1249_vm13, %v8134_v22, %v1246_v38 }
 0x4ec   :  { %v9149_v43 = vpop.f32.mrf.mxu0  ;;  %v1255_v44 = vsel %vm1252_vm14, %v1254_v41, %v1250_v42 }
 0x4ed   :  { %v1256_v45 = vmul.f32 %v9100_v54, %v1255_v44  ;;  %v1332_v54 = vpop.f32.mrf.mxu3 }
 0x4ee   :  { %v1333_v60 = vadd.f32 %v8033_v49, %v1332_v54  ;;  %v7339_v54 = vld [vmem:[%s11628_s5 + $0x138] sm:$0xff] }
 0x4ef   :  { %7277 = vmatmul.msk.f32.gmra.mxu2 %vm296_vm5, %v1256_v45 }
 0x4f0   :  { %v1571_v52 = vrot.slane %v1333_v60, 1  ;;  %v7337_v60 = vld [vmem:[%s11628_s5 + $0x128] sm:$0xff] }
 0x4f2   :  { %v1572_v6 = vsel %vm78_vm0, %v1570_v61, %v1571_v52  ;;  %v7336_v61 = vld [vmem:[%s11628_s5 + $0x120] sm:$0xff] }
 0x4f4   :  { %v1366_v47 = vpop.f32.mrf.mxu0 }
 0x4f5   :  { %v1367_v50 = vadd.f32 %v8032_v46, %v1366_v47 }
 0x4fc   :  { %v1369_v34 = vpop.f32.mrf.mxu0 }
 0x4fd   :  { %v1370_v23 = vadd.f32 %v8032_v46, %v1369_v34 }
 0x4ff   :  { %7318 = vmatpush.xpose.msk.msrb.mxu3 %vm225_vm4, %v1370_v23  ;;  %v1574_v62 = vrot.slane %v1370_v23, 1 }
 0x503   :  { %7319 = vmatpush.xpose.msk.msrb.mxu3 %vm225_vm4, %v1367_v50 }
 0x504   :  { %v1372_v55 = vpop.f32.mrf.mxu0 }
 0x505   :  { %v1373_v30 = vadd.f32 %v8032_v46, %v1372_v55  ;;  %v7350_v55 = vld [vmem:[%s11624_s23 + $0x130] sm:$0xff] }
 0x506   :  { %7320 = vmatmul.msk.f32.vlgmr.msrb.gmra.mxu3 %vm225_vm4, %v1327_v51  ;;  %v7351_v51 = vld [vmem:[%s11624_s23 + $0x138] sm:$0xff] }
 0x507   :  { %v1575_v59 = vrot.slane %v1373_v30, 1  ;;  %1716 = vmatpush.msra.mxu3 %v7339_v54  ;;  %v7349_v30 = vld [vmem:[%s11624_s23 + $0x128] sm:$0xff] }
 0x509   :  { %7325 = vmatpush.xpose.msk.msrb.mxu1 %vm225_vm4, %v1575_v59  ;;  %v1576_v1 = vsel %vm78_vm0, %v1574_v62, %v1575_v59  ;;  %v7348_v59 = vld [vmem:[%s11624_s23 + $0x120] sm:$0xff]  ;;  %v7335_v62 = vld [vmem:[%s11628_s5 + $0x118] sm:$0xff] }
 0x50d   :  { %7326 = vmatpush.xpose.msk.msrb.mxu1 %vm225_vm4, %v1576_v1 }
 0x50e   :  { %7321 = vmatmul.msk.f32.gmra.mxu3 %vm225_vm4, %v1330_v58  ;;  %v7338_v58 = vld [vmem:[%s11628_s5 + $0x130] sm:$0xff] }
 0x50f   :  { %1717 = vmatpush.msra.mxu3 %v7338_v58 }
 0x510   :  { %7327 = vmatmul.msk.f32.vlgmr.msrb.gmra.mxu1 %vm225_vm4, %v1572_v6  ;;  %v7346_v6 = vld [vmem:[%s11624_s23 + $0x110] sm:$0xff] }
 0x511   :  { %1718 = vmatpush.msra.mxu3 %v7337_v60 }
 0x513   :  { %1719 = vmatpush.msra.mxu3 %v7336_v61 }
 0x515   :  { %1720 = vmatpush.msra.mxu3 %v7335_v62 }
 0x518   :  { %7328 = vmatmul.msk.f32.gmra.mxu1 %vm225_vm4, %v1571_v52  ;;  %v7347_v52 = vld [vmem:[%s11624_s23 + $0x118] sm:$0xff] }
 0x51e   :  { %v9197_v39 = vpop.f32.mrf.mxu2 }
 0x520   :  { %v1406_v8 = vpop.f32.mrf.mxu1 }
 0x521   :  { %v1407_v11 = vadd.f32 %v8034_v10, %v1406_v8  ;;  %v7334_v8 = vld [vmem:[%s11628_s5 + $0x110] sm:$0xff] }
 0x522   :  { %1721 = vmatpush.msra.mxu3 %v7334_v8  ;;  %v7359_v8 = vld [vmem:[%s11595_s7 + $0x118] sm:$0xff] }
 0x523   :  { %7315 = vmatmul.msk.f32.vlgmr.msra.gmra.mxu2 %vm225_vm4, %v1407_v11  ;;  %v7333_v11 = vld [vmem:[%s11628_s5 + $0x108] sm:$0xff] }
 0x524   :  { %1722 = vmatpush.msra.mxu3 %v7333_v11  ;;  %v7357_v11 = vld [vmem:[%s11595_s7 + $0x108] sm:$0xff] }
 0x528   :  { %v1409_v14 = vpop.f32.mrf.mxu1 }
 0x529   :  { %v1410_v57 = vadd.f32 %v8034_v10, %v1409_v14  ;;  %v7332_v14 = vld [vmem:[%s11628_s5 + $0x100] sm:$0xff] }
 0x52a   :  { %1723 = vmatpush.msra.mxu3 %v7332_v14 }
 0x52b   :  { %7316 = vmatmul.msk.f32.gmra.mxu2 %vm225_vm4, %v1410_v57  ;;  %7341 = vmatmul.msk.f32.vlgmr.msra.gmra.mxu3 %vm113_vm2, %v8596_v35 }
 0x530   :  { %v1412_v15 = vpop.f32.mrf.mxu1 }
 0x531   :  { %v1413_v16 = vadd.f32 %v8034_v10, %v1412_v15  ;;  %v7345_v10 = vld [vmem:[%s11624_s23 + $0x108] sm:$0xff] }
 0x533   :  { %7317 = vmatmul.msk.f32.gmra.mxu2 %vm225_vm4, %v1413_v16  ;;  %7342 = vmatmul.msk.f32.gmra.mxu3 %vm113_vm2, %v8614_v40 }
 0x53b   :  { %7343 = vmatmul.msk.f32.gmra.mxu3 %vm113_vm2, %v8590_v33 }
 0x572   :  { %v9199_v47 = vpop.f32.mrf.mxu2 }
 0x589   :  { %v1481_v17 = vpop.f32.mrf.mxu3 }
 0x58a   :  { %v1487_v13 = vsel %vm296_vm5, %v1481_v17, -inf }
 0x58b   :  { %1488 = vmax.xlane.f32.xlu0 %v1487_v13 }
 0x58d   :  { %v1602_v24 = vpop.f32.mrf.mxu1 }
 0x58e   :  { %v1608_v25 = vsel %vm296_vm5, %v1602_v24, -inf }
 0x591   :  { %v1484_v20 = vpop.f32.mrf.mxu3 }
 0x592   :  { %v1490_v21 = vsel %vm300_vm6, %v1484_v20, -inf }
 0x593   :  { %1491 = vmax.xlane.f32.xlu1 %v1490_v21 }
 0x595   :  { %v9185_v36 = vpop.f32.mrf.mxu1 }
 0x596   :  { %v1611_v42 = vsel %vm300_vm6, %v9185_v36, -inf }
 0x59b   :  { %1609 = vmax.xlane.f32.xlu1 %v1608_v25 }
 0x5a6   :  { %v1443_v48 = vpop.f32.mrf.mxu2 }
 0x5ae   :  { %v1446_v46 = vpop.f32.mrf.mxu2 }
 0x5af   :  { %7322 = vmatpush.msk.msrb.mxu0 %vm96_vm1, %v1446_v46  ;;  %v1657_v34 = vrot.slane %v1446_v46, 1 }
 0x5b1   :  { %1559 = vmatpush.msrb.mxu0 %v1443_v48 }
 0x5b3   :  { %1756 = vmatpush.msra.mxu0 %v7351_v51 }
 0x5b5   :  { %1757 = vmatpush.msra.mxu0 %v7350_v55 }
 0x5b6   :  { %v1449_v23 = vpop.f32.mrf.mxu2 }
 0x5b7   :  { %v1658_v49 = vrot.slane %v1449_v23, 1  ;;  %1758 = vmatpush.msra.mxu0 %v7349_v30 }
 0x5b9   :  { %7329 = vmatpush.msk.msrb.mxu2 %vm96_vm1, %v1658_v49  ;;  %v1659_v50 = vsel %vm78_vm0, %v1657_v34, %v1658_v49  ;;  %1759 = vmatpush.msra.mxu0 %v7348_v59 }
 0x5bb   :  { %1684 = vmatpush.msrb.mxu2 %v1659_v50  ;;  %1760 = vmatpush.msra.mxu0 %v7347_v52 }
 0x5bd   :  { %1761 = vmatpush.msra.mxu0 %v7346_v6  ;;  %v7360_v6 = vld [vmem:[%s11595_s7 + $0x120] sm:$0xff] }
 0x5bf   :  { %1762 = vmatpush.msra.mxu0 %v7345_v10  ;;  %v7358_v10 = vld [vmem:[%s11595_s7 + $0x110] sm:$0xff] }
 0x5c1   :  { %1763 = vmatpush.msra.mxu0 %v7344_v9  ;;  %v7356_v9 = vld [vmem:[%s11595_s7 + $0x100] sm:$0xff] }
 0x5fe   :  { %v1489_v0 = vpop.xlane.xlu0 %1488 }
 0x5ff   :  { %v1493_v26 = vsub.f32 %v1481_v17, %v1489_v0 }
 0x601   :  { %v1495_v27 = vmul.f32 1.442695, %v1493_v26 }
 0x603   :  { %8135 = vpow2.f32 %v1495_v27 }
 0x606   :  { %v1492_v29 = vpop.xlane.xlu1 %1491 }
 0x607   :  { %v1494_v31 = vsub.f32 %v1484_v20, %v1492_v29 }
 0x609   :  { %v9181_v7 = vpop.eup %8135  ;;  %v1497_v22 = vmul.f32 1.442695, %v1494_v31 }
 0x60a   :  { %v1499_v28 = vsel %vm296_vm5, %v9181_v7, 0.0 }
 0x60b   :  { %8137 = vpow2.f32 %v1497_v22  ;;  %1500 = vadd.xlane.f32.xlu2 %v1499_v28 }
 0x60e   :  { %v1610_v18 = vpop.xlane.xlu1 %1609 }
 0x60f   :  { %v1614_v37 = vsub.f32 %v1602_v24, %v1610_v18 }
 0x611   :  { %v9187_v12 = vpop.eup %8137  ;;  %v1616_v38 = vmul.f32 1.442695, %v1614_v37 }
 0x612   :  { %v1502_v41 = vsel %vm300_vm6, %v9187_v12, 0.0 }
 0x613   :  { %8139 = vpow2.f32 %v1616_v38  ;;  %1503 = vadd.xlane.f32.xlu0 %v1502_v41  ;;  %1612 = vmax.xlane.f32.xlu2 %v1611_v42 }
 0x619   :  { %v9193_v44 = vpop.eup %8139 }
 0x61a   :  { %v1620_v45 = vsel %vm296_vm5, %v9193_v44, 0.0 }
 0x61b   :  { %1621 = vadd.xlane.f32.xlu0 %v1620_v45 }
 0x67e   :  { %v1501_v1 = vpop.xlane.xlu2 %1500 }
 0x67f   :  { %8141 = vrcp.f32 %v1501_v1  ;;  %v1516_v21 = vand.u32 2147483648, %v1501_v1  ;;  %v1514_v0 = vand.u32 2147483647, %v1501_v1  ;;  %vm1510_vm3 = vweird.f32 %v1501_v1 }
 0x681   :  { %v1517_v29 = vor.u32 1.1754944e-38, %v1516_v21  ;;  %vm1515_vm8 = vcmp.eq.f32.partialorder %v1514_v0, 8.507059e+37 }
 0x685   :  { %v8142_v57 = vpop.eup %8141 }
 0x686   :  { %v1506_v15 = vmul.f32 %v8142_v57, %v1501_v1  ;;  %v1613_v16 = vpop.xlane.xlu2 %1612  ;;  %v1504_v17 = vpop.xlane.xlu0 %1503  ;;  %vm1511_vm15 = vweird.f32 %v8142_v57  ;;  %v7361_v1 = vld [vmem:[%s11595_s7 + $0x128] sm:$0xff] }
 0x687   :  { %v1615_v13 = vsub.f32 %v9185_v36, %v1613_v16  ;;  %8143 = vrcp.f32 %v1504_v17  ;;  %vm1512_vm7 = vmor %vm1510_vm3, %vm1511_vm15  ;;  %v1531_v41 = vand.u32 2147483648, %v1504_v17  ;;  %v1529_v48 = vand.u32 2147483647, %v1504_v17 }
 0x688   :  { %v1507_v20 = vsub.f32 1.0, %v1506_v15  ;;  %vm1525_vm10 = vweird.f32 %v1504_v17 }
 0x689   :  { %v1618_v24 = vmul.f32 1.442695, %v1615_v13  ;;  %v1532_v23 = vor.u32 1.1754944e-38, %v1531_v41  ;;  %vm1530_vm12 = vcmp.eq.f32.partialorder %v1529_v48, 8.507059e+37  ;;  %v8036_v41 = vld [vmem:[%s11630_s3 + $0x4] ss:$0 sm:$0xff] }
 0x68a   :  { %v1508_v25 = vmul.f32 %v8142_v57, %v1507_v20 }
 0x68b   :  { %8145 = vpow2.f32 %v1618_v24 }
 0x68c   :  { %v1509_v26 = vadd.f32 %v8142_v57, %v1508_v25 }
 0x68d   :  { %v8144_v27 = vpop.eup %8143 }
 0x68e   :  { %v1513_v31 = vsel %vm1512_vm7, %v8142_v57, %v1509_v26  ;;  %v1521_v22 = vmul.f32 %v8144_v27, %v1504_v17  ;;  %v1622_v28 = vpop.xlane.xlu0 %1621  ;;  %vm1526_vm9 = vweird.f32 %v8144_v27 }
 0x68f   :  { %v1518_v18 = vsel %vm1515_vm8, %v1517_v29, %v1513_v31  ;;  %8147 = vrcp.f32 %v1622_v28  ;;  %vm1527_vm11 = vmor %vm1525_vm10, %vm1526_vm9  ;;  %v1637_v55 = vand.u32 2147483648, %v1622_v28  ;;  %v1635_v30 = vand.u32 2147483647, %v1622_v28  ;;  %v1725_v31 = vpop.f32.mrf.mxu3 }
 0x690   :  { %v1522_v36 = vsub.f32 1.0, %v1521_v22  ;;  %v1519_v37 = vmul.f32 %v9181_v7, %v1518_v18  ;;  %vm1631_vm14 = vweird.f32 %v1622_v28  ;;  %v8035_v18 = vld [vmem:[%s11629_s6 + $0x4] ss:$0 sm:$0xff] }
 0x691   :  { %v9258_v38 = vpop.eup %8145  ;;  %v1638_v59 = vor.u32 1.1754944e-38, %v1637_v55  ;;  %vm1636_vm3 = vcmp.eq.f32.partialorder %v1635_v30, 8.507059e+37  ;;  %v8037_v30 = vld [vmem:[%s11596_s8 + $0x4] ss:$0 sm:$0xff] }
 0x692   :  { %v1523_v42 = vmul.f32 %v8144_v27, %v1522_v36  ;;  %7323 = vmatmul.msk.f32.vlgmr.msrb.gmra.mxu0 %vm296_vm5, %v1519_v37  ;;  %v1623_v45 = vsel %vm300_vm6, %v9258_v38, 0.0 }
 0x693   :  { %1624 = vadd.xlane.f32.xlu1 %v1623_v45  ;;  %v1726_v45 = vadd.f32 %v8036_v41, %v1725_v31 }
 0x694   :  { %v1524_v46 = vadd.f32 %v8144_v27, %v1523_v42 }
 0x695   :  { %v8148_v34 = vpop.eup %8147 }
 0x696   :  { %v1627_v7 = vmul.f32 %v8148_v34, %v1622_v28  ;;  %v1528_v49 = vsel %vm1527_vm11, %v8144_v27, %v1524_v46  ;;  %vm1632_vm13 = vweird.f32 %v8148_v34 }
 0x697   :  { %v1533_v50 = vsel %vm1530_vm12, %v1532_v23, %v1528_v49  ;;  %vm1633_vm15 = vmor %vm1631_vm14, %vm1632_vm13  ;;  %v1728_v28 = vpop.f32.mrf.mxu3 }
 0x698   :  { %v1628_v51 = vsub.f32 1.0, %v1627_v7  ;;  %v1534_v54 = vmul.f32 %v9187_v12, %v1533_v50  ;;  %v7363_v12 = vld [vmem:[%s11595_s7 + $0x138] sm:$0xff]  ;;  %v1729_v46 = vadd.f32 %v8036_v41, %v1728_v28 }
 0x699   :  { %1796 = vmatpush.msra.mxu1 %v7363_v12 }
 0x69a   :  { %v1629_v58 = vmul.f32 %v8148_v34, %v1628_v51  ;;  %7324 = vmatmul.msk.f32.gmra.mxu0 %vm296_vm5, %v1534_v54  ;;  %v1969_v49 = vrot.slane %v1729_v46, 1 }
 0x69c   :  { %v1630_v60 = vadd.f32 %v8148_v34, %v1629_v58 }
 0x69e   :  { %v1634_v61 = vsel %vm1633_vm15, %v8148_v34, %v1630_v60 }
 0x69f   :  { %v1639_v52 = vsel %vm1636_vm3, %v1638_v59, %v1634_v61  ;;  %v7368_v59 = vld [vmem:[%s11597_s9 + $0x20] sm:$0xff] }
 0x6a0   :  { %v1640_v62 = vmul.f32 %v9193_v44, %v1639_v52  ;;  %v7362_v44 = vld [vmem:[%s11595_s7 + $0x130] sm:$0xff]  ;;  %1840 = vmatpush.msra.mxu2 %v7368_v59 }
 0x6a1   :  { %1797 = vmatpush.msra.mxu1 %v7362_v44  ;;  %v7400_v59 = vld [vmem:[%s11624_s23 + $0x150] sm:$0xff] }
 0x6a2   :  { %7330 = vmatmul.msk.f32.vlgmr.msrb.gmra.mxu2 %vm296_vm5, %v1640_v62  ;;  %7353 = vmatmul.msk.f32.vlgmr.msra.gmra.mxu0 %vm113_vm2, %v8596_v35 }
 0x6a3   :  { %1798 = vmatpush.msra.mxu1 %v7361_v1 }
 0x6a5   :  { %1799 = vmatpush.msra.mxu1 %v7360_v6 }
 0x6a7   :  { %1800 = vmatpush.msra.mxu1 %v7359_v8 }
 0x6a9   :  { %1801 = vmatpush.msra.mxu1 %v7358_v10 }
 0x6aa   :  { %7354 = vmatmul.msk.f32.gmra.mxu0 %vm113_vm2, %v8614_v40 }
 0x6ab   :  { %1802 = vmatpush.msra.mxu1 %v7357_v11 }
 0x6ad   :  { %1803 = vmatpush.msra.mxu1 %v7356_v9 }
 0x6ae   :  { %7365 = vmatmul.msk.f32.vlgmr.msra.gmra.mxu1 %vm113_vm2, %v8596_v35 }
 0x6b2   :  { %7355 = vmatmul.msk.f32.gmra.mxu0 %vm113_vm2, %v8590_v33 }
 0x6b6   :  { %7366 = vmatmul.msk.f32.gmra.mxu1 %vm113_vm2, %v8614_v40 }
 0x6be   :  { %7367 = vmatmul.msk.f32.gmra.mxu1 %vm113_vm2, %v8590_v33 }
 0x706   :  { %v1625_v14 = vpop.xlane.xlu1 %1624 }
 0x707   :  { %8149 = vrcp.f32 %v1625_v14  ;;  %v1652_v13 = vand.u32 2147483648, %v1625_v14  ;;  %v1650_v21 = vand.u32 2147483647, %v1625_v14  ;;  %vm1646_vm8 = vweird.f32 %v1625_v14 }
 0x709   :  { %v1653_v25 = vor.u32 1.1754944e-38, %v1652_v13  ;;  %vm1651_vm10 = vcmp.eq.f32.partialorder %v1650_v21, 8.507059e+37 }
 0x70d   :  { %v8150_v57 = vpop.eup %8149 }
 0x70e   :  { %v1642_v15 = vmul.f32 %v8150_v57, %v1625_v14  ;;  %vm1647_vm7 = vweird.f32 %v8150_v57 }
 0x70f   :  { %v9303_v16 = vpop.f32.mrf.mxu0  ;;  %vm1648_vm9 = vmor %vm1646_vm8, %vm1647_vm7 }
 0x710   :  { %v1643_v17 = vsub.f32 1.0, %v1642_v15 }
 0x712   :  { %v1644_v20 = vmul.f32 %v8150_v57, %v1643_v17 }
 0x714   :  { %v1645_v24 = vadd.f32 %v8150_v57, %v1644_v20 }
 0x716   :  { %v1649_v0 = vsel %vm1648_vm9, %v8150_v57, %v1645_v24 }
 0x717   :  { %v9307_v26 = vpop.f32.mrf.mxu0  ;;  %v1654_v27 = vsel %vm1651_vm10, %v1653_v25, %v1649_v0 }
 0x718   :  { %v1655_v29 = vmul.f32 %v9258_v38, %v1654_v27  ;;  %v1731_v38 = vpop.f32.mrf.mxu3 }
 0x719   :  { %v1732_v23 = vadd.f32 %v8036_v41, %v1731_v38 }
 0x71a   :  { %7331 = vmatmul.msk.f32.gmra.mxu2 %vm296_vm5, %v1655_v29 }
 0x71b   :  { %v1970_v50 = vrot.slane %v1732_v23, 1  ;;  %v7393_v23 = vld [vmem:[%s11628_s5 + $0x178] sm:$0xff] }
 0x71d   :  { %v1971_v55 = vsel %vm78_vm0, %v1969_v49, %v1970_v50  ;;  %v7392_v49 = vld [vmem:[%s11628_s5 + $0x170] sm:$0xff] }
 0x71f   :  { %v1765_v22 = vpop.f32.mrf.mxu0 }
 0x720   :  { %v1766_v42 = vadd.f32 %v8035_v18, %v1765_v22 }
 0x727   :  { %v1768_v36 = vpop.f32.mrf.mxu0 }
 0x728   :  { %v1769_v37 = vadd.f32 %v8035_v18, %v1768_v36  ;;  %v9355_v36 = vpop.f32.mrf.mxu2 }
 0x72a   :  { %7372 = vmatpush.xpose.msk.msrb.mxu3 %vm225_vm4, %v1769_v37  ;;  %v1973_v51 = vrot.slane %v1769_v37, 1 }
 0x72b   :  { %v1805_v58 = vpop.f32.mrf.mxu1 }
 0x72c   :  { %v1806_v60 = vadd.f32 %v8037_v30, %v1805_v58  ;;  %v7401_v58 = vld [vmem:[%s11624_s23 + $0x158] sm:$0xff] }
 0x72e   :  { %7373 = vmatpush.xpose.msk.msrb.mxu3 %vm225_vm4, %v1766_v42  ;;  %7369 = vmatmul.msk.f32.vlgmr.msra.gmra.mxu2 %vm225_vm4, %v1806_v60 }
 0x72f   :  { %v1771_v48 = vpop.f32.mrf.mxu0 }
 0x730   :  { %v1772_v34 = vadd.f32 %v8035_v18, %v1771_v48 }
 0x731   :  { %7374 = vmatmul.msk.f32.vlgmr.msrb.gmra.mxu3 %vm225_vm4, %v1726_v45 }
 0x732   :  { %v1974_v7 = vrot.slane %v1772_v34, 1  ;;  %v7405_v34 = vld [vmem:[%s11624_s23 + $0x178] sm:$0xff]  ;;  %2115 = vmatpush.msra.mxu3 %v7393_v23 }
 0x733   :  { %v1808_v61 = vpop.f32.mrf.mxu1 }
 0x734   :  { %7379 = vmatpush.xpose.msk.msrb.mxu1 %vm225_vm4, %v1974_v7  ;;  %v1975_v54 = vsel %vm78_vm0, %v1973_v51, %v1974_v7  ;;  %v1809_v52 = vadd.f32 %v8037_v30, %v1808_v61  ;;  %v7404_v7 = vld [vmem:[%s11624_s23 + $0x170] sm:$0xff]  ;;  %2116 = vmatpush.msra.mxu3 %v7392_v49  ;;  %v7391_v51 = vld [vmem:[%s11628_s5 + $0x168] sm:$0xff] }
 0x735   :  { %v7388_v61 = vld [vmem:[%s11628_s5 + $0x150] sm:$0xff] }
 0x736   :  { %7370 = vmatmul.msk.f32.gmra.mxu2 %vm225_vm4, %v1809_v52  ;;  %2117 = vmatpush.msra.mxu3 %v7391_v51  ;;  %v7399_v52 = vld [vmem:[%s11624_s23 + $0x148] sm:$0xff] }
 0x738   :  { %7380 = vmatpush.xpose.msk.msrb.mxu1 %vm225_vm4, %v1975_v54  ;;  %v7402_v54 = vld [vmem:[%s11624_s23 + $0x160] sm:$0xff] }
 0x739   :  { %7375 = vmatmul.msk.f32.gmra.mxu3 %vm225_vm4, %v1729_v46 }
 0x73b   :  { %7381 = vmatmul.msk.f32.vlgmr.msrb.gmra.mxu1 %vm225_vm4, %v1971_v55  ;;  %v1811_v62 = vpop.f32.mrf.mxu1  ;;  %v7390_v55 = vld [vmem:[%s11628_s5 + $0x160] sm:$0xff] }
 0x73c   :  { %v1812_v12 = vadd.f32 %v8037_v30, %v1811_v62  ;;  %2118 = vmatpush.msra.mxu3 %v7390_v55  ;;  %v7389_v30 = vld [vmem:[%s11628_s5 + $0x158] sm:$0xff]  ;;  %v7387_v62 = vld [vmem:[%s11628_s5 + $0x148] sm:$0xff] }
 0x73e   :  { %7371 = vmatmul.msk.f32.gmra.mxu2 %vm225_vm4, %v1812_v12  ;;  %2119 = vmatpush.msra.mxu3 %v7389_v30  ;;  %v7398_v12 = vld [vmem:[%s11624_s23 + $0x140] sm:$0xff] }
 0x740   :  { %2120 = vmatpush.msra.mxu3 %v7388_v61 }
 0x742   :  { %2121 = vmatpush.msra.mxu3 %v7387_v62  ;;  %v7415_v62 = vld [vmem:[%s11595_s7 + $0x168] sm:$0xff] }
 0x743   :  { %7382 = vmatmul.msk.f32.gmra.mxu1 %vm225_vm4, %v1970_v50  ;;  %v7403_v50 = vld [vmem:[%s11624_s23 + $0x168] sm:$0xff] }
 0x79d   :  { %v9357_v37 = vpop.f32.mrf.mxu2 }
 0x7b1   :  { %v1842_v41 = vpop.f32.mrf.mxu2 }
 0x7b4   :  { %v1880_v44 = vpop.f32.mrf.mxu3 }
 0x7b5   :  { %v1886_v1 = vsel %vm296_vm5, %v1880_v44, -inf }
 0x7b6   :  { %1887 = vmax.xlane.f32.xlu2 %v1886_v1 }
 0x7b8   :  { %v2001_v10 = vpop.f32.mrf.mxu1 }
 0x7b9   :  { %v2007_v11 = vsel %vm296_vm5, %v2001_v10, -inf  ;;  %v1845_v42 = vpop.f32.mrf.mxu2 }
 0x7ba   :  { %7376 = vmatpush.msk.msrb.mxu0 %vm96_vm1, %v1845_v42  ;;  %v2056_v45 = vrot.slane %v1845_v42, 1 }
 0x7bc   :  { %v1883_v6 = vpop.f32.mrf.mxu3  ;;  %1958 = vmatpush.msrb.mxu0 %v1842_v41 }
 0x7bd   :  { %v1889_v8 = vsel %vm300_vm6, %v1883_v6, -inf }
 0x7be   :  { %1890 = vmax.xlane.f32.xlu0 %v1889_v8  ;;  %2155 = vmatpush.msra.mxu0 %v7405_v34 }
 0x7c0   :  { %v9343_v25 = vpop.f32.mrf.mxu1  ;;  %2156 = vmatpush.msra.mxu0 %v7404_v7 }
 0x7c1   :  { %v2010_v31 = vsel %vm300_vm6, %v9343_v25, -inf  ;;  %v1848_v38 = vpop.f32.mrf.mxu2 }
 0x7c2   :  { %v2057_v48 = vrot.slane %v1848_v38, 1  ;;  %2157 = vmatpush.msra.mxu0 %v7403_v50 }
 0x7c4   :  { %7383 = vmatpush.msk.msrb.mxu2 %vm96_vm1, %v2057_v48  ;;  %v2058_v46 = vsel %vm78_vm0, %v2056_v45, %v2057_v48  ;;  %2158 = vmatpush.msra.mxu0 %v7402_v54 }
 0x7c6   :  { %2008 = vmax.xlane.f32.xlu0 %v2007_v11  ;;  %2083 = vmatpush.msrb.mxu2 %v2058_v46 }
 0x7c7   :  { %2159 = vmatpush.msra.mxu0 %v7401_v58 }
 0x7c9   :  { %2160 = vmatpush.msra.mxu0 %v7400_v59 }
 0x7cb   :  { %2161 = vmatpush.msra.mxu0 %v7399_v52 }
 0x7cd   :  { %2162 = vmatpush.msra.mxu0 %v7398_v12  ;;  %v7414_v12 = vld [vmem:[%s11595_s7 + $0x160] sm:$0xff] }
 0x829   :  { %v1888_v9 = vpop.xlane.xlu2 %1887 }
 0x82a   :  { %v1892_v14 = vsub.f32 %v1880_v44, %v1888_v9  ;;  %v7386_v44 = vld [vmem:[%s11628_s5 + $0x140] sm:$0xff] }
 0x82b   :  { %2122 = vmatpush.msra.mxu3 %v7386_v44  ;;  %v7413_v44 = vld [vmem:[%s11595_s7 + $0x158] sm:$0xff] }
 0x82c   :  { %v1894_v57 = vmul.f32 1.442695, %v1892_v14  ;;  %7395 = vmatmul.msk.f32.vlgmr.msra.gmra.mxu3 %vm113_vm2, %v8596_v35 }
 0x82e   :  { %8151 = vpow2.f32 %v1894_v57 }
 0x831   :  { %v1891_v15 = vpop.xlane.xlu0 %1890 }
 0x832   :  { %v1893_v17 = vsub.f32 %v1883_v6, %v1891_v15 }
 0x834   :  { %v9339_v13 = vpop.eup %8151  ;;  %v1896_v20 = vmul.f32 1.442695, %v1893_v17  ;;  %7396 = vmatmul.msk.f32.gmra.mxu3 %vm113_vm2, %v8614_v40 }
 0x835   :  { %v1898_v21 = vsel %vm296_vm5, %v9339_v13, 0.0 }
 0x836   :  { %8153 = vpow2.f32 %v1896_v20  ;;  %1899 = vadd.xlane.f32.xlu1 %v1898_v21 }
 0x839   :  { %v2009_v24 = vpop.xlane.xlu0 %2008 }
 0x83a   :  { %v2013_v0 = vsub.f32 %v2001_v10, %v2009_v24 }
 0x83c   :  { %v9345_v27 = vpop.eup %8153  ;;  %v2015_v29 = vmul.f32 1.442695, %v2013_v0  ;;  %7397 = vmatmul.msk.f32.gmra.mxu3 %vm113_vm2, %v8590_v33 }
 0x83d   :  { %v1901_v22 = vsel %vm300_vm6, %v9345_v27, 0.0 }
 0x83e   :  { %8155 = vpow2.f32 %v2015_v29  ;;  %2011 = vmax.xlane.f32.xlu1 %v2010_v31  ;;  %1902 = vadd.xlane.f32.xlu2 %v1901_v22 }
 0x844   :  { %v9351_v28 = vpop.eup %8155 }
 0x845   :  { %v2019_v18 = vsel %vm296_vm5, %v9351_v28, 0.0 }
 0x846   :  { %2020 = vadd.xlane.f32.xlu2 %v2019_v18 }
 0x8a9   :  { %v1900_v60 = vpop.xlane.xlu1 %1899 }
 0x8aa   :  { %8157 = vrcp.f32 %v1900_v60  ;;  %v1915_v14 = vand.u32 2147483648, %v1900_v60  ;;  %v1913_v17 = vand.u32 2147483647, %v1900_v60  ;;  %vm1909_vm12 = vweird.f32 %v1900_v60 }
 0x8ac   :  { %v1916_v24 = vor.u32 1.1754944e-38, %v1915_v14  ;;  %vm1914_vm14 = vcmp.eq.f32.partialorder %v1913_v17, 8.507059e+37 }
 0x8b0   :  { %v8158_v1 = vpop.eup %8157 }
 0x8b1   :  { %v1905_v6 = vmul.f32 %v8158_v1, %v1900_v60  ;;  %v2012_v8 = vpop.xlane.xlu1 %2011  ;;  %v1903_v10 = vpop.xlane.xlu2 %1902  ;;  %vm1910_vm11 = vweird.f32 %v8158_v1 }
 0x8b2   :  { %v2014_v11 = vsub.f32 %v9343_v25, %v2012_v8  ;;  %8159 = vrcp.f32 %v1903_v10  ;;  %vm1911_vm13 = vmor %vm1909_vm12, %vm1910_vm11  ;;  %v1930_v42 = vand.u32 2147483648, %v1903_v10  ;;  %v1928_v38 = vand.u32 2147483647, %v1903_v10  ;;  %v7410_v8 = vld [vmem:[%s11595_s7 + $0x140] sm:$0xff] }
 0x8b3   :  { %v1906_v9 = vsub.f32 1.0, %v1905_v6  ;;  %vm1924_vm3 = vweird.f32 %v1903_v10  ;;  %v7411_v6 = vld [vmem:[%s11595_s7 + $0x148] sm:$0xff] }
 0x8b4   :  { %v2017_v57 = vmul.f32 1.442695, %v2014_v11  ;;  %v1931_v23 = vor.u32 1.1754944e-38, %v1930_v42  ;;  %vm1929_vm8 = vcmp.eq.f32.partialorder %v1928_v38, 8.507059e+37 }
 0x8b5   :  { %v1907_v15 = vmul.f32 %v8158_v1, %v1906_v9 }
 0x8b6   :  { %8161 = vpow2.f32 %v2017_v57 }
 0x8b7   :  { %v1908_v20 = vadd.f32 %v8158_v1, %v1907_v15 }
 0x8b8   :  { %v8160_v21 = vpop.eup %8159 }
 0x8b9   :  { %v1912_v0 = vsel %vm1911_vm13, %v8158_v1, %v1908_v20  ;;  %v1920_v29 = vmul.f32 %v8160_v21, %v1903_v10  ;;  %v2021_v25 = vpop.xlane.xlu2 %2020  ;;  %vm1925_vm15 = vweird.f32 %v8160_v21  ;;  %v7412_v1 = vld [vmem:[%s11595_s7 + $0x150] sm:$0xff] }
 0x8ba   :  { %v1917_v31 = vsel %vm1914_vm14, %v1916_v24, %v1912_v0  ;;  %8163 = vrcp.f32 %v2021_v25  ;;  %vm1926_vm7 = vmor %vm1924_vm3, %vm1925_vm15  ;;  %v2036_v54 = vand.u32 2147483648, %v2021_v25  ;;  %v2034_v58 = vand.u32 2147483647, %v2021_v25 }
 0x8bb   :  { %v1921_v22 = vsub.f32 1.0, %v1920_v29  ;;  %v1918_v18 = vmul.f32 %v9339_v13, %v1917_v31  ;;  %vm2030_vm10 = vweird.f32 %v2021_v25 }
 0x8bc   :  { %v9416_v41 = vpop.eup %8161  ;;  %v2037_v60 = vor.u32 1.1754944e-38, %v2036_v54  ;;  %vm2035_vm12 = vcmp.eq.f32.partialorder %v2034_v58, 8.507059e+37 }
 0x8bd   :  { %v1922_v45 = vmul.f32 %v8160_v21, %v1921_v22  ;;  %7377 = vmatmul.msk.f32.vlgmr.msrb.gmra.mxu0 %vm296_vm5, %v1918_v18  ;;  %v2022_v48 = vsel %vm300_vm6, %v9416_v41, 0.0  ;;  %v2124_v22 = vpop.f32.mrf.mxu3 }
 0x8be   :  { %2023 = vadd.xlane.f32.xlu0 %v2022_v48 }
 0x8bf   :  { %v1923_v46 = vadd.f32 %v8160_v21, %v1922_v45  ;;  %v8038_v45 = vld [vmem:[%s11629_s6 + $0x5] ss:$0 sm:$0xff] }
 0x8c0   :  { %v8164_v34 = vpop.eup %8163 }
 0x8c1   :  { %v2026_v13 = vmul.f32 %v8164_v34, %v2021_v25  ;;  %v1927_v7 = vsel %vm1926_vm7, %v8160_v21, %v1923_v46  ;;  %vm2031_vm9 = vweird.f32 %v8164_v34  ;;  %v8039_v46 = vld [vmem:[%s11630_s3 + $0x5] ss:$0 sm:$0xff] }
 0x8c2   :  { %v1932_v49 = vsel %vm1929_vm8, %v1931_v23, %v1927_v7  ;;  %vm2032_vm11 = vmor %vm2030_vm10, %vm2031_vm9  ;;  %v2125_v23 = vadd.f32 %v8039_v46, %v2124_v22 }
 0x8c3   :  { %v2027_v50 = vsub.f32 1.0, %v2026_v13  ;;  %v1933_v51 = vmul.f32 %v9345_v27, %v1932_v49  ;;  %v7417_v27 = vld [vmem:[%s11595_s7 + $0x178] sm:$0xff] }
 0x8c4   :  { %2195 = vmatpush.msra.mxu1 %v7417_v27  ;;  %v7422_v27 = vld [vmem:[%s11597_s9 + $0x28] sm:$0xff] }
 0x8c5   :  { %v2028_v55 = vmul.f32 %v8164_v34, %v2027_v50  ;;  %7378 = vmatmul.msk.f32.gmra.mxu0 %vm296_vm5, %v1933_v51  ;;  %v2127_v42 = vpop.f32.mrf.mxu3  ;;  %2239 = vmatpush.msra.mxu2 %v7422_v27  ;;  %v7444_v27 = vld [vmem:[%s11628_s5 + $0x1a0] sm:$0xff] }
 0x8c6   :  { %v2128_v7 = vadd.f32 %v8039_v46, %v2127_v42 }
 0x8c7   :  { %v2029_v30 = vadd.f32 %v8164_v34, %v2028_v55 }
 0x8c8   :  { %v2368_v54 = vrot.slane %v2128_v7, 1 }
 0x8c9   :  { %v2033_v59 = vsel %vm2032_vm11, %v8164_v34, %v2029_v30 }
 0x8ca   :  { %v2038_v61 = vsel %vm2035_vm12, %v2037_v60, %v2033_v59 }
 0x8cb   :  { %v2039_v52 = vmul.f32 %v9351_v28, %v2038_v61  ;;  %v7416_v28 = vld [vmem:[%s11595_s7 + $0x170] sm:$0xff]  ;;  %v8040_v61 = vld [vmem:[%s11596_s8 + $0x5] ss:$0 sm:$0xff] }
 0x8cc   :  { %2196 = vmatpush.msra.mxu1 %v7416_v28 }
 0x8cd   :  { %7384 = vmatmul.msk.f32.vlgmr.msrb.gmra.mxu2 %vm296_vm5, %v2039_v52  ;;  %7407 = vmatmul.msk.f32.vlgmr.msra.gmra.mxu0 %vm113_vm2, %v8596_v35 }
 0x8ce   :  { %2197 = vmatpush.msra.mxu1 %v7415_v62 }
 0x8d0   :  { %2198 = vmatpush.msra.mxu1 %v7414_v12 }
 0x8d2   :  { %2199 = vmatpush.msra.mxu1 %v7413_v44 }
 0x8d4   :  { %2200 = vmatpush.msra.mxu1 %v7412_v1 }
 0x8d5   :  { %7408 = vmatmul.msk.f32.gmra.mxu0 %vm113_vm2, %v8614_v40 }
 0x8d6   :  { %2201 = vmatpush.msra.mxu1 %v7411_v6 }
 0x8d8   :  { %2202 = vmatpush.msra.mxu1 %v7410_v8 }
 0x8d9   :  { %7419 = vmatmul.msk.f32.vlgmr.msra.gmra.mxu1 %vm113_vm2, %v8596_v35 }
 0x8dd   :  { %7409 = vmatmul.msk.f32.gmra.mxu0 %vm113_vm2, %v8590_v33 }
 0x8e1   :  { %7420 = vmatmul.msk.f32.gmra.mxu1 %vm113_vm2, %v8614_v40 }
 0x8e9   :  { %7421 = vmatmul.msk.f32.gmra.mxu1 %vm113_vm2, %v8590_v33 }
 0x931   :  { %v2024_v10 = vpop.xlane.xlu0 %2023 }
 0x932   :  { %8165 = vrcp.f32 %v2024_v10  ;;  %v2051_v15 = vand.u32 2147483648, %v2024_v10  ;;  %v2049_v20 = vand.u32 2147483647, %v2024_v10  ;;  %vm2045_vm14 = vweird.f32 %v2024_v10 }
 0x934   :  { %v2052_v24 = vor.u32 1.1754944e-38, %v2051_v15  ;;  %vm2050_vm3 = vcmp.eq.f32.partialorder %v2049_v20, 8.507059e+37 }
 0x938   :  { %v8166_v11 = vpop.eup %8165 }
 0x939   :  { %v2041_v9 = vmul.f32 %v8166_v11, %v2024_v10  ;;  %vm2046_vm13 = vweird.f32 %v8166_v11 }
 0x93a   :  { %v9461_v14 = vpop.f32.mrf.mxu0  ;;  %vm2047_vm15 = vmor %vm2045_vm14, %vm2046_vm13 }
 0x93b   :  { %v2042_v57 = vsub.f32 1.0, %v2041_v9 }
 0x93d   :  { %v2043_v17 = vmul.f32 %v8166_v11, %v2042_v57 }
 0x93f   :  { %v2044_v21 = vadd.f32 %v8166_v11, %v2043_v17 }
 0x941   :  { %v2048_v0 = vsel %vm2047_vm15, %v8166_v11, %v2044_v21 }
 0x942   :  { %v9465_v29 = vpop.f32.mrf.mxu0  ;;  %v2053_v25 = vsel %vm2050_vm3, %v2052_v24, %v2048_v0 }
 0x943   :  { %v2054_v31 = vmul.f32 %v9416_v41, %v2053_v25  ;;  %v2130_v41 = vpop.f32.mrf.mxu3 }
 0x944   :  { %v2131_v50 = vadd.f32 %v8039_v46, %v2130_v41 }
 0x945   :  { %7385 = vmatmul.msk.f32.gmra.mxu2 %vm296_vm5, %v2054_v31 }
 0x946   :  { %v2369_v55 = vrot.slane %v2131_v50, 1 }
 0x948   :  { %v2370_v60 = vsel %vm78_vm0, %v2368_v54, %v2369_v55 }
 0x94a   :  { %v2164_v18 = vpop.f32.mrf.mxu0 }
 0x94b   :  { %v2165_v34 = vadd.f32 %v8038_v45, %v2164_v18 }
 0x952   :  { %v2167_v38 = vpop.f32.mrf.mxu0 }
 0x953   :  { %v2168_v48 = vadd.f32 %v8038_v45, %v2167_v38 }
 0x955   :  { %7426 = vmatpush.xpose.msk.msrb.mxu3 %vm225_vm4, %v2168_v48  ;;  %v2372_v58 = vrot.slane %v2168_v48, 1 }
 0x956   :  { %v2204_v59 = vpop.f32.mrf.mxu1 }
 0x957   :  { %v2205_v52 = vadd.f32 %v8040_v61, %v2204_v59  ;;  %v7457_v59 = vld [vmem:[%s11624_s23 + $0x1a8] sm:$0xff] }
 0x959   :  { %7427 = vmatpush.xpose.msk.msrb.mxu3 %vm225_vm4, %v2165_v34  ;;  %7423 = vmatmul.msk.f32.vlgmr.msra.gmra.mxu2 %vm225_vm4, %v2205_v52  ;;  %v7456_v52 = vld [vmem:[%s11624_s23 + $0x1a0] sm:$0xff] }
 0x95a   :  { %v2170_v13 = vpop.f32.mrf.mxu0 }
 0x95b   :  { %v2171_v49 = vadd.f32 %v8038_v45, %v2170_v13 }
 0x95c   :  { %7428 = vmatmul.msk.f32.vlgmr.msrb.gmra.mxu3 %vm225_vm4, %v2125_v23  ;;  %v9513_v23 = vpop.f32.mrf.mxu2 }
 0x95d   :  { %v2373_v51 = vrot.slane %v2171_v49, 1 }
 0x95e   :  { %v2207_v28 = vpop.f32.mrf.mxu1 }
 0x95f   :  { %7433 = vmatpush.xpose.msk.msrb.mxu1 %vm225_vm4, %v2373_v51  ;;  %v2374_v30 = vsel %vm78_vm0, %v2372_v58, %v2373_v51  ;;  %v2208_v62 = vadd.f32 %v8040_v61, %v2207_v28  ;;  %v7447_v58 = vld [vmem:[%s11628_s5 + $0x1b8] sm:$0xff] }
 0x960   :  { %2514 = vmatpush.msra.mxu3 %v7447_v58  ;;  %v7455_v28 = vld [vmem:[%s11624_s23 + $0x198] sm:$0xff] }
 0x961   :  { %7424 = vmatmul.msk.f32.gmra.mxu2 %vm225_vm4, %v2208_v62  ;;  %v7443_v62 = vld [vmem:[%s11628_s5 + $0x198] sm:$0xff] }
 0x963   :  { %7434 = vmatpush.xpose.msk.msrb.mxu1 %vm225_vm4, %v2374_v30  ;;  %v7458_v30 = vld [vmem:[%s11624_s23 + $0x1b0] sm:$0xff] }
 0x964   :  { %7429 = vmatmul.msk.f32.gmra.mxu3 %vm225_vm4, %v2128_v7 }
 0x966   :  { %7435 = vmatmul.msk.f32.vlgmr.msrb.gmra.mxu1 %vm225_vm4, %v2370_v60  ;;  %v2210_v12 = vpop.f32.mrf.mxu1  ;;  %v7446_v60 = vld [vmem:[%s11628_s5 + $0x1b0] sm:$0xff] }
 0x967   :  { %v2211_v44 = vadd.f32 %v8040_v61, %v2210_v12  ;;  %2515 = vmatpush.msra.mxu3 %v7446_v60  ;;  %v7445_v61 = vld [vmem:[%s11628_s5 + $0x1a8] sm:$0xff] }
 0x969   :  { %7425 = vmatmul.msk.f32.gmra.mxu2 %vm225_vm4, %v2211_v44  ;;  %2516 = vmatpush.msra.mxu3 %v7445_v61  ;;  %v7454_v44 = vld [vmem:[%s11624_s23 + $0x190] sm:$0xff] }
 0x96b   :  { %2517 = vmatpush.msra.mxu3 %v7444_v27 }
 0x96d   :  { %2518 = vmatpush.msra.mxu3 %v7443_v62 }
 0x96e   :  { %7436 = vmatmul.msk.f32.gmra.mxu1 %vm225_vm4, %v2369_v55  ;;  %v7459_v55 = vld [vmem:[%s11624_s23 + $0x1b8] sm:$0xff] }
 0x9c8   :  { %v9515_v41 = vpop.f32.mrf.mxu2 }
 0x9dc   :  { %v2241_v13 = vpop.f32.mrf.mxu2 }
 0x9df   :  { %v2279_v1 = vpop.f32.mrf.mxu3 }
 0x9e0   :  { %v2285_v6 = vsel %vm296_vm5, %v2279_v1, -inf }
 0x9e1   :  { %2286 = vmax.xlane.f32.xlu1 %v2285_v6  ;;  %v7453_v6 = vld [vmem:[%s11624_s23 + $0x188] sm:$0xff] }
 0x9e3   :  { %v2400_v11 = vpop.f32.mrf.mxu1 }
 0x9e4   :  { %v2406_v9 = vsel %vm296_vm5, %v2400_v11, -inf  ;;  %v2244_v7 = vpop.f32.mrf.mxu2 }
 0x9e5   :  { %7430 = vmatpush.msk.msrb.mxu0 %vm96_vm1, %v2244_v7  ;;  %v2455_v50 = vrot.slane %v2244_v7, 1 }
 0x9e7   :  { %v2282_v8 = vpop.f32.mrf.mxu3  ;;  %2357 = vmatpush.msrb.mxu0 %v2241_v13 }
 0x9e8   :  { %v2288_v10 = vsel %vm300_vm6, %v2282_v8, -inf }
 0x9e9   :  { %2289 = vmax.xlane.f32.xlu2 %v2288_v10  ;;  %2554 = vmatpush.msra.mxu0 %v7459_v55  ;;  %v7452_v10 = vld [vmem:[%s11624_s23 + $0x180] sm:$0xff] }
 0x9eb   :  { %v9501_v22 = vpop.f32.mrf.mxu1  ;;  %2555 = vmatpush.msra.mxu0 %v7458_v30 }
 0x9ec   :  { %v2409_v38 = vsel %vm300_vm6, %v9501_v22, -inf  ;;  %v2247_v49 = vpop.f32.mrf.mxu2 }
 0x9ed   :  { %v2456_v51 = vrot.slane %v2247_v49, 1  ;;  %2556 = vmatpush.msra.mxu0 %v7457_v59 }
 0x9ef   :  { %7437 = vmatpush.msk.msrb.mxu2 %vm96_vm1, %v2456_v51  ;;  %v2457_v54 = vsel %vm78_vm0, %v2455_v50, %v2456_v51  ;;  %2557 = vmatpush.msra.mxu0 %v7456_v52 }
 0x9f1   :  { %2407 = vmax.xlane.f32.xlu2 %v2406_v9  ;;  %2482 = vmatpush.msrb.mxu2 %v2457_v54 }
 0x9f2   :  { %2558 = vmatpush.msra.mxu0 %v7455_v28 }
 0x9f4   :  { %2559 = vmatpush.msra.mxu0 %v7454_v44 }
 0x9f6   :  { %2560 = vmatpush.msra.mxu0 %v7453_v6 }
 0x9f8   :  { %2561 = vmatpush.msra.mxu0 %v7452_v10 }
 0xa54   :  { %v2287_v57 = vpop.xlane.xlu1 %2286 }
 0xa55   :  { %v2291_v15 = vsub.f32 %v2279_v1, %v2287_v57  ;;  %v7442_v1 = vld [vmem:[%s11628_s5 + $0x190] sm:$0xff] }
 0xa56   :  { %2519 = vmatpush.msra.mxu3 %v7442_v1 }
 0xa57   :  { %v2293_v17 = vmul.f32 1.442695, %v2291_v15 }
 0xa59   :  { %8167 = vpow2.f32 %v2293_v17 }
 0xa5c   :  { %v2290_v20 = vpop.xlane.xlu2 %2289 }
 0xa5d   :  { %v2292_v21 = vsub.f32 %v2282_v8, %v2290_v20  ;;  %v7441_v8 = vld [vmem:[%s11628_s5 + $0x188] sm:$0xff] }
 0xa5e   :  { %2520 = vmatpush.msra.mxu3 %v7441_v8 }
 0xa5f   :  { %v9497_v24 = vpop.eup %8167  ;;  %v2295_v0 = vmul.f32 1.442695, %v2292_v21 }
 0xa60   :  { %v2297_v25 = vsel %vm296_vm5, %v9497_v24, 0.0 }
 0xa61   :  { %8169 = vpow2.f32 %v2295_v0  ;;  %2298 = vadd.xlane.f32.xlu0 %v2297_v25 }
 0xa64   :  { %v2408_v31 = vpop.xlane.xlu2 %2407 }
 0xa65   :  { %v2412_v18 = vsub.f32 %v2400_v11, %v2408_v31  ;;  %v7440_v11 = vld [vmem:[%s11628_s5 + $0x180] sm:$0xff] }
 0xa66   :  { %2521 = vmatpush.msra.mxu3 %v7440_v11 }
 0xa67   :  { %v9503_v42 = vpop.eup %8169  ;;  %v2414_v45 = vmul.f32 1.442695, %v2412_v18  ;;  %7449 = vmatmul.msk.f32.vlgmr.msra.gmra.mxu3 %vm113_vm2, %v8596_v35 }
 0xa68   :  { %v2300_v48 = vsel %vm300_vm6, %v9503_v42, 0.0 }
 0xa69   :  { %8171 = vpow2.f32 %v2414_v45  ;;  %2410 = vmax.xlane.f32.xlu0 %v2409_v38  ;;  %2301 = vadd.xlane.f32.xlu1 %v2300_v48 }
 0xa6f   :  { %v9509_v46 = vpop.eup %8171  ;;  %7450 = vmatmul.msk.f32.gmra.mxu3 %vm113_vm2, %v8614_v40 }
 0xa70   :  { %v2418_v34 = vsel %vm296_vm5, %v9509_v46, 0.0 }
 0xa71   :  { %2419 = vadd.xlane.f32.xlu1 %v2418_v34 }
 0xa77   :  { %7451 = vmatmul.msk.f32.gmra.mxu3 %vm113_vm2, %v8590_v33 }
 0xad4   :  { %v2299_v12 = vpop.xlane.xlu0 %2298 }
 0xad5   :  { %8173 = vrcp.f32 %v2299_v12  ;;  %v2314_v0 = vand.u32 2147483648, %v2299_v12  ;;  %v2312_v31 = vand.u32 2147483647, %v2299_v12  ;;  %vm2308_vm8 = vweird.f32 %v2299_v12 }
 0xad7   :  { %v2315_v48 = vor.u32 1.1754944e-38, %v2314_v0  ;;  %vm2313_vm10 = vcmp.eq.f32.partialorder %v2312_v31, 8.507059e+37  ;;  %v7464_v0 = vld [vmem:[%s11595_s7 + $0x180] sm:$0xff] }
 0xadb   :  { %v8174_v9 = vpop.eup %8173 }
 0xadc   :  { %v2304_v57 = vmul.f32 %v8174_v9, %v2299_v12  ;;  %v2302_v15 = vpop.xlane.xlu1 %2301  ;;  %v2411_v17 = vpop.xlane.xlu0 %2410  ;;  %vm2309_vm7 = vweird.f32 %v8174_v9 }
 0xadd   :  { %8175 = vrcp.f32 %v2302_v15  ;;  %v2413_v21 = vsub.f32 %v9501_v22, %v2411_v17  ;;  %vm2310_vm9 = vmor %vm2308_vm8, %vm2309_vm7  ;;  %v2329_v51 = vand.u32 2147483648, %v2302_v15  ;;  %v2327_v58 = vand.u32 2147483647, %v2302_v15  ;;  %v7467_v17 = vld [vmem:[%s11595_s7 + $0x198] sm:$0xff] }
 0xade   :  { %v2305_v20 = vsub.f32 1.0, %v2304_v57  ;;  %vm2323_vm12 = vweird.f32 %v2302_v15  ;;  %v7469_v57 = vld [vmem:[%s11595_s7 + $0x1a8] sm:$0xff] }
 0xadf   :  { %v2416_v18 = vmul.f32 1.442695, %v2413_v21  ;;  %v2330_v61 = vor.u32 1.1754944e-38, %v2329_v51  ;;  %vm2328_vm14 = vcmp.eq.f32.partialorder %v2327_v58, 8.507059e+37  ;;  %v7465_v21 = vld [vmem:[%s11595_s7 + $0x188] sm:$0xff] }
 0xae0   :  { %v2306_v25 = vmul.f32 %v8174_v9, %v2305_v20  ;;  %v7466_v20 = vld [vmem:[%s11595_s7 + $0x190] sm:$0xff] }
 0xae1   :  { %8177 = vpow2.f32 %v2416_v18 }
 0xae2   :  { %v2307_v45 = vadd.f32 %v8174_v9, %v2306_v25 }
 0xae3   :  { %v8176_v38 = vpop.eup %8175 }
 0xae4   :  { %v2311_v34 = vsel %vm2310_vm9, %v8174_v9, %v2307_v45  ;;  %v2319_v13 = vmul.f32 %v8176_v38, %v2302_v15  ;;  %v2420_v7 = vpop.xlane.xlu1 %2419  ;;  %vm2324_vm11 = vweird.f32 %v8176_v38  ;;  %v7468_v15 = vld [vmem:[%s11595_s7 + $0x1a0] sm:$0xff] }
 0xae5   :  { %v2316_v49 = vsel %vm2313_vm10, %v2315_v48, %v2311_v34  ;;  %8179 = vrcp.f32 %v2420_v7  ;;  %vm2325_vm13 = vmor %vm2323_vm12, %vm2324_vm11  ;;  %v2435_v12 = vand.u32 2147483648, %v2420_v7  ;;  %v2433_v1 = vand.u32 2147483647, %v2420_v7 }
 0xae6   :  { %v2317_v22 = vmul.f32 %v9497_v24, %v2316_v49  ;;  %v2320_v50 = vsub.f32 1.0, %v2319_v13  ;;  %vm2429_vm3 = vweird.f32 %v2420_v7 }
 0xae7   :  { %v9574_v54 = vpop.eup %8177  ;;  %v2436_v8 = vor.u32 1.1754944e-38, %v2435_v12  ;;  %vm2434_vm8 = vcmp.eq.f32.partialorder %v2433_v1, 8.507059e+37 }
 0xae8   :  { %v2321_v55 = vmul.f32 %v8176_v38, %v2320_v50  ;;  %7431 = vmatmul.msk.f32.vlgmr.msrb.gmra.mxu0 %vm296_vm5, %v2317_v22  ;;  %v2421_v30 = vsel %vm300_vm6, %v9574_v54, 0.0 }
 0xae9   :  { %2422 = vadd.xlane.f32.xlu2 %v2421_v30 }
 0xaea   :  { %v2322_v60 = vadd.f32 %v8176_v38, %v2321_v55  ;;  %v2523_v58 = vpop.f32.mrf.mxu3 }
 0xaeb   :  { %v8180_v59 = vpop.eup %8179 }
 0xaec   :  { %v2425_v24 = vmul.f32 %v8180_v59, %v2420_v7  ;;  %v2326_v52 = vsel %vm2325_vm13, %v8176_v38, %v2322_v60  ;;  %vm2430_vm15 = vweird.f32 %v8180_v59 }
 0xaed   :  { %v2331_v27 = vsel %vm2328_vm14, %v2330_v61, %v2326_v52  ;;  %vm2431_vm7 = vmor %vm2429_vm3, %vm2430_vm15  ;;  %v8042_v52 = vld [vmem:[%s11630_s3 + $0x6] ss:$0 sm:$0xff] }
 0xaee   :  { %v2426_v28 = vsub.f32 1.0, %v2425_v24  ;;  %v2332_v62 = vmul.f32 %v9503_v42, %v2331_v27  ;;  %v7471_v42 = vld [vmem:[%s11595_s7 + $0x1b8] sm:$0xff] }
 0xaef   :  { %2594 = vmatpush.msra.mxu1 %v7471_v42 }
 0xaf0   :  { %v2427_v44 = vmul.f32 %v8180_v59, %v2426_v28  ;;  %7432 = vmatmul.msk.f32.gmra.mxu0 %vm296_vm5, %v2332_v62  ;;  %v2524_v28 = vadd.f32 %v8042_v52, %v2523_v58 }
 0xaf2   :  { %v2428_v6 = vadd.f32 %v8180_v59, %v2427_v44  ;;  %v2526_v60 = vpop.f32.mrf.mxu3 }
 0xaf3   :  { %v2527_v12 = vadd.f32 %v8042_v52, %v2526_v60 }
 0xaf4   :  { %v2432_v10 = vsel %vm2431_vm7, %v8180_v59, %v2428_v6  ;;  %v8041_v59 = vld [vmem:[%s11629_s6 + $0x6] ss:$0 sm:$0xff] }
 0xaf5   :  { %v2437_v11 = vsel %vm2434_vm8, %v2436_v8, %v2432_v10  ;;  %v2767_v8 = vrot.slane %v2527_v12, 1 }
 0xaf6   :  { %v2438_v9 = vmul.f32 %v9509_v46, %v2437_v11  ;;  %v7470_v46 = vld [vmem:[%s11595_s7 + $0x1b0] sm:$0xff] }
 0xaf7   :  { %2595 = vmatpush.msra.mxu1 %v7470_v46 }
 0xaf8   :  { %7438 = vmatmul.msk.f32.vlgmr.msrb.gmra.mxu2 %vm296_vm5, %v2438_v9  ;;  %7461 = vmatmul.msk.f32.vlgmr.msra.gmra.mxu0 %vm113_vm2, %v8596_v35 }
 0xaf9   :  { %2596 = vmatpush.msra.mxu1 %v7469_v57  ;;  %v8043_v57 = vld [vmem:[%s11596_s8 + $0x6] ss:$0 sm:$0xff] }
 0xafb   :  { %2597 = vmatpush.msra.mxu1 %v7468_v15 }
 0xafd   :  { %2598 = vmatpush.msra.mxu1 %v7467_v17  ;;  %v7476_v17 = vld [vmem:[%s11597_s9 + $0x30] sm:$0xff] }
 0xafe   :  { %2638 = vmatpush.msra.mxu2 %v7476_v17 }
 0xaff   :  { %2599 = vmatpush.msra.mxu1 %v7466_v20 }
 0xb00   :  { %7462 = vmatmul.msk.f32.gmra.mxu0 %vm113_vm2, %v8614_v40 }
 0xb01   :  { %2600 = vmatpush.msra.mxu1 %v7465_v21 }
 0xb03   :  { %2601 = vmatpush.msra.mxu1 %v7464_v0 }
 0xb04   :  { %7473 = vmatmul.msk.f32.vlgmr.msra.gmra.mxu1 %vm113_vm2, %v8596_v35 }
 0xb08   :  { %7463 = vmatmul.msk.f32.gmra.mxu0 %vm113_vm2, %v8590_v33 }
 0xb0c   :  { %7474 = vmatmul.msk.f32.gmra.mxu1 %vm113_vm2, %v8614_v40 }
 0xb14   :  { %7475 = vmatmul.msk.f32.gmra.mxu1 %vm113_vm2, %v8590_v33 }
 0xb5c   :  { %v2423_v25 = vpop.xlane.xlu2 %2422 }
 0xb5d   :  { %8181 = vrcp.f32 %v2423_v25  ;;  %v2450_v48 = vand.u32 2147483648, %v2423_v25  ;;  %v2448_v13 = vand.u32 2147483647, %v2423_v25  ;;  %vm2444_vm10 = vweird.f32 %v2423_v25 }
 0xb5f   :  { %v2451_v49 = vor.u32 1.1754944e-38, %v2450_v48  ;;  %vm2449_vm12 = vcmp.eq.f32.partialorder %v2448_v13, 8.507059e+37 }
 0xb63   :  { %v8182_v31 = vpop.eup %8181 }
 0xb64   :  { %v2440_v18 = vmul.f32 %v8182_v31, %v2423_v25  ;;  %vm2445_vm9 = vweird.f32 %v8182_v31 }
 0xb65   :  { %v9619_v45 = vpop.f32.mrf.mxu0  ;;  %vm2446_vm11 = vmor %vm2444_vm10, %vm2445_vm9 }
 0xb66   :  { %v2441_v38 = vsub.f32 1.0, %v2440_v18 }
 0xb68   :  { %v2442_v34 = vmul.f32 %v8182_v31, %v2441_v38 }
 0xb6a   :  { %v2443_v7 = vadd.f32 %v8182_v31, %v2442_v34 }
 0xb6c   :  { %v2447_v50 = vsel %vm2446_vm11, %v8182_v31, %v2443_v7 }
 0xb6d   :  { %v9623_v22 = vpop.f32.mrf.mxu0  ;;  %v2452_v51 = vsel %vm2449_vm12, %v2451_v49, %v2447_v50 }
 0xb6e   :  { %v2453_v55 = vmul.f32 %v9574_v54, %v2452_v51  ;;  %v2529_v54 = vpop.f32.mrf.mxu3 }
 0xb6f   :  { %v2530_v1 = vadd.f32 %v8042_v52, %v2529_v54 }
 0xb70   :  { %7439 = vmatmul.msk.f32.gmra.mxu2 %vm296_vm5, %v2453_v55 }
 0xb71   :  { %v2768_v10 = vrot.slane %v2530_v1, 1 }
 0xb73   :  { %v2769_v42 = vsel %vm78_vm0, %v2767_v8, %v2768_v10 }
 0xb75   :  { %v2563_v30 = vpop.f32.mrf.mxu0 }
 0xb76   :  { %v2564_v27 = vadd.f32 %v8041_v59, %v2563_v30 }
 0xb7d   :  { %v2566_v61 = vpop.f32.mrf.mxu0 }
 0xb7e   :  { %v2567_v24 = vadd.f32 %v8041_v59, %v2566_v61 }
 0xb80   :  { %7480 = vmatpush.xpose.msk.msrb.mxu3 %vm225_vm4, %v2567_v24  ;;  %v2771_v11 = vrot.slane %v2567_v24, 1 }
 0xb81   :  { %v2603_v46 = vpop.f32.mrf.mxu1 }
 0xb82   :  { %v2604_v15 = vadd.f32 %v8043_v57, %v2603_v46 }
 0xb84   :  { %7481 = vmatpush.xpose.msk.msrb.mxu3 %vm225_vm4, %v2564_v27  ;;  %7477 = vmatmul.msk.f32.vlgmr.msra.gmra.mxu2 %vm225_vm4, %v2604_v15  ;;  %v7498_v15 = vld [vmem:[%s11628_s5 + $0x1e0] sm:$0xff] }
 0xb85   :  { %v2569_v62 = vpop.f32.mrf.mxu0 }
 0xb86   :  { %v2570_v44 = vadd.f32 %v8041_v59, %v2569_v62 }
 0xb87   :  { %7482 = vmatmul.msk.f32.vlgmr.msrb.gmra.mxu3 %vm225_vm4, %v2524_v28 }
 0xb88   :  { %v2772_v6 = vrot.slane %v2570_v44, 1  ;;  %v9671_v44 = vpop.f32.mrf.mxu2 }
 0xb89   :  { %v2606_v20 = vpop.f32.mrf.mxu1 }
 0xb8a   :  { %7487 = vmatpush.xpose.msk.msrb.mxu1 %vm225_vm4, %v2772_v6  ;;  %v2773_v9 = vsel %vm78_vm0, %v2771_v11, %v2772_v6  ;;  %v2607_v21 = vadd.f32 %v8043_v57, %v2606_v20  ;;  %v7500_v11 = vld [vmem:[%s11628_s5 + $0x1f0] sm:$0xff]  ;;  %v7497_v20 = vld [vmem:[%s11628_s5 + $0x1d8] sm:$0xff] }
 0xb8c   :  { %7478 = vmatmul.msk.f32.gmra.mxu2 %vm225_vm4, %v2607_v21  ;;  %v7513_v21 = vld [vmem:[%s11624_s23 + $0x1f8] sm:$0xff] }
 0xb8e   :  { %7488 = vmatpush.xpose.msk.msrb.mxu1 %vm225_vm4, %v2773_v9 }
 0xb8f   :  { %7483 = vmatmul.msk.f32.gmra.mxu3 %vm225_vm4, %v2527_v12 }
 0xb91   :  { %7489 = vmatmul.msk.f32.vlgmr.msrb.gmra.mxu1 %vm225_vm4, %v2769_v42  ;;  %v2609_v0 = vpop.f32.mrf.mxu1 }
 0xb92   :  { %v2610_v25 = vadd.f32 %v8043_v57, %v2609_v0  ;;  %v7499_v57 = vld [vmem:[%s11628_s5 + $0x1e8] sm:$0xff]  ;;  %v7496_v0 = vld [vmem:[%s11628_s5 + $0x1d0] sm:$0xff] }
 0xb94   :  { %7479 = vmatmul.msk.f32.gmra.mxu2 %vm225_vm4, %v2610_v25  ;;  %v7512_v25 = vld [vmem:[%s11624_s23 + $0x1f0] sm:$0xff] }
 0xb99   :  { %7490 = vmatmul.msk.f32.gmra.mxu1 %vm225_vm4, %v2768_v10  ;;  %v7501_v10 = vld [vmem:[%s11628_s5 + $0x1f8] sm:$0xff] }
 0xb9a   :  { %2913 = vmatpush.msra.mxu3 %v7501_v10 }
 0xb9c   :  { %2914 = vmatpush.msra.mxu3 %v7500_v11 }
 0xb9e   :  { %2915 = vmatpush.msra.mxu3 %v7499_v57 }
 0xba0   :  { %2916 = vmatpush.msra.mxu3 %v7498_v15 }
 0xba2   :  { %2917 = vmatpush.msra.mxu3 %v7497_v20 }
 0xba4   :  { %2918 = vmatpush.msra.mxu3 %v7496_v0 }
 0xbf3   :  { %v9673_v1 = vpop.f32.mrf.mxu2 }
 0xc07   :  { %v2640_v6 = vpop.f32.mrf.mxu2 }
 0xc0a   :  { %v2678_v31 = vpop.f32.mrf.mxu3 }
 0xc0b   :  { %v2684_v18 = vsel %vm296_vm5, %v2678_v31, -inf }
 0xc0c   :  { %2685 = vmax.xlane.f32.xlu0 %v2684_v18  ;;  %v7511_v18 = vld [vmem:[%s11624_s23 + $0x1e8] sm:$0xff] }
 0xc0e   :  { %v2799_v34 = vpop.f32.mrf.mxu1 }
 0xc0f   :  { %v2805_v13 = vsel %vm296_vm5, %v2799_v34, -inf  ;;  %v2643_v8 = vpop.f32.mrf.mxu2 }
 0xc10   :  { %7484 = vmatpush.msk.msrb.mxu0 %vm96_vm1, %v2643_v8  ;;  %v2854_v42 = vrot.slane %v2643_v8, 1 }
 0xc12   :  { %v2681_v38 = vpop.f32.mrf.mxu3  ;;  %2756 = vmatpush.msrb.mxu0 %v2640_v6 }
 0xc13   :  { %v2687_v48 = vsel %vm300_vm6, %v2681_v38, -inf }
 0xc14   :  { %2688 = vmax.xlane.f32.xlu1 %v2687_v48  ;;  %2953 = vmatpush.msra.mxu0 %v7513_v21  ;;  %v7510_v48 = vld [vmem:[%s11624_s23 + $0x1e0] sm:$0xff] }
 0xc16   :  { %v9659_v61 = vpop.f32.mrf.mxu1  ;;  %2954 = vmatpush.msra.mxu0 %v7512_v25 }
 0xc17   :  { %v2808_v54 = vsel %vm300_vm6, %v9659_v61, -inf  ;;  %v2646_v9 = vpop.f32.mrf.mxu2 }
 0xc18   :  { %v2855_v46 = vrot.slane %v2646_v9, 1  ;;  %2955 = vmatpush.msra.mxu0 %v7511_v18 }
 0xc1a   :  { %7491 = vmatpush.msk.msrb.mxu2 %vm96_vm1, %v2855_v46  ;;  %v2856_v17 = vsel %vm78_vm0, %v2854_v42, %v2855_v46  ;;  %2956 = vmatpush.msra.mxu0 %v7510_v48 }
 0xc1c   :  { %2806 = vmax.xlane.f32.xlu1 %v2805_v13  ;;  %2881 = vmatpush.msrb.mxu2 %v2856_v17 }
 0xc7f   :  { %v2686_v7 = vpop.xlane.xlu0 %2685 }
 0xc80   :  { %v2690_v49 = vsub.f32 %v2678_v31, %v2686_v7  ;;  %v7495_v31 = vld [vmem:[%s11628_s5 + $0x1c8] sm:$0xff]  ;;  %v7508_v7 = vld [vmem:[%s11624_s23 + $0x1d0] sm:$0xff] }
 0xc81   :  { %2919 = vmatpush.msra.mxu3 %v7495_v31 }
 0xc82   :  { %v2692_v50 = vmul.f32 1.442695, %v2690_v49  ;;  %v7507_v49 = vld [vmem:[%s11624_s23 + $0x1c8] sm:$0xff] }
 0xc84   :  { %8183 = vpow2.f32 %v2692_v50  ;;  %v7506_v50 = vld [vmem:[%s11624_s23 + $0x1c0] sm:$0xff] }
 0xc87   :  { %v2689_v51 = vpop.xlane.xlu1 %2688 }
 0xc88   :  { %v2691_v55 = vsub.f32 %v2681_v38, %v2689_v51  ;;  %v7494_v38 = vld [vmem:[%s11628_s5 + $0x1c0] sm:$0xff] }
 0xc89   :  { %2920 = vmatpush.msra.mxu3 %v7494_v38 }
 0xc8a   :  { %v9655_v58 = vpop.eup %8183  ;;  %v2694_v30 = vmul.f32 1.442695, %v2691_v55  ;;  %7503 = vmatmul.msk.f32.vlgmr.msra.gmra.mxu3 %vm113_vm2, %v8596_v35 }
 0xc8b   :  { %v2696_v60 = vsel %vm296_vm5, %v9655_v58, 0.0 }
 0xc8c   :  { %8185 = vpow2.f32 %v2694_v30  ;;  %2697 = vadd.xlane.f32.xlu2 %v2696_v60 }
 0xc8f   :  { %v2807_v59 = vpop.xlane.xlu1 %2806 }
 0xc90   :  { %v2811_v24 = vsub.f32 %v2799_v34, %v2807_v59  ;;  %v7509_v34 = vld [vmem:[%s11624_s23 + $0x1d8] sm:$0xff] }
 0xc91   :  { %2957 = vmatpush.msra.mxu0 %v7509_v34 }
 0xc92   :  { %v9661_v52 = vpop.eup %8185  ;;  %v2813_v27 = vmul.f32 1.442695, %v2811_v24  ;;  %7504 = vmatmul.msk.f32.gmra.mxu3 %vm113_vm2, %v8614_v40 }
 0xc93   :  { %v2699_v28 = vsel %vm300_vm6, %v9661_v52, 0.0  ;;  %2958 = vmatpush.msra.mxu0 %v7508_v7 }
 0xc94   :  { %8187 = vpow2.f32 %v2813_v27  ;;  %2700 = vadd.xlane.f32.xlu0 %v2699_v28  ;;  %2809 = vmax.xlane.f32.xlu2 %v2808_v54 }
 0xc95   :  { %2959 = vmatpush.msra.mxu0 %v7507_v49 }
 0xc97   :  { %2960 = vmatpush.msra.mxu0 %v7506_v50 }
 0xc9a   :  { %v9667_v62 = vpop.eup %8187  ;;  %7505 = vmatmul.msk.f32.gmra.mxu3 %vm113_vm2, %v8590_v33 }
 0xc9b   :  { %v2817_v12 = vsel %vm296_vm5, %v9667_v62, 0.0 }
 0xc9c   :  { %2818 = vadd.xlane.f32.xlu0 %v2817_v12 }
 0xcff   :  { %v2698_v13 = vpop.xlane.xlu2 %2697 }
 0xd00   :  { %8189 = vrcp.f32 %v2698_v13  ;;  %v2713_v27 = vand.u32 2147483648, %v2698_v13  ;;  %v2711_v12 = vand.u32 2147483647, %v2698_v13  ;;  %vm2707_vm14 = vweird.f32 %v2698_v13 }
 0xd02   :  { %v2714_v10 = vor.u32 1.1754944e-38, %v2713_v27  ;;  %vm2712_vm3 = vcmp.eq.f32.partialorder %v2711_v12, 8.507059e+37  ;;  %v7522_v27 = vld [vmem:[%s11595_s7 + $0x1e0] sm:$0xff]  ;;  %v7519_v12 = vld [vmem:[%s11595_s7 + $0x1c8] sm:$0xff] }
 0xd06   :  { %v8190_v51 = vpop.eup %8189 }
 0xd07   :  { %v2703_v55 = vmul.f32 %v8190_v51, %v2698_v13  ;;  %v2810_v30 = vpop.xlane.xlu2 %2809  ;;  %v2701_v60 = vpop.xlane.xlu0 %2700  ;;  %vm2708_vm13 = vweird.f32 %v8190_v51 }
 0xd08   :  { %v2812_v59 = vsub.f32 %v9659_v61, %v2810_v30  ;;  %8191 = vrcp.f32 %v2701_v60  ;;  %vm2709_vm15 = vmor %vm2707_vm14, %vm2708_vm13  ;;  %v2728_v17 = vand.u32 2147483648, %v2701_v60  ;;  %v2726_v21 = vand.u32 2147483647, %v2701_v60 }
 0xd09   :  { %v2704_v24 = vsub.f32 1.0, %v2703_v55  ;;  %vm2722_vm8 = vweird.f32 %v2701_v60 }
 0xd0a   :  { %v2815_v28 = vmul.f32 1.442695, %v2812_v59  ;;  %v2729_v18 = vor.u32 1.1754944e-38, %v2728_v17  ;;  %vm2727_vm10 = vcmp.eq.f32.partialorder %v2726_v21, 8.507059e+37 }
 0xd0b   :  { %v2705_v54 = vmul.f32 %v8190_v51, %v2704_v24  ;;  %v7523_v24 = vld [vmem:[%s11595_s7 + $0x1e8] sm:$0xff] }
 0xd0c   :  { %8193 = vpow2.f32 %v2815_v28  ;;  %v7521_v28 = vld [vmem:[%s11595_s7 + $0x1d8] sm:$0xff] }
 0xd0d   :  { %v2706_v6 = vadd.f32 %v8190_v51, %v2705_v54  ;;  %v7520_v54 = vld [vmem:[%s11595_s7 + $0x1d0] sm:$0xff] }
 0xd0e   :  { %v8192_v8 = vpop.eup %8191 }
 0xd0f   :  { %v2710_v11 = vsel %vm2709_vm15, %v8190_v51, %v2706_v6  ;;  %v2718_v9 = vmul.f32 %v8192_v8, %v2701_v60  ;;  %v2819_v61 = vpop.xlane.xlu0 %2818  ;;  %vm2723_vm7 = vweird.f32 %v8192_v8  ;;  %v7518_v6 = vld [vmem:[%s11595_s7 + $0x1c0] sm:$0xff] }
 0xd10   :  { %v2715_v42 = vsel %vm2712_vm3, %v2714_v10, %v2710_v11  ;;  %8195 = vrcp.f32 %v2819_v61  ;;  %vm2724_vm9 = vmor %vm2722_vm8, %vm2723_vm7  ;;  %v2834_v7 = vand.u32 2147483648, %v2819_v61  ;;  %v2832_v50 = vand.u32 2147483647, %v2819_v61 }
 0xd11   :  { %v2716_v46 = vmul.f32 %v9655_v58, %v2715_v42  ;;  %v2719_v57 = vsub.f32 1.0, %v2718_v9  ;;  %vm2828_vm12 = vweird.f32 %v2819_v61 }
 0xd12   :  { %v9734_v15 = vpop.eup %8193  ;;  %v2835_v55 = vor.u32 1.1754944e-38, %v2834_v7  ;;  %vm2833_vm14 = vcmp.eq.f32.partialorder %v2832_v50, 8.507059e+37  ;;  %v8044_v7 = vld [vmem:[%s11630_s3 + $0x7] ss:$0 sm:$0xff] }
 0xd13   :  { %v2720_v20 = vmul.f32 %v8192_v8, %v2719_v57  ;;  %7485 = vmatmul.msk.f32.vlgmr.msrb.gmra.mxu0 %vm296_vm5, %v2716_v46  ;;  %v2820_v0 = vsel %vm300_vm6, %v9734_v15, 0.0 }
 0xd14   :  { %2821 = vadd.xlane.f32.xlu1 %v2820_v0 }
 0xd15   :  { %v2721_v25 = vadd.f32 %v8192_v8, %v2720_v20 }
 0xd16   :  { %v8196_v31 = vpop.eup %8195 }
 0xd17   :  { %v2824_v58 = vmul.f32 %v8196_v31, %v2819_v61  ;;  %v2725_v38 = vsel %vm2724_vm9, %v8192_v8, %v2721_v25  ;;  %vm2829_vm11 = vweird.f32 %v8196_v31 }
 0xd18   :  { %v2730_v48 = vsel %vm2727_vm10, %v2729_v18, %v2725_v38  ;;  %vm2830_vm13 = vmor %vm2828_vm12, %vm2829_vm11  ;;  %v2922_v18 = vpop.f32.mrf.mxu3 }
 0xd19   :  { %v2825_v34 = vsub.f32 1.0, %v2824_v58  ;;  %v2731_v13 = vmul.f32 %v9661_v52, %v2730_v48  ;;  %v7525_v52 = vld [vmem:[%s11595_s7 + $0x1f8] sm:$0xff]  ;;  %v8045_v48 = vld [vmem:[%s11629_s6 + $0x7] ss:$0 sm:$0xff] }
 0xd1a   :  { %2993 = vmatpush.msra.mxu1 %v7525_v52 }
 0xd1b   :  { %v2826_v49 = vmul.f32 %v8196_v31, %v2825_v34  ;;  %7486 = vmatmul.msk.f32.gmra.mxu0 %vm296_vm5, %v2731_v13 }
 0xd1d   :  { %v2827_v51 = vadd.f32 %v8196_v31, %v2826_v49 }
 0xd1f   :  { %v2831_v30 = vsel %vm2830_vm13, %v8196_v31, %v2827_v51 }
 0xd20   :  { %v2836_v60 = vsel %vm2833_vm14, %v2835_v55, %v2831_v30  ;;  %v2925_v38 = vpop.f32.mrf.mxu3 }
 0xd21   :  { %v2837_v59 = vmul.f32 %v9667_v62, %v2836_v60  ;;  %v7524_v62 = vld [vmem:[%s11595_s7 + $0x1f0] sm:$0xff]  ;;  %v2926_v30 = vadd.f32 %v8044_v7, %v2925_v38 }
 0xd22   :  { %2994 = vmatpush.msra.mxu1 %v7524_v62 }
 0xd23   :  { %7492 = vmatmul.msk.f32.vlgmr.msrb.gmra.mxu2 %vm296_vm5, %v2837_v59  ;;  %7515 = vmatmul.msk.f32.vlgmr.msra.gmra.mxu0 %vm113_vm2, %v8596_v35  ;;  %v3166_v62 = vrot.slane %v2926_v30, 1 }
 0xd24   :  { %2995 = vmatpush.msra.mxu1 %v7523_v24 }
 0xd26   :  { %2996 = vmatpush.msra.mxu1 %v7522_v27 }
 0xd28   :  { %2997 = vmatpush.msra.mxu1 %v7521_v28  ;;  %v2928_v50 = vpop.f32.mrf.mxu3 }
 0xd29   :  { %v2929_v60 = vadd.f32 %v8044_v7, %v2928_v50 }
 0xd2a   :  { %2998 = vmatpush.msra.mxu1 %v7520_v54  ;;  %v7530_v54 = vld [vmem:[%s11597_s9 + $0x38] sm:$0xff] }
 0xd2b   :  { %7516 = vmatmul.msk.f32.gmra.mxu0 %vm113_vm2, %v8614_v40  ;;  %v3167_v24 = vrot.slane %v2929_v60, 1  ;;  %3037 = vmatpush.msra.mxu2 %v7530_v54 }
 0xd2c   :  { %2999 = vmatpush.msra.mxu1 %v7519_v12  ;;  %v8046_v12 = vld [vmem:[%s11596_s8 + $0x7] ss:$0 sm:$0xff] }
 0xd2d   :  { %v3168_v28 = vsel %vm78_vm0, %v3166_v62, %v3167_v24 }
 0xd2e   :  { %3000 = vmatpush.msra.mxu1 %v7518_v6 }
 0xd2f   :  { %7527 = vmatmul.msk.f32.vlgmr.msra.gmra.mxu1 %vm113_vm2, %v8596_v35 }
 0xd33   :  { %7517 = vmatmul.msk.f32.gmra.mxu0 %vm113_vm2, %v8590_v33 }
 0xd37   :  { %7528 = vmatmul.msk.f32.gmra.mxu1 %vm113_vm2, %v8614_v40 }
 0xd3f   :  { %7529 = vmatmul.msk.f32.gmra.mxu1 %vm113_vm2, %v8590_v33 }
 0xd87   :  { %v2822_v8 = vpop.xlane.xlu1 %2821 }
 0xd88   :  { %8197 = vrcp.f32 %v2822_v8  ;;  %v2849_v42 = vand.u32 2147483648, %v2822_v8  ;;  %v2847_v57 = vand.u32 2147483647, %v2822_v8  ;;  %vm2843_vm3 = vweird.f32 %v2822_v8 }
 0xd8a   :  { %v2850_v20 = vor.u32 1.1754944e-38, %v2849_v42  ;;  %vm2848_vm8 = vcmp.eq.f32.partialorder %v2847_v57, 8.507059e+37 }
 0xd8e   :  { %v8198_v10 = vpop.eup %8197 }
 0xd8f   :  { %v2839_v11 = vmul.f32 %v8198_v10, %v2822_v8  ;;  %vm2844_vm15 = vweird.f32 %v8198_v10 }
 0xd90   :  { %v9779_v9 = vpop.f32.mrf.mxu0  ;;  %vm2845_vm7 = vmor %vm2843_vm3, %vm2844_vm15 }
 0xd91   :  { %v2840_v61 = vsub.f32 1.0, %v2839_v11 }
 0xd93   :  { %v2841_v46 = vmul.f32 %v8198_v10, %v2840_v61 }
 0xd95   :  { %v2842_v17 = vadd.f32 %v8198_v10, %v2841_v46 }
 0xd97   :  { %v2846_v21 = vsel %vm2845_vm7, %v8198_v10, %v2842_v17 }
 0xd98   :  { %v9781_v0 = vpop.f32.mrf.mxu0  ;;  %v2851_v25 = vsel %vm2848_vm8, %v2850_v20, %v2846_v21 }
 0xd99   :  { %v2852_v31 = vmul.f32 %v9734_v15, %v2851_v25  ;;  %v2923_v15 = vadd.f32 %v8044_v7, %v2922_v18 }
 0xd9b   :  { %7493 = vmatmul.msk.f32.gmra.mxu2 %vm296_vm5, %v2852_v31 }
 0xda0   :  { %v2962_v58 = vpop.f32.mrf.mxu0 }
 0xda1   :  { %v2963_v49 = vadd.f32 %v8045_v48, %v2962_v58 }
 0xda6   :  { %v9814_v58 = vpop.f32.mrf.mxu2 }
 0xda8   :  { %v2965_v34 = vpop.f32.mrf.mxu0 }
 0xda9   :  { %v2966_v13 = vadd.f32 %v8045_v48, %v2965_v34 }
 0xdab   :  { %7534 = vmatpush.xpose.msk.msrb.mxu3 %vm225_vm4, %v2966_v13  ;;  %v3170_v52 = vrot.slane %v2966_v13, 1 }
 0xdac   :  { %v3002_v6 = vpop.f32.mrf.mxu1 }
 0xdad   :  { %v3003_v8 = vadd.f32 %v8046_v12, %v3002_v6 }
 0xdaf   :  { %7535 = vmatpush.xpose.msk.msrb.mxu3 %vm225_vm4, %v2963_v49  ;;  %7531 = vmatmul.msk.f32.vlgmr.msra.gmra.mxu2 %vm225_vm4, %v3003_v8 }
 0xdb0   :  { %v2968_v51 = vpop.f32.mrf.mxu0 }
 0xdb1   :  { %v2969_v55 = vadd.f32 %v8045_v48, %v2968_v51 }
 0xdb2   :  { %7536 = vmatmul.msk.f32.vlgmr.msrb.gmra.mxu3 %vm225_vm4, %v2923_v15 }
 0xdb3   :  { %v3171_v59 = vrot.slane %v2969_v55, 1 }
 0xdb4   :  { %v3005_v10 = vpop.f32.mrf.mxu1 }
 0xdb5   :  { %7541 = vmatpush.xpose.msk.msrb.mxu1 %vm225_vm4, %v3171_v59  ;;  %v3172_v27 = vsel %vm78_vm0, %v3170_v52, %v3171_v59  ;;  %v3006_v11 = vadd.f32 %v8046_v12, %v3005_v10 }
 0xdb7   :  { %7532 = vmatmul.msk.f32.gmra.mxu2 %vm225_vm4, %v3006_v11 }
 0xdb9   :  { %7542 = vmatpush.xpose.msk.msrb.mxu1 %vm225_vm4, %v3172_v27 }
 0xdba   :  { %7537 = vmatmul.msk.f32.gmra.mxu3 %vm225_vm4, %v2926_v30 }
 0xdbc   :  { %7543 = vmatmul.msk.f32.vlgmr.msrb.gmra.mxu1 %vm225_vm4, %v3168_v28  ;;  %v3008_v61 = vpop.f32.mrf.mxu1 }
 0xdbd   :  { %v3009_v42 = vadd.f32 %v8046_v12, %v3008_v61 }
 0xdbf   :  { %7533 = vmatmul.msk.f32.gmra.mxu2 %vm225_vm4, %v3009_v42 }
 0xdc4   :  { %7544 = vmatmul.msk.f32.gmra.mxu1 %vm225_vm4, %v3167_v24 }
 0xe1e   :  { %v9816_v38 = vpop.f32.mrf.mxu2 }
 0xe32   :  { %v3039_v48 = vpop.f32.mrf.mxu2 }
 0xe35   :  { %v3077_v46 = vpop.f32.mrf.mxu3 }
 0xe36   :  { %v3083_v57 = vsel %vm296_vm5, %v3077_v46, -inf }
 0xe37   :  { %3084 = vmax.xlane.f32.xlu2 %v3083_v57 }
 0xe39   :  { %v3198_v17 = vpop.f32.mrf.mxu1 }
 0xe3a   :  { %v3204_v20 = vsel %vm296_vm5, %v3198_v17, -inf  ;;  %v3042_v34 = vpop.f32.mrf.mxu2 }
 0xe3b   :  { %3205 = vmax.xlane.f32.xlu0 %v3204_v20  ;;  %7538 = vmatpush.msk.msrb.mxu0 %vm96_vm1, %v3042_v34  ;;  %v3253_v7 = vrot.slane %v3042_v34, 1 }
 0xe3d   :  { %v3080_v21 = vpop.f32.mrf.mxu3  ;;  %3155 = vmatpush.msrb.mxu0 %v3039_v48 }
 0xe3e   :  { %v3086_v25 = vsel %vm300_vm6, %v3080_v21, -inf }
 0xe3f   :  { %3087 = vmax.xlane.f32.xlu1 %v3086_v25 }
 0xe41   :  { %v3201_v31 = vpop.f32.mrf.mxu1 }
 0xe42   :  { %v3207_v18 = vsel %vm300_vm6, %v3201_v31, -inf  ;;  %v3045_v13 = vpop.f32.mrf.mxu2 }
 0xe43   :  { %3208 = vmax.xlane.f32.xlu2 %v3207_v18  ;;  %v3254_v49 = vrot.slane %v3045_v13, 1 }
 0xe45   :  { %7545 = vmatpush.msk.msrb.mxu2 %vm96_vm1, %v3254_v49  ;;  %v3255_v15 = vsel %vm78_vm0, %v3253_v7, %v3254_v49 }
 0xe47   :  { %3280 = vmatpush.msrb.mxu2 %v3255_v15 }
 0xeaa   :  { %v3085_v50 = vpop.xlane.xlu2 %3084 }
 0xeab   :  { %v3089_v51 = vsub.f32 %v3077_v46, %v3085_v50 }
 0xead   :  { %v3091_v55 = vmul.f32 1.442695, %v3089_v51 }
 0xeae   :  { %v3206_v30 = vpop.xlane.xlu0 %3205 }
 0xeaf   :  { %8199 = vpow2.f32 %v3091_v55  ;;  %v3210_v60 = vsub.f32 %v3198_v17, %v3206_v30 }
 0xeb1   :  { %v3212_v59 = vmul.f32 1.442695, %v3210_v60 }
 0xeb2   :  { %v3088_v52 = vpop.xlane.xlu1 %3087 }
 0xeb3   :  { %8201 = vpow2.f32 %v3212_v59  ;;  %v3090_v62 = vsub.f32 %v3080_v21, %v3088_v52 }
 0xeb5   :  { %v8200_v24 = vpop.eup %8199  ;;  %v3093_v27 = vmul.f32 1.442695, %v3090_v62 }
 0xeb6   :  { %v3209_v28 = vpop.xlane.xlu2 %3208  ;;  %v3095_v54 = vsel %vm296_vm5, %v8200_v24, 0.0 }
 0xeb7   :  { %8203 = vpow2.f32 %v3093_v27  ;;  %v3211_v12 = vsub.f32 %v3201_v31, %v3209_v28  ;;  %3096 = vadd.xlane.f32.xlu0 %v3095_v54 }
 0xeb9   :  { %v8202_v6 = vpop.eup %8201  ;;  %v3214_v8 = vmul.f32 1.442695, %v3211_v12 }
 0xeba   :  { %v3216_v10 = vsel %vm296_vm5, %v8202_v6, 0.0 }
 0xebb   :  { %8205 = vpow2.f32 %v3214_v8  ;;  %3217 = vadd.xlane.f32.xlu1 %v3216_v10 }
 0xebd   :  { %v9823_v11 = vpop.eup %8203 }
 0xebe   :  { %v3098_v61 = vsel %vm300_vm6, %v9823_v11, 0.0 }
 0xebf   :  { %3099 = vadd.xlane.f32.xlu2 %v3098_v61 }
 0xec1   :  { %v9827_v42 = vpop.eup %8205 }
 0xec2   :  { %v3219_v46 = vsel %vm300_vm6, %v9827_v42, 0.0 }
 0xec3   :  { %3220 = vadd.xlane.f32.xlu0 %v3219_v46 }
 0xf2a   :  { %v3097_v57 = vpop.xlane.xlu0 %3096 }
 0xf2b   :  { %8207 = vrcp.f32 %v3097_v57  ;;  %v3110_v48 = vand.u32 2147483647, %v3097_v57  ;;  %v3112_v34 = vand.u32 2147483648, %v3097_v57  ;;  %vm3106_vm10 = vweird.f32 %v3097_v57 }
 0xf2d   :  { %vm3111_vm12 = vcmp.eq.f32.partialorder %v3110_v48, 8.507059e+37  ;;  %v3113_v55 = vor.u32 1.1754944e-38, %v3112_v34 }
 0xf2e   :  { %v3218_v17 = vpop.xlane.xlu1 %3217 }
 0xf2f   :  { %8209 = vrcp.f32 %v3218_v17  ;;  %v3231_v30 = vand.u32 2147483647, %v3218_v17  ;;  %v3233_v60 = vand.u32 2147483648, %v3218_v17  ;;  %vm3227_vm14 = vweird.f32 %v3218_v17 }
 0xf31   :  { %v8208_v20 = vpop.eup %8207  ;;  %vm3232_vm3 = vcmp.eq.f32.partialorder %v3231_v30, 8.507059e+37  ;;  %v3234_v10 = vor.u32 1.1754944e-38, %v3233_v60 }
 0xf32   :  { %v3102_v21 = vmul.f32 %v8208_v20, %v3097_v57  ;;  %v3100_v25 = vpop.xlane.xlu2 %3099  ;;  %vm3107_vm9 = vweird.f32 %v8208_v20 }
 0xf33   :  { %8211 = vrcp.f32 %v3100_v25  ;;  %vm3108_vm11 = vmor %vm3106_vm10, %vm3107_vm9  ;;  %v3125_v61 = vand.u32 2147483647, %v3100_v25  ;;  %v3127_v46 = vand.u32 2147483648, %v3100_v25  ;;  %vm3121_vm8 = vweird.f32 %v3100_v25 }
 0xf34   :  { %v3103_v31 = vsub.f32 1.0, %v3102_v21 }
 0xf35   :  { %v8210_v18 = vpop.eup %8209  ;;  %vm3126_vm10 = vcmp.eq.f32.partialorder %v3125_v61, 8.507059e+37 }
 0xf36   :  { %v3104_v13 = vmul.f32 %v8208_v20, %v3103_v31  ;;  %v3223_v7 = vmul.f32 %v8210_v18, %v3218_v17  ;;  %v3221_v49 = vpop.xlane.xlu0 %3220  ;;  %vm3228_vm13 = vweird.f32 %v8210_v18  ;;  %v3128_v17 = vor.u32 1.1754944e-38, %v3127_v46 }
 0xf37   :  { %8213 = vrcp.f32 %v3221_v49  ;;  %vm3229_vm15 = vmor %vm3227_vm14, %vm3228_vm13 }
 0xf38   :  { %v3105_v15 = vadd.f32 %v8208_v20, %v3104_v13  ;;  %v3224_v50 = vsub.f32 1.0, %v3223_v7  ;;  %v3248_v13 = vand.u32 2147483648, %v3221_v49 }
 0xf39   :  { %v8212_v51 = vpop.eup %8211 }
 0xf3a   :  { %v3109_v59 = vsel %vm3108_vm11, %v8208_v20, %v3105_v15  ;;  %v3225_v52 = vmul.f32 %v8210_v18, %v3224_v50  ;;  %v3117_v62 = vmul.f32 %v8212_v51, %v3100_v25  ;;  %vm3122_vm7 = vweird.f32 %v8212_v51 }
 0xf3b   :  { %v3114_v27 = vsel %vm3111_vm12, %v3113_v55, %v3109_v59  ;;  %vm3123_vm9 = vmor %vm3121_vm8, %vm3122_vm7  ;;  %v3246_v15 = vand.u32 2147483647, %v3221_v49  ;;  %vm3242_vm12 = vweird.f32 %v3221_v49 }
 0xf3c   :  { %v3115_v28 = vmul.f32 %v8200_v24, %v3114_v27  ;;  %v3226_v54 = vadd.f32 %v8210_v18, %v3225_v52  ;;  %v3118_v12 = vsub.f32 1.0, %v3117_v62  ;;  %v732_v52 = vadd.f32 %v8935_v53, %v9031_v63 }
 0xf3d   :  { %v8214_v8 = vpop.eup %8213  ;;  %vm3247_vm14 = vcmp.eq.f32.partialorder %v3246_v15, 8.507059e+37  ;;  %v891_v27 = vadd.f32 %v9039_v4, %v8997_v2  ;;  %v735_v53 = vadd.f32 %v8943_v56, %v9037_v3 }
 0xf3e   :  { %v3230_v57 = vsel %vm3229_vm15, %v8210_v18, %v3226_v54  ;;  %v3119_v21 = vmul.f32 %v8212_v51, %v3118_v12  ;;  %v3238_v31 = vmul.f32 %v8214_v8, %v3221_v49  ;;  %7539 = vmatmul.msk.f32.vlgmr.msrb.gmra.mxu0 %vm296_vm5, %v3115_v28  ;;  %vm3243_vm11 = vweird.f32 %v8214_v8 }
 0xf3f   :  { %v3235_v20 = vsel %vm3232_vm3, %v3234_v10, %v3230_v57  ;;  %vm3244_vm13 = vmor %vm3242_vm12, %vm3243_vm11  ;;  %v1293_v63 = vadd.f32 %v9197_v39, %v891_v27  ;;  %v894_v12 = vadd.f32 %v9041_v5, %v8999_v19  ;;  %vm3316_vm15 = vcmask 517120   ;;  %v3402_v27 = vld [vmem:[%s11599_s11 + $0x30] sm:$0xff] }
 0xf40   :  { %v3236_v48 = vmul.f32 %v8202_v6, %v3235_v20  ;;  %v3120_v34 = vadd.f32 %v8212_v51, %v3119_v21  ;;  %v3239_v24 = vsub.f32 1.0, %v3238_v31  ;;  %v3249_v6 = vor.u32 1.1754944e-38, %v3248_v13 }
 0xf42   :  { %v3240_v7 = vmul.f32 %v8214_v8, %v3239_v24  ;;  %7546 = vmatmul.msk.f32.vlgmr.msrb.gmra.mxu2 %vm296_vm5, %v3236_v48  ;;  %v3124_v18 = vsel %vm3123_vm9, %v8212_v51, %v3120_v34  ;;  %v1168_v51 = vadd.f32 %v9145_v32, %v732_v52  ;;  %v8397_v48 = vmov 64.0  }
 0xf43   :  { %v3129_v50 = vsel %vm3126_vm10, %v3128_v17, %v3124_v18  ;;  %8215 = vrcp.f32 %v8397_v48 }
 0xf44   :  { %v3241_v55 = vadd.f32 %v8214_v8, %v3240_v7  ;;  %v3130_v30 = vmul.f32 %v9823_v11, %v3129_v50  ;;  %v1567_v49 = vadd.f32 %v9303_v16, %v1168_v51  ;;  %v1169_v16 = vadd.f32 %v9149_v43, %v735_v53  ;;  %v3398_v53 = vld [vmem:[%s11599_s11 + $0x10] sm:$0xff] }
 0xf45   :  { %v1294_v43 = vadd.f32 %v9199_v47, %v894_v12 }
 0xf46   :  { %7540 = vmatmul.msk.f32.gmra.mxu0 %vm296_vm5, %v3130_v30  ;;  %v3245_v25 = vsel %vm3244_vm13, %v8214_v8, %v3241_v55  ;;  %v1966_v11 = vadd.f32 %v9461_v14, %v1567_v49  ;;  %v1692_v14 = vadd.f32 %v9355_v36, %v1293_v63  ;;  %v1568_v2 = vadd.f32 %v9307_v26, %v1169_v16  ;;  %v3397_v63 = vld [vmem:[%s11599_s11 + $0x8] sm:$0xff] }
 0xf47   :  { %v3250_v60 = vsel %vm3247_vm14, %v3249_v6, %v3245_v25 }
 0xf48   :  { %v3251_v59 = vmul.f32 %v9827_v42, %v3250_v60  ;;  %v2365_v62 = vadd.f32 %v9619_v45, %v1966_v11  ;;  %v8047_v42 = vld [vmem:[%s11598_s10] ss:$0 sm:$0xff]  ;;  %v2091_v4 = vadd.f32 %v9513_v23, %v1692_v14  ;;  %v1967_v8 = vadd.f32 %v9465_v29, %v1568_v2 }
 0xf4a   :  { %7547 = vmatmul.msk.f32.gmra.mxu2 %vm296_vm5, %v3251_v59  ;;  %v2764_v28 = vadd.f32 %v9779_v9, %v2365_v62  ;;  %v2490_v56 = vadd.f32 %v9671_v44, %v2091_v4  ;;  %v2366_v39 = vadd.f32 %v9623_v22, %v1967_v8  ;;  %v3403_v62 = vld [vmem:[%s11599_s11 + $0x38] sm:$0xff] }
 0xf4b   :  { %3425 = vmatpush.msra.mxu0 %v3403_v62  ;;  %v3448_v62 = vld [vmem:[%s11601_s13 + $0x10] sm:$0xff] }
 0xf4c   :  { %v2889_v26 = vadd.f32 %v9814_v58, %v2490_v56  ;;  %v2765_v10 = vadd.f32 %v9781_v0, %v2366_v39  ;;  %v3461_v39 = vld [vmem:[%s11601_s13 + $0x78] sm:$0xff] }
 0xf4d   :  { %3426 = vmatpush.msra.mxu0 %v3402_v27  ;;  %v3447_v27 = vld [vmem:[%s11601_s13 + $0x8] sm:$0xff] }
 0xfbb   :  { %v3157_v54 = vpop.f32.mrf.mxu0 }
 0xfbc   :  { %v3163_v32 = vadd.f32 %v3157_v54, %v2764_v28  ;;  %v3401_v28 = vld [vmem:[%s11599_s11 + $0x28] sm:$0xff]  ;;  %v3399_v54 = vld [vmem:[%s11599_s11 + $0x18] sm:$0xff] }
 0xfbd   :  { %3427 = vmatpush.msra.mxu0 %v3401_v28  ;;  %v3446_v28 = vld [vmem:[%s11601_s13] sm:$0xff] }
 0xfbe   :  { %v3302_v45 = vadd.f32 %v8047_v42, %v3163_v32  ;;  %v3396_v32 = vld [vmem:[%s11599_s11] sm:$0xff] }
 0xfc0   :  { %v3305_v9 = vadd.f32 %v3302_v45, %v8596_v35  ;;  %v1693_v35 = vadd.f32 %v9357_v37, %v1294_v43 }
 0xfc2   :  { %v3310_v3 = vsel %vm113_vm2, %v3305_v9, 0.0  ;;  %v2092_v5 = vadd.f32 %v9515_v41, %v1693_v35  ;;  %v8048_v35 = vld [vmem:[%s11603_s15] ss:$0 sm:$0xff] }
 0xfc3   :  { %3311 = vadd.xlane.f32.xlu1 %v3310_v3  ;;  %v3160_v36 = vpop.f32.mrf.mxu0 }
 0xfc4   :  { %v3164_v29 = vadd.f32 %v3160_v36, %v2765_v10  ;;  %v2491_v61 = vadd.f32 %v9673_v1, %v2092_v5 }
 0xfc5   :  { %v3282_v23 = vpop.f32.mrf.mxu2 }
 0xfc6   :  { %v3288_v19 = vadd.f32 %v3282_v23, %v2889_v26  ;;  %v2890_v22 = vadd.f32 %v9816_v38, %v2491_v61  ;;  %v8216_v38 = vpop.eup %8215  ;;  %v3460_v26 = vld [vmem:[%s11601_s13 + $0x70] sm:$0xff]  ;;  %v3459_v23 = vld [vmem:[%s11601_s13 + $0x68] sm:$0xff] }
 0xfc7   :  { %v3321_v34 = vmul.f32 64.0, %v8216_v38  ;;  %vm3325_vm3 = vweird.f32 %v8216_v38 }
 0xfc8   :  { %v3292_v44 = vrot.slane %v3288_v19, 7 }
 0xfc9   :  { %v3322_v24 = vsub.f32 1.0, %v3321_v34 }
 0xfca   :  { %v3297_v46 = vsel %vm96_vm1, %v3164_v29, %v3292_v44  ;;  %v3458_v29 = vld [vmem:[%s11601_s13 + $0x60] sm:$0xff] }
 0xfcb   :  { %v3303_v47 = vadd.f32 %v8047_v42, %v3297_v46 }
 0xfcd   :  { %v3285_v57 = vpop.f32.mrf.mxu2  ;;  %v3306_v58 = vadd.f32 %v3303_v47, %v8614_v40  ;;  %v3323_v40 = vmul.f32 %v8216_v38, %v3322_v24  ;;  %v3453_v24 = vld [vmem:[%s11601_s13 + $0x38] sm:$0xff] }
 0xfce   :  { %v3289_v21 = vadd.f32 %v3285_v57, %v2890_v22  ;;  %v3457_v22 = vld [vmem:[%s11601_s13 + $0x58] sm:$0xff] }
 0xfcf   :  { %v3313_v37 = vsel %vm113_vm2, %v3306_v58, 0.0  ;;  %v3324_v17 = vadd.f32 %v8216_v38, %v3323_v40 }
 0xfd0   :  { %v3293_v31 = vrot.slane %v3289_v21, 7  ;;  %3314 = vadd.xlane.f32.xlu2 %v3313_v37 }
 0xfd1   :  { %v9876_v13 = vsel %vm3325_vm3, %v8216_v38, %v3324_v17 }
 0xfd2   :  { %v3294_v0 = vsel %vm96_vm1, %v3292_v44, %v3293_v31  ;;  %v8049_v44 = vld [vmem:[%s11604_s16] ss:$0 sm:$0xff]  ;;  %v3456_v31 = vld [vmem:[%s11601_s13 + $0x50] sm:$0xff] }
 0xfd3   :  { %v3304_v41 = vadd.f32 %v8047_v42, %v3294_v0  ;;  %v3400_v42 = vld [vmem:[%s11599_s11 + $0x20] sm:$0xff] }
 0xfd4   :  { %3428 = vmatpush.msra.mxu0 %v3400_v42 }
 0xfd5   :  { %v3307_v20 = vadd.f32 %v3304_v41, %v8590_v33  ;;  %v3455_v41 = vld [vmem:[%s11601_s13 + $0x48] sm:$0xff] }
 0xfd6   :  { %3429 = vmatpush.msra.mxu0 %v3399_v54 }
 0xfd7   :  { %v3317_v1 = vsel %vm3316_vm15, %v3307_v20, 0.0 }
 0xfd8   :  { %3318 = vadd.xlane.f32.xlu0 %v3317_v1  ;;  %3430 = vmatpush.msra.mxu0 %v3398_v53  ;;  %v3454_v1 = vld [vmem:[%s11601_s13 + $0x40] sm:$0xff] }
 0xfda   :  { %3431 = vmatpush.msra.mxu0 %v3397_v63 }
 0xfdc   :  { %3432 = vmatpush.msra.mxu0 %v3396_v32 }
 0xfde   :  { %3466 = vmatpush.msrb.mxu0 %v3461_v39 }
 0xfe0   :  { %3467 = vmatpush.msrb.mxu0 %v3460_v26 }
 0xfe2   :  { %3468 = vmatpush.msrb.mxu0 %v3459_v23 }
 0xfe4   :  { %3469 = vmatpush.msrb.mxu0 %v3458_v29 }
 0xfe6   :  { %3470 = vmatpush.msrb.mxu0 %v3457_v22 }
 0xfe8   :  { %3471 = vmatpush.msrb.mxu0 %v3456_v31 }
 0xfea   :  { %3472 = vmatpush.msrb.mxu0 %v3455_v41 }
 0xfec   :  { %3473 = vmatpush.msrb.mxu0 %v3454_v1  ;;  %v7570_v1 = vld [vmem:[%s11624_s23 + $0x238] sm:$0xff] }
 0xfed   :  { %3646 = vmatpush.msra.mxu2 %v7570_v1 }
 0xfee   :  { %3474 = vmatpush.msrb.mxu0 %v3453_v24  ;;  %v7569_v24 = vld [vmem:[%s11624_s23 + $0x230] sm:$0xff] }
 0xfef   :  { %3647 = vmatpush.msra.mxu2 %v7569_v24 }
0x1036   :  { %v3312_v7 = vpop.xlane.xlu1 %3311 }
0x1037   :  { %v3327_v15 = vmul.f32 %v9876_v13, %v3312_v7  ;;  %v3452_v7 = vld [vmem:[%s11601_s13 + $0x30] sm:$0xff] }
0x1038   :  { %3475 = vmatpush.msrb.mxu0 %v3452_v7  ;;  %v7556_v7 = vld [vmem:[%s11628_s5 + $0x228] sm:$0xff] }
0x1039   :  { %v3330_v18 = vsub.f32 %v3305_v9, %v3327_v15 }
0x103b   :  { %v3333_v50 = vmul.f32 %v3330_v18, %v3330_v18 }
0x103d   :  { %v3336_v33 = vsel %vm113_vm2, %v3333_v50, 0.0  ;;  %v3451_v50 = vld [vmem:[%s11601_s13 + $0x28] sm:$0xff] }
0x103e   :  { %3337 = vadd.xlane.f32.xlu1 %v3336_v33  ;;  %3476 = vmatpush.msrb.mxu0 %v3451_v50  ;;  %v7604_v50 = vld [vmem:[%s11628_s5 + $0x268] sm:$0xff] }
0x1043   :  { %v3315_v55 = vpop.xlane.xlu2 %3314 }
0x1044   :  { %v3328_v30 = vmul.f32 %v9876_v13, %v3315_v55 }
0x1046   :  { %v9881_v6 = vsub.f32 %v3306_v58, %v3328_v30 }
0x1048   :  { %v3334_v25 = vmul.f32 %v9881_v6, %v9881_v6 }
0x104a   :  { %v3339_v60 = vsel %vm113_vm2, %v3334_v25, 0.0  ;;  %v3450_v25 = vld [vmem:[%s11601_s13 + $0x20] sm:$0xff] }
0x104b   :  { %3340 = vadd.xlane.f32.xlu2 %v3339_v60  ;;  %v3319_v59 = vpop.xlane.xlu0 %3318  ;;  %3477 = vmatpush.msrb.mxu0 %v3450_v25  ;;  %v7603_v25 = vld [vmem:[%s11628_s5 + $0x260] sm:$0xff] }
0x104c   :  { %v3329_v52 = vmul.f32 %v9876_v13, %v3319_v59 }
0x104e   :  { %v9887_v51 = vsub.f32 %v3307_v20, %v3329_v52 }
0x1050   :  { %v3335_v49 = vmul.f32 %v9887_v51, %v9887_v51 }
0x1052   :  { %v3342_v11 = vsel %vm3316_vm15, %v3335_v49, 0.0 }
0x1053   :  { %3343 = vadd.xlane.f32.xlu0 %v3342_v11 }
0x10b1   :  { %v3338_v16 = vpop.xlane.xlu1 %3337 }
0x10b2   :  { %v3345_v14 = vmul.f32 %v3338_v16, %v9876_v13 }
0x10b4   :  { %v3348_v45 = vadd.f32 1e-05, %v3345_v14 }
0x10b6   :  { %8217 = vrsqrt.f32 %v3348_v45  ;;  %vm3357_vm8 = vweird.f32 %v3348_v45 }
0x10bc   :  { %v8218_v2 = vpop.eup %8217 }
0x10bd   :  { %v3352_v4 = vmul.f32 %v8218_v2, %v3348_v45  ;;  %vm3358_vm7 = vweird.f32 %v8218_v2 }
0x10be   :  { %v3341_v9 = vpop.xlane.xlu2 %3340  ;;  %vm3359_vm9 = vmor %vm3357_vm8, %vm3358_vm7 }
0x10bf   :  { %v3353_v12 = vmul.f32 %v8218_v2, %v3352_v4  ;;  %v3346_v8 = vmul.f32 %v3341_v9, %v9876_v13  ;;  %v8051_v4 = vld [vmem:[%s11602_s14] ss:$0 sm:$0xff] }
0x10c1   :  { %v3354_v56 = vmul.f32 0.5, %v3353_v12  ;;  %v3349_v3 = vadd.f32 1e-05, %v3346_v8 }
0x10c3   :  { %v3355_v43 = vsub.f32 1.5, %v3354_v56  ;;  %8219 = vrsqrt.f32 %v3349_v3  ;;  %vm3367_vm11 = vweird.f32 %v3349_v3 }
0x10c5   :  { %v3356_v36 = vmul.f32 %v8218_v2, %v3355_v43 }
0x10c6   :  { %v3344_v10 = vpop.xlane.xlu0 %3343 }
0x10c7   :  { %v3360_v19 = vsel %vm3359_vm9, %v8218_v2, %v3356_v36  ;;  %v3347_v5 = vmul.f32 %v3344_v10, %v9876_v13 }
0x10c8   :  { %v3381_v61 = vmul.f32 %v3360_v19, %v3330_v18 }
0x10c9   :  { %v8220_v46 = vpop.eup %8219  ;;  %v3350_v47 = vadd.f32 1e-05, %v3347_v5 }
0x10ca   :  { %v3387_v57 = vmul.f32 %v8048_v35, %v3381_v61  ;;  %v3362_v58 = vmul.f32 %v8220_v46, %v3349_v3  ;;  %vm3368_vm10 = vweird.f32 %v8220_v46 }
0x10cb   :  { %8221 = vrsqrt.f32 %v3350_v47  ;;  %vm3369_vm12 = vmor %vm3367_vm11, %vm3368_vm10  ;;  %vm3377_vm14 = vweird.f32 %v3350_v47 }
0x10cc   :  { %v9940_v21 = vadd.f32 %v8049_v44, %v3387_v57  ;;  %v3363_v37 = vmul.f32 %v8220_v46, %v3362_v58 }
0x10ce   :  { %v3364_v0 = vmul.f32 0.5, %v3363_v37  ;;  %7548 = vmatmul.msk.f32.vlgmr.msra.gmra.mxu0 %vm113_vm2, %v9940_v21 }
0x10d0   :  { %v3365_v20 = vsub.f32 1.5, %v3364_v0 }
0x10d1   :  { %v8222_v48 = vpop.eup %8221 }
0x10d2   :  { %v3366_v38 = vmul.f32 %v8220_v46, %v3365_v20  ;;  %v3372_v34 = vmul.f32 %v8222_v48, %v3350_v47  ;;  %vm3378_vm13 = vweird.f32 %v8222_v48  ;;  %v7558_v20 = vld [vmem:[%s11628_s5 + $0x238] sm:$0xff] }
0x10d3   :  { %vm3379_vm3 = vmor %vm3377_vm14, %vm3378_vm13  ;;  %3606 = vmatpush.msra.mxu1 %v7558_v20 }
0x10d4   :  { %v3370_v40 = vsel %vm3369_vm12, %v8220_v46, %v3366_v38  ;;  %v3373_v17 = vmul.f32 %v8222_v48, %v3372_v34  ;;  %v7606_v38 = vld [vmem:[%s11628_s5 + $0x278] sm:$0xff]  ;;  %v7557_v34 = vld [vmem:[%s11628_s5 + $0x230] sm:$0xff] }
0x10d5   :  { %v3382_v15 = vmul.f32 %v3370_v40, %v9881_v6  ;;  %v3449_v6 = vld [vmem:[%s11601_s13 + $0x18] sm:$0xff]  ;;  %v7581_v40 = vld [vmem:[%s11595_s7 + $0x230] sm:$0xff]  ;;  %3607 = vmatpush.msra.mxu1 %v7557_v34 }
0x10d6   :  { %v3374_v18 = vmul.f32 0.5, %v3373_v17  ;;  %3478 = vmatpush.msrb.mxu0 %v3449_v6  ;;  %v7605_v17 = vld [vmem:[%s11628_s5 + $0x270] sm:$0xff]  ;;  %v7566_v6 = vld [vmem:[%s11624_s23 + $0x218] sm:$0xff] }
0x10d7   :  { %v3388_v33 = vmul.f32 %v8048_v35, %v3382_v15  ;;  %v7568_v15 = vld [vmem:[%s11624_s23 + $0x228] sm:$0xff]  ;;  %3608 = vmatpush.msra.mxu1 %v7556_v7 }
0x10d8   :  { %v3375_v55 = vsub.f32 1.5, %v3374_v18  ;;  %3479 = vmatpush.msrb.mxu0 %v3448_v62  ;;  %v7580_v18 = vld [vmem:[%s11595_s7 + $0x228] sm:$0xff]  ;;  %3648 = vmatpush.msra.mxu2 %v7568_v15  ;;  %v7577_v62 = vld [vmem:[%s11595_s7 + $0x210] sm:$0xff] }
0x10d9   :  { %v3394_v30 = vadd.f32 %v8049_v44, %v3388_v33  ;;  %v7555_v33 = vld [vmem:[%s11628_s5 + $0x220] sm:$0xff] }
0x10da   :  { %v3376_v60 = vmul.f32 %v8222_v48, %v3375_v55  ;;  %3480 = vmatpush.msrb.mxu0 %v3447_v27  ;;  %v7567_v55 = vld [vmem:[%s11624_s23 + $0x220] sm:$0xff]  ;;  %3609 = vmatpush.msra.mxu1 %v7555_v33  ;;  %v7601_v27 = vld [vmem:[%s11628_s5 + $0x250] sm:$0xff] }
0x10db   :  { %7549 = vmatmul.msk.f32.gmra.mxu0 %vm113_vm2, %v3394_v30  ;;  %3649 = vmatpush.msra.mxu2 %v7567_v55  ;;  %v7629_v33 = vld [vmem:[%s11595_s7 + $0x270] sm:$0xff]  ;;  %v7628_v55 = vld [vmem:[%s11595_s7 + $0x268] sm:$0xff] }
0x10dc   :  { %v3380_v59 = vsel %vm3379_vm3, %v8222_v48, %v3376_v60  ;;  %3481 = vmatpush.msrb.mxu0 %v3446_v28  ;;  %v7582_v48 = vld [vmem:[%s11595_s7 + $0x238] sm:$0xff]  ;;  %v7552_v28 = vld [vmem:[%s11628_s5 + $0x208] sm:$0xff] }
0x10dd   :  { %v3383_v52 = vmul.f32 %v3380_v59, %v9887_v51  ;;  %v8050_v51 = vld [vmem:[%s11600_s12] ss:$0 sm:$0xff]  ;;  %3686 = vmatpush.msra.mxu3 %v7582_v48  ;;  %v7554_v60 = vld [vmem:[%s11628_s5 + $0x218] sm:$0xff]  ;;  %3650 = vmatpush.msra.mxu2 %v7566_v6  ;;  %v7624_v6 = vld [vmem:[%s11595_s7 + $0x248] sm:$0xff] }
0x10de   :  { %3933 = vmatpush.msra.mxu0 %v7606_v38  ;;  %v7578_v59 = vld [vmem:[%s11595_s7 + $0x218] sm:$0xff]  ;;  %3610 = vmatpush.msra.mxu1 %v7554_v60  ;;  %v7625_v60 = vld [vmem:[%s11595_s7 + $0x250] sm:$0xff] }
0x10df   :  { %v3389_v49 = vmul.f32 %v8048_v35, %v3383_v52  ;;  %3687 = vmatpush.msra.mxu3 %v7581_v40  ;;  %v7602_v52 = vld [vmem:[%s11628_s5 + $0x258] sm:$0xff] }
0x10e0   :  { %3934 = vmatpush.msra.mxu0 %v7605_v17 }
0x10e1   :  { %v3395_v11 = vadd.f32 %v8049_v44, %v3389_v49  ;;  %3688 = vmatpush.msra.mxu3 %v7580_v18  ;;  %v7553_v49 = vld [vmem:[%s11628_s5 + $0x210] sm:$0xff] }
0x10e2   :  { %3935 = vmatpush.msra.mxu0 %v7604_v50  ;;  %3611 = vmatpush.msra.mxu1 %v7553_v49  ;;  %v7587_v50 = vld [vmem:[%s11597_s9 + $0x40] sm:$0xff] }
0x10e3   :  { %7550 = vmatmul.msk.f32.gmra.mxu0 %vm113_vm2, %v3395_v11 }
0x10e4   :  { %3936 = vmatpush.msra.mxu0 %v7603_v25  ;;  %3612 = vmatpush.msra.mxu1 %v7552_v28  ;;  %v7626_v25 = vld [vmem:[%s11595_s7 + $0x258] sm:$0xff] }
0x10e6   :  { %3937 = vmatpush.msra.mxu0 %v7602_v52  ;;  %v7623_v52 = vld [vmem:[%s11595_s7 + $0x240] sm:$0xff] }
0x10e8   :  { %3938 = vmatpush.msra.mxu0 %v7601_v27 }
0x114b   :  { %v3434_v42 = vpop.f32.mrf.mxu0 }
0x114c   :  { %v3435_v54 = vadd.f32 %v8050_v51, %v3434_v42  ;;  %v7576_v42 = vld [vmem:[%s11595_s7 + $0x208] sm:$0xff] }
0x114e   :  { %v3443_v53 = vmax.f32 %v3435_v54, 0.0  ;;  %v7600_v54 = vld [vmem:[%s11628_s5 + $0x248] sm:$0xff] }
0x114f   :  { %3939 = vmatpush.msra.mxu0 %v7600_v54 }
0x1150   :  { %3482 = vmatmul.f32.vlgmr.msrb.gmra.mxu0 %v3443_v53  ;;  %v7551_v53 = vld [vmem:[%s11628_s5 + $0x200] sm:$0xff] }
0x1151   :  { %3613 = vmatpush.msra.mxu1 %v7551_v53 }
0x1153   :  { %3730 = vmatpush.msrb.mxu1 %v7587_v50 }
0x1158   :  { %v3437_v63 = vpop.f32.mrf.mxu0 }
0x1159   :  { %v3438_v32 = vadd.f32 %v8050_v51, %v3437_v63  ;;  %v7563_v63 = vld [vmem:[%s11624_s23 + $0x200] sm:$0xff] }
0x115b   :  { %v3444_v16 = vmax.f32 %v3438_v32, 0.0  ;;  %v7575_v32 = vld [vmem:[%s11595_s7 + $0x200] sm:$0xff] }
0x115d   :  { %3485 = vmatmul.f32.gmra.mxu0 %v3444_v16  ;;  %v7599_v16 = vld [vmem:[%s11628_s5 + $0x240] sm:$0xff] }
0x115e   :  { %3940 = vmatpush.msra.mxu0 %v7599_v16 }
0x1160   :  { %v3440_v14 = vpop.f32.mrf.mxu0 }
0x1161   :  { %v3441_v45 = vadd.f32 %v8050_v51, %v3440_v14  ;;  %v7564_v51 = vld [vmem:[%s11624_s23 + $0x208] sm:$0xff] }
0x1163   :  { %v3445_v2 = vmax.f32 %v3441_v45, 0.0 }
0x1165   :  { %3488 = vmatmul.f32.gmra.mxu0 %v3445_v2 }
0x11cd   :  { %v3483_v9 = vpop.f32.mrf.mxu0 }
0x11ce   :  { %v3484_v12 = vadd.f32 %v8051_v4, %v3483_v9 }
0x11d0   :  { %v3492_v8 = vadd.f32 %v3484_v12, %v9940_v21 }
0x11d2   :  { %v3497_v56 = vsel %vm113_vm2, %v3492_v8, 0.0 }
0x11d3   :  { %3498 = vadd.xlane.f32.xlu1 %v3497_v56 }
0x11da   :  { %v3486_v3 = vpop.f32.mrf.mxu0 }
0x11db   :  { %v3487_v43 = vadd.f32 %v8051_v4, %v3486_v3 }
0x11dd   :  { %v3493_v39 = vadd.f32 %v3487_v43, %v3394_v30  ;;  %v7579_v30 = vld [vmem:[%s11595_s7 + $0x220] sm:$0xff] }
0x11de   :  { %3689 = vmatpush.msra.mxu3 %v7579_v30  ;;  %v7627_v30 = vld [vmem:[%s11595_s7 + $0x260] sm:$0xff] }
0x11df   :  { %v3500_v26 = vsel %vm113_vm2, %v3493_v39, 0.0 }
0x11e0   :  { %3501 = vadd.xlane.f32.xlu2 %v3500_v26  ;;  %3690 = vmatpush.msra.mxu3 %v7578_v59  ;;  %v8057_v59 = vld [vmem:[%s11596_s8 + $0x8] ss:$0 sm:$0xff] }
0x11e2   :  { %v3489_v36 = vpop.f32.mrf.mxu0  ;;  %3691 = vmatpush.msra.mxu3 %v7577_v62 }
0x11e3   :  { %v3490_v23 = vadd.f32 %v8051_v4, %v3489_v36  ;;  %v8052_v36 = vld [vmem:[%s11605_s17] ss:$0 sm:$0xff] }
0x11e4   :  { %3692 = vmatpush.msra.mxu3 %v7576_v42 }
0x11e5   :  { %v3494_v35 = vadd.f32 %v3490_v23, %v3395_v11  ;;  %v7565_v11 = vld [vmem:[%s11624_s23 + $0x210] sm:$0xff] }
0x11e6   :  { %3651 = vmatpush.msra.mxu2 %v7565_v11  ;;  %3693 = vmatpush.msra.mxu3 %v7575_v32  ;;  %v8054_v32 = vld [vmem:[%s11630_s3 + $0x8] ss:$0 sm:$0xff] }
0x11e7   :  { %v3503_v10 = vsel %vm3316_vm15, %v3494_v35, 0.0 }
0x11e8   :  { %3504 = vadd.xlane.f32.xlu0 %v3503_v10  ;;  %3652 = vmatpush.msra.mxu2 %v7564_v51  ;;  %v8056_v51 = vld [vmem:[%s11629_s6 + $0x8] ss:$0 sm:$0xff] }
0x11ea   :  { %3653 = vmatpush.msra.mxu2 %v7563_v63 }
0x1246   :  { %v3499_v19 = vpop.xlane.xlu1 %3498 }
0x1247   :  { %v3506_v5 = vmul.f32 %v3499_v19, %v9876_v13  ;;  %v8053_v19 = vld [vmem:[%s11606_s18] ss:$0 sm:$0xff] }
0x1249   :  { %v9992_v29 = vsub.f32 %v3492_v8, %v3506_v5 }
0x124b   :  { %v3512_v44 = vmul.f32 %v9992_v29, %v9992_v29 }
0x124d   :  { %v3515_v61 = vsel %vm113_vm2, %v3512_v44, 0.0 }
0x124e   :  { %3516 = vadd.xlane.f32.xlu1 %v3515_v61 }
0x1253   :  { %v3502_v46 = vpop.xlane.xlu2 %3501 }
0x1254   :  { %v3507_v47 = vmul.f32 %v3502_v46, %v9876_v13 }
0x1256   :  { %v9998_v22 = vsub.f32 %v3493_v39, %v3507_v47 }
0x1258   :  { %v3513_v57 = vmul.f32 %v9998_v22, %v9998_v22 }
0x125a   :  { %v3518_v58 = vsel %vm113_vm2, %v3513_v57, 0.0 }
0x125b   :  { %3519 = vadd.xlane.f32.xlu2 %v3518_v58  ;;  %v3505_v21 = vpop.xlane.xlu0 %3504 }
0x125c   :  { %v3508_v37 = vmul.f32 %v3505_v21, %v9876_v13 }
0x125e   :  { %v10004_v31 = vsub.f32 %v3494_v35, %v3508_v37 }
0x1260   :  { %v3514_v0 = vmul.f32 %v10004_v31, %v10004_v31 }
0x1262   :  { %v3521_v41 = vsel %vm3316_vm15, %v3514_v0, 0.0 }
0x1263   :  { %3522 = vadd.xlane.f32.xlu0 %v3521_v41 }
0x12c1   :  { %v3517_v14 = vpop.xlane.xlu1 %3516 }
0x12c2   :  { %v3524_v45 = vmul.f32 %v3517_v14, %v9876_v13  ;;  %v7618_v14 = vld [vmem:[%s11624_s23 + $0x278] sm:$0xff] }
0x12c4   :  { %v3527_v2 = vadd.f32 1e-05, %v3524_v45 }
0x12c6   :  { %8223 = vrsqrt.f32 %v3527_v2  ;;  %vm3536_vm8 = vweird.f32 %v3527_v2 }
0x12cc   :  { %v8224_v4 = vpop.eup %8223 }
0x12cd   :  { %v3531_v9 = vmul.f32 %v8224_v4, %v3527_v2  ;;  %vm3537_vm7 = vweird.f32 %v8224_v4 }
0x12ce   :  { %v3520_v12 = vpop.xlane.xlu2 %3519  ;;  %vm3538_vm9 = vmor %vm3536_vm8, %vm3537_vm7 }
0x12cf   :  { %v3532_v8 = vmul.f32 %v8224_v4, %v3531_v9  ;;  %v3525_v56 = vmul.f32 %v3520_v12, %v9876_v13  ;;  %v7617_v9 = vld [vmem:[%s11624_s23 + $0x270] sm:$0xff] }
0x12d1   :  { %v3533_v3 = vmul.f32 0.5, %v3532_v8  ;;  %v3528_v43 = vadd.f32 1e-05, %v3525_v56 }
0x12d3   :  { %v3534_v39 = vsub.f32 1.5, %v3533_v3  ;;  %8225 = vrsqrt.f32 %v3528_v43  ;;  %vm3546_vm11 = vweird.f32 %v3528_v43  ;;  %v7616_v3 = vld [vmem:[%s11624_s23 + $0x268] sm:$0xff] }
0x12d5   :  { %v3535_v26 = vmul.f32 %v8224_v4, %v3534_v39 }
0x12d6   :  { %v3523_v23 = vpop.xlane.xlu0 %3522 }
0x12d7   :  { %v3539_v35 = vsel %vm3538_vm9, %v8224_v4, %v3535_v26  ;;  %v3526_v10 = vmul.f32 %v3523_v23, %v9876_v13  ;;  %v7615_v26 = vld [vmem:[%s11624_s23 + $0x260] sm:$0xff] }
0x12d8   :  { %v3560_v5 = vmul.f32 %v3539_v35, %v9992_v29  ;;  %v7614_v35 = vld [vmem:[%s11624_s23 + $0x258] sm:$0xff] }
0x12d9   :  { %v8226_v44 = vpop.eup %8225  ;;  %v3529_v61 = vadd.f32 1e-05, %v3526_v10 }
0x12da   :  { %v3566_v46 = vmul.f32 %v8052_v36, %v3560_v5  ;;  %v3541_v47 = vmul.f32 %v8226_v44, %v3528_v43  ;;  %vm3547_vm10 = vweird.f32 %v8226_v44  ;;  %v7613_v5 = vld [vmem:[%s11624_s23 + $0x250] sm:$0xff] }
0x12db   :  { %8227 = vrsqrt.f32 %v3529_v61  ;;  %vm3548_vm12 = vmor %vm3546_vm11, %vm3547_vm10  ;;  %vm3556_vm14 = vweird.f32 %v3529_v61 }
0x12dc   :  { %v10115_v57 = vadd.f32 %v8053_v19, %v3566_v46  ;;  %v3542_v58 = vmul.f32 %v8226_v44, %v3541_v47  ;;  %v7611_v47 = vld [vmem:[%s11624_s23 + $0x240] sm:$0xff] }
0x12de   :  { %v3543_v21 = vmul.f32 0.5, %v3542_v58  ;;  %7560 = vmatmul.msk.f32.vlgmr.msra.gmra.mxu1 %vm113_vm2, %v10115_v57  ;;  %7572 = vmatmul.msk.f32.vlgmr.msra.gmra.mxu2 %vm113_vm2, %v10115_v57  ;;  %v7635_v58 = vld [vmem:[%s11597_s9 + $0x48] sm:$0xff] }
0x12df   :  { %7584 = vmatmul.msk.f32.vlgmr.msra.gmra.mxu3 %vm113_vm2, %v10115_v57  ;;  %7608 = vmatmul.msk.f32.vlgmr.msra.gmra.mxu0 %vm113_vm2, %v10115_v57 }
0x12e0   :  { %v3544_v29 = vsub.f32 1.5, %v3543_v21 }
0x12e1   :  { %v8228_v37 = vpop.eup %8227 }
0x12e2   :  { %v3545_v0 = vmul.f32 %v8226_v44, %v3544_v29  ;;  %v3551_v41 = vmul.f32 %v8228_v37, %v3529_v61  ;;  %vm3557_vm13 = vweird.f32 %v8228_v37  ;;  %v7612_v61 = vld [vmem:[%s11624_s23 + $0x248] sm:$0xff] }
0x12e3   :  { %vm3558_vm3 = vmor %vm3556_vm14, %vm3557_vm13 }
0x12e4   :  { %v3549_v20 = vsel %vm3548_vm12, %v8226_v44, %v3545_v0  ;;  %v3552_v1 = vmul.f32 %v8228_v37, %v3551_v41 }
0x12e5   :  { %v3561_v48 = vmul.f32 %v3549_v20, %v9998_v22  ;;  %v8058_v20 = vld [vmem:[%s11596_s8 + $0x9] ss:$0 sm:$0xff] }
0x12e6   :  { %v3553_v38 = vmul.f32 0.5, %v3552_v1 }
0x12e7   :  { %v3567_v34 = vmul.f32 %v8052_v36, %v3561_v48 }
0x12e8   :  { %v3554_v24 = vsub.f32 1.5, %v3553_v38 }
0x12e9   :  { %v10126_v40 = vadd.f32 %v8053_v19, %v3567_v34 }
0x12ea   :  { %v3555_v17 = vmul.f32 %v8228_v37, %v3554_v24 }
0x12eb   :  { %7561 = vmatmul.msk.f32.gmra.mxu1 %vm113_vm2, %v10126_v40  ;;  %7573 = vmatmul.msk.f32.gmra.mxu2 %vm113_vm2, %v10126_v40 }
0x12ec   :  { %v3559_v7 = vsel %vm3558_vm3, %v8228_v37, %v3555_v17  ;;  %7585 = vmatmul.msk.f32.gmra.mxu3 %vm113_vm2, %v10126_v40  ;;  %7609 = vmatmul.msk.f32.gmra.mxu0 %vm113_vm2, %v10126_v40 }
0x12ed   :  { %v3562_v22 = vmul.f32 %v3559_v7, %v10004_v31  ;;  %v7630_v31 = vld [vmem:[%s11595_s7 + $0x278] sm:$0xff] }
0x12ee   :  { %4013 = vmatpush.msra.mxu1 %v7630_v31 }
0x12ef   :  { %v3568_v15 = vmul.f32 %v8052_v36, %v3562_v22 }
0x12f0   :  { %4014 = vmatpush.msra.mxu1 %v7629_v33  ;;  %v8059_v33 = vld [vmem:[%s11629_s6 + $0x9] ss:$0 sm:$0xff] }
0x12f1   :  { %v10137_v18 = vadd.f32 %v8053_v19, %v3568_v15 }
0x12f2   :  { %4015 = vmatpush.msra.mxu1 %v7628_v55 }
0x12f3   :  { %7562 = vmatmul.msk.f32.gmra.mxu1 %vm113_vm2, %v10137_v18  ;;  %7574 = vmatmul.msk.f32.gmra.mxu2 %vm113_vm2, %v10137_v18 }
0x12f4   :  { %7586 = vmatmul.msk.f32.gmra.mxu3 %vm113_vm2, %v10137_v18  ;;  %7610 = vmatmul.msk.f32.gmra.mxu0 %vm113_vm2, %v10137_v18 }
0x12f5   :  { %4016 = vmatpush.msra.mxu1 %v7627_v30 }
0x12f7   :  { %4017 = vmatpush.msra.mxu1 %v7626_v25  ;;  %v8055_v25 = vld [vmem:[%s11630_s3 + $0x9] ss:$0 sm:$0xff] }
0x12f9   :  { %4018 = vmatpush.msra.mxu1 %v7625_v60 }
0x12fb   :  { %4019 = vmatpush.msra.mxu1 %v7624_v6 }
0x12fd   :  { %4020 = vmatpush.msra.mxu1 %v7623_v52 }
0x135b   :  { %v3615_v62 = vpop.f32.mrf.mxu1 }
0x135c   :  { %v3616_v45 = vadd.f32 %v8054_v32, %v3615_v62  ;;  %v3942_v7 = vpop.f32.mrf.mxu0 }
0x135d   :  { %v3943_v6 = vadd.f32 %v8055_v25, %v3942_v7  ;;  %v8060_v7 = vld [vmem:[%s11629_s6 + $0xa] ss:$0 sm:$0xff] }
0x1361   :  { %v3655_v27 = vpop.f32.mrf.mxu2 }
0x1362   :  { %v3695_v49 = vpop.f32.mrf.mxu3  ;;  %v3656_v16 = vadd.f32 %v8056_v51, %v3655_v27 }
0x1363   :  { %v3696_v11 = vadd.f32 %v8057_v59, %v3695_v49 }
0x1365   :  { %7588 = vmatmul.msk.f32.vlgmr.msrb.gmra.mxu1 %vm225_vm4, %v3696_v11 }
0x1368   :  { %v3618_v28 = vpop.f32.mrf.mxu1 }
0x1369   :  { %v3619_v36 = vadd.f32 %v8054_v32, %v3618_v28  ;;  %v3945_v31 = vpop.f32.mrf.mxu0 }
0x136b   :  { %v3825_v44 = vrot.slane %v3619_v36, 1 }
0x136e   :  { %v3658_v42 = vpop.f32.mrf.mxu2 }
0x136f   :  { %v3659_v54 = vadd.f32 %v8056_v51, %v3658_v42  ;;  %v3698_v53 = vpop.f32.mrf.mxu3  ;;  %v7678_v42 = vld [vmem:[%s11624_s23 + $0x2b8] sm:$0xff] }
0x1370   :  { %v3699_v63 = vadd.f32 %v8057_v59, %v3698_v53  ;;  %v3621_v2 = vpop.f32.mrf.mxu1 }
0x1371   :  { %7591 = vmatpush.xpose.msk.msrb.mxu2 %vm225_vm4, %v3659_v54  ;;  %v3622_v43 = vadd.f32 %v8054_v32, %v3621_v2  ;;  %v3829_v23 = vrot.slane %v3659_v54, 1  ;;  %v3948_v52 = vpop.f32.mrf.mxu0  ;;  %v7673_v2 = vld [vmem:[%s11624_s23 + $0x290] sm:$0xff] }
0x1372   :  { %7589 = vmatmul.msk.f32.gmra.mxu1 %vm225_vm4, %v3699_v63  ;;  %v3949_v62 = vadd.f32 %v8055_v25, %v3948_v52  ;;  %v7677_v63 = vld [vmem:[%s11624_s23 + $0x2b0] sm:$0xff] }
0x1373   :  { %v3826_v10 = vrot.slane %v3622_v43, 1  ;;  %v7661_v52 = vld [vmem:[%s11628_s5 + $0x290] sm:$0xff] }
0x1375   :  { %7592 = vmatpush.xpose.msk.msrb.mxu2 %vm225_vm4, %v3656_v16  ;;  %v3827_v46 = vsel %vm78_vm0, %v3825_v44, %v3826_v10  ;;  %v7676_v16 = vld [vmem:[%s11624_s23 + $0x2a8] sm:$0xff] }
0x1376   :  { %v3661_v4 = vpop.f32.mrf.mxu2 }
0x1377   :  { %v3662_v12 = vadd.f32 %v8056_v51, %v3661_v4  ;;  %v3701_v8 = vpop.f32.mrf.mxu3  ;;  %v4219_v51 = vrot.slane %v3949_v62, 1  ;;  %v7672_v4 = vld [vmem:[%s11624_s23 + $0x288] sm:$0xff] }
0x1378   :  { %v3702_v56 = vadd.f32 %v8057_v59, %v3701_v8  ;;  %7593 = vmatmul.msk.f32.vlgmr.msrb.gmra.mxu2 %vm225_vm4, %v3616_v45  ;;  %v3946_v59 = vadd.f32 %v8055_v25, %v3945_v31  ;;  %v7674_v45 = vld [vmem:[%s11624_s23 + $0x298] sm:$0xff]  ;;  %v7665_v25 = vld [vmem:[%s11628_s5 + $0x2b0] sm:$0xff] }
0x1379   :  { %3973 = vmatpush.msra.mxu2 %v7618_v14  ;;  %v3830_v39 = vrot.slane %v3662_v12, 1  ;;  %v7675_v14 = vld [vmem:[%s11624_s23 + $0x2a0] sm:$0xff] }
0x137a   :  { %7590 = vmatmul.msk.f32.gmra.mxu1 %vm225_vm4, %v3702_v56  ;;  %v4218_v53 = vrot.slane %v3946_v59, 1 }
0x137b   :  { %3974 = vmatpush.msra.mxu2 %v7617_v9  ;;  %7595 = vmatpush.xpose.msk.msrb.mxu3 %vm225_vm4, %v3830_v39  ;;  %v3831_v19 = vsel %vm78_vm0, %v3829_v23, %v3830_v39  ;;  %v7671_v9 = vld [vmem:[%s11624_s23 + $0x280] sm:$0xff] }
0x137c   :  { %v4220_v32 = vsel %vm78_vm0, %v4218_v53, %v4219_v51 }
0x137d   :  { %3975 = vmatpush.msra.mxu2 %v7616_v3 }
0x137f   :  { %3976 = vmatpush.msra.mxu2 %v7615_v26  ;;  %7596 = vmatpush.xpose.msk.msrb.mxu3 %vm225_vm4, %v3831_v19 }
0x1380   :  { %7594 = vmatmul.msk.f32.gmra.mxu2 %vm225_vm4, %v3619_v36 }
0x1381   :  { %3977 = vmatpush.msra.mxu2 %v7614_v35 }
0x1382   :  { %7632 = vmatmul.msk.f32.vlgmr.msra.gmra.mxu1 %vm113_vm2, %v10115_v57  ;;  %7597 = vmatmul.msk.f32.vlgmr.msrb.gmra.mxu3 %vm225_vm4, %v3827_v46 }
0x1383   :  { %3978 = vmatpush.msra.mxu2 %v7613_v5  ;;  %4057 = vmatpush.msra.mxu3 %v7635_v58 }
0x1385   :  { %3979 = vmatpush.msra.mxu2 %v7612_v61 }
0x1387   :  { %3980 = vmatpush.msra.mxu2 %v7611_v47 }
0x1388   :  { %7620 = vmatmul.msk.f32.vlgmr.msra.gmra.mxu2 %vm113_vm2, %v10115_v57 }
0x138a   :  { %7633 = vmatmul.msk.f32.gmra.mxu1 %vm113_vm2, %v10126_v40  ;;  %7598 = vmatmul.msk.f32.gmra.mxu3 %vm225_vm4, %v3826_v10 }
0x1390   :  { %7621 = vmatmul.msk.f32.gmra.mxu2 %vm113_vm2, %v10126_v40 }
0x1392   :  { %7634 = vmatmul.msk.f32.gmra.mxu1 %vm113_vm2, %v10137_v18 }
0x1398   :  { %7622 = vmatmul.msk.f32.gmra.mxu2 %vm113_vm2, %v10137_v18 }
0x13e2   :  { %v3732_v21 = vpop.f32.mrf.mxu1 }
0x13ef   :  { %v10235_v29 = vpop.f32.mrf.mxu1 }
0x13f0   :  { %7646 = vmatpush.msk.msrb.mxu1 %vm96_vm1, %v10235_v29  ;;  %v4341_v46 = vrot.slane %v10235_v29, 1 }
0x13f2   :  { %4207 = vmatpush.msrb.mxu1 %v3732_v21 }
0x13f7   :  { %v10239_v37 = vpop.f32.mrf.mxu1 }
0x13f8   :  { %v4342_v61 = vrot.slane %v10239_v37, 1 }
0x13fa   :  { %v4343_v47 = vsel %vm78_vm0, %v4341_v46, %v4342_v61 }
0x13fb   :  { %v10241_v0 = vpop.f32.mrf.mxu2 }
0x13fc   :  { %v3776_v41 = vsel %vm296_vm5, %v10241_v0, -inf }
0x13fd   :  { %3777 = vmax.xlane.f32.xlu1 %v3776_v41 }
0x13ff   :  { %v4022_v1 = vpop.f32.mrf.mxu1 }
0x1400   :  { %v4023_v48 = vadd.f32 %v8058_v20, %v4022_v1 }
0x1402   :  { %7636 = vmatmul.msk.f32.vlgmr.msra.gmra.mxu3 %vm225_vm4, %v4023_v48 }
0x1403   :  { %v10249_v38 = vpop.f32.mrf.mxu2 }
0x1404   :  { %v3779_v34 = vsel %vm300_vm6, %v10249_v38, -inf }
0x1405   :  { %3780 = vmax.xlane.f32.xlu2 %v3779_v34  ;;  %v10304_v56 = vpop.f32.mrf.mxu3 }
0x1407   :  { %v4025_v24 = vpop.f32.mrf.mxu1 }
0x1408   :  { %v4026_v17 = vadd.f32 %v8058_v20, %v4025_v24 }
0x140a   :  { %7637 = vmatmul.msk.f32.gmra.mxu3 %vm225_vm4, %v4026_v17 }
0x140b   :  { %v3982_v22 = vpop.f32.mrf.mxu2 }
0x140c   :  { %v3983_v60 = vadd.f32 %v8059_v33, %v3982_v22 }
0x140d   :  { %v10311_v35 = vpop.f32.mrf.mxu3 }
0x140e   :  { %v3866_v17 = vsel %vm300_vm6, %v10311_v35, -inf }
0x140f   :  { %v4028_v15 = vpop.f32.mrf.mxu1 }
0x1410   :  { %v4029_v50 = vadd.f32 %v8058_v20, %v4028_v15 }
0x1412   :  { %7638 = vmatmul.msk.f32.gmra.mxu3 %vm225_vm4, %v4029_v50 }
0x1413   :  { %v3985_v55 = vpop.f32.mrf.mxu2 }
0x1414   :  { %v3986_v30 = vadd.f32 %v8059_v33, %v3985_v55 }
0x1416   :  { %7639 = vmatpush.xpose.msk.msrb.mxu0 %vm225_vm4, %v3986_v30  ;;  %8019 = vmatpush.xpose.msk.msrb.mxu2 %vm225_vm4, %v3986_v30  ;;  %v4222_v28 = vrot.slane %v3986_v30, 1  ;;  %v7666_v30 = vld [vmem:[%s11628_s5 + $0x2b8] sm:$0xff] }
0x1417   :  { %4400 = vmatpush.msra.mxu1 %v7666_v30 }
0x1419   :  { %4401 = vmatpush.msra.mxu1 %v7665_v25  ;;  %v7719_v25 = vld [vmem:[%s11628_s5 + $0x2f0] sm:$0xff] }
0x141a   :  { %7640 = vmatpush.xpose.msk.msrb.mxu0 %vm225_vm4, %v3983_v60  ;;  %8020 = vmatpush.xpose.msk.msrb.mxu2 %vm225_vm4, %v3983_v60  ;;  %v7664_v60 = vld [vmem:[%s11628_s5 + $0x2a8] sm:$0xff] }
0x141b   :  { %v3988_v49 = vpop.f32.mrf.mxu2  ;;  %4402 = vmatpush.msra.mxu1 %v7664_v60  ;;  %v7718_v60 = vld [vmem:[%s11628_s5 + $0x2e8] sm:$0xff] }
0x141c   :  { %v3989_v11 = vadd.f32 %v8059_v33, %v3988_v49  ;;  %v7660_v49 = vld [vmem:[%s11628_s5 + $0x288] sm:$0xff] }
0x141d   :  { %7641 = vmatmul.msk.f32.vlgmr.msrb.gmra.mxu0 %vm225_vm4, %v3943_v6  ;;  %7642 = vmatmul.msk.f32.vlgmr.msrb.gmra.mxu2 %vm225_vm4, %v3946_v59  ;;  %v7663_v6 = vld [vmem:[%s11628_s5 + $0x2a0] sm:$0xff]  ;;  %v7662_v59 = vld [vmem:[%s11628_s5 + $0x298] sm:$0xff] }
0x141e   :  { %v4223_v27 = vrot.slane %v3989_v11, 1  ;;  %4403 = vmatpush.msra.mxu1 %v7663_v6  ;;  %v7659_v11 = vld [vmem:[%s11628_s5 + $0x280] sm:$0xff] }
0x141f   :  { %v7717_v6 = vld [vmem:[%s11628_s5 + $0x2e0] sm:$0xff] }
0x1420   :  { %7649 = vmatpush.xpose.msk.msrb.mxu3 %vm225_vm4, %v4223_v27  ;;  %v4224_v54 = vsel %vm78_vm0, %v4222_v28, %v4223_v27  ;;  %4404 = vmatpush.msra.mxu1 %v7662_v59  ;;  %v7716_v59 = vld [vmem:[%s11628_s5 + $0x2d8] sm:$0xff] }
0x1422   :  { %4405 = vmatpush.msra.mxu1 %v7661_v52  ;;  %v7715_v52 = vld [vmem:[%s11628_s5 + $0x2d0] sm:$0xff] }
0x1424   :  { %7650 = vmatpush.xpose.msk.msrb.mxu3 %vm225_vm4, %v4224_v54  ;;  %4406 = vmatpush.msra.mxu1 %v7660_v49 }
0x1426   :  { %4407 = vmatpush.msra.mxu1 %v7659_v11  ;;  %v7714_v11 = vld [vmem:[%s11628_s5 + $0x2c8] sm:$0xff] }
0x1427   :  { %7651 = vmatmul.msk.f32.vlgmr.msrb.gmra.mxu3 %vm225_vm4, %v4220_v32 }
0x1428   :  { %4440 = vmatpush.msra.mxu3 %v7678_v42 }
0x142a   :  { %4441 = vmatpush.msra.mxu3 %v7677_v63 }
0x142c   :  { %4442 = vmatpush.msra.mxu3 %v7676_v16 }
0x142e   :  { %4443 = vmatpush.msra.mxu3 %v7675_v14 }
0x142f   :  { %7652 = vmatmul.msk.f32.gmra.mxu3 %vm225_vm4, %v4219_v51 }
0x1430   :  { %4444 = vmatpush.msra.mxu3 %v7674_v45 }
0x1432   :  { %4445 = vmatpush.msra.mxu3 %v7673_v2 }
0x1434   :  { %4446 = vmatpush.msra.mxu3 %v7672_v4 }
0x1436   :  { %4447 = vmatpush.msra.mxu3 %v7671_v9 }
0x1437   :  { %7680 = vmatmul.msk.f32.vlgmr.msra.gmra.mxu3 %vm113_vm2, %v10115_v57 }
0x143f   :  { %7681 = vmatmul.msk.f32.gmra.mxu3 %vm113_vm2, %v10126_v40 }
0x1447   :  { %7682 = vmatmul.msk.f32.gmra.mxu3 %vm113_vm2, %v10137_v18 }
0x1470   :  { %v3778_v12 = vpop.xlane.xlu1 %3777 }
0x1471   :  { %v3782_v8 = vsub.f32 %v10241_v0, %v3778_v12 }
0x1473   :  { %v3784_v3 = vmul.f32 1.442695, %v3782_v8 }
0x1475   :  { %8229 = vpow2.f32 %v3784_v3 }
0x1478   :  { %v3781_v43 = vpop.xlane.xlu2 %3780 }
0x1479   :  { %v3783_v39 = vsub.f32 %v10249_v38, %v3781_v43 }
0x147b   :  { %v10307_v26 = vpop.eup %8229  ;;  %v3786_v36 = vmul.f32 1.442695, %v3783_v39 }
0x147c   :  { %v3788_v23 = vsel %vm296_vm5, %v10307_v26, 0.0 }
0x147d   :  { %8231 = vpow2.f32 %v3786_v36  ;;  %3789 = vadd.xlane.f32.xlu0 %v3788_v23 }
0x1483   :  { %v10313_v10 = vpop.eup %8231 }
0x1484   :  { %v3791_v19 = vsel %vm300_vm6, %v10313_v10, 0.0 }
0x1485   :  { %v4059_v5 = vpop.f32.mrf.mxu3  ;;  %3792 = vadd.xlane.f32.xlu1 %v3791_v19 }
0x148d   :  { %v4062_v44 = vpop.f32.mrf.mxu3 }
0x148e   :  { %7643 = vmatpush.msk.msra.mxu2 %vm96_vm1, %v4062_v44  ;;  %v4305_v21 = vrot.slane %v4062_v44, 1 }
0x1490   :  { %4175 = vmatpush.msra.mxu2 %v4059_v5 }
0x1492   :  { %7656 = vmatpush.msk.msrb.mxu2 %vm96_vm1, %v4342_v61 }
0x1494   :  { %4368 = vmatpush.msrb.mxu2 %v4343_v47 }
0x1495   :  { %v4065_v58 = vpop.f32.mrf.mxu3 }
0x1496   :  { %v4306_v0 = vrot.slane %v4065_v58, 1 }
0x1498   :  { %7653 = vmatpush.msk.msra.mxu0 %vm96_vm1, %v4306_v0  ;;  %v4307_v41 = vsel %vm78_vm0, %v4305_v21, %v4306_v0 }
0x149a   :  { %4332 = vmatpush.msra.mxu0 %v4307_v41  ;;  %v10332_v48 = vpop.f32.mrf.mxu0 }
0x149b   :  { %v4103_v34 = vsel %vm296_vm5, %v10332_v48, -inf }
0x14aa   :  { %v10324_v20 = vpop.f32.mrf.mxu3 }
0x14ab   :  { %v4256_v37 = vsel %vm296_vm5, %v10324_v20, -inf }
0x14ac   :  { %4257 = vmax.xlane.f32.xlu2 %v4256_v37  ;;  %v10397_v37 = vpop.f32.mrf.mxu2 }
0x14b2   :  { %v10328_v29 = vpop.f32.mrf.mxu3 }
0x14b3   :  { %v4259_v1 = vsel %vm300_vm6, %v10328_v29, -inf }
0x14b4   :  { %4260 = vmax.xlane.f32.xlu0 %v4259_v1 }
0x14ba   :  { %v4449_v38 = vpop.f32.mrf.mxu3 }
0x14bb   :  { %v4450_v36 = vadd.f32 %v8060_v7, %v4449_v38 }
0x14bc   :  { %4104 = vmax.xlane.f32.xlu0 %v4103_v34  ;;  %v4106_v34 = vsel %vm300_vm6, %v10397_v37, -inf }
0x14c2   :  { %v4452_v24 = vpop.f32.mrf.mxu3 }
0x14c3   :  { %v4453_v22 = vadd.f32 %v8060_v7, %v4452_v24 }
0x14c4   :  { %3867 = vmax.xlane.f32.xlu0 %v3866_v17 }
0x14c5   :  { %v4659_v31 = vrot.slane %v4453_v22, 1 }
0x14ca   :  { %v4455_v15 = vpop.f32.mrf.mxu3 }
0x14cb   :  { %v10341_v50 = vadd.f32 %v8060_v7, %v4455_v15 }
0x14cd   :  { %v4660_v33 = vrot.slane %v10341_v50, 1 }
0x14cf   :  { %v10347_v55 = vsel %vm78_vm0, %v4659_v31, %v4660_v33 }
0x14f0   :  { %v3790_v62 = vpop.xlane.xlu0 %3789 }
0x14f1   :  { %8233 = vrcp.f32 %v3790_v62  ;;  %v3805_v54 = vand.u32 2147483648, %v3790_v62  ;;  %v3803_v63 = vand.u32 2147483647, %v3790_v62  ;;  %vm3799_vm8 = vweird.f32 %v3790_v62 }
0x14f3   :  { %v3806_v14 = vor.u32 1.1754944e-38, %v3805_v54  ;;  %vm3804_vm10 = vcmp.eq.f32.partialorder %v3803_v63, 8.507059e+37  ;;  %v7687_v54 = vld [vmem:[%s11595_s7 + $0x2a0] sm:$0xff]  ;;  %v10463_v63 = vld [vmem:[%s11630_s3 + $0xa] ss:$0 sm:$0xff] }
0x14f7   :  { %v8234_v27 = vpop.eup %8233 }
0x14f8   :  { %v3795_v28 = vmul.f32 %v8234_v27, %v3790_v62  ;;  %v3793_v51 = vpop.xlane.xlu1 %3792  ;;  %vm3800_vm7 = vweird.f32 %v8234_v27  ;;  %v7713_v62 = vld [vmem:[%s11628_s5 + $0x2c0] sm:$0xff] }
0x14f9   :  { %8235 = vrcp.f32 %v3793_v51  ;;  %vm3801_vm9 = vmor %vm3799_vm8, %vm3800_vm7  ;;  %v3820_v8 = vand.u32 2147483648, %v3793_v51  ;;  %v3818_v43 = vand.u32 2147483647, %v3793_v51  ;;  %vm3814_vm12 = vweird.f32 %v3793_v51 }
0x14fa   :  { %v3796_v42 = vsub.f32 1.0, %v3795_v28  ;;  %v7689_v28 = vld [vmem:[%s11595_s7 + $0x2b0] sm:$0xff] }
0x14fb   :  { %v3821_v23 = vor.u32 1.1754944e-38, %v3820_v8  ;;  %vm3819_vm14 = vcmp.eq.f32.partialorder %v3818_v43, 8.507059e+37 }
0x14fc   :  { %v3797_v53 = vmul.f32 %v8234_v27, %v3796_v42  ;;  %v7688_v42 = vld [vmem:[%s11595_s7 + $0x2a8] sm:$0xff] }
0x14fe   :  { %v3798_v32 = vadd.f32 %v8234_v27, %v3797_v53  ;;  %v7686_v53 = vld [vmem:[%s11595_s7 + $0x298] sm:$0xff] }
0x14ff   :  { %v8236_v16 = vpop.eup %8235 }
0x1500   :  { %v3802_v45 = vsel %vm3801_vm9, %v8234_v27, %v3798_v32  ;;  %v3810_v2 = vmul.f32 %v8236_v16, %v3793_v51  ;;  %vm3815_vm11 = vweird.f32 %v8236_v16  ;;  %v7690_v27 = vld [vmem:[%s11595_s7 + $0x2b8] sm:$0xff]  ;;  %v7685_v32 = vld [vmem:[%s11595_s7 + $0x290] sm:$0xff] }
0x1501   :  { %v3807_v4 = vsel %vm3804_vm10, %v3806_v14, %v3802_v45  ;;  %vm3816_vm13 = vmor %vm3814_vm12, %vm3815_vm11  ;;  %4480 = vmatpush.msrb.mxu0 %v7690_v27  ;;  %v7684_v14 = vld [vmem:[%s11595_s7 + $0x288] sm:$0xff] }
0x1502   :  { %v10374_v9 = vmul.f32 %v10307_v26, %v3807_v4  ;;  %v3811_v12 = vsub.f32 1.0, %v3810_v2  ;;  %v7683_v2 = vld [vmem:[%s11595_s7 + $0x280] sm:$0xff] }
0x1503   :  { %4481 = vmatpush.msrb.mxu0 %v7689_v28 }
0x1504   :  { %v3812_v3 = vmul.f32 %v8236_v16, %v3811_v12  ;;  %7647 = vmatmul.msk.f32.vlgmr.msrb.gmra.mxu1 %vm296_vm5, %v10374_v9 }
0x1505   :  { %7699 = vmatpush.xpose.msk.msrb.mxu1 %vm225_vm4, %v4453_v22  ;;  %4482 = vmatpush.msrb.mxu0 %v7688_v42 }
0x1506   :  { %v3813_v39 = vadd.f32 %v8236_v16, %v3812_v3 }
0x1507   :  { %4483 = vmatpush.msrb.mxu0 %v7687_v54 }
0x1508   :  { %v3817_v19 = vsel %vm3816_vm13, %v8236_v16, %v3813_v39 }
0x1509   :  { %7700 = vmatpush.xpose.msk.msrb.mxu1 %vm225_vm4, %v4450_v36  ;;  %v3822_v26 = vsel %vm3819_vm14, %v3821_v23, %v3817_v19  ;;  %4484 = vmatpush.msrb.mxu0 %v7686_v53 }
0x150a   :  { %v10381_v5 = vmul.f32 %v10313_v10, %v3822_v26 }
0x150b   :  { %4485 = vmatpush.msrb.mxu0 %v7685_v32  ;;  %v7744_v32 = vld [vmem:[%s11595_s7 + $0x2f8] sm:$0xff] }
0x150c   :  { %7648 = vmatmul.msk.f32.gmra.mxu1 %vm296_vm5, %v10381_v5 }
0x150d   :  { %4486 = vmatpush.msrb.mxu0 %v7684_v14  ;;  %v7741_v14 = vld [vmem:[%s11595_s7 + $0x2e0] sm:$0xff] }
0x150f   :  { %4487 = vmatpush.msrb.mxu0 %v7683_v2  ;;  %v7739_v2 = vld [vmem:[%s11595_s7 + $0x2d0] sm:$0xff] }
0x1514   :  { %7668 = vmatmul.msk.f32.vlgmr.msra.gmra.mxu1 %vm113_vm2, %v10115_v57 }
0x151c   :  { %7669 = vmatmul.msk.f32.gmra.mxu1 %vm113_vm2, %v10126_v40 }
0x151f   :  { %v4258_v44 = vpop.xlane.xlu2 %4257 }
0x1520   :  { %v4262_v61 = vsub.f32 %v10324_v20, %v4258_v44 }
0x1522   :  { %v4264_v46 = vmul.f32 1.442695, %v4262_v61 }
0x1524   :  { %8237 = vpow2.f32 %v4264_v46  ;;  %7670 = vmatmul.msk.f32.gmra.mxu1 %vm113_vm2, %v10137_v18 }
0x1527   :  { %v4261_v47 = vpop.xlane.xlu0 %4260 }
0x1528   :  { %v4263_v10 = vsub.f32 %v10328_v29, %v4261_v47 }
0x152a   :  { %v10393_v58 = vpop.eup %8237  ;;  %v4266_v21 = vmul.f32 1.442695, %v4263_v10 }
0x152b   :  { %v4268_v0 = vsel %vm296_vm5, %v10393_v58, 0.0 }
0x152c   :  { %8239 = vpow2.f32 %v4266_v21  ;;  %4269 = vadd.xlane.f32.xlu1 %v4268_v0 }
0x152f   :  { %v4105_v41 = vpop.xlane.xlu0 %4104 }
0x1530   :  { %v4109_v20 = vsub.f32 %v10332_v48, %v4105_v41  ;;  %v3863_v48 = vsel %vm296_vm5, %v10304_v56, -inf }
0x1532   :  { %v10400_v1 = vpop.eup %8239  ;;  %v4111_v38 = vmul.f32 1.442695, %v4109_v20 }
0x1533   :  { %v4271_v29 = vsel %vm300_vm6, %v10400_v1, 0.0 }
0x1534   :  { %8241 = vpow2.f32 %v4111_v38  ;;  %4107 = vmax.xlane.f32.xlu1 %v4106_v34  ;;  %4272 = vadd.xlane.f32.xlu2 %v4271_v29 }
0x1537   :  { %v3868_v24 = vpop.xlane.xlu0 %3867 }
0x1538   :  { %v3870_v17 = vsub.f32 %v10311_v35, %v3868_v24  ;;  %v7720_v35 = vld [vmem:[%s11628_s5 + $0x2f8] sm:$0xff] }
0x1539   :  { %4803 = vmatpush.msra.mxu1 %v7720_v35 }
0x153a   :  { %v10407_v7 = vpop.eup %8241  ;;  %v3873_v22 = vmul.f32 1.442695, %v3870_v17 }
0x153b   :  { %v4115_v15 = vsel %vm296_vm5, %v10407_v7, 0.0  ;;  %4804 = vmatpush.msra.mxu1 %v7719_v25 }
0x153c   :  { %8243 = vpow2.f32 %v3873_v22  ;;  %3864 = vmax.xlane.f32.xlu2 %v3863_v48  ;;  %4116 = vadd.xlane.f32.xlu1 %v4115_v15 }
0x153d   :  { %4805 = vmatpush.msra.mxu1 %v7718_v60 }
0x153f   :  { %4806 = vmatpush.msra.mxu1 %v7717_v6 }
0x1541   :  { %4807 = vmatpush.msra.mxu1 %v7716_v59 }
0x1542   :  { %v10413_v31 = vpop.eup %8243 }
0x1543   :  { %v3878_v30 = vsel %vm300_vm6, %v10413_v31, 0.0  ;;  %4808 = vmatpush.msra.mxu1 %v7715_v52 }
0x1544   :  { %3879 = vadd.xlane.f32.xlu1 %v3878_v30 }
0x1545   :  { %4809 = vmatpush.msra.mxu1 %v7714_v11 }
0x1547   :  { %4810 = vmatpush.msra.mxu1 %v7713_v62 }
0x1581   :  { %v10435_v49 = vpop.f32.mrf.mxu1 }
0x1589   :  { %v10449_v51 = vpop.f32.mrf.mxu1 }
0x1591   :  { %v4409_v16 = vpop.f32.mrf.mxu1 }
0x1592   :  { %v4410_v45 = vadd.f32 %v10463_v63, %v4409_v16  ;;  %v7743_v16 = vld [vmem:[%s11595_s7 + $0x2f0] sm:$0xff] }
0x1594   :  { %7701 = vmatmul.msk.f32.vlgmr.msrb.gmra.mxu1 %vm225_vm4, %v4410_v45  ;;  %v7740_v45 = vld [vmem:[%s11595_s7 + $0x2d8] sm:$0xff] }
0x1599   :  { %v4412_v4 = vpop.f32.mrf.mxu1 }
0x159a   :  { %v10477_v12 = vadd.f32 %v10463_v63, %v4412_v4  ;;  %v7738_v4 = vld [vmem:[%s11595_s7 + $0x2c8] sm:$0xff] }
0x159c   :  { %7702 = vmatmul.msk.f32.gmra.mxu1 %vm225_vm4, %v10477_v12 }
0x159f   :  { %v4270_v8 = vpop.xlane.xlu1 %4269 }
0x15a0   :  { %8245 = vrcp.f32 %v4270_v8  ;;  %v4285_v26 = vand.u32 2147483648, %v4270_v8  ;;  %v4283_v46 = vand.u32 2147483647, %v4270_v8  ;;  %vm4279_vm7 = vweird.f32 %v4270_v8 }
0x15a2   :  { %v4286_v21 = vor.u32 1.1754944e-38, %v4285_v26  ;;  %vm4284_vm9 = vcmp.eq.f32.partialorder %v4283_v46, 8.507059e+37 }
0x15a4   :  { %7722 = vmatmul.msk.f32.vlgmr.msra.gmra.mxu1 %vm113_vm2, %v10115_v57 }
0x15a6   :  { %v8246_v3 = vpop.eup %8245 }
0x15a7   :  { %v4275_v43 = vmul.f32 %v8246_v3, %v4270_v8  ;;  %v4108_v39 = vpop.xlane.xlu1 %4107  ;;  %v4273_v36 = vpop.xlane.xlu2 %4272  ;;  %vm4280_vm3 = vweird.f32 %v8246_v3 }
0x15a8   :  { %v4110_v23 = vsub.f32 %v10397_v37, %v4108_v39  ;;  %8247 = vrcp.f32 %v4273_v36  ;;  %vm4281_vm8 = vmor %vm4279_vm7, %vm4280_vm3  ;;  %v4300_v15 = vand.u32 2147483648, %v4273_v36  ;;  %v4298_v35 = vand.u32 2147483647, %v4273_v36  ;;  %v4415_v8 = vpop.f32.mrf.mxu1 }
0x15a9   :  { %v4276_v19 = vsub.f32 1.0, %v4275_v43  ;;  %vm4294_vm11 = vweird.f32 %v4273_v36  ;;  %v4416_v43 = vadd.f32 %v10463_v63, %v4415_v8 }
0x15aa   :  { %v4113_v44 = vmul.f32 1.442695, %v4110_v23  ;;  %v4301_v25 = vor.u32 1.1754944e-38, %v4300_v15  ;;  %vm4299_vm13 = vcmp.eq.f32.partialorder %v4298_v35, 8.507059e+37 }
0x15ab   :  { %v4277_v61 = vmul.f32 %v8246_v3, %v4276_v19  ;;  %v4656_v39 = vrot.slane %v4416_v43, 1 }
0x15ac   :  { %8249 = vpow2.f32 %v4113_v44  ;;  %7723 = vmatmul.msk.f32.gmra.mxu1 %vm113_vm2, %v10126_v40 }
0x15ad   :  { %v4278_v47 = vadd.f32 %v8246_v3, %v4277_v61 }
0x15ae   :  { %v8248_v10 = vpop.eup %8247 }
0x15af   :  { %v4282_v0 = vsel %vm4281_vm8, %v8246_v3, %v4278_v47  ;;  %v4290_v41 = vmul.f32 %v8248_v10, %v4273_v36  ;;  %v3865_v37 = vpop.xlane.xlu2 %3864  ;;  %v4117_v20 = vpop.xlane.xlu1 %4116  ;;  %vm4295_vm10 = vweird.f32 %v8248_v10  ;;  %v7737_v3 = vld [vmem:[%s11595_s7 + $0x2c0] sm:$0xff]  ;;  %v4655_v36 = vrot.slane %v10477_v12, 1 }
0x15b0   :  { %v4287_v38 = vsel %vm4284_vm9, %v4286_v21, %v4282_v0  ;;  %v3869_v34 = vsub.f32 %v10304_v56, %v3865_v37  ;;  %8251 = vrcp.f32 %v4117_v20  ;;  %vm4296_vm12 = vmor %vm4294_vm11, %vm4295_vm10  ;;  %v4130_v27 = vand.u32 2147483647, %v4117_v20  ;;  %v7695_v37 = vld [vmem:[%s11597_s9 + $0x50] sm:$0xff] }
0x15b1   :  { %v10488_v29 = vmul.f32 %v10393_v58, %v4287_v38  ;;  %v4291_v24 = vsub.f32 1.0, %v4290_v41  ;;  %vm4126_vm3 = vweird.f32 %v4117_v20  ;;  %v4657_v23 = vsel %vm78_vm0, %v4655_v36, %v4656_v39 }
0x15b2   :  { %v10490_v17 = vpop.eup %8249  ;;  %v3871_v22 = vmul.f32 1.442695, %v3869_v34  ;;  %vm4131_vm8 = vcmp.eq.f32.partialorder %v4130_v27, 8.507059e+37 }
0x15b3   :  { %v4292_v48 = vmul.f32 %v8248_v10, %v4291_v24  ;;  %7654 = vmatmul.msk.f32.vlgmr.msra.gmra.mxu0 %vm296_vm5, %v10488_v29  ;;  %v4118_v30 = vsel %vm300_vm6, %v10490_v17, 0.0 }
0x15b4   :  { %8253 = vpow2.f32 %v3871_v22  ;;  %7706 = vmatpush.xpose.msk.msra.mxu0 %vm225_vm4, %v4660_v33  ;;  %7724 = vmatmul.msk.f32.gmra.mxu1 %vm113_vm2, %v10137_v18  ;;  %v4132_v33 = vand.u32 2147483648, %v4117_v20 }
0x15b5   :  { %v4293_v56 = vadd.f32 %v8248_v10, %v4292_v48  ;;  %4119 = vadd.xlane.f32.xlu2 %v4118_v30 }
0x15b6   :  { %v8252_v58 = vpop.eup %8251 }
0x15b7   :  { %v4122_v60 = vmul.f32 %v8252_v58, %v4117_v20  ;;  %v4297_v6 = vsel %vm4296_vm12, %v8248_v10, %v4293_v56  ;;  %vm4127_vm14 = vweird.f32 %v8252_v58  ;;  %v3880_v44 = vpop.xlane.xlu1 %3879 }
0x15b8   :  { %7707 = vmatpush.xpose.msk.msra.mxu0 %vm225_vm4, %v10347_v55  ;;  %v4302_v52 = vsel %vm4299_vm13, %v4301_v25, %v4297_v6  ;;  %vm4128_vm7 = vmor %vm4126_vm3, %vm4127_vm14  ;;  %v4133_v55 = vor.u32 1.1754944e-38, %v4132_v33 }
0x15b9   :  { %v4123_v59 = vsub.f32 1.0, %v4122_v60  ;;  %v10506_v11 = vmul.f32 %v10400_v1, %v4302_v52 }
0x15ba   :  { %v10503_v50 = vpop.eup %8253 }
0x15bb   :  { %v4124_v62 = vmul.f32 %v8252_v58, %v4123_v59  ;;  %v3875_v28 = vsel %vm296_vm5, %v10503_v50, 0.0  ;;  %7655 = vmatmul.msk.f32.gmra.mxu0 %vm296_vm5, %v10506_v11 }
0x15bc   :  { %3876 = vadd.xlane.f32.xlu0 %v3875_v28 }
0x15bd   :  { %v4125_v42 = vadd.f32 %v8252_v58, %v4124_v62 }
0x15bf   :  { %v4129_v54 = vsel %vm4128_vm7, %v8252_v58, %v4125_v42 }
0x15c0   :  { %v4134_v53 = vsel %vm4131_vm8, %v4133_v55, %v4129_v54 }
0x15c1   :  { %v10513_v1 = vmul.f32 %v10407_v7, %v4134_v53  ;;  %v7742_v7 = vld [vmem:[%s11595_s7 + $0x2e8] sm:$0xff]  ;;  %v3907_v53 = vand.u32 2147483648, %v3880_v44 }
0x15c3   :  { %7644 = vmatmul.msk.f32.vlgmr.msra.gmra.mxu2 %vm296_vm5, %v10513_v1  ;;  %7692 = vmatmul.msk.f32.vlgmr.msrb.gmra.mxu0 %vm113_vm2, %v10115_v57 }
0x15c4   :  { %4883 = vmatpush.msrb.mxu0 %v7744_v32  ;;  %4524 = vmatpush.msra.mxu2 %v7695_v37 }
0x15c6   :  { %4884 = vmatpush.msrb.mxu0 %v7743_v16  ;;  %v3905_v16 = vand.u32 2147483647, %v3880_v44 }
0x15c8   :  { %4885 = vmatpush.msrb.mxu0 %v7742_v7 }
0x15ca   :  { %4886 = vmatpush.msrb.mxu0 %v7741_v14  ;;  %v3908_v14 = vor.u32 1.1754944e-38, %v3907_v53  ;;  %v7726_v53 = vld [vmem:[%s11624_s23 + $0x2c8] sm:$0xff] }
0x15cb   :  { %7693 = vmatmul.msk.f32.gmra.mxu0 %vm113_vm2, %v10126_v40 }
0x15cc   :  { %4887 = vmatpush.msrb.mxu0 %v7740_v45 }
0x15ce   :  { %4888 = vmatpush.msrb.mxu0 %v7739_v2 }
0x15d0   :  { %4889 = vmatpush.msrb.mxu0 %v7738_v4 }
0x15d2   :  { %4890 = vmatpush.msrb.mxu0 %v7737_v3 }
0x15d3   :  { %7694 = vmatmul.msk.f32.gmra.mxu0 %vm113_vm2, %v10137_v18 }
0x15db   :  { %7708 = vmatmul.msk.f32.vlgmr.msra.gmra.mxu0 %vm225_vm4, %v4657_v23 }
0x15e3   :  { %7709 = vmatmul.msk.f32.gmra.mxu0 %vm225_vm4, %v4656_v39 }
0x15eb   :  { %7746 = vmatmul.msk.f32.vlgmr.msrb.gmra.mxu0 %vm113_vm2, %v10115_v57 }
0x15f3   :  { %7747 = vmatmul.msk.f32.gmra.mxu0 %vm113_vm2, %v10126_v40 }
0x15fb   :  { %7748 = vmatmul.msk.f32.gmra.mxu0 %vm113_vm2, %v10137_v18 }
0x1611   :  { %v10558_v63 = vpop.f32.mrf.mxu1 }
0x1612   :  { %v4570_v12 = vsel %vm296_vm5, %v10558_v63, -inf }
0x1613   :  { %4571 = vmax.xlane.f32.xlu2 %v4570_v12 }
0x1619   :  { %v10562_v19 = vpop.f32.mrf.mxu1 }
0x161a   :  { %v4573_v26 = vsel %vm300_vm6, %v10562_v19, -inf }
0x161b   :  { %4574 = vmax.xlane.f32.xlu0 %v4573_v26 }
0x1628   :  { %v4120_v61 = vpop.xlane.xlu2 %4119 }
0x1629   :  { %8255 = vrcp.f32 %v4120_v61  ;;  %v4147_v20 = vand.u32 2147483648, %v4120_v61  ;;  %v4145_v24 = vand.u32 2147483647, %v4120_v61  ;;  %vm4141_vm10 = vweird.f32 %v4120_v61 }
0x162a   :  { %8257 = vrcp.f32 %v3880_v44 }
0x162b   :  { %v4148_v15 = vor.u32 1.1754944e-38, %v4147_v20  ;;  %vm4146_vm12 = vcmp.eq.f32.partialorder %v4145_v24, 8.507059e+37 }
0x162f   :  { %v8256_v46 = vpop.eup %8255  ;;  %v3877_v47 = vpop.xlane.xlu0 %3876 }
0x1630   :  { %v4137_v10 = vmul.f32 %v8256_v46, %v4120_v61  ;;  %8259 = vrcp.f32 %v3877_v47  ;;  %v10566_v21 = vpop.f32.mrf.mxu0  ;;  %v8258_v0 = vpop.eup %8257  ;;  %vm4142_vm9 = vweird.f32 %v8256_v46  ;;  %v3892_v6 = vand.u32 2147483648, %v3877_v47 }
0x1631   :  { %v3897_v38 = vmul.f32 %v8258_v0, %v3880_v44  ;;  %vm4143_vm11 = vmor %vm4141_vm10, %vm4142_vm9  ;;  %v3890_v33 = vand.u32 2147483647, %v3877_v47  ;;  %vm3886_vm14 = vweird.f32 %v3877_v47  ;;  %vm3902_vm8 = vweird.f32 %v8258_v0 }
0x1632   :  { %v4138_v41 = vsub.f32 1.0, %v4137_v10  ;;  %v3893_v28 = vor.u32 1.1754944e-38, %v3892_v6  ;;  %vm3901_vm9 = vweird.f32 %v3880_v44 }
0x1633   :  { %v3898_v35 = vsub.f32 1.0, %v3897_v38  ;;  %vm3891_vm7 = vcmp.eq.f32.partialorder %v3890_v33, 8.507059e+37  ;;  %vm3903_vm10 = vmor %vm3901_vm9, %vm3902_vm8  ;;  %v7732_v33 = vld [vmem:[%s11624_s23 + $0x2f8] sm:$0xff] }
0x1634   :  { %v4139_v34 = vmul.f32 %v8256_v46, %v4138_v41 }
0x1635   :  { %v3899_v62 = vmul.f32 %v8258_v0, %v3898_v35 }
0x1636   :  { %v8260_v22 = vpop.eup %8259  ;;  %v4140_v48 = vadd.f32 %v8256_v46, %v4139_v34 }
0x1637   :  { %v3882_v30 = vmul.f32 %v8260_v22, %v3877_v47  ;;  %vm3887_vm13 = vweird.f32 %v8260_v22  ;;  %v3900_v55 = vadd.f32 %v8258_v0, %v3899_v62  ;;  %v7731_v62 = vld [vmem:[%s11624_s23 + $0x2f0] sm:$0xff] }
0x1638   :  { %v4144_v56 = vsel %vm4143_vm11, %v8256_v46, %v4140_v48  ;;  %v10571_v25 = vpop.f32.mrf.mxu0  ;;  %vm3888_vm3 = vmor %vm3886_vm14, %vm3887_vm13  ;;  %vm3906_vm11 = vcmp.eq.f32.partialorder %v3905_v16, 8.507059e+37 }
0x1639   :  { %v3883_v58 = vsub.f32 1.0, %v3882_v30  ;;  %v4149_v60 = vsel %vm4146_vm12, %v4148_v15, %v4144_v56  ;;  %v3904_v7 = vsel %vm3903_vm10, %v8258_v0, %v3900_v55  ;;  %v7727_v55 = vld [vmem:[%s11624_s23 + $0x2d0] sm:$0xff] }
0x163a   :  { %v10574_v59 = vmul.f32 %v10490_v17, %v4149_v60  ;;  %v3909_v45 = vsel %vm3906_vm11, %v3908_v14, %v3904_v7 }
0x163b   :  { %v3884_v52 = vmul.f32 %v8260_v22, %v3883_v58  ;;  %v10584_v4 = vmul.f32 %v10413_v31, %v3909_v45 }
0x163c   :  { %7645 = vmatmul.msk.f32.gmra.mxu2 %vm296_vm5, %v10574_v59 }
0x163d   :  { %v3885_v27 = vadd.f32 %v8260_v22, %v3884_v52 }
0x163f   :  { %v3889_v42 = vsel %vm3888_vm3, %v8260_v22, %v3885_v27  ;;  %v7730_v27 = vld [vmem:[%s11624_s23 + $0x2e8] sm:$0xff] }
0x1640   :  { %v3894_v54 = vsel %vm3891_vm7, %v3893_v28, %v3889_v42  ;;  %v4489_v32 = vpop.f32.mrf.mxu0  ;;  %v7729_v28 = vld [vmem:[%s11624_s23 + $0x2e0] sm:$0xff]  ;;  %v7728_v42 = vld [vmem:[%s11624_s23 + $0x2d8] sm:$0xff] }
0x1641   :  { %v10579_v17 = vmul.f32 %v10503_v50, %v3894_v54  ;;  %v8063_v50 = vld [vmem:[%s11596_s8 + $0xa] ss:$0 sm:$0xff] }
0x1642   :  { %v4490_v3 = vadd.f32 %v8063_v50, %v4489_v32  ;;  %v7725_v32 = vld [vmem:[%s11624_s23 + $0x2c0] sm:$0xff] }
0x1644   :  { %7657 = vmatmul.msk.f32.vlgmr.msrb.gmra.mxu2 %vm296_vm5, %v10579_v17 }
0x1646   :  { %v10606_v20 = vpop.f32.mrf.mxu2 }
0x1648   :  { %v4492_v2 = vpop.f32.mrf.mxu0 }
0x1649   :  { %v4493_v39 = vadd.f32 %v8063_v50, %v4492_v2 }
0x164c   :  { %7658 = vmatmul.msk.f32.gmra.mxu2 %vm296_vm5, %v10584_v4 }
0x1650   :  { %v4495_v8 = vpop.f32.mrf.mxu0 }
0x1651   :  { %v4496_v31 = vadd.f32 %v8063_v50, %v4495_v8 }
0x1654   :  { %7696 = vmatmul.msk.f32.vlgmr.msra.gmra.mxu2 %vm225_vm4, %v4490_v3 }
0x1658   :  { %v4687_v43 = vpop.f32.mrf.mxu0 }
0x1659   :  { %v4693_v36 = vsel %vm296_vm5, %v4687_v43, -inf }
0x165a   :  { %4694 = vmax.xlane.f32.xlu0 %v4693_v36 }
0x165c   :  { %7697 = vmatmul.msk.f32.gmra.mxu2 %vm225_vm4, %v4493_v39 }
0x1660   :  { %v4690_v0 = vpop.f32.mrf.mxu0 }
0x1661   :  { %v4696_v37 = vsel %vm300_vm6, %v4690_v0, -inf }
0x1664   :  { %7698 = vmatmul.msk.f32.gmra.mxu2 %vm225_vm4, %v4496_v31 }
0x1686   :  { %v4572_v23 = vpop.xlane.xlu2 %4571 }
0x1687   :  { %v4576_v12 = vsub.f32 %v10558_v63, %v4572_v23 }
0x1689   :  { %v4578_v26 = vmul.f32 1.442695, %v4576_v12 }
0x168b   :  { %8261 = vpow2.f32 %v4578_v26 }
0x168e   :  { %v4575_v44 = vpop.xlane.xlu0 %4574 }
0x168f   :  { %v4577_v61 = vsub.f32 %v10562_v19, %v4575_v44 }
0x1691   :  { %v10597_v46 = vpop.eup %8261  ;;  %v4580_v47 = vmul.f32 1.442695, %v4577_v61  ;;  %v4215_v61 = vadd.f32 %v10513_v1, %v10374_v9 }
0x1692   :  { %v4582_v10 = vsel %vm296_vm5, %v10597_v46, 0.0 }
0x1693   :  { %8263 = vpow2.f32 %v4580_v47  ;;  %4583 = vadd.xlane.f32.xlu1 %v4582_v10 }
0x1699   :  { %v10601_v41 = vpop.eup %8263 }
0x169a   :  { %v4585_v63 = vsel %vm300_vm6, %v10601_v41, 0.0 }
0x169b   :  { %4697 = vmax.xlane.f32.xlu1 %v4696_v37  ;;  %4586 = vadd.xlane.f32.xlu2 %v4585_v63 }
0x16bf   :  { %v10608_v19 = vpop.f32.mrf.mxu2 }
0x16c7   :  { %v10610_v38 = vpop.f32.mrf.mxu2 }
0x16cd   :  { %v4695_v34 = vpop.xlane.xlu0 %4694 }
0x16ce   :  { %v4699_v24 = vsub.f32 %v4687_v43, %v4695_v34 }
0x16cf   :  { %v10612_v22 = vpop.f32.mrf.mxu2 }
0x16d0   :  { %v4701_v48 = vmul.f32 1.442695, %v4699_v24 }
0x16d2   :  { %8265 = vpow2.f32 %v4701_v48 }
0x16d7   :  { %v4526_v15 = vpop.f32.mrf.mxu2 }
0x16d8   :  { %v10614_v30 = vpop.eup %8265 }
0x16d9   :  { %v4705_v35 = vsel %vm296_vm5, %v10614_v30, 0.0 }
0x16da   :  { %4706 = vadd.xlane.f32.xlu2 %v4705_v35  ;;  %v4216_v35 = vadd.f32 %v10574_v59, %v10381_v5 }
0x16df   :  { %v4529_v56 = vpop.f32.mrf.mxu2 }
0x16e0   :  { %7703 = vmatpush.msk.msrb.mxu3 %vm96_vm1, %v4529_v56  ;;  %v4742_v60 = vrot.slane %v4529_v56, 1 }
0x16e2   :  { %4642 = vmatpush.msrb.mxu3 %v4526_v15 }
0x16e4   :  { %4843 = vmatpush.msra.mxu3 %v7732_v33 }
0x16e6   :  { %4844 = vmatpush.msra.mxu3 %v7731_v62 }
0x16e7   :  { %v4532_v58 = vpop.f32.mrf.mxu2 }
0x16e8   :  { %v4743_v6 = vrot.slane %v4532_v58, 1  ;;  %4845 = vmatpush.msra.mxu3 %v7730_v27 }
0x16ea   :  { %7710 = vmatpush.msk.msrb.mxu2 %vm96_vm1, %v4743_v6  ;;  %v4744_v52 = vsel %vm78_vm0, %v4742_v60, %v4743_v6  ;;  %4846 = vmatpush.msra.mxu3 %v7729_v28 }
0x16ec   :  { %4769 = vmatpush.msrb.mxu2 %v4744_v52  ;;  %4847 = vmatpush.msra.mxu3 %v7728_v42 }
0x16ee   :  { %4848 = vmatpush.msra.mxu3 %v7727_v55  ;;  %v4376_v55 = vadd.f32 %v10488_v29, %v10579_v17 }
0x16f0   :  { %4849 = vmatpush.msra.mxu3 %v7726_v53 }
0x16f2   :  { %4850 = vmatpush.msra.mxu3 %v7725_v32  ;;  %v7749_v32 = vld [vmem:[%s11597_s9 + $0x58] sm:$0xff] }
0x16f3   :  { %4927 = vmatpush.msra.mxu2 %v7749_v32 }
0x1706   :  { %v4584_v54 = vpop.xlane.xlu1 %4583 }
0x1707   :  { %8267 = vrcp.f32 %v4584_v54  ;;  %v4599_v8 = vand.u32 2147483648, %v4584_v54  ;;  %v4597_v39 = vand.u32 2147483647, %v4584_v54  ;;  %vm4593_vm13 = vweird.f32 %v4584_v54 }
0x1709   :  { %v4600_v23 = vor.u32 1.1754944e-38, %v4599_v8  ;;  %vm4598_vm3 = vcmp.eq.f32.partialorder %v4597_v39, 8.507059e+37  ;;  %v4377_v39 = vadd.f32 %v10506_v11, %v10584_v4 }
0x170d   :  { %v8268_v16 = vpop.eup %8267 }
0x170e   :  { %v4589_v7 = vmul.f32 %v8268_v16, %v4584_v54  ;;  %v4698_v14 = vpop.xlane.xlu1 %4697  ;;  %v4587_v45 = vpop.xlane.xlu2 %4586  ;;  %vm4594_vm12 = vweird.f32 %v8268_v16 }
0x170f   :  { %v4700_v2 = vsub.f32 %v4690_v0, %v4698_v14  ;;  %8269 = vrcp.f32 %v4587_v45  ;;  %vm4595_vm14 = vmor %vm4593_vm13, %vm4594_vm12  ;;  %v4612_v37 = vand.u32 2147483647, %v4587_v45  ;;  %v4614_v63 = vand.u32 2147483648, %v4587_v45 }
0x1710   :  { %v4590_v50 = vsub.f32 1.0, %v4589_v7  ;;  %vm4608_vm8 = vweird.f32 %v4587_v45 }
0x1711   :  { %v4703_v3 = vmul.f32 1.442695, %v4700_v2  ;;  %v4615_v9 = vor.u32 1.1754944e-38, %v4614_v63  ;;  %vm4613_vm10 = vcmp.eq.f32.partialorder %v4612_v37, 8.507059e+37 }
0x1712   :  { %v4591_v43 = vmul.f32 %v8268_v16, %v4590_v50 }
0x1713   :  { %8271 = vpow2.f32 %v4703_v3 }
0x1714   :  { %v4592_v36 = vadd.f32 %v8268_v16, %v4591_v43 }
0x1715   :  { %v8270_v31 = vpop.eup %8269 }
0x1716   :  { %v4596_v12 = vsel %vm4595_vm14, %v8268_v16, %v4592_v36  ;;  %v4604_v26 = vmul.f32 %v8270_v31, %v4587_v45  ;;  %vm4609_vm7 = vweird.f32 %v8270_v31 }
0x1717   :  { %v4601_v44 = vsel %vm4598_vm3, %v4600_v23, %v4596_v12  ;;  %vm4610_vm9 = vmor %vm4608_vm8, %vm4609_vm7  ;;  %v8064_v12 = vld [vmem:[%s11596_s8 + $0xb] ss:$0 sm:$0xff] }
0x1718   :  { %v4602_v47 = vmul.f32 %v10597_v46, %v4601_v44  ;;  %v4605_v10 = vsub.f32 1.0, %v4604_v26 }
0x1719   :  { %v10648_v0 = vpop.eup %8271 }
0x171a   :  { %v10650_v34 = vadd.f32 %v4602_v47, %v4215_v61  ;;  %v4606_v24 = vmul.f32 %v8270_v31, %v4605_v10  ;;  %7704 = vmatmul.msk.f32.vlgmr.msrb.gmra.mxu3 %vm296_vm5, %v4602_v47  ;;  %v4708_v48 = vsel %vm300_vm6, %v10648_v0, 0.0  ;;  %v4812_v61 = vpop.f32.mrf.mxu1 }
0x171b   :  { %4709 = vadd.xlane.f32.xlu0 %v4708_v48 }
0x171c   :  { %v4607_v15 = vadd.f32 %v8270_v31, %v4606_v24 }
0x171e   :  { %v4611_v1 = vsel %vm4610_vm9, %v8270_v31, %v4607_v15  ;;  %v4892_v31 = vpop.f32.mrf.mxu0  ;;  %v8062_v15 = vld [vmem:[%s11630_s3 + $0xb] ss:$0 sm:$0xff] }
0x171f   :  { %v4616_v46 = vsel %vm4613_vm10, %v4615_v9, %v4611_v1  ;;  %v4893_v44 = vadd.f32 %v8064_v12, %v4892_v31  ;;  %v7774_v1 = vld [vmem:[%s11628_s5 + $0x338] sm:$0xff] }
0x1720   :  { %v4617_v56 = vmul.f32 %v10601_v41, %v4616_v46  ;;  %v4813_v46 = vadd.f32 %v8062_v15, %v4812_v61 }
0x1722   :  { %7705 = vmatmul.msk.f32.gmra.mxu3 %vm296_vm5, %v4617_v56  ;;  %v10659_v58 = vadd.f32 %v4617_v56, %v4216_v35  ;;  %v4815_v4 = vpop.f32.mrf.mxu1 }
0x1726   :  { %v4895_v47 = vpop.f32.mrf.mxu0 }
0x1727   :  { %v4896_v11 = vadd.f32 %v8064_v12, %v4895_v47 }
0x172a   :  { %7734 = vmatmul.msk.f32.vlgmr.msra.gmra.mxu3 %vm113_vm2, %v10115_v57  ;;  %v4818_v35 = vpop.f32.mrf.mxu1 }
0x172e   :  { %v4898_v37 = vpop.f32.mrf.mxu0 }
0x172f   :  { %v4899_v48 = vadd.f32 %v8064_v12, %v4898_v37 }
0x1732   :  { %7735 = vmatmul.msk.f32.gmra.mxu3 %vm113_vm2, %v10126_v40 }
0x173a   :  { %7736 = vmatmul.msk.f32.gmra.mxu3 %vm113_vm2, %v10137_v18 }
0x174d   :  { %v4707_v60 = vpop.xlane.xlu2 %4706 }
0x174e   :  { %8273 = vrcp.f32 %v4707_v60  ;;  %v4722_v59 = vand.u32 2147483648, %v4707_v60  ;;  %v4720_v33 = vand.u32 2147483647, %v4707_v60  ;;  %vm4716_vm12 = vweird.f32 %v4707_v60 }
0x1750   :  { %v4723_v27 = vor.u32 1.1754944e-38, %v4722_v59  ;;  %vm4721_vm14 = vcmp.eq.f32.partialorder %v4720_v33, 8.507059e+37  ;;  %v4816_v33 = vadd.f32 %v8062_v15, %v4815_v4 }
0x1752   :  { %v5058_v32 = vrot.slane %v4816_v33, 1 }
0x1754   :  { %v8274_v6 = vpop.eup %8273 }
0x1755   :  { %v4712_v52 = vmul.f32 %v8274_v6, %v4707_v60  ;;  %vm4717_vm11 = vweird.f32 %v8274_v6  ;;  %v7773_v60 = vld [vmem:[%s11628_s5 + $0x330] sm:$0xff] }
0x1756   :  { %vm4718_vm13 = vmor %vm4716_vm12, %vm4717_vm11 }
0x1757   :  { %v4713_v5 = vsub.f32 1.0, %v4712_v52  ;;  %v7772_v52 = vld [vmem:[%s11628_s5 + $0x328] sm:$0xff] }
0x1759   :  { %v4714_v41 = vmul.f32 %v8274_v6, %v4713_v5  ;;  %v4819_v5 = vadd.f32 %v8062_v15, %v4818_v35 }
0x175b   :  { %v4715_v62 = vadd.f32 %v8274_v6, %v4714_v41  ;;  %v7771_v41 = vld [vmem:[%s11628_s5 + $0x320] sm:$0xff] }
0x175d   :  { %v4719_v28 = vsel %vm4718_vm13, %v8274_v6, %v4715_v62 }
0x175e   :  { %v4724_v42 = vsel %vm4721_vm14, %v4723_v27, %v4719_v28  ;;  %v7770_v27 = vld [vmem:[%s11628_s5 + $0x318] sm:$0xff]  ;;  %v5059_v28 = vrot.slane %v4819_v5, 1 }
0x175f   :  { %v4725_v54 = vmul.f32 %v10614_v30, %v4724_v42  ;;  %v7798_v42 = vld [vmem:[%s11595_s7 + $0x338] sm:$0xff] }
0x1761   :  { %v10670_v53 = vadd.f32 %v4725_v54, %v4376_v55  ;;  %7711 = vmatmul.msk.f32.vlgmr.msrb.gmra.mxu2 %vm296_vm5, %v4725_v54  ;;  %v7769_v54 = vld [vmem:[%s11628_s5 + $0x310] sm:$0xff] }
0x178e   :  { %v4710_v16 = vpop.xlane.xlu0 %4709 }
0x178f   :  { %8275 = vrcp.f32 %v4710_v16  ;;  %v4737_v2 = vand.u32 2147483648, %v4710_v16  ;;  %v4735_v29 = vand.u32 2147483647, %v4710_v16  ;;  %vm4731_vm7 = vweird.f32 %v4710_v16 }
0x1791   :  { %v4738_v30 = vor.u32 1.1754944e-38, %v4737_v2  ;;  %vm4736_vm9 = vcmp.eq.f32.partialorder %v4735_v29, 8.507059e+37  ;;  %v7796_v2 = vld [vmem:[%s11595_s7 + $0x328] sm:$0xff]  ;;  %v7794_v29 = vld [vmem:[%s11595_s7 + $0x318] sm:$0xff] }
0x1795   :  { %v8276_v7 = vpop.eup %8275 }
0x1796   :  { %v4727_v14 = vmul.f32 %v8276_v7, %v4710_v16  ;;  %vm4732_vm3 = vweird.f32 %v8276_v7  ;;  %v7768_v16 = vld [vmem:[%s11628_s5 + $0x308] sm:$0xff] }
0x1797   :  { %vm4733_vm8 = vmor %vm4731_vm7, %vm4732_vm3 }
0x1798   :  { %v4728_v45 = vsub.f32 1.0, %v4727_v14  ;;  %v5060_v14 = vsel %vm78_vm0, %v5058_v32, %v5059_v28  ;;  %v7782_v32 = vld [vmem:[%s11624_s23 + $0x318] sm:$0xff] }
0x179a   :  { %v4729_v50 = vmul.f32 %v8276_v7, %v4728_v45  ;;  %v7767_v45 = vld [vmem:[%s11628_s5 + $0x300] sm:$0xff] }
0x179c   :  { %v4730_v17 = vadd.f32 %v8276_v7, %v4729_v50  ;;  %v7795_v50 = vld [vmem:[%s11595_s7 + $0x320] sm:$0xff] }
0x179d   :  { %v10676_v8 = vpop.f32.mrf.mxu3 }
0x179e   :  { %v4734_v3 = vsel %vm4733_vm8, %v8276_v7, %v4730_v17  ;;  %v7797_v7 = vld [vmem:[%s11595_s7 + $0x330] sm:$0xff] }
0x179f   :  { %v4739_v43 = vsel %vm4736_vm9, %v4738_v30, %v4734_v3  ;;  %v7793_v17 = vld [vmem:[%s11595_s7 + $0x310] sm:$0xff]  ;;  %v7792_v30 = vld [vmem:[%s11595_s7 + $0x308] sm:$0xff]  ;;  %v7791_v3 = vld [vmem:[%s11595_s7 + $0x300] sm:$0xff] }
0x17a0   :  { %v4740_v36 = vmul.f32 %v10648_v0, %v4739_v43  ;;  %v8065_v0 = vld [vmem:[%s11629_s6 + $0xb] ss:$0 sm:$0xff] }
0x17a2   :  { %7712 = vmatmul.msk.f32.gmra.mxu2 %vm296_vm5, %v4740_v36  ;;  %v10682_v23 = vadd.f32 %v4740_v36, %v4377_v39 }
0x17a5   :  { %v10687_v26 = vpop.f32.mrf.mxu3 }
0x17aa   :  { %7750 = vmatmul.msk.f32.vlgmr.msra.gmra.mxu2 %vm225_vm4, %v4893_v44 }
0x17ad   :  { %v4852_v10 = vpop.f32.mrf.mxu3 }
0x17ae   :  { %v4853_v9 = vadd.f32 %v8065_v0, %v4852_v10 }
0x17b2   :  { %7751 = vmatmul.msk.f32.gmra.mxu2 %vm225_vm4, %v4896_v11 }
0x17b5   :  { %v4855_v63 = vpop.f32.mrf.mxu3 }
0x17b6   :  { %v4856_v24 = vadd.f32 %v8065_v0, %v4855_v63 }
0x17b8   :  { %7753 = vmatpush.xpose.msk.msrb.mxu1 %vm225_vm4, %v4856_v24  ;;  %v5062_v62 = vrot.slane %v4856_v24, 1 }
0x17ba   :  { %7752 = vmatmul.msk.f32.gmra.mxu2 %vm225_vm4, %v4899_v48 }
0x17bc   :  { %7754 = vmatpush.xpose.msk.msrb.mxu1 %vm225_vm4, %v4853_v9 }
0x17bd   :  { %v4858_v56 = vpop.f32.mrf.mxu3 }
0x17be   :  { %v4859_v6 = vadd.f32 %v8065_v0, %v4858_v56 }
0x17bf   :  { %7755 = vmatmul.msk.f32.vlgmr.msrb.gmra.mxu1 %vm225_vm4, %v4813_v46 }
0x17c0   :  { %5206 = vmatpush.msra.mxu1 %v7774_v1  ;;  %v5063_v59 = vrot.slane %v4859_v6, 1 }
0x17c2   :  { %5207 = vmatpush.msra.mxu1 %v7773_v60  ;;  %7760 = vmatpush.xpose.msk.msra.mxu0 %vm225_vm4, %v5063_v59  ;;  %v5064_v55 = vsel %vm78_vm0, %v5062_v62, %v5063_v59 }
0x17c4   :  { %5208 = vmatpush.msra.mxu1 %v7772_v52 }
0x17c6   :  { %5209 = vmatpush.msra.mxu1 %v7771_v41  ;;  %7761 = vmatpush.xpose.msk.msra.mxu0 %vm225_vm4, %v5064_v55  ;;  %v7784_v55 = vld [vmem:[%s11624_s23 + $0x328] sm:$0xff] }
0x17c7   :  { %7756 = vmatmul.msk.f32.gmra.mxu1 %vm225_vm4, %v4816_v33 }
0x17c8   :  { %5210 = vmatpush.msra.mxu1 %v7770_v27 }
0x17c9   :  { %7762 = vmatmul.msk.f32.vlgmr.msra.gmra.mxu0 %vm225_vm4, %v5060_v14  ;;  %v7780_v14 = vld [vmem:[%s11624_s23 + $0x308] sm:$0xff] }
0x17ca   :  { %5286 = vmatpush.msrb.mxu0 %v7798_v42  ;;  %5211 = vmatpush.msra.mxu1 %v7769_v54  ;;  %v7785_v42 = vld [vmem:[%s11624_s23 + $0x330] sm:$0xff]  ;;  %v7783_v54 = vld [vmem:[%s11624_s23 + $0x320] sm:$0xff] }
0x17cc   :  { %5212 = vmatpush.msra.mxu1 %v7768_v16  ;;  %5287 = vmatpush.msrb.mxu0 %v7797_v7  ;;  %v7781_v7 = vld [vmem:[%s11624_s23 + $0x310] sm:$0xff] }
0x17ce   :  { %5213 = vmatpush.msra.mxu1 %v7767_v45  ;;  %5288 = vmatpush.msrb.mxu0 %v7796_v2  ;;  %v7779_v45 = vld [vmem:[%s11624_s23 + $0x300] sm:$0xff] }
0x17cf   :  { %7776 = vmatmul.msk.f32.vlgmr.msra.gmra.mxu1 %vm113_vm2, %v10115_v57 }
0x17d0   :  { %5289 = vmatpush.msrb.mxu0 %v7795_v50 }
0x17d1   :  { %7763 = vmatmul.msk.f32.gmra.mxu0 %vm225_vm4, %v5059_v28  ;;  %v7786_v28 = vld [vmem:[%s11624_s23 + $0x338] sm:$0xff] }
0x17d2   :  { %5290 = vmatpush.msrb.mxu0 %v7794_v29 }
0x17d4   :  { %5291 = vmatpush.msrb.mxu0 %v7793_v17 }
0x17d6   :  { %5292 = vmatpush.msrb.mxu0 %v7792_v30 }
0x17d7   :  { %7777 = vmatmul.msk.f32.gmra.mxu1 %vm113_vm2, %v10126_v40 }
0x17d8   :  { %5293 = vmatpush.msrb.mxu0 %v7791_v3 }
0x17d9   :  { %7800 = vmatmul.msk.f32.vlgmr.msrb.gmra.mxu0 %vm113_vm2, %v10115_v57 }
0x17df   :  { %7778 = vmatmul.msk.f32.gmra.mxu1 %vm113_vm2, %v10137_v18 }
0x17e1   :  { %7801 = vmatmul.msk.f32.gmra.mxu0 %vm113_vm2, %v10126_v40 }
0x17e4   :  { %v10768_v43 = vpop.f32.mrf.mxu2 }
0x17e9   :  { %7802 = vmatmul.msk.f32.gmra.mxu0 %vm113_vm2, %v10137_v18 }
0x1825   :  { %v10770_v39 = vpop.f32.mrf.mxu2 }
0x182d   :  { %v4929_v36 = vpop.f32.mrf.mxu2 }
0x1835   :  { %v4932_v31 = vpop.f32.mrf.mxu2 }
0x1836   :  { %7757 = vmatpush.msk.msrb.mxu3 %vm96_vm1, %v4932_v31  ;;  %v5145_v47 = vrot.slane %v4932_v31, 1 }
0x1838   :  { %5045 = vmatpush.msrb.mxu3 %v4929_v36 }
0x183a   :  { %5246 = vmatpush.msra.mxu3 %v7786_v28 }
0x183c   :  { %v4967_v12 = vpop.f32.mrf.mxu1  ;;  %5247 = vmatpush.msra.mxu3 %v7785_v42 }
0x183d   :  { %v4935_v44 = vpop.f32.mrf.mxu2  ;;  %v4973_v61 = vsel %vm296_vm5, %v4967_v12, -inf }
0x183e   :  { %v5146_v10 = vrot.slane %v4935_v44, 1  ;;  %4974 = vmax.xlane.f32.xlu1 %v4973_v61  ;;  %5248 = vmatpush.msra.mxu3 %v7784_v55 }
0x1840   :  { %7764 = vmatpush.msk.msrb.mxu2 %vm96_vm1, %v5146_v10  ;;  %v5147_v11 = vsel %vm78_vm0, %v5145_v47, %v5146_v10  ;;  %5249 = vmatpush.msra.mxu3 %v7783_v54 }
0x1842   :  { %5172 = vmatpush.msrb.mxu2 %v5147_v11  ;;  %5250 = vmatpush.msra.mxu3 %v7782_v32 }
0x1844   :  { %v4970_v4 = vpop.f32.mrf.mxu1  ;;  %5251 = vmatpush.msra.mxu3 %v7781_v7 }
0x1845   :  { %v4976_v0 = vsel %vm300_vm6, %v4970_v4, -inf }
0x1846   :  { %4977 = vmax.xlane.f32.xlu2 %v4976_v0  ;;  %v5090_v37 = vpop.f32.mrf.mxu0  ;;  %5252 = vmatpush.msra.mxu3 %v7780_v14 }
0x1847   :  { %v5096_v63 = vsel %vm296_vm5, %v5090_v37, -inf }
0x1848   :  { %5253 = vmatpush.msra.mxu3 %v7779_v45 }
0x184e   :  { %5097 = vmax.xlane.f32.xlu2 %v5096_v63  ;;  %v5093_v6 = vpop.f32.mrf.mxu0 }
0x184f   :  { %v5099_v41 = vsel %vm300_vm6, %v5093_v6, -inf }
0x18b1   :  { %v4975_v24 = vpop.xlane.xlu1 %4974 }
0x18b2   :  { %v4979_v48 = vsub.f32 %v4967_v12, %v4975_v24 }
0x18b4   :  { %v4981_v15 = vmul.f32 1.442695, %v4979_v48 }
0x18b6   :  { %8277 = vpow2.f32 %v4981_v15 }
0x18b9   :  { %v4978_v9 = vpop.xlane.xlu2 %4977 }
0x18ba   :  { %v4980_v1 = vsub.f32 %v4970_v4, %v4978_v9 }
0x18bc   :  { %v8278_v46 = vpop.eup %8277  ;;  %v4983_v35 = vmul.f32 1.442695, %v4980_v1 }
0x18bd   :  { %v4985_v56 = vsel %vm296_vm5, %v8278_v46, 0.0 }
0x18be   :  { %8279 = vpow2.f32 %v4983_v35  ;;  %4986 = vadd.xlane.f32.xlu0 %v4985_v56 }
0x18c1   :  { %v5098_v60 = vpop.xlane.xlu2 %5097 }
0x18c2   :  { %v5102_v52 = vsub.f32 %v5090_v37, %v5098_v60 }
0x18c4   :  { %v10779_v5 = vpop.eup %8279  ;;  %v5104_v59 = vmul.f32 1.442695, %v5102_v52 }
0x18c5   :  { %v4988_v33 = vsel %vm300_vm6, %v10779_v5, 0.0 }
0x18c6   :  { %8281 = vpow2.f32 %v5104_v59  ;;  %5100 = vmax.xlane.f32.xlu0 %v5099_v41  ;;  %4989 = vadd.xlane.f32.xlu1 %v4988_v33 }
0x18cc   :  { %v10784_v62 = vpop.eup %8281 }
0x18cd   :  { %v5108_v27 = vsel %vm296_vm5, %v10784_v62, 0.0 }
0x18ce   :  { %5109 = vadd.xlane.f32.xlu1 %v5108_v27 }
0x1931   :  { %v4987_v16 = vpop.xlane.xlu0 %4986 }
0x1932   :  { %8283 = vrcp.f32 %v4987_v16  ;;  %v5002_v36 = vand.u32 2147483648, %v4987_v16  ;;  %v5000_v12 = vand.u32 2147483647, %v4987_v16  ;;  %vm4996_vm11 = vweird.f32 %v4987_v16 }
0x1934   :  { %v5003_v10 = vor.u32 1.1754944e-38, %v5002_v36  ;;  %vm5001_vm13 = vcmp.eq.f32.partialorder %v5000_v12, 8.507059e+37 }
0x1938   :  { %v8284_v2 = vpop.eup %8283 }
0x1939   :  { %v4992_v50 = vmul.f32 %v8284_v2, %v4987_v16  ;;  %v4990_v29 = vpop.xlane.xlu1 %4989  ;;  %v5101_v17 = vpop.xlane.xlu0 %5100  ;;  %vm4997_vm10 = vweird.f32 %v8284_v2 }
0x193a   :  { %8285 = vrcp.f32 %v4990_v29  ;;  %v5103_v3 = vsub.f32 %v5093_v6, %v5101_v17  ;;  %vm4998_vm12 = vmor %vm4996_vm11, %vm4997_vm10  ;;  %v5017_v48 = vand.u32 2147483648, %v4990_v29  ;;  %v5015_v35 = vand.u32 2147483647, %v4990_v29 }
0x193b   :  { %v4993_v30 = vsub.f32 1.0, %v4992_v50  ;;  %vm5011_vm3 = vweird.f32 %v4990_v29 }
0x193c   :  { %v5106_v44 = vmul.f32 1.442695, %v5103_v3  ;;  %v5018_v52 = vor.u32 1.1754944e-38, %v5017_v48  ;;  %vm5016_vm8 = vcmp.eq.f32.partialorder %v5015_v35, 8.507059e+37 }
0x193d   :  { %v4994_v31 = vmul.f32 %v8284_v2, %v4993_v30 }
0x193e   :  { %8287 = vpow2.f32 %v5106_v44 }
0x193f   :  { %v4995_v61 = vadd.f32 %v8284_v2, %v4994_v31 }
0x1940   :  { %v8286_v47 = vpop.eup %8285 }
0x1941   :  { %v4999_v11 = vsel %vm4998_vm12, %v8284_v2, %v4995_v61  ;;  %v5007_v4 = vmul.f32 %v8286_v47, %v4990_v29  ;;  %v5110_v0 = vpop.xlane.xlu1 %5109  ;;  %vm5012_vm14 = vweird.f32 %v8286_v47  ;;  %v5295_v61 = vpop.f32.mrf.mxu0 }
0x1942   :  { %v5004_v37 = vsel %vm5001_vm13, %v5003_v10, %v4999_v11  ;;  %8289 = vrcp.f32 %v5110_v0  ;;  %vm5013_vm7 = vmor %vm5011_vm3, %vm5012_vm14  ;;  %v5125_v27 = vand.u32 2147483648, %v5110_v0  ;;  %v5123_v42 = vand.u32 2147483647, %v5110_v0  ;;  %v8067_v10 = vld [vmem:[%s11596_s8 + $0xc] ss:$0 sm:$0xff] }
0x1943   :  { %v5005_v63 = vmul.f32 %v8278_v46, %v5004_v37  ;;  %v5008_v24 = vsub.f32 1.0, %v5007_v4  ;;  %vm5119_vm10 = vweird.f32 %v5110_v0  ;;  %v5215_v4 = vpop.f32.mrf.mxu1 }
0x1944   :  { %v8288_v15 = vpop.eup %8287  ;;  %v5126_v32 = vor.u32 1.1754944e-38, %v5125_v27  ;;  %vm5124_vm12 = vcmp.eq.f32.partialorder %v5123_v42, 8.507059e+37  ;;  %v7826_v27 = vld [vmem:[%s11628_s5 + $0x368] sm:$0xff] }
0x1945   :  { %v10813_v9 = vadd.f32 %v5005_v63, %v10650_v34  ;;  %v5009_v1 = vmul.f32 %v8286_v47, %v5008_v24  ;;  %7758 = vmatmul.msk.f32.vlgmr.msrb.gmra.mxu3 %vm296_vm5, %v5005_v63  ;;  %v5111_v56 = vsel %vm300_vm6, %v8288_v15, 0.0 }
0x1946   :  { %5112 = vadd.xlane.f32.xlu2 %v5111_v56  ;;  %v8066_v56 = vld [vmem:[%s11630_s3 + $0xc] ss:$0 sm:$0xff] }
0x1947   :  { %v5010_v60 = vadd.f32 %v8286_v47, %v5009_v1 }
0x1948   :  { %v8290_v6 = vpop.eup %8289 }
0x1949   :  { %v5115_v46 = vmul.f32 %v8290_v6, %v5110_v0  ;;  %v5014_v59 = vsel %vm5013_vm7, %v8286_v47, %v5010_v60  ;;  %vm5120_vm9 = vweird.f32 %v8290_v6  ;;  %v5296_v0 = vadd.f32 %v8067_v10, %v5295_v61  ;;  %v5298_v37 = vpop.f32.mrf.mxu0  ;;  %v7845_v61 = vld [vmem:[%s11595_s7 + $0x340] sm:$0xff] }
0x194a   :  { %v5019_v41 = vsel %vm5016_vm8, %v5018_v52, %v5014_v59  ;;  %vm5121_vm11 = vmor %vm5119_vm10, %vm5120_vm9  ;;  %v5299_v24 = vadd.f32 %v8067_v10, %v5298_v37  ;;  %v7828_v52 = vld [vmem:[%s11628_s5 + $0x378] sm:$0xff] }
0x194b   :  { %v5116_v33 = vsub.f32 1.0, %v5115_v46  ;;  %v5020_v34 = vmul.f32 %v10779_v5, %v5019_v41  ;;  %v5218_v48 = vpop.f32.mrf.mxu1  ;;  %v5216_v46 = vadd.f32 %v8066_v56, %v5215_v4 }
0x194d   :  { %v5117_v28 = vmul.f32 %v8290_v6, %v5116_v33  ;;  %7759 = vmatmul.msk.f32.gmra.mxu3 %vm296_vm5, %v5020_v34  ;;  %v10820_v55 = vadd.f32 %v5020_v34, %v10659_v58  ;;  %v7803_v58 = vld [vmem:[%s11597_s9 + $0x60] sm:$0xff]  ;;  %v7827_v33 = vld [vmem:[%s11628_s5 + $0x370] sm:$0xff] }
0x194e   :  { %5330 = vmatpush.msra.mxu2 %v7803_v58  ;;  %v7852_v58 = vld [vmem:[%s11595_s7 + $0x378] sm:$0xff] }
0x194f   :  { %v5118_v54 = vadd.f32 %v8290_v6, %v5117_v28 }
0x1951   :  { %v5122_v16 = vsel %vm5121_vm11, %v8290_v6, %v5118_v54  ;;  %v5301_v1 = vpop.f32.mrf.mxu0  ;;  %v7825_v54 = vld [vmem:[%s11628_s5 + $0x360] sm:$0xff] }
0x1952   :  { %v5127_v7 = vsel %vm5124_vm12, %v5126_v32, %v5122_v16  ;;  %v5302_v60 = vadd.f32 %v8067_v10, %v5301_v1  ;;  %v5219_v32 = vadd.f32 %v8066_v56, %v5218_v48 }
0x1953   :  { %v5128_v14 = vmul.f32 %v10784_v62, %v5127_v7  ;;  %v5221_v59 = vpop.f32.mrf.mxu1  ;;  %v7824_v7 = vld [vmem:[%s11628_s5 + $0x358] sm:$0xff] }
0x1954   :  { %v5222_v28 = vadd.f32 %v8066_v56, %v5221_v59 }
0x1955   :  { %v10824_v5 = vadd.f32 %v5128_v14, %v10670_v53  ;;  %7765 = vmatmul.msk.f32.vlgmr.msrb.gmra.mxu2 %vm296_vm5, %v5128_v14  ;;  %7788 = vmatmul.msk.f32.vlgmr.msra.gmra.mxu3 %vm113_vm2, %v10115_v57 }
0x1956   :  { %v5462_v14 = vrot.slane %v5222_v28, 1 }
0x195d   :  { %7789 = vmatmul.msk.f32.gmra.mxu3 %vm113_vm2, %v10126_v40 }
0x1965   :  { %7790 = vmatmul.msk.f32.gmra.mxu3 %vm113_vm2, %v10137_v18 }
0x19b9   :  { %v5113_v62 = vpop.xlane.xlu2 %5112 }
0x19ba   :  { %8291 = vrcp.f32 %v5113_v62  ;;  %v5140_v50 = vand.u32 2147483648, %v5113_v62  ;;  %v5138_v17 = vand.u32 2147483647, %v5113_v62  ;;  %vm5134_vm14 = vweird.f32 %v5113_v62 }
0x19bc   :  { %v5141_v36 = vor.u32 1.1754944e-38, %v5140_v50  ;;  %vm5139_vm7 = vcmp.eq.f32.partialorder %v5138_v17, 8.507059e+37  ;;  %v7851_v50 = vld [vmem:[%s11595_s7 + $0x370] sm:$0xff]  ;;  %v7821_v17 = vld [vmem:[%s11628_s5 + $0x340] sm:$0xff] }
0x19c0   :  { %v8292_v53 = vpop.eup %8291 }
0x19c1   :  { %v5130_v45 = vmul.f32 %v8292_v53, %v5113_v62  ;;  %vm5135_vm13 = vweird.f32 %v8292_v53 }
0x19c2   :  { %vm5136_vm3 = vmor %vm5134_vm14, %vm5135_vm13 }
0x19c3   :  { %v5131_v2 = vsub.f32 1.0, %v5130_v45  ;;  %v5461_v45 = vrot.slane %v5219_v32, 1 }
0x19c5   :  { %v5132_v29 = vmul.f32 %v8292_v53, %v5131_v2  ;;  %v7822_v2 = vld [vmem:[%s11628_s5 + $0x348] sm:$0xff] }
0x19c7   :  { %v5133_v30 = vadd.f32 %v8292_v53, %v5132_v29  ;;  %v5463_v29 = vsel %vm78_vm0, %v5461_v45, %v5462_v14  ;;  %v7840_v45 = vld [vmem:[%s11624_s23 + $0x378] sm:$0xff] }
0x19c8   :  { %v10836_v3 = vpop.f32.mrf.mxu3 }
0x19c9   :  { %v5137_v31 = vsel %vm5136_vm3, %v8292_v53, %v5133_v30  ;;  %v7823_v53 = vld [vmem:[%s11628_s5 + $0x350] sm:$0xff]  ;;  %v7850_v30 = vld [vmem:[%s11595_s7 + $0x368] sm:$0xff] }
0x19ca   :  { %v5142_v12 = vsel %vm5139_vm7, %v5141_v36, %v5137_v31  ;;  %v7849_v36 = vld [vmem:[%s11595_s7 + $0x360] sm:$0xff]  ;;  %v7848_v31 = vld [vmem:[%s11595_s7 + $0x358] sm:$0xff] }
0x19cb   :  { %v5143_v44 = vmul.f32 %v8288_v15, %v5142_v12  ;;  %v7847_v12 = vld [vmem:[%s11595_s7 + $0x350] sm:$0xff] }
0x19cd   :  { %7766 = vmatmul.msk.f32.gmra.mxu2 %vm296_vm5, %v5143_v44  ;;  %v10840_v47 = vadd.f32 %v5143_v44, %v10682_v23  ;;  %v8068_v23 = vld [vmem:[%s11629_s6 + $0xc] ss:$0 sm:$0xff] }
0x19ce   :  { %v7846_v44 = vld [vmem:[%s11595_s7 + $0x348] sm:$0xff] }
0x19d0   :  { %v10845_v11 = vpop.f32.mrf.mxu3 }
0x19d5   :  { %7804 = vmatmul.msk.f32.vlgmr.msra.gmra.mxu2 %vm225_vm4, %v5296_v0 }
0x19d8   :  { %v5255_v63 = vpop.f32.mrf.mxu3  ;;  %v10926_v10 = vpop.f32.mrf.mxu2 }
0x19d9   :  { %v5256_v6 = vadd.f32 %v8068_v23, %v5255_v63 }
0x19dd   :  { %7805 = vmatmul.msk.f32.gmra.mxu2 %vm225_vm4, %v5299_v24 }
0x19e0   :  { %v5258_v15 = vpop.f32.mrf.mxu3 }
0x19e1   :  { %v5259_v35 = vadd.f32 %v8068_v23, %v5258_v15 }
0x19e3   :  { %7807 = vmatpush.xpose.msk.msrb.mxu1 %vm225_vm4, %v5259_v35  ;;  %v5465_v16 = vrot.slane %v5259_v35, 1 }
0x19e5   :  { %7806 = vmatmul.msk.f32.gmra.mxu2 %vm225_vm4, %v5302_v60 }
0x19e7   :  { %7808 = vmatpush.xpose.msk.msrb.mxu1 %vm225_vm4, %v5256_v6 }
0x19e8   :  { %v5261_v41 = vpop.f32.mrf.mxu3 }
0x19e9   :  { %v5262_v34 = vadd.f32 %v8068_v23, %v5261_v41 }
0x19ea   :  { %7809 = vmatmul.msk.f32.vlgmr.msrb.gmra.mxu1 %vm225_vm4, %v5216_v46 }
0x19eb   :  { %5609 = vmatpush.msra.mxu1 %v7828_v52  ;;  %v5466_v42 = vrot.slane %v5262_v34, 1 }
0x19ed   :  { %5610 = vmatpush.msra.mxu1 %v7827_v33  ;;  %7814 = vmatpush.xpose.msk.msra.mxu0 %vm225_vm4, %v5466_v42  ;;  %v5467_v62 = vsel %vm78_vm0, %v5465_v16, %v5466_v42 }
0x19ef   :  { %5611 = vmatpush.msra.mxu1 %v7826_v27 }
0x19f1   :  { %5612 = vmatpush.msra.mxu1 %v7825_v54  ;;  %7815 = vmatpush.xpose.msk.msra.mxu0 %vm225_vm4, %v5467_v62 }
0x19f2   :  { %7810 = vmatmul.msk.f32.gmra.mxu1 %vm225_vm4, %v5219_v32 }
0x19f3   :  { %5613 = vmatpush.msra.mxu1 %v7824_v7 }
0x19f4   :  { %7816 = vmatmul.msk.f32.vlgmr.msra.gmra.mxu0 %vm225_vm4, %v5463_v29  ;;  %v7837_v29 = vld [vmem:[%s11624_s23 + $0x360] sm:$0xff] }
0x19f5   :  { %5689 = vmatpush.msrb.mxu0 %v7852_v58  ;;  %5614 = vmatpush.msra.mxu1 %v7823_v53 }
0x19f7   :  { %5615 = vmatpush.msra.mxu1 %v7822_v2  ;;  %5690 = vmatpush.msrb.mxu0 %v7851_v50  ;;  %v7839_v2 = vld [vmem:[%s11624_s23 + $0x370] sm:$0xff]  ;;  %v7838_v50 = vld [vmem:[%s11624_s23 + $0x368] sm:$0xff] }
0x19f9   :  { %5616 = vmatpush.msra.mxu1 %v7821_v17  ;;  %5691 = vmatpush.msrb.mxu0 %v7850_v30  ;;  %v7836_v17 = vld [vmem:[%s11624_s23 + $0x358] sm:$0xff] }
0x19fa   :  { %7830 = vmatmul.msk.f32.vlgmr.msra.gmra.mxu1 %vm113_vm2, %v10115_v57 }
0x19fb   :  { %5692 = vmatpush.msrb.mxu0 %v7849_v36  ;;  %v7835_v36 = vld [vmem:[%s11624_s23 + $0x350] sm:$0xff] }
0x19fc   :  { %7817 = vmatmul.msk.f32.gmra.mxu0 %vm225_vm4, %v5462_v14 }
0x19fd   :  { %5693 = vmatpush.msrb.mxu0 %v7848_v31  ;;  %v7834_v31 = vld [vmem:[%s11624_s23 + $0x348] sm:$0xff] }
0x19ff   :  { %5694 = vmatpush.msrb.mxu0 %v7847_v12  ;;  %v7833_v12 = vld [vmem:[%s11624_s23 + $0x340] sm:$0xff] }
0x1a01   :  { %5695 = vmatpush.msrb.mxu0 %v7846_v44 }
0x1a02   :  { %7831 = vmatmul.msk.f32.gmra.mxu1 %vm113_vm2, %v10126_v40 }
0x1a03   :  { %5696 = vmatpush.msrb.mxu0 %v7845_v61 }
0x1a04   :  { %7854 = vmatmul.msk.f32.vlgmr.msrb.gmra.mxu0 %vm113_vm2, %v10115_v57 }
0x1a0a   :  { %7832 = vmatmul.msk.f32.gmra.mxu1 %vm113_vm2, %v10137_v18 }
0x1a0c   :  { %7855 = vmatmul.msk.f32.gmra.mxu0 %vm113_vm2, %v10126_v40 }
0x1a14   :  { %7856 = vmatmul.msk.f32.gmra.mxu0 %vm113_vm2, %v10137_v18 }
0x1a50   :  { %v10928_v4 = vpop.f32.mrf.mxu2 }
0x1a58   :  { %v5332_v0 = vpop.f32.mrf.mxu2 }
0x1a60   :  { %v5335_v37 = vpop.f32.mrf.mxu2 }
0x1a61   :  { %7811 = vmatpush.msk.msrb.mxu3 %vm96_vm1, %v5335_v37  ;;  %v5548_v23 = vrot.slane %v5335_v37, 1 }
0x1a63   :  { %5448 = vmatpush.msrb.mxu3 %v5332_v0 }
0x1a65   :  { %5649 = vmatpush.msra.mxu3 %v7840_v45 }
0x1a67   :  { %v5370_v63 = vpop.f32.mrf.mxu1  ;;  %5650 = vmatpush.msra.mxu3 %v7839_v2 }
0x1a68   :  { %v5376_v24 = vsel %vm296_vm5, %v5370_v63, -inf  ;;  %v5338_v48 = vpop.f32.mrf.mxu2 }
0x1a69   :  { %5377 = vmax.xlane.f32.xlu0 %v5376_v24  ;;  %v5549_v15 = vrot.slane %v5338_v48, 1  ;;  %5651 = vmatpush.msra.mxu3 %v7838_v50 }
0x1a6b   :  { %7818 = vmatpush.msk.msrb.mxu2 %vm96_vm1, %v5549_v15  ;;  %v5550_v1 = vsel %vm78_vm0, %v5548_v23, %v5549_v15  ;;  %5652 = vmatpush.msra.mxu3 %v7837_v29 }
0x1a6d   :  { %5575 = vmatpush.msrb.mxu2 %v5550_v1  ;;  %5653 = vmatpush.msra.mxu3 %v7836_v17 }
0x1a6f   :  { %v5373_v35 = vpop.f32.mrf.mxu1  ;;  %5654 = vmatpush.msra.mxu3 %v7835_v36 }
0x1a70   :  { %v5379_v56 = vsel %vm300_vm6, %v5373_v35, -inf }
0x1a71   :  { %5380 = vmax.xlane.f32.xlu1 %v5379_v56  ;;  %v5493_v60 = vpop.f32.mrf.mxu0  ;;  %5655 = vmatpush.msra.mxu3 %v7834_v31 }
0x1a72   :  { %v5499_v6 = vsel %vm296_vm5, %v5493_v60, -inf }
0x1a73   :  { %5656 = vmatpush.msra.mxu3 %v7833_v12 }
0x1a79   :  { %5500 = vmax.xlane.f32.xlu1 %v5499_v6  ;;  %v5496_v54 = vpop.f32.mrf.mxu0 }
0x1a7a   :  { %v5502_v58 = vsel %vm300_vm6, %v5496_v54, -inf }
0x1adc   :  { %v5378_v52 = vpop.xlane.xlu0 %5377 }
0x1add   :  { %v5382_v46 = vsub.f32 %v5370_v63, %v5378_v52 }
0x1adf   :  { %v5384_v59 = vmul.f32 1.442695, %v5382_v46 }
0x1ae1   :  { %8293 = vpow2.f32 %v5384_v59 }
0x1ae4   :  { %v5381_v41 = vpop.xlane.xlu1 %5380 }
0x1ae5   :  { %v5383_v33 = vsub.f32 %v5373_v35, %v5381_v41 }
0x1ae7   :  { %v8294_v34 = vpop.eup %8293  ;;  %v5386_v27 = vmul.f32 1.442695, %v5383_v33 }
0x1ae8   :  { %v5388_v28 = vsel %vm296_vm5, %v8294_v34, 0.0 }
0x1ae9   :  { %8295 = vpow2.f32 %v5386_v27  ;;  %5389 = vadd.xlane.f32.xlu2 %v5388_v28 }
0x1aec   :  { %v5501_v42 = vpop.xlane.xlu1 %5500 }
0x1aed   :  { %v5505_v32 = vsub.f32 %v5493_v60, %v5501_v42 }
0x1aef   :  { %v10937_v16 = vpop.eup %8295  ;;  %v5507_v7 = vmul.f32 1.442695, %v5505_v32 }
0x1af0   :  { %v5391_v14 = vsel %vm300_vm6, %v10937_v16, 0.0 }
0x1af1   :  { %8297 = vpow2.f32 %v5507_v7  ;;  %5392 = vadd.xlane.f32.xlu0 %v5391_v14  ;;  %5503 = vmax.xlane.f32.xlu2 %v5502_v58 }
0x1af7   :  { %v10942_v62 = vpop.eup %8297 }
0x1af8   :  { %v5511_v53 = vsel %vm296_vm5, %v10942_v62, 0.0 }
0x1af9   :  { %5512 = vadd.xlane.f32.xlu0 %v5511_v53 }
0x1b5c   :  { %v5390_v30 = vpop.xlane.xlu2 %5389 }
0x1b5d   :  { %8299 = vrcp.f32 %v5390_v30  ;;  %v5405_v48 = vand.u32 2147483648, %v5390_v30  ;;  %v5403_v1 = vand.u32 2147483647, %v5390_v30  ;;  %vm5399_vm9 = vweird.f32 %v5390_v30 }
0x1b5f   :  { %v5406_v60 = vor.u32 1.1754944e-38, %v5405_v48  ;;  %vm5404_vm11 = vcmp.eq.f32.partialorder %v5403_v1, 8.507059e+37 }
0x1b63   :  { %v8300_v44 = vpop.eup %8299 }
0x1b64   :  { %v5395_v61 = vmul.f32 %v8300_v44, %v5390_v30  ;;  %v5504_v0 = vpop.xlane.xlu2 %5503  ;;  %v5393_v37 = vpop.xlane.xlu0 %5392  ;;  %vm5400_vm8 = vweird.f32 %v8300_v44 }
0x1b65   :  { %v5506_v63 = vsub.f32 %v5496_v54, %v5504_v0  ;;  %8301 = vrcp.f32 %v5393_v37  ;;  %vm5401_vm10 = vmor %vm5399_vm9, %vm5400_vm8  ;;  %v5418_v28 = vand.u32 2147483647, %v5393_v37  ;;  %v5420_v42 = vand.u32 2147483648, %v5393_v37 }
0x1b66   :  { %v5396_v24 = vsub.f32 1.0, %v5395_v61  ;;  %vm5414_vm13 = vweird.f32 %v5393_v37 }
0x1b67   :  { %v5509_v23 = vmul.f32 1.442695, %v5506_v63  ;;  %v5421_v53 = vor.u32 1.1754944e-38, %v5420_v42  ;;  %vm5419_vm3 = vcmp.eq.f32.partialorder %v5418_v28, 8.507059e+37  ;;  %v8070_v28 = vld [vmem:[%s11596_s8 + $0xd] ss:$0 sm:$0xff] }
0x1b68   :  { %v5397_v15 = vmul.f32 %v8300_v44, %v5396_v24 }
0x1b69   :  { %8303 = vpow2.f32 %v5509_v23 }
0x1b6a   :  { %v5398_v35 = vadd.f32 %v8300_v44, %v5397_v15 }
0x1b6b   :  { %v8302_v56 = vpop.eup %8301 }
0x1b6c   :  { %v5402_v6 = vsel %vm5401_vm10, %v8300_v44, %v5398_v35  ;;  %v5410_v52 = vmul.f32 %v8302_v56, %v5393_v37  ;;  %v5513_v46 = vpop.xlane.xlu0 %5512  ;;  %vm5415_vm12 = vweird.f32 %v8302_v56 }
0x1b6d   :  { %v5407_v59 = vsel %vm5404_vm11, %v5406_v60, %v5402_v6  ;;  %8305 = vrcp.f32 %v5513_v46  ;;  %vm5416_vm14 = vmor %vm5414_vm13, %vm5415_vm12  ;;  %v5528_v29 = vand.u32 2147483648, %v5513_v46  ;;  %v5526_v30 = vand.u32 2147483647, %v5513_v46 }
0x1b6e   :  { %v5408_v41 = vmul.f32 %v8294_v34, %v5407_v59  ;;  %v5411_v33 = vsub.f32 1.0, %v5410_v52  ;;  %vm5522_vm8 = vweird.f32 %v5513_v46  ;;  %v4213_v6 = vadd.f32 %v10449_v51, %v10608_v19  ;;  %v5618_v51 = vpop.f32.mrf.mxu1 }
0x1b6f   :  { %v8304_v27 = vpop.eup %8303  ;;  %v5529_v12 = vor.u32 1.1754944e-38, %v5528_v29  ;;  %vm5527_vm10 = vcmp.eq.f32.partialorder %v5526_v30, 8.507059e+37  ;;  %v7881_v30 = vld [vmem:[%s11628_s5 + $0x3b0] sm:$0xff] }
0x1b70   :  { %v10971_v54 = vadd.f32 %v5408_v41, %v10813_v9  ;;  %v5412_v32 = vmul.f32 %v8302_v56, %v5411_v33  ;;  %7812 = vmatmul.msk.f32.vlgmr.msrb.gmra.mxu3 %vm296_vm5, %v5408_v41  ;;  %v5514_v7 = vsel %vm300_vm6, %v8304_v27, 0.0  ;;  %v4651_v59 = vadd.f32 %v10687_v26, %v4213_v6  ;;  %v7904_v6 = vld [vmem:[%s11595_s7 + $0x3a8] sm:$0xff] }
0x1b71   :  { %5515 = vadd.xlane.f32.xlu1 %v5514_v7 }
0x1b72   :  { %v5413_v14 = vadd.f32 %v8302_v56, %v5412_v32  ;;  %v5054_v33 = vadd.f32 %v10845_v11, %v4651_v59  ;;  %v8071_v11 = vld [vmem:[%s11629_s6 + $0xd] ss:$0 sm:$0xff]  ;;  %v7901_v59 = vld [vmem:[%s11595_s7 + $0x390] sm:$0xff] }
0x1b73   :  { %v8306_v58 = vpop.eup %8305 }
0x1b74   :  { %v5518_v34 = vmul.f32 %v8306_v58, %v5513_v46  ;;  %v5417_v45 = vsel %vm5416_vm14, %v8302_v56, %v5413_v14  ;;  %vm5523_vm7 = vweird.f32 %v8306_v58  ;;  %v5698_v46 = vpop.f32.mrf.mxu0 }
0x1b75   :  { %v5422_v2 = vsel %vm5419_vm3, %v5421_v53, %v5417_v45  ;;  %vm5524_vm9 = vmor %vm5522_vm8, %vm5523_vm7  ;;  %v5699_v7 = vadd.f32 %v8070_v28, %v5698_v46  ;;  %v8069_v45 = vld [vmem:[%s11630_s3 + $0xd] ss:$0 sm:$0xff]  ;;  %v7902_v46 = vld [vmem:[%s11595_s7 + $0x398] sm:$0xff] }
0x1b76   :  { %v5519_v50 = vsub.f32 1.0, %v5518_v34  ;;  %v5423_v9 = vmul.f32 %v10937_v16, %v5422_v2 }
0x1b78   :  { %v5520_v17 = vmul.f32 %v8306_v58, %v5519_v50  ;;  %7813 = vmatmul.msk.f32.gmra.mxu3 %vm296_vm5, %v5423_v9  ;;  %v10978_v36 = vadd.f32 %v5423_v9, %v10820_v55  ;;  %v7857_v55 = vld [vmem:[%s11597_s9 + $0x68] sm:$0xff]  ;;  %v7882_v50 = vld [vmem:[%s11628_s5 + $0x3b8] sm:$0xff]  ;;  %v5619_v9 = vadd.f32 %v8069_v45, %v5618_v51 }
0x1b79   :  { %5733 = vmatpush.msra.mxu2 %v7857_v55 }
0x1b7a   :  { %v5521_v31 = vadd.f32 %v8306_v58, %v5520_v17 }
0x1b7c   :  { %v5525_v44 = vsel %vm5524_vm9, %v8306_v58, %v5521_v31  ;;  %v5701_v19 = vpop.f32.mrf.mxu0 }
0x1b7d   :  { %v5530_v61 = vsel %vm5527_vm10, %v5529_v12, %v5525_v44  ;;  %v7880_v12 = vld [vmem:[%s11628_s5 + $0x3a8] sm:$0xff] }
0x1b7e   :  { %v5531_v0 = vmul.f32 %v10942_v62, %v5530_v61 }
0x1b80   :  { %v10982_v16 = vadd.f32 %v5531_v0, %v10824_v5  ;;  %7819 = vmatmul.msk.f32.vlgmr.msrb.gmra.mxu2 %vm296_vm5, %v5531_v0  ;;  %7842 = vmatmul.msk.f32.vlgmr.msra.gmra.mxu3 %vm113_vm2, %v10115_v57  ;;  %v7879_v0 = vld [vmem:[%s11628_s5 + $0x3a0] sm:$0xff] }
0x1b84   :  { %v5704_v14 = vpop.f32.mrf.mxu0 }
0x1b85   :  { %v5705_v34 = vadd.f32 %v8070_v28, %v5704_v14 }
0x1b88   :  { %7843 = vmatmul.msk.f32.gmra.mxu3 %vm113_vm2, %v10126_v40 }
0x1b90   :  { %7844 = vmatmul.msk.f32.gmra.mxu3 %vm113_vm2, %v10137_v18 }
0x1be4   :  { %v5516_v62 = vpop.xlane.xlu1 %5515 }
0x1be5   :  { %8307 = vrcp.f32 %v5516_v62  ;;  %v5543_v24 = vand.u32 2147483648, %v5516_v62  ;;  %v5541_v23 = vand.u32 2147483647, %v5516_v62  ;;  %vm5537_vm12 = vweird.f32 %v5516_v62 }
0x1be7   :  { %v5544_v1 = vor.u32 1.1754944e-38, %v5543_v24  ;;  %vm5542_vm14 = vcmp.eq.f32.partialorder %v5541_v23, 8.507059e+37 }
0x1beb   :  { %v8308_v5 = vpop.eup %8307 }
0x1bec   :  { %v5533_v37 = vmul.f32 %v8308_v5, %v5516_v62  ;;  %vm5538_vm11 = vweird.f32 %v8308_v5 }
0x1bed   :  { %vm5539_vm13 = vmor %vm5537_vm12, %vm5538_vm11 }
0x1bee   :  { %v5534_v63 = vsub.f32 1.0, %v5533_v37 }
0x1bf0   :  { %v5535_v48 = vmul.f32 %v8308_v5, %v5534_v63  ;;  %v7906_v63 = vld [vmem:[%s11595_s7 + $0x3b8] sm:$0xff] }
0x1bf2   :  { %v5536_v15 = vadd.f32 %v8308_v5, %v5535_v48  ;;  %v7877_v48 = vld [vmem:[%s11628_s5 + $0x390] sm:$0xff] }
0x1bf3   :  { %v10994_v35 = vpop.f32.mrf.mxu3 }
0x1bf4   :  { %v5540_v56 = vsel %vm5539_vm13, %v8308_v5, %v5536_v15  ;;  %v7878_v5 = vld [vmem:[%s11628_s5 + $0x398] sm:$0xff]  ;;  %v7876_v15 = vld [vmem:[%s11628_s5 + $0x388] sm:$0xff] }
0x1bf5   :  { %v5545_v60 = vsel %vm5542_vm14, %v5544_v1, %v5540_v56  ;;  %v7905_v1 = vld [vmem:[%s11595_s7 + $0x3b0] sm:$0xff] }
0x1bf6   :  { %v5546_v52 = vmul.f32 %v8304_v27, %v5545_v60  ;;  %v5702_v27 = vadd.f32 %v8070_v28, %v5701_v19  ;;  %v7875_v60 = vld [vmem:[%s11628_s5 + $0x380] sm:$0xff] }
0x1bf7   :  { %v7899_v28 = vld [vmem:[%s11595_s7 + $0x380] sm:$0xff] }
0x1bf8   :  { %7820 = vmatmul.msk.f32.gmra.mxu2 %vm296_vm5, %v5546_v52  ;;  %v11001_v41 = vadd.f32 %v5546_v52, %v10840_v47  ;;  %v5621_v47 = vpop.f32.mrf.mxu1  ;;  %v7903_v52 = vld [vmem:[%s11595_s7 + $0x3a0] sm:$0xff] }
0x1bf9   :  { %v5622_v55 = vadd.f32 %v8069_v45, %v5621_v47 }
0x1bfb   :  { %v5453_v42 = vpop.f32.mrf.mxu3  ;;  %v5864_v23 = vrot.slane %v5622_v55, 1 }
0x1bfc   :  { %v11007_v32 = vadd.f32 %v5453_v42, %v5054_v33  ;;  %v7900_v33 = vld [vmem:[%s11595_s7 + $0x388] sm:$0xff] }
0x1c00   :  { %7858 = vmatmul.msk.f32.vlgmr.msra.gmra.mxu2 %vm225_vm4, %v5699_v7  ;;  %v5624_v29 = vpop.f32.mrf.mxu1  ;;  %v4374_v7 = vadd.f32 %v10612_v22, %v10571_v25 }
0x1c01   :  { %v5625_v44 = vadd.f32 %v8069_v45, %v5624_v29 }
0x1c02   :  { %v4778_v51 = vadd.f32 %v10770_v39, %v4374_v7 }
0x1c03   :  { %v5658_v26 = vpop.f32.mrf.mxu3  ;;  %v5865_v37 = vrot.slane %v5625_v44, 1  ;;  %v11088_v42 = vpop.f32.mrf.mxu2 }
0x1c04   :  { %v5659_v2 = vadd.f32 %v8071_v11, %v5658_v26  ;;  %v5181_v19 = vadd.f32 %v10928_v4, %v4778_v51 }
0x1c05   :  { %v5866_v56 = vsel %vm78_vm0, %v5864_v23, %v5865_v37  ;;  %v7894_v23 = vld [vmem:[%s11624_s23 + $0x3b8] sm:$0xff] }
0x1c08   :  { %7859 = vmatmul.msk.f32.gmra.mxu2 %vm225_vm4, %v5702_v27 }
0x1c0b   :  { %v5661_v58 = vpop.f32.mrf.mxu3 }
0x1c0c   :  { %v5662_v53 = vadd.f32 %v8071_v11, %v5661_v58 }
0x1c0e   :  { %7861 = vmatpush.xpose.msk.msrb.mxu1 %vm225_vm4, %v5662_v53  ;;  %v5868_v62 = vrot.slane %v5662_v53, 1 }
0x1c10   :  { %7860 = vmatmul.msk.f32.gmra.mxu2 %vm225_vm4, %v5705_v34 }
0x1c12   :  { %7862 = vmatpush.xpose.msk.msrb.mxu1 %vm225_vm4, %v5659_v2 }
0x1c13   :  { %v5664_v17 = vpop.f32.mrf.mxu3 }
0x1c14   :  { %v5665_v31 = vadd.f32 %v8071_v11, %v5664_v17 }
0x1c15   :  { %7863 = vmatmul.msk.f32.vlgmr.msrb.gmra.mxu1 %vm225_vm4, %v5619_v9 }
0x1c16   :  { %6012 = vmatpush.msra.mxu1 %v7882_v50  ;;  %v5869_v61 = vrot.slane %v5665_v31, 1 }
0x1c18   :  { %6013 = vmatpush.msra.mxu1 %v7881_v30  ;;  %7868 = vmatpush.xpose.msk.msra.mxu0 %vm225_vm4, %v5869_v61  ;;  %v5870_v24 = vsel %vm78_vm0, %v5868_v62, %v5869_v61 }
0x1c1a   :  { %6014 = vmatpush.msra.mxu1 %v7880_v12 }
0x1c1c   :  { %6015 = vmatpush.msra.mxu1 %v7879_v0  ;;  %7869 = vmatpush.xpose.msk.msra.mxu0 %vm225_vm4, %v5870_v24 }
0x1c1d   :  { %7864 = vmatmul.msk.f32.gmra.mxu1 %vm225_vm4, %v5622_v55 }
0x1c1e   :  { %6016 = vmatpush.msra.mxu1 %v7878_v5 }
0x1c1f   :  { %7870 = vmatmul.msk.f32.vlgmr.msra.gmra.mxu0 %vm225_vm4, %v5866_v56  ;;  %v7891_v56 = vld [vmem:[%s11624_s23 + $0x3a0] sm:$0xff] }
0x1c20   :  { %6092 = vmatpush.msrb.mxu0 %v7906_v63  ;;  %6017 = vmatpush.msra.mxu1 %v7877_v48 }
0x1c22   :  { %6018 = vmatpush.msra.mxu1 %v7876_v15  ;;  %6093 = vmatpush.msrb.mxu0 %v7905_v1  ;;  %v7893_v15 = vld [vmem:[%s11624_s23 + $0x3b0] sm:$0xff]  ;;  %v7892_v1 = vld [vmem:[%s11624_s23 + $0x3a8] sm:$0xff] }
0x1c24   :  { %6019 = vmatpush.msra.mxu1 %v7875_v60  ;;  %6094 = vmatpush.msrb.mxu0 %v7904_v6  ;;  %v7890_v60 = vld [vmem:[%s11624_s23 + $0x398] sm:$0xff] }
0x1c25   :  { %7884 = vmatmul.msk.f32.vlgmr.msra.gmra.mxu1 %vm113_vm2, %v10115_v57 }
0x1c26   :  { %6095 = vmatpush.msrb.mxu0 %v7903_v52  ;;  %v7889_v52 = vld [vmem:[%s11624_s23 + $0x390] sm:$0xff] }
0x1c27   :  { %7871 = vmatmul.msk.f32.gmra.mxu0 %vm225_vm4, %v5865_v37 }
0x1c28   :  { %6096 = vmatpush.msrb.mxu0 %v7902_v46  ;;  %v7888_v46 = vld [vmem:[%s11624_s23 + $0x388] sm:$0xff] }
0x1c2a   :  { %6097 = vmatpush.msrb.mxu0 %v7901_v59  ;;  %v7887_v59 = vld [vmem:[%s11624_s23 + $0x380] sm:$0xff] }
0x1c2c   :  { %6098 = vmatpush.msrb.mxu0 %v7900_v33 }
0x1c2d   :  { %7885 = vmatmul.msk.f32.gmra.mxu1 %vm113_vm2, %v10126_v40 }
0x1c2e   :  { %6099 = vmatpush.msrb.mxu0 %v7899_v28 }
0x1c2f   :  { %7908 = vmatmul.msk.f32.vlgmr.msrb.gmra.mxu0 %vm113_vm2, %v10115_v57 }
0x1c35   :  { %7886 = vmatmul.msk.f32.gmra.mxu1 %vm113_vm2, %v10137_v18 }
0x1c37   :  { %7909 = vmatmul.msk.f32.gmra.mxu0 %vm113_vm2, %v10126_v40 }
0x1c3f   :  { %7910 = vmatmul.msk.f32.gmra.mxu0 %vm113_vm2, %v10137_v18 }
0x1c7b   :  { %v5580_v26 = vpop.f32.mrf.mxu2 }
0x1c7c   :  { %v11094_v27 = vadd.f32 %v5580_v26, %v5181_v19 }
0x1c83   :  { %v5735_v47 = vpop.f32.mrf.mxu2 }
0x1c8b   :  { %v5738_v11 = vpop.f32.mrf.mxu2 }
0x1c8c   :  { %7865 = vmatpush.msk.msrb.mxu3 %vm96_vm1, %v5738_v11  ;;  %v5951_v34 = vrot.slane %v5738_v11, 1 }
0x1c8e   :  { %5851 = vmatpush.msrb.mxu3 %v5735_v47 }
0x1c90   :  { %6052 = vmatpush.msra.mxu3 %v7894_v23 }
0x1c92   :  { %v5773_v14 = vpop.f32.mrf.mxu1  ;;  %6053 = vmatpush.msra.mxu3 %v7893_v15 }
0x1c93   :  { %v5741_v58 = vpop.f32.mrf.mxu2  ;;  %v5779_v53 = vsel %vm296_vm5, %v5773_v14, -inf }
0x1c94   :  { %v5952_v45 = vrot.slane %v5741_v58, 1  ;;  %5780 = vmax.xlane.f32.xlu2 %v5779_v53  ;;  %6054 = vmatpush.msra.mxu3 %v7892_v1 }
0x1c96   :  { %7872 = vmatpush.msk.msrb.mxu2 %vm96_vm1, %v5952_v45  ;;  %v5953_v25 = vsel %vm78_vm0, %v5951_v34, %v5952_v45  ;;  %6055 = vmatpush.msra.mxu3 %v7891_v56 }
0x1c98   :  { %5978 = vmatpush.msrb.mxu2 %v5953_v25  ;;  %6056 = vmatpush.msra.mxu3 %v7890_v60 }
0x1c9a   :  { %v5776_v22 = vpop.f32.mrf.mxu1  ;;  %6057 = vmatpush.msra.mxu3 %v7889_v52 }
0x1c9b   :  { %v5782_v39 = vsel %vm300_vm6, %v5776_v22, -inf }
0x1c9c   :  { %5783 = vmax.xlane.f32.xlu0 %v5782_v39  ;;  %v5896_v4 = vpop.f32.mrf.mxu0  ;;  %6058 = vmatpush.msra.mxu3 %v7888_v46 }
0x1c9d   :  { %v5902_v2 = vsel %vm296_vm5, %v5896_v4, -inf }
0x1c9e   :  { %6059 = vmatpush.msra.mxu3 %v7887_v59  ;;  %v4210_v59 = vadd.f32 %v10435_v49, %v10606_v20 }
0x1ca4   :  { %5903 = vmax.xlane.f32.xlu0 %v5902_v2  ;;  %v5899_v0 = vpop.f32.mrf.mxu0 }
0x1ca5   :  { %v5905_v37 = vsel %vm300_vm6, %v5899_v0, -inf }
0x1d07   :  { %v5781_v50 = vpop.xlane.xlu2 %5780 }
0x1d08   :  { %v5785_v9 = vsub.f32 %v5773_v14, %v5781_v50 }
0x1d0a   :  { %v5787_v29 = vmul.f32 1.442695, %v5785_v9 }
0x1d0c   :  { %8309 = vpow2.f32 %v5787_v29 }
0x1d0f   :  { %v5784_v17 = vpop.xlane.xlu0 %5783 }
0x1d10   :  { %v5786_v30 = vsub.f32 %v5776_v22, %v5784_v17 }
0x1d12   :  { %v8310_v31 = vpop.eup %8309  ;;  %v5789_v12 = vmul.f32 1.442695, %v5786_v30 }
0x1d13   :  { %v5791_v44 = vsel %vm296_vm5, %v8310_v31, 0.0 }
0x1d14   :  { %8311 = vpow2.f32 %v5789_v12  ;;  %5792 = vadd.xlane.f32.xlu1 %v5791_v44 }
0x1d17   :  { %v5904_v61 = vpop.xlane.xlu0 %5903 }
0x1d18   :  { %v5908_v55 = vsub.f32 %v5896_v4, %v5904_v61 }
0x1d1a   :  { %v11103_v62 = vpop.eup %8311  ;;  %v5910_v5 = vmul.f32 1.442695, %v5908_v55 }
0x1d1b   :  { %v5794_v63 = vsel %vm300_vm6, %v11103_v62, 0.0 }
0x1d1c   :  { %8313 = vpow2.f32 %v5910_v5  ;;  %5906 = vmax.xlane.f32.xlu1 %v5905_v37  ;;  %5795 = vadd.xlane.f32.xlu2 %v5794_v63 }
0x1d22   :  { %v11108_v24 = vpop.eup %8313 }
0x1d23   :  { %v5914_v48 = vsel %vm296_vm5, %v11108_v24, 0.0 }
0x1d24   :  { %5915 = vadd.xlane.f32.xlu2 %v5914_v48 }
0x1d87   :  { %v5793_v6 = vpop.xlane.xlu1 %5792 }
0x1d88   :  { %8315 = vrcp.f32 %v5793_v6  ;;  %v5808_v47 = vand.u32 2147483648, %v5793_v6  ;;  %v5806_v58 = vand.u32 2147483647, %v5793_v6  ;;  %vm5802_vm7 = vweird.f32 %v5793_v6 }
0x1d8a   :  { %v5809_v45 = vor.u32 1.1754944e-38, %v5808_v47  ;;  %vm5807_vm9 = vcmp.eq.f32.partialorder %v5806_v58, 8.507059e+37 }
0x1d8e   :  { %v8316_v33 = vpop.eup %8315 }
0x1d8f   :  { %v5798_v28 = vmul.f32 %v8316_v33, %v5793_v6  ;;  %v5907_v7 = vpop.xlane.xlu1 %5906  ;;  %v5796_v51 = vpop.xlane.xlu2 %5795  ;;  %vm5803_vm3 = vweird.f32 %v8316_v33 }
0x1d90   :  { %v5909_v19 = vsub.f32 %v5899_v0, %v5907_v7  ;;  %8317 = vrcp.f32 %v5796_v51  ;;  %vm5804_vm8 = vmor %vm5802_vm7, %vm5803_vm3  ;;  %v5821_v29 = vand.u32 2147483647, %v5796_v51  ;;  %v5823_v17 = vand.u32 2147483648, %v5796_v51 }
0x1d91   :  { %v5799_v26 = vsub.f32 1.0, %v5798_v28  ;;  %vm5817_vm11 = vweird.f32 %v5796_v51  ;;  %v4650_v28 = vadd.f32 %v10676_v8, %v4210_v59 }
0x1d92   :  { %v5912_v11 = vmul.f32 1.442695, %v5909_v19  ;;  %vm5822_vm13 = vcmp.eq.f32.partialorder %v5821_v29, 8.507059e+37 }
0x1d93   :  { %v5800_v14 = vmul.f32 %v8316_v33, %v5799_v26  ;;  %v5053_v19 = vadd.f32 %v10836_v3, %v4650_v28  ;;  %v7959_v28 = vld [vmem:[%s11595_s7 + $0x3f0] sm:$0xff] }
0x1d94   :  { %8319 = vpow2.f32 %v5912_v11 }
0x1d95   :  { %v5801_v53 = vadd.f32 %v8316_v33, %v5800_v14  ;;  %v5456_v11 = vadd.f32 %v10994_v35, %v5053_v19  ;;  %v8073_v35 = vld [vmem:[%s11596_s8 + $0xe] ss:$0 sm:$0xff] }
0x1d96   :  { %v8318_v34 = vpop.eup %8317  ;;  %v7958_v19 = vld [vmem:[%s11595_s7 + $0x3e8] sm:$0xff] }
0x1d97   :  { %v5805_v25 = vsel %vm5804_vm8, %v8316_v33, %v5801_v53  ;;  %v5813_v22 = vmul.f32 %v8318_v34, %v5796_v51  ;;  %v5916_v39 = vpop.xlane.xlu2 %5915  ;;  %vm5818_vm10 = vweird.f32 %v8318_v34 }
0x1d98   :  { %v5810_v4 = vsel %vm5807_vm9, %v5809_v45, %v5805_v25  ;;  %8321 = vrcp.f32 %v5916_v39  ;;  %vm5819_vm12 = vmor %vm5817_vm11, %vm5818_vm10  ;;  %v5931_v48 = vand.u32 2147483648, %v5916_v39  ;;  %v5929_v15 = vand.u32 2147483647, %v5916_v39  ;;  %v6101_v45 = vpop.f32.mrf.mxu0 }
0x1d99   :  { %v5811_v2 = vmul.f32 %v8310_v31, %v5810_v4  ;;  %v5814_v50 = vsub.f32 1.0, %v5813_v22  ;;  %v5824_v31 = vor.u32 1.1754944e-38, %v5823_v17  ;;  %vm5925_vm3 = vweird.f32 %v5916_v39  ;;  %v6021_v4 = vpop.f32.mrf.mxu1 }
0x1d9a   :  { %v11136_v9 = vpop.eup %8319  ;;  %v5932_v60 = vor.u32 1.1754944e-38, %v5931_v48  ;;  %vm5930_vm8 = vcmp.eq.f32.partialorder %v5929_v15, 8.507059e+37  ;;  %v7934_v48 = vld [vmem:[%s11628_s5 + $0x3e8] sm:$0xff] }
0x1d9b   :  { %v11139_v30 = vadd.f32 %v5811_v2, %v10971_v54  ;;  %v5815_v12 = vmul.f32 %v8318_v34, %v5814_v50  ;;  %7866 = vmatmul.msk.f32.vlgmr.msrb.gmra.mxu3 %vm296_vm5, %v5811_v2  ;;  %v5917_v44 = vsel %vm300_vm6, %v11136_v9, 0.0 }
0x1d9c   :  { %5918 = vadd.xlane.f32.xlu0 %v5917_v44 }
0x1d9d   :  { %v5816_v61 = vadd.f32 %v8318_v34, %v5815_v12 }
0x1d9e   :  { %v8322_v0 = vpop.eup %8321 }
0x1d9f   :  { %v5921_v55 = vmul.f32 %v8322_v0, %v5916_v39  ;;  %v5820_v5 = vsel %vm5819_vm12, %v8318_v34, %v5816_v61  ;;  %vm5926_vm14 = vweird.f32 %v8322_v0  ;;  %v6102_v39 = vadd.f32 %v8073_v35, %v6101_v45 }
0x1da0   :  { %v5825_v37 = vsel %vm5822_vm13, %v5824_v31, %v5820_v5  ;;  %vm5927_vm7 = vmor %vm5925_vm3, %vm5926_vm14  ;;  %v6104_v2 = vpop.f32.mrf.mxu0  ;;  %v7936_v31 = vld [vmem:[%s11628_s5 + $0x3f8] sm:$0xff] }
0x1da1   :  { %v5922_v63 = vsub.f32 1.0, %v5921_v55  ;;  %v5826_v54 = vmul.f32 %v11103_v62, %v5825_v37  ;;  %v6024_v29 = vpop.f32.mrf.mxu1 }
0x1da3   :  { %v5923_v23 = vmul.f32 %v8322_v0, %v5922_v63  ;;  %7867 = vmatmul.msk.f32.gmra.mxu3 %vm296_vm5, %v5826_v54  ;;  %v11147_v1 = vadd.f32 %v5826_v54, %v10978_v36  ;;  %v7911_v36 = vld [vmem:[%s11597_s9 + $0x70] sm:$0xff] }
0x1da4   :  { %6136 = vmatpush.msra.mxu2 %v7911_v36  ;;  %v7935_v63 = vld [vmem:[%s11628_s5 + $0x3f0] sm:$0xff]  ;;  %v7960_v36 = vld [vmem:[%s11595_s7 + $0x3f8] sm:$0xff] }
0x1da5   :  { %v5924_v56 = vadd.f32 %v8322_v0, %v5923_v23 }
0x1da7   :  { %v5928_v6 = vsel %vm5927_vm7, %v8322_v0, %v5924_v56  ;;  %v7933_v56 = vld [vmem:[%s11628_s5 + $0x3e0] sm:$0xff] }
0x1da8   :  { %v5933_v52 = vsel %vm5930_vm8, %v5932_v60, %v5928_v6  ;;  %v6107_v17 = vpop.f32.mrf.mxu0 }
0x1da9   :  { %v5934_v46 = vmul.f32 %v11108_v24, %v5933_v52  ;;  %v6108_v61 = vadd.f32 %v8073_v35, %v6107_v17  ;;  %v6027_v5 = vpop.f32.mrf.mxu1  ;;  %v7932_v52 = vld [vmem:[%s11628_s5 + $0x3d8] sm:$0xff] }
0x1dab   :  { %v11151_v62 = vadd.f32 %v5934_v46, %v10982_v16  ;;  %7873 = vmatmul.msk.f32.vlgmr.msrb.gmra.mxu2 %vm296_vm5, %v5934_v46  ;;  %7896 = vmatmul.msk.f32.vlgmr.msra.gmra.mxu3 %vm113_vm2, %v10115_v57 }
0x1db3   :  { %7897 = vmatmul.msk.f32.gmra.mxu3 %vm113_vm2, %v10126_v40 }
0x1dbb   :  { %7898 = vmatmul.msk.f32.gmra.mxu3 %vm113_vm2, %v10137_v18 }
0x1e0f   :  { %v5919_v24 = vpop.xlane.xlu0 %5918 }
0x1e10   :  { %8323 = vrcp.f32 %v5919_v24  ;;  %v5946_v51 = vand.u32 2147483648, %v5919_v24  ;;  %v5944_v47 = vand.u32 2147483647, %v5919_v24  ;;  %vm5940_vm10 = vweird.f32 %v5919_v24 }
0x1e12   :  { %v5947_v58 = vor.u32 1.1754944e-38, %v5946_v51  ;;  %vm5945_vm12 = vcmp.eq.f32.partialorder %v5944_v47, 8.507059e+37  ;;  %v7929_v51 = vld [vmem:[%s11628_s5 + $0x3c0] sm:$0xff]  ;;  %v7956_v47 = vld [vmem:[%s11595_s7 + $0x3d8] sm:$0xff] }
0x1e16   :  { %v8324_v16 = vpop.eup %8323 }
0x1e17   :  { %v5936_v33 = vmul.f32 %v8324_v16, %v5919_v24  ;;  %vm5941_vm9 = vweird.f32 %v8324_v16 }
0x1e18   :  { %vm5942_vm11 = vmor %vm5940_vm10, %vm5941_vm9 }
0x1e19   :  { %v5937_v7 = vsub.f32 1.0, %v5936_v33  ;;  %v7930_v33 = vld [vmem:[%s11628_s5 + $0x3c8] sm:$0xff] }
0x1e1b   :  { %v5938_v26 = vmul.f32 %v8324_v16, %v5937_v7 }
0x1e1d   :  { %v5939_v14 = vadd.f32 %v8324_v16, %v5938_v26  ;;  %v7957_v26 = vld [vmem:[%s11595_s7 + $0x3e0] sm:$0xff] }
0x1e1e   :  { %v5853_v53 = vpop.f32.mrf.mxu3 }
0x1e1f   :  { %v11168_v34 = vadd.f32 %v5853_v53, %v5456_v11  ;;  %v5943_v49 = vsel %vm5942_vm11, %v8324_v16, %v5939_v14  ;;  %v7931_v16 = vld [vmem:[%s11628_s5 + $0x3d0] sm:$0xff]  ;;  %v7954_v14 = vld [vmem:[%s11595_s7 + $0x3c8] sm:$0xff] }
0x1e20   :  { %v5948_v20 = vsel %vm5945_vm12, %v5947_v58, %v5943_v49  ;;  %v7955_v11 = vld [vmem:[%s11595_s7 + $0x3d0] sm:$0xff]  ;;  %v7953_v58 = vld [vmem:[%s11595_s7 + $0x3c0] sm:$0xff]  ;;  %s7130_s7 = sshll.u32 %s11609_s21, 4  ;;  %s7131_s7 = int_to_ptr.hbm [resolvable:$true] %s7130_s7 }
0x1e21   :  { %v5949_v8 = vmul.f32 %v11136_v9, %v5948_v20  ;;  %v6105_v9 = vadd.f32 %v8073_v35, %v6104_v2 }
0x1e23   :  { %7874 = vmatmul.msk.f32.gmra.mxu2 %vm296_vm5, %v5949_v8  ;;  %v11173_v3 = vadd.f32 %v5949_v8, %v11001_v41  ;;  %v8074_v41 = vld [vmem:[%s11629_s6 + $0xe] ss:$0 sm:$0xff] }
0x1e26   :  { %v5856_v25 = vpop.f32.mrf.mxu3 }
0x1e27   :  { %v11179_v22 = vadd.f32 %v5856_v25, %v11007_v32  ;;  %v8072_v32 = vld [vmem:[%s11630_s3 + $0xe] ss:$0 sm:$0xff] }
0x1e28   :  { %v6022_v55 = vadd.f32 %v8072_v32, %v6021_v4  ;;  %v6028_v23 = vadd.f32 %v8072_v32, %v6027_v5  ;;  %v6025_v60 = vadd.f32 %v8072_v32, %v6024_v29 }
0x1e2a   :  { %v6268_v46 = vrot.slane %v6028_v23, 1  ;;  %v6267_v59 = vrot.slane %v6025_v60, 1 }
0x1e2b   :  { %7912 = vmatmul.msk.f32.vlgmr.msra.gmra.mxu2 %vm225_vm4, %v6102_v39 }
0x1e2c   :  { %v6269_v7 = vsel %vm78_vm0, %v6267_v59, %v6268_v46  ;;  %v7943_v59 = vld [vmem:[%s11624_s23 + $0x3d0] sm:$0xff] }
0x1e2e   :  { %v6061_v50 = vpop.f32.mrf.mxu3  ;;  %v11260_v53 = vpop.f32.mrf.mxu2 }
0x1e2f   :  { %v6062_v0 = vadd.f32 %v8074_v41, %v6061_v50 }
0x1e33   :  { %7913 = vmatmul.msk.f32.gmra.mxu2 %vm225_vm4, %v6105_v9 }
0x1e36   :  { %v6064_v12 = vpop.f32.mrf.mxu3 }
0x1e37   :  { %v6065_v44 = vadd.f32 %v8074_v41, %v6064_v12 }
0x1e39   :  { %7915 = vmatpush.xpose.msk.msrb.mxu1 %vm225_vm4, %v6065_v44  ;;  %v6271_v6 = vrot.slane %v6065_v44, 1 }
0x1e3b   :  { %7914 = vmatmul.msk.f32.gmra.mxu2 %vm225_vm4, %v6108_v61 }
0x1e3d   :  { %7916 = vmatpush.xpose.msk.msrb.mxu1 %vm225_vm4, %v6062_v0 }
0x1e3e   :  { %v6067_v37 = vpop.f32.mrf.mxu3 }
0x1e3f   :  { %v6068_v54 = vadd.f32 %v8074_v41, %v6067_v37 }
0x1e40   :  { %7917 = vmatmul.msk.f32.vlgmr.msrb.gmra.mxu1 %vm225_vm4, %v6022_v55 }
0x1e41   :  { %6415 = vmatpush.msra.mxu1 %v7936_v31  ;;  %v6272_v15 = vrot.slane %v6068_v54, 1 }
0x1e43   :  { %6416 = vmatpush.msra.mxu1 %v7935_v63  ;;  %7922 = vmatpush.xpose.msk.msra.mxu0 %vm225_vm4, %v6272_v15  ;;  %v6273_v24 = vsel %vm78_vm0, %v6271_v6, %v6272_v15  ;;  %v7948_v6 = vld [vmem:[%s11624_s23 + $0x3f8] sm:$0xff] }
0x1e45   :  { %6417 = vmatpush.msra.mxu1 %v7934_v48 }
0x1e47   :  { %6418 = vmatpush.msra.mxu1 %v7933_v56  ;;  %7923 = vmatpush.xpose.msk.msra.mxu0 %vm225_vm4, %v6273_v24  ;;  %v7944_v24 = vld [vmem:[%s11624_s23 + $0x3d8] sm:$0xff] }
0x1e48   :  { %7918 = vmatmul.msk.f32.gmra.mxu1 %vm225_vm4, %v6025_v60 }
0x1e49   :  { %6419 = vmatpush.msra.mxu1 %v7932_v52  ;;  %v7947_v52 = vld [vmem:[%s11624_s23 + $0x3f0] sm:$0xff] }
0x1e4a   :  { %7924 = vmatmul.msk.f32.vlgmr.msra.gmra.mxu0 %vm225_vm4, %v6269_v7 }
0x1e4b   :  { %6495 = vmatpush.msrb.mxu0 %v7960_v36  ;;  %6420 = vmatpush.msra.mxu1 %v7931_v16  ;;  %v7945_v36 = vld [vmem:[%s11624_s23 + $0x3e0] sm:$0xff] }
0x1e4d   :  { %6421 = vmatpush.msra.mxu1 %v7930_v33  ;;  %6496 = vmatpush.msrb.mxu0 %v7959_v28  ;;  %v7942_v33 = vld [vmem:[%s11624_s23 + $0x3c8] sm:$0xff]  ;;  %v7941_v28 = vld [vmem:[%s11624_s23 + $0x3c0] sm:$0xff] }
0x1e4f   :  { %6422 = vmatpush.msra.mxu1 %v7929_v51  ;;  %6497 = vmatpush.msrb.mxu0 %v7958_v19 }
0x1e50   :  { %7938 = vmatmul.msk.f32.vlgmr.msra.gmra.mxu1 %vm113_vm2, %v10115_v57 }
0x1e51   :  { %6498 = vmatpush.msrb.mxu0 %v7957_v26 }
0x1e52   :  { %7925 = vmatmul.msk.f32.gmra.mxu0 %vm225_vm4, %v6268_v46  ;;  %v7946_v46 = vld [vmem:[%s11624_s23 + $0x3e8] sm:$0xff] }
0x1e53   :  { %6499 = vmatpush.msrb.mxu0 %v7956_v47 }
0x1e55   :  { %6500 = vmatpush.msrb.mxu0 %v7955_v11 }
0x1e57   :  { %6501 = vmatpush.msrb.mxu0 %v7954_v14 }
0x1e58   :  { %7939 = vmatmul.msk.f32.gmra.mxu1 %vm113_vm2, %v10126_v40 }
0x1e59   :  { %6502 = vmatpush.msrb.mxu0 %v7953_v58 }
0x1e5a   :  { %7962 = vmatmul.msk.f32.vlgmr.msrb.gmra.mxu0 %vm113_vm2, %v10115_v57 }
0x1e60   :  { %7940 = vmatmul.msk.f32.gmra.mxu1 %vm113_vm2, %v10137_v18 }
0x1e62   :  { %7963 = vmatmul.msk.f32.gmra.mxu0 %vm113_vm2, %v10126_v40 }
0x1e6a   :  { %7964 = vmatmul.msk.f32.gmra.mxu0 %vm113_vm2, %v10137_v18 }
0x1ea6   :  { %v5983_v49 = vpop.f32.mrf.mxu2 }
0x1ea7   :  { %v11263_v20 = vadd.f32 %v5983_v49, %v11094_v27 }
0x1eae   :  { %v6138_v8 = vpop.f32.mrf.mxu2 }
0x1eb6   :  { %v6141_v45 = vpop.f32.mrf.mxu2 }
0x1eb7   :  { %7919 = vmatpush.msk.msrb.mxu3 %vm96_vm1, %v6141_v45  ;;  %v6354_v4 = vrot.slane %v6141_v45, 1 }
0x1eb9   :  { %6254 = vmatpush.msrb.mxu3 %v6138_v8 }
0x1ebb   :  { %6455 = vmatpush.msra.mxu3 %v7948_v6 }
0x1ebd   :  { %v6176_v35 = vpop.f32.mrf.mxu1  ;;  %6456 = vmatpush.msra.mxu3 %v7947_v52 }
0x1ebe   :  { %v6144_v25 = vpop.f32.mrf.mxu2  ;;  %v6182_v39 = vsel %vm296_vm5, %v6176_v35, -inf }
0x1ebf   :  { %v6355_v2 = vrot.slane %v6144_v25, 1  ;;  %6183 = vmax.xlane.f32.xlu1 %v6182_v39  ;;  %6457 = vmatpush.msra.mxu3 %v7946_v46 }
0x1ec1   :  { %7926 = vmatpush.msk.msrb.mxu2 %vm96_vm1, %v6355_v2  ;;  %v6356_v50 = vsel %vm78_vm0, %v6354_v4, %v6355_v2  ;;  %6458 = vmatpush.msra.mxu3 %v7945_v36 }
0x1ec3   :  { %6381 = vmatpush.msrb.mxu2 %v6356_v50  ;;  %6459 = vmatpush.msra.mxu3 %v7944_v24 }
0x1ec5   :  { %v6179_v9 = vpop.f32.mrf.mxu1  ;;  %6460 = vmatpush.msra.mxu3 %v7943_v59 }
0x1ec6   :  { %v6185_v27 = vsel %vm300_vm6, %v6179_v9, -inf }
0x1ec7   :  { %6186 = vmax.xlane.f32.xlu2 %v6185_v27  ;;  %v6299_v29 = vpop.f32.mrf.mxu0  ;;  %6461 = vmatpush.msra.mxu3 %v7942_v33 }
0x1ec8   :  { %v6305_v41 = vsel %vm296_vm5, %v6299_v29, -inf }
0x1ec9   :  { %6462 = vmatpush.msra.mxu3 %v7941_v28 }
0x1ecf   :  { %6306 = vmax.xlane.f32.xlu2 %v6305_v41  ;;  %v6302_v37 = vpop.f32.mrf.mxu0 }
0x1ed0   :  { %v6308_v23 = vsel %vm300_vm6, %v6302_v37, -inf }
0x1f32   :  { %v6184_v17 = vpop.xlane.xlu1 %6183 }
0x1f33   :  { %v6188_v12 = vsub.f32 %v6176_v35, %v6184_v17 }
0x1f35   :  { %v6190_v44 = vmul.f32 1.442695, %v6188_v12 }
0x1f37   :  { %8325 = vpow2.f32 %v6190_v44 }
0x1f3a   :  { %v6187_v61 = vpop.xlane.xlu2 %6186 }
0x1f3b   :  { %v6189_v32 = vsub.f32 %v6179_v9, %v6187_v61 }
0x1f3d   :  { %v8326_v0 = vpop.eup %8325  ;;  %v6192_v31 = vmul.f32 1.442695, %v6189_v32 }
0x1f3e   :  { %v6194_v55 = vsel %vm296_vm5, %v8326_v0, 0.0 }
0x1f3f   :  { %8327 = vpow2.f32 %v6192_v31  ;;  %6195 = vadd.xlane.f32.xlu0 %v6194_v55 }
0x1f42   :  { %v6307_v5 = vpop.xlane.xlu2 %6306 }
0x1f43   :  { %v6311_v63 = vsub.f32 %v6299_v29, %v6307_v5 }
0x1f45   :  { %v11272_v54 = vpop.eup %8327  ;;  %v6313_v48 = vmul.f32 1.442695, %v6311_v63 }
0x1f46   :  { %v6197_v15 = vsel %vm300_vm6, %v11272_v54, 0.0 }
0x1f47   :  { %8329 = vpow2.f32 %v6313_v48  ;;  %6309 = vmax.xlane.f32.xlu0 %v6308_v23  ;;  %6198 = vadd.xlane.f32.xlu1 %v6197_v15 }
0x1f4d   :  { %v11277_v56 = vpop.eup %8329 }
0x1f4e   :  { %v6317_v60 = vsel %vm296_vm5, %v11277_v56, 0.0 }
0x1f4f   :  { %6318 = vadd.xlane.f32.xlu1 %v6317_v60 }
0x1fb2   :  { %v6196_v16 = vpop.xlane.xlu0 %6195 }
0x1fb3   :  { %8331 = vrcp.f32 %v6196_v16  ;;  %v6211_v14 = vand.u32 2147483648, %v6196_v16  ;;  %v6209_v49 = vand.u32 2147483647, %v6196_v16  ;;  %vm6205_vm14 = vweird.f32 %v6196_v16 }
0x1fb5   :  { %v6212_v25 = vor.u32 1.1754944e-38, %v6211_v14  ;;  %vm6210_vm7 = vcmp.eq.f32.partialorder %v6209_v49, 8.507059e+37  ;;  %v6504_v49 = vpop.f32.mrf.mxu0 }
0x1fb9   :  { %v8332_v7 = vpop.eup %8331 }
0x1fba   :  { %v6201_v51 = vmul.f32 %v8332_v7, %v6196_v16  ;;  %v6199_v19 = vpop.xlane.xlu1 %6198  ;;  %v6310_v26 = vpop.xlane.xlu0 %6309  ;;  %vm6206_vm13 = vweird.f32 %v8332_v7 }
0x1fbb   :  { %8333 = vrcp.f32 %v6199_v19  ;;  %v6312_v11 = vsub.f32 %v6302_v37, %v6310_v26  ;;  %vm6207_vm3 = vmor %vm6205_vm14, %vm6206_vm13  ;;  %v6226_v29 = vand.u32 2147483648, %v6199_v19  ;;  %v6224_v44 = vand.u32 2147483647, %v6199_v19 }
0x1fbc   :  { %v6202_v47 = vsub.f32 1.0, %v6201_v51  ;;  %vm6220_vm9 = vweird.f32 %v6199_v19 }
0x1fbd   :  { %v6315_v8 = vmul.f32 1.442695, %v6312_v11  ;;  %v6227_v55 = vor.u32 1.1754944e-38, %v6226_v29  ;;  %vm6225_vm11 = vcmp.eq.f32.partialorder %v6224_v44, 8.507059e+37 }
0x1fbe   :  { %v6203_v58 = vmul.f32 %v8332_v7, %v6202_v47 }
0x1fbf   :  { %8335 = vpow2.f32 %v6315_v8 }
0x1fc0   :  { %v6204_v45 = vadd.f32 %v8332_v7, %v6203_v58 }
0x1fc1   :  { %v8334_v35 = vpop.eup %8333 }
0x1fc2   :  { %v6208_v39 = vsel %vm6207_vm3, %v8332_v7, %v6204_v45  ;;  %v6216_v4 = vmul.f32 %v8334_v35, %v6199_v19  ;;  %v6319_v2 = vpop.xlane.xlu1 %6318  ;;  %vm6221_vm8 = vweird.f32 %v8334_v35  ;;  %v8076_v45 = vld [vmem:[%s11596_s8 + $0xf] ss:$0 sm:$0xff] }
0x1fc3   :  { %v6213_v50 = vsel %vm6210_vm7, %v6212_v25, %v6208_v39  ;;  %8337 = vrcp.f32 %v6319_v2  ;;  %vm6222_vm10 = vmor %vm6220_vm9, %vm6221_vm8  ;;  %v6334_v48 = vand.u32 2147483648, %v6319_v2  ;;  %v6332_v15 = vand.u32 2147483647, %v6319_v2 }
0x1fc4   :  { %v6214_v9 = vmul.f32 %v8326_v0, %v6213_v50  ;;  %v6217_v27 = vsub.f32 1.0, %v6216_v4  ;;  %vm6328_vm13 = vweird.f32 %v6319_v2  ;;  %v6505_v39 = vadd.f32 %v8076_v45, %v6504_v49  ;;  %v6507_v4 = vpop.f32.mrf.mxu0 }
0x1fc5   :  { %v8336_v41 = vpop.eup %8335  ;;  %v6335_v52 = vor.u32 1.1754944e-38, %v6334_v48  ;;  %vm6333_vm3 = vcmp.eq.f32.partialorder %v6332_v15, 8.507059e+37  ;;  %v6508_v50 = vadd.f32 %v8076_v45, %v6507_v4 }
0x1fc6   :  { %v11306_v17 = vadd.f32 %v6214_v9, %v11139_v30  ;;  %v6218_v12 = vmul.f32 %v8334_v35, %v6217_v27  ;;  %7920 = vmatmul.msk.f32.vlgmr.msrb.gmra.mxu3 %vm296_vm5, %v6214_v9  ;;  %v6320_v61 = vsel %vm300_vm6, %v8336_v41, 0.0 }
0x1fc7   :  { %6321 = vadd.xlane.f32.xlu2 %v6320_v61 }
0x1fc8   :  { %v6219_v32 = vadd.f32 %v8334_v35, %v6218_v12 }
0x1fc9   :  { %v8338_v31 = vpop.eup %8337 }
0x1fca   :  { %v6324_v0 = vmul.f32 %v8338_v31, %v6319_v2  ;;  %v6223_v5 = vsel %vm6222_vm10, %v8334_v35, %v6219_v32  ;;  %vm6329_vm12 = vweird.f32 %v8338_v31 }
0x1fcb   :  { %v6228_v37 = vsel %vm6225_vm11, %v6227_v55, %v6223_v5  ;;  %vm6330_vm14 = vmor %vm6328_vm13, %vm6329_vm12 }
0x1fcc   :  { %v6325_v63 = vsub.f32 1.0, %v6324_v0  ;;  %v6229_v30 = vmul.f32 %v11272_v54, %v6228_v37  ;;  %v6510_v29 = vpop.f32.mrf.mxu0 }
0x1fcd   :  { %v6511_v12 = vadd.f32 %v8076_v45, %v6510_v29 }
0x1fce   :  { %v6326_v23 = vmul.f32 %v8338_v31, %v6325_v63  ;;  %7921 = vmatmul.msk.f32.gmra.mxu3 %vm296_vm5, %v6229_v30  ;;  %v11313_v60 = vadd.f32 %v6229_v30, %v11147_v1  ;;  %v7965_v1 = vld [vmem:[%s11597_s9 + $0x78] sm:$0xff] }
0x1fcf   :  { %6539 = vmatpush.msra.mxu2 %v7965_v1 }
0x1fd0   :  { %v6327_v6 = vadd.f32 %v8338_v31, %v6326_v23 }
0x1fd2   :  { %v6331_v46 = vsel %vm6330_vm14, %v8338_v31, %v6327_v6 }
0x1fd3   :  { %v6336_v36 = vsel %vm6333_vm3, %v6335_v52, %v6331_v46 }
0x1fd4   :  { %v6337_v24 = vmul.f32 %v11277_v56, %v6336_v36 }
0x1fd6   :  { %v11317_v54 = vadd.f32 %v6337_v24, %v11151_v62  ;;  %7927 = vmatmul.msk.f32.vlgmr.msrb.gmra.mxu2 %vm296_vm5, %v6337_v24  ;;  %7950 = vmatmul.msk.f32.vlgmr.msra.gmra.mxu3 %vm113_vm2, %v10115_v57 }
0x1fde   :  { %7951 = vmatmul.msk.f32.gmra.mxu3 %vm113_vm2, %v10126_v40 }
0x1fe6   :  { %7952 = vmatmul.msk.f32.gmra.mxu3 %vm113_vm2, %v10137_v18 }
0x203a   :  { %v6322_v56 = vpop.xlane.xlu2 %6321 }
0x203b   :  { %8339 = vrcp.f32 %v6322_v56  ;;  %v6349_v33 = vand.u32 2147483648, %v6322_v56  ;;  %v6347_v7 = vand.u32 2147483647, %v6322_v56  ;;  %vm6343_vm8 = vweird.f32 %v6322_v56 }
0x203d   :  { %v6350_v26 = vor.u32 1.1754944e-38, %v6349_v33  ;;  %vm6348_vm10 = vcmp.eq.f32.partialorder %v6347_v7, 8.507059e+37 }
0x2041   :  { %v8340_v62 = vpop.eup %8339 }
0x2042   :  { %v6339_v16 = vmul.f32 %v8340_v62, %v6322_v56  ;;  %vm6344_vm7 = vweird.f32 %v8340_v62 }
0x2043   :  { %vm6345_vm9 = vmor %vm6343_vm8, %vm6344_vm7 }
0x2044   :  { %v6340_v59 = vsub.f32 1.0, %v6339_v16 }
0x2046   :  { %v6341_v28 = vmul.f32 %v8340_v62, %v6340_v59 }
0x2048   :  { %v6342_v51 = vadd.f32 %v8340_v62, %v6341_v28 }
0x2049   :  { %v6256_v19 = vpop.f32.mrf.mxu3 }
0x204a   :  { %v11330_v47 = vadd.f32 %v6256_v19, %v11168_v34  ;;  %v6346_v11 = vsel %vm6345_vm9, %v8340_v62, %v6342_v51  ;;  %v6424_v34 = vpop.f32.mrf.mxu1 }
0x204b   :  { %v6351_v14 = vsel %vm6348_vm10, %v6350_v26, %v6346_v11 }
0x204c   :  { %v6352_v58 = vmul.f32 %v8336_v41, %v6351_v14 }
0x204e   :  { %7928 = vmatmul.msk.f32.gmra.mxu2 %vm296_vm5, %v6352_v58  ;;  %v11334_v8 = vadd.f32 %v6352_v58, %v11173_v3  ;;  %v8077_v3 = vld [vmem:[%s11629_s6 + $0xf] ss:$0 sm:$0xff] }
0x2051   :  { %v6259_v35 = vpop.f32.mrf.mxu3 }
0x2052   :  { %v11340_v25 = vadd.f32 %v6259_v35, %v11179_v22  ;;  %v6427_v9 = vpop.f32.mrf.mxu1  ;;  %v8075_v22 = vld [vmem:[%s11630_s3 + $0xf] ss:$0 sm:$0xff] }
0x2053   :  { %v6425_v61 = vadd.f32 %v8075_v22, %v6424_v34  ;;  %v6428_v37 = vadd.f32 %v8075_v22, %v6427_v9 }
0x2055   :  { %v6670_v23 = vrot.slane %v6428_v37, 1 }
0x2056   :  { %7966 = vmatmul.msk.f32.vlgmr.msra.gmra.mxu2 %vm225_vm4, %v6505_v39 }
0x2059   :  { %v6464_v2 = vpop.f32.mrf.mxu3  ;;  %v11361_v6 = vpop.f32.mrf.mxu2 }
0x205a   :  { %v6465_v44 = vadd.f32 %v8077_v3, %v6464_v2  ;;  %v6430_v32 = vpop.f32.mrf.mxu1 }
0x205b   :  { %v6431_v0 = vadd.f32 %v8075_v22, %v6430_v32 }
0x205d   :  { %v6671_v30 = vrot.slane %v6431_v0, 1 }
0x205e   :  { %7967 = vmatmul.msk.f32.gmra.mxu2 %vm225_vm4, %v6508_v50 }
0x205f   :  { %v6672_v15 = vsel %vm78_vm0, %v6670_v23, %v6671_v30 }
0x2061   :  { %v6467_v27 = vpop.f32.mrf.mxu3 }
0x2062   :  { %v6468_v41 = vadd.f32 %v8077_v3, %v6467_v27 }
0x2064   :  { %7969 = vmatpush.xpose.msk.msrb.mxu1 %vm225_vm4, %v6468_v41  ;;  %v6674_v63 = vrot.slane %v6468_v41, 1 }
0x2066   :  { %7968 = vmatmul.msk.f32.gmra.mxu2 %vm225_vm4, %v6511_v12 }
0x2068   :  { %7970 = vmatpush.xpose.msk.msrb.mxu1 %vm225_vm4, %v6465_v44 }
0x2069   :  { %v6470_v31 = vpop.f32.mrf.mxu3 }
0x206a   :  { %v6471_v55 = vadd.f32 %v8077_v3, %v6470_v31 }
0x206b   :  { %7971 = vmatmul.msk.f32.vlgmr.msrb.gmra.mxu1 %vm225_vm4, %v6425_v61 }
0x206c   :  { %v6675_v5 = vrot.slane %v6471_v55, 1 }
0x206e   :  { %7976 = vmatpush.xpose.msk.msra.mxu0 %vm225_vm4, %v6675_v5  ;;  %v6676_v48 = vsel %vm78_vm0, %v6674_v63, %v6675_v5 }
0x2072   :  { %7977 = vmatpush.xpose.msk.msra.mxu0 %vm225_vm4, %v6676_v48 }
0x2073   :  { %7972 = vmatmul.msk.f32.gmra.mxu1 %vm225_vm4, %v6428_v37 }
0x2075   :  { %7978 = vmatmul.msk.f32.vlgmr.msra.gmra.mxu0 %vm225_vm4, %v6672_v15 }
0x207d   :  { %7979 = vmatmul.msk.f32.gmra.mxu0 %vm225_vm4, %v6671_v30 }
0x20d1   :  { %v6386_v52 = vpop.f32.mrf.mxu2 }
0x20d2   :  { %v11364_v46 = vadd.f32 %v6386_v52, %v11263_v20 }
0x20d9   :  { %v6541_v36 = vpop.f32.mrf.mxu2 }
0x20e1   :  { %v6544_v24 = vpop.f32.mrf.mxu2 }
0x20e2   :  { %7973 = vmatpush.msk.msrb.mxu3 %vm96_vm1, %v6544_v24  ;;  %v6757_v16 = vrot.slane %v6544_v24, 1 }
0x20e4   :  { %6657 = vmatpush.msrb.mxu3 %v6541_v36 }
0x20e8   :  { %v6579_v1 = vpop.f32.mrf.mxu1 }
0x20e9   :  { %v6585_v56 = vsel %vm296_vm5, %v6579_v1, -inf  ;;  %v6547_v62 = vpop.f32.mrf.mxu2 }
0x20ea   :  { %6586 = vmax.xlane.f32.xlu0 %v6585_v56  ;;  %v6758_v59 = vrot.slane %v6547_v62, 1 }
0x20ec   :  { %7980 = vmatpush.msk.msrb.mxu2 %vm96_vm1, %v6758_v59  ;;  %v6759_v33 = vsel %vm78_vm0, %v6757_v16, %v6758_v59 }
0x20ee   :  { %6784 = vmatpush.msrb.mxu2 %v6759_v33 }
0x20f0   :  { %v6582_v28 = vpop.f32.mrf.mxu1 }
0x20f1   :  { %v6588_v20 = vsel %vm300_vm6, %v6582_v28, -inf }
0x20f2   :  { %v6702_v7 = vpop.f32.mrf.mxu0  ;;  %6589 = vmax.xlane.f32.xlu2 %v6588_v20 }
0x20f3   :  { %v6708_v51 = vsel %vm296_vm5, %v6702_v7, -inf }
0x20f4   :  { %6709 = vmax.xlane.f32.xlu1 %v6708_v51 }
0x20fa   :  { %v6705_v2 = vpop.f32.mrf.mxu0 }
0x20fb   :  { %v6711_v3 = vsel %vm300_vm6, %v6705_v2, -inf }
0x215d   :  { %v6587_v19 = vpop.xlane.xlu0 %6586 }
0x215e   :  { %v6591_v26 = vsub.f32 %v6579_v1, %v6587_v19 }
0x2160   :  { %v6593_v11 = vmul.f32 1.442695, %v6591_v26 }
0x2162   :  { %8341 = vpow2.f32 %v6593_v11 }
0x2165   :  { %v6590_v14 = vpop.xlane.xlu2 %6589 }
0x2166   :  { %v6592_v58 = vsub.f32 %v6582_v28, %v6590_v14 }
0x2167   :  { %v6710_v49 = vpop.xlane.xlu1 %6709 }
0x2168   :  { %v8342_v45 = vpop.eup %8341  ;;  %v6595_v35 = vmul.f32 1.442695, %v6592_v58  ;;  %v6714_v34 = vsub.f32 %v6702_v7, %v6710_v49 }
0x2169   :  { %v6597_v39 = vsel %vm296_vm5, %v8342_v45, 0.0 }
0x216a   :  { %8343 = vpow2.f32 %v6595_v35  ;;  %v6716_v4 = vmul.f32 1.442695, %v6714_v34  ;;  %6598 = vadd.xlane.f32.xlu0 %v6597_v39 }
0x216c   :  { %8345 = vpow2.f32 %v6716_v4 }
0x2170   :  { %v11373_v50 = vpop.eup %8343 }
0x2171   :  { %v6600_v9 = vsel %vm300_vm6, %v11373_v50, 0.0 }
0x2172   :  { %v11378_v27 = vpop.eup %8345  ;;  %6601 = vadd.xlane.f32.xlu2 %v6600_v9  ;;  %6712 = vmax.xlane.f32.xlu0 %v6711_v3 }
0x2173   :  { %v6720_v29 = vsel %vm296_vm5, %v11378_v27, 0.0 }
0x2174   :  { %6721 = vadd.xlane.f32.xlu1 %v6720_v29 }
0x21dd   :  { %v6599_v41 = vpop.xlane.xlu0 %6598 }
0x21de   :  { %8347 = vrcp.f32 %v6599_v41  ;;  %v6614_v0 = vand.u32 2147483648, %v6599_v41  ;;  %v6612_v37 = vand.u32 2147483647, %v6599_v41  ;;  %vm6608_vm4 = vweird.f32 %v6599_v41 }
0x21e0   :  { %v6615_v23 = vor.u32 1.1754944e-38, %v6614_v0  ;;  %vm6613_vm12 = vcmp.eq.f32.partialorder %v6612_v37, 8.507059e+37 }
0x21e4   :  { %v8348_v22 = vpop.eup %8347 }
0x21e5   :  { %v6604_v12 = vmul.f32 %v8348_v22, %v6599_v41  ;;  %v6602_v44 = vpop.xlane.xlu2 %6601  ;;  %v6713_v61 = vpop.xlane.xlu0 %6712  ;;  %vm6609_vm0 = vweird.f32 %v8348_v22 }
0x21e6   :  { %8349 = vrcp.f32 %v6602_v44  ;;  %v6715_v31 = vsub.f32 %v6705_v2, %v6713_v61  ;;  %vm6610_vm11 = vmor %vm6608_vm4, %vm6609_vm0  ;;  %v6627_v16 = vand.u32 2147483647, %v6602_v44  ;;  %v6629_v59 = vand.u32 2147483648, %v6602_v44 }
0x21e7   :  { %v6605_v32 = vsub.f32 1.0, %v6604_v12  ;;  %v6722_v55 = vpop.xlane.xlu1 %6721  ;;  %vm6623_vm14 = vweird.f32 %v6602_v44 }
0x21e8   :  { %8351 = vrcp.f32 %v6722_v55  ;;  %v6718_v63 = vmul.f32 1.442695, %v6715_v31  ;;  %v6735_v51 = vand.u32 2147483647, %v6722_v55  ;;  %v6737_v19 = vand.u32 2147483648, %v6722_v55 }
0x21e9   :  { %v6606_v5 = vmul.f32 %v8348_v22, %v6605_v32  ;;  %v6630_v49 = vor.u32 1.1754944e-38, %v6629_v59  ;;  %vm6628_vm8 = vcmp.eq.f32.partialorder %v6627_v16, 8.507059e+37  ;;  %vm6731_vm9 = vweird.f32 %v6722_v55  ;;  %v8078_v31 = vld [vmem:[%s11598_s10 + $0x1] ss:$0 sm:$0xff] }
0x21ea   :  { %8353 = vpow2.f32 %v6718_v63  ;;  %v6738_v35 = vor.u32 1.1754944e-38, %v6737_v19  ;;  %vm6736_vm0 = vcmp.eq.f32.partialorder %v6735_v51, 8.507059e+37  ;;  %v4371_v32 = vadd.f32 %v10610_v38, %v10566_v21 }
0x21eb   :  { %v6607_v30 = vadd.f32 %v8348_v22, %v6606_v5 }
0x21ec   :  { %v8350_v48 = vpop.eup %8349  ;;  %v4777_v5 = vadd.f32 %v10768_v43, %v4371_v32 }
0x21ed   :  { %v6611_v15 = vsel %vm6610_vm11, %v8348_v22, %v6607_v30  ;;  %v6619_v52 = vmul.f32 %v8350_v48, %v6602_v44  ;;  %vm6624_vm13 = vweird.f32 %v8350_v48 }
0x21ee   :  { %v8352_v36 = vpop.eup %8351  ;;  %v6616_v24 = vsel %vm6613_vm12, %v6615_v23, %v6611_v15  ;;  %vm6625_vm7 = vmor %vm6623_vm14, %vm6624_vm13 }
0x21ef   :  { %v6617_v1 = vmul.f32 %v8342_v45, %v6616_v24  ;;  %v6620_v56 = vsub.f32 1.0, %v6619_v52  ;;  %v6727_v62 = vmul.f32 %v8352_v36, %v6722_v55  ;;  %vm6732_vm3 = vweird.f32 %v8352_v36 }
0x21f0   :  { %v8354_v33 = vpop.eup %8353  ;;  %vm6733_vm10 = vmor %vm6731_vm9, %vm6732_vm3 }
0x21f1   :  { %v6667_v28 = vadd.f32 %v6617_v1, %v11306_v17  ;;  %v6621_v20 = vmul.f32 %v8350_v48, %v6620_v56  ;;  %v6728_v7 = vsub.f32 1.0, %v6727_v62  ;;  %7974 = vmatmul.msk.f32.vlgmr.msrb.gmra.mxu3 %vm296_vm5, %v6617_v1  ;;  %v6723_v26 = vsel %vm300_vm6, %v8354_v33, 0.0 }
0x21f2   :  { %6724 = vadd.xlane.f32.xlu0 %v6723_v26 }
0x21f3   :  { %v7056_v11 = vmul.f32 0.125, %v6667_v28  ;;  %v6622_v14 = vadd.f32 %v8350_v48, %v6621_v20  ;;  %v6729_v58 = vmul.f32 %v8352_v36, %v6728_v7 }
0x21f5   :  { %7058 = vst.msk [vmem:[%s11610_s22] sm:$0xff] %vm296_vm5, %v7056_v11  ;;  %v6730_v17 = vadd.f32 %v8352_v36, %v6729_v58  ;;  %v6626_v45 = vsel %vm6625_vm7, %v8350_v48, %v6622_v14  ;;  %v5180_v48 = vadd.f32 %v10926_v10, %v4777_v5  ;;  %v8009_v5 = vld [vmem:[%s11601_s13 + $0xd8] sm:$0xff] }
0x21f6   :  { %v6631_v34 = vsel %vm6628_vm8, %v6630_v49, %v6626_v45 }
0x21f7   :  { %v6734_v39 = vsel %vm6733_vm10, %v8352_v36, %v6730_v17  ;;  %v6632_v4 = vmul.f32 %v11373_v50, %v6631_v34  ;;  %v5583_v38 = vadd.f32 %v11088_v42, %v5180_v48  ;;  %v7992_v34 = vld [vmem:[%s11599_s11 + $0x70] sm:$0xff] }
0x21f8   :  { %v6739_v2 = vsel %vm6736_vm0, %v6738_v35, %v6734_v39  ;;  %v7991_v39 = vld [vmem:[%s11599_s11 + $0x68] sm:$0xff]  ;;  %v8008_v48 = vld [vmem:[%s11601_s13 + $0xd0] sm:$0xff] }
0x21f9   :  { %v6740_v9 = vmul.f32 %v11378_v27, %v6739_v2  ;;  %7975 = vmatmul.msk.f32.gmra.mxu3 %vm296_vm5, %v6632_v4  ;;  %v6668_v3 = vadd.f32 %v6632_v4, %v11313_v60  ;;  %v5986_v43 = vadd.f32 %v11260_v53, %v5583_v38  ;;  %v7989_v4 = vld [vmem:[%s11599_s11 + $0x58] sm:$0xff]  ;;  %v7988_v2 = vld [vmem:[%s11599_s11 + $0x50] sm:$0xff] }
0x21fb   :  { %v6794_v29 = vadd.f32 %v6740_v9, %v11317_v54  ;;  %v7057_v41 = vmul.f32 0.125, %v6668_v3  ;;  %7981 = vmatmul.msk.f32.vlgmr.msrb.gmra.mxu2 %vm296_vm5, %v6740_v9  ;;  %v6389_v1 = vadd.f32 %v11361_v6, %v5986_v43  ;;  %v7987_v9 = vld [vmem:[%s11599_s11 + $0x48] sm:$0xff]  ;;  %v7986_v3 = vld [vmem:[%s11599_s11 + $0x40] sm:$0xff] }
0x21fd   :  { %v7060_v22 = vmul.f32 0.125, %v6794_v29  ;;  %7059 = vst.msk [vmem:[%s11610_s22 + $0x8] sm:$0x1] %vm300_vm6, %v7057_v41 }
0x21ff   :  { %8017 = vst.msk [vmem:[%s11610_s22 + $0x10] sm:$0xff] %vm296_vm5, %v7060_v22 }
0x2265   :  { %v6725_v50 = vpop.xlane.xlu0 %6724 }
0x2266   :  { %8355 = vrcp.f32 %v6725_v50  ;;  %v6752_v54 = vand.u32 2147483648, %v6725_v50  ;;  %v6750_v61 = vand.u32 2147483647, %v6725_v50  ;;  %vm6746_vm11 = vweird.f32 %v6725_v50 }
0x2268   :  { %v6753_v37 = vor.u32 1.1754944e-38, %v6752_v54  ;;  %vm6751_vm13 = vcmp.eq.f32.partialorder %v6750_v61, 8.507059e+37  ;;  %v8011_v54 = vld [vmem:[%s11601_s13 + $0xe8] sm:$0xff] }
0x226c   :  { %v8356_v27 = vpop.eup %8355 }
0x226d   :  { %v6742_v60 = vmul.f32 %v8356_v27, %v6725_v50  ;;  %vm6747_vm4 = vweird.f32 %v8356_v27  ;;  %v8013_v50 = vld [vmem:[%s11601_s13 + $0xf8] sm:$0xff] }
0x226e   :  { %vm6748_vm12 = vmor %vm6746_vm11, %vm6747_vm4  ;;  %6971 = vmatpush.msra.mxu3 %v8013_v50 }
0x226f   :  { %v6743_v12 = vsub.f32 1.0, %v6742_v60 }
0x2271   :  { %v6744_v44 = vmul.f32 %v8356_v27, %v6743_v12 }
0x2273   :  { %v6745_v55 = vadd.f32 %v8356_v27, %v6744_v44 }
0x2274   :  { %v6659_v0 = vpop.f32.mrf.mxu3 }
0x2275   :  { %v6665_v63 = vadd.f32 %v6659_v0, %v11330_v47  ;;  %v6749_v30 = vsel %vm6748_vm12, %v8356_v27, %v6745_v55  ;;  %v8012_v27 = vld [vmem:[%s11601_s13 + $0xf0] sm:$0xff] }
0x2276   :  { %v6754_v15 = vsel %vm6751_vm13, %v6753_v37, %v6749_v30  ;;  %6972 = vmatpush.msra.mxu3 %v8012_v27 }
0x2277   :  { %v6809_v23 = vadd.f32 %v8078_v31, %v6665_v63  ;;  %v6755_v21 = vmul.f32 %v8354_v33, %v6754_v15 }
0x2278   :  { %6973 = vmatpush.msra.mxu3 %v8011_v54 }
0x2279   :  { %v6812_v52 = vadd.f32 %v6809_v23, %v10115_v57  ;;  %7982 = vmatmul.msk.f32.gmra.mxu2 %vm296_vm5, %v6755_v21  ;;  %v6795_v36 = vadd.f32 %v6755_v21, %v11334_v8  ;;  %v11492_v21 = vld [vmem:[%s11603_s15 + $0x1] ss:$0 sm:$0xff] }
0x227b   :  { %v6819_v24 = vsel %vm113_vm2, %v6812_v52, 0.0  ;;  %v7061_v47 = vmul.f32 0.125, %v6795_v36  ;;  %v11499_v36 = vld [vmem:[%s11604_s16 + $0x1] ss:$0 sm:$0xff] }
0x227c   :  { %6820 = vadd.xlane.f32.xlu1 %v6819_v24  ;;  %v6662_v10 = vpop.f32.mrf.mxu3 }
0x227d   :  { %8018 = vst.msk [vmem:[%s11610_s22 + $0x18] sm:$0x1] %vm300_vm6, %v7061_v47  ;;  %v6666_v56 = vadd.f32 %v6662_v10, %v11340_v25 }
0x227e   :  { %v6786_v42 = vpop.f32.mrf.mxu2 }
0x227f   :  { %v6792_v57 = vadd.f32 %v6786_v42, %v6389_v1 }
0x2281   :  { %v6798_v62 = vrot.slane %v6792_v57, 7 }
0x2283   :  { %v6803_v8 = vsel %vm96_vm1, %v6666_v56, %v6798_v62 }
0x2284   :  { %v6810_v53 = vadd.f32 %v8078_v31, %v6803_v8 }
0x2286   :  { %v6813_v16 = vadd.f32 %v6810_v53, %v10126_v40 }
0x2288   :  { %v6822_v59 = vsel %vm113_vm2, %v6813_v16, 0.0 }
0x2289   :  { %6823 = vadd.xlane.f32.xlu2 %v6822_v59 }
0x22ef   :  { %v6821_v6 = vpop.xlane.xlu1 %6820 }
0x22f0   :  { %v6828_v33 = vmul.f32 %v6821_v6, %v9876_v13 }
0x22f2   :  { %v11427_v28 = vsub.f32 %v6812_v52, %v6828_v33  ;;  %v8007_v33 = vld [vmem:[%s11601_s13 + $0xc8] sm:$0xff] }
0x22f4   :  { %v6834_v20 = vmul.f32 %v11427_v28, %v11427_v28 }
0x22f6   :  { %v6837_v7 = vsel %vm113_vm2, %v6834_v20, 0.0  ;;  %v8005_v20 = vld [vmem:[%s11601_s13 + $0xb8] sm:$0xff] }
0x22f7   :  { %6838 = vadd.xlane.f32.xlu1 %v6837_v7  ;;  %v8004_v7 = vld [vmem:[%s11601_s13 + $0xb0] sm:$0xff] }
0x22fc   :  { %v6824_v25 = vpop.xlane.xlu2 %6823  ;;  %v6789_v19 = vpop.f32.mrf.mxu2 }
0x22fd   :  { %v6829_v51 = vmul.f32 %v6824_v25, %v9876_v13  ;;  %v6793_v40 = vadd.f32 %v6789_v19, %v11364_v46  ;;  %v7993_v46 = vld [vmem:[%s11599_s11 + $0x78] sm:$0xff]  ;;  %v8003_v25 = vld [vmem:[%s11601_s13 + $0xa8] sm:$0xff] }
0x22fe   :  { %6928 = vmatpush.msra.mxu1 %v7993_v46  ;;  %v8001_v19 = vld [vmem:[%s11601_s13 + $0x98] sm:$0xff] }
0x22ff   :  { %v11434_v26 = vsub.f32 %v6813_v16, %v6829_v51  ;;  %v6799_v11 = vrot.slane %v6793_v40, 7  ;;  %v8002_v51 = vld [vmem:[%s11601_s13 + $0xa0] sm:$0xff]  ;;  %v8000_v40 = vld [vmem:[%s11601_s13 + $0x90] sm:$0xff] }
0x2300   :  { %6929 = vmatpush.msra.mxu1 %v7992_v34 }
0x2301   :  { %v6835_v14 = vmul.f32 %v11434_v26, %v11434_v26  ;;  %v6800_v58 = vsel %vm96_vm1, %v6798_v62, %v6799_v11  ;;  %v7998_v11 = vld [vmem:[%s11601_s13 + $0x80] sm:$0xff] }
0x2302   :  { %v6811_v17 = vadd.f32 %v8078_v31, %v6800_v58  ;;  %6930 = vmatpush.msra.mxu1 %v7991_v39  ;;  %v8010_v31 = vld [vmem:[%s11601_s13 + $0xe0] sm:$0xff] }
0x2303   :  { %v6840_v49 = vsel %vm113_vm2, %v6835_v14, 0.0  ;;  %6974 = vmatpush.msra.mxu3 %v8010_v31 }
0x2304   :  { %6841 = vadd.xlane.f32.xlu2 %v6840_v49  ;;  %v6814_v45 = vadd.f32 %v6811_v17, %v10137_v18  ;;  %v7990_v18 = vld [vmem:[%s11599_s11 + $0x60] sm:$0xff] }
0x2305   :  { %6931 = vmatpush.msra.mxu1 %v7990_v18  ;;  %6975 = vmatpush.msra.mxu3 %v8009_v5 }
0x2306   :  { %v6825_v35 = vsel %vm3316_vm15, %v6814_v45, 0.0 }
0x2307   :  { %6826 = vadd.xlane.f32.xlu0 %v6825_v35  ;;  %6932 = vmatpush.msra.mxu1 %v7989_v4 }
0x2308   :  { %6976 = vmatpush.msra.mxu3 %v8008_v48 }
0x2309   :  { %6933 = vmatpush.msra.mxu1 %v7988_v2 }
0x230a   :  { %6977 = vmatpush.msra.mxu3 %v8007_v33 }
0x230b   :  { %6934 = vmatpush.msra.mxu1 %v7987_v9 }
0x230d   :  { %6935 = vmatpush.msra.mxu1 %v7986_v3 }
0x236a   :  { %v6839_v29 = vpop.xlane.xlu1 %6838 }
0x236b   :  { %v6846_v41 = vmul.f32 %v6839_v29, %v9876_v13 }
0x236d   :  { %v6849_v22 = vadd.f32 1e-05, %v6846_v41 }
0x236f   :  { %8357 = vrsqrt.f32 %v6849_v22  ;;  %vm6858_vm6 = vweird.f32 %v6849_v22 }
0x2375   :  { %v8358_v60 = vpop.eup %8357 }
0x2376   :  { %v6853_v12 = vmul.f32 %v8358_v60, %v6849_v22  ;;  %vm6859_vm5 = vweird.f32 %v8358_v60 }
0x2377   :  { %v6842_v44 = vpop.xlane.xlu2 %6841  ;;  %vm6860_vm14 = vmor %vm6858_vm6, %vm6859_vm5 }
0x2378   :  { %v6854_v61 = vmul.f32 %v8358_v60, %v6853_v12  ;;  %v6847_v32 = vmul.f32 %v6842_v44, %v9876_v13  ;;  %v8082_v12 = vld [vmem:[%s11602_s14 + $0x1] ss:$0 sm:$0xff] }
0x237a   :  { %v6855_v55 = vmul.f32 0.5, %v6854_v61  ;;  %v6850_v0 = vadd.f32 1e-05, %v6847_v32  ;;  %v6827_v37 = vpop.xlane.xlu0 %6826 }
0x237b   :  { %v6830_v30 = vmul.f32 %v6827_v37, %v9876_v13 }
0x237c   :  { %v6856_v63 = vsub.f32 1.5, %v6855_v55  ;;  %8359 = vrsqrt.f32 %v6850_v0  ;;  %vm6868_vm7 = vweird.f32 %v6850_v0 }
0x237d   :  { %v11487_v15 = vsub.f32 %v6814_v45, %v6830_v30  ;;  %v8081_v45 = vld [vmem:[%s11600_s12 + $0x1] ss:$0 sm:$0xff] }
0x237e   :  { %v6857_v23 = vmul.f32 %v8358_v60, %v6856_v63 }
0x237f   :  { %v6836_v52 = vmul.f32 %v11487_v15, %v11487_v15 }
0x2380   :  { %v6861_v38 = vsel %vm6860_vm14, %v8358_v60, %v6857_v23 }
0x2381   :  { %v6882_v43 = vmul.f32 %v6861_v38, %v11427_v28  ;;  %v6843_v47 = vsel %vm3316_vm15, %v6836_v52, 0.0  ;;  %v8006_v28 = vld [vmem:[%s11601_s13 + $0xc0] sm:$0xff] }
0x2382   :  { %v8360_v24 = vpop.eup %8359  ;;  %6844 = vadd.xlane.f32.xlu1 %v6843_v47  ;;  %6978 = vmatpush.msra.mxu3 %v8006_v28 }
0x2383   :  { %v6888_v1 = vmul.f32 %v11492_v21, %v6882_v43  ;;  %v6863_v10 = vmul.f32 %v8360_v24, %v6850_v0  ;;  %vm6869_vm3 = vweird.f32 %v8360_v24 }
0x2384   :  { %vm6870_vm8 = vmor %vm6868_vm7, %vm6869_vm3  ;;  %6979 = vmatpush.msra.mxu3 %v8005_v20  ;;  %v8083_v20 = vld [vmem:[%s11605_s17 + $0x1] ss:$0 sm:$0xff] }
0x2385   :  { %v11505_v42 = vadd.f32 %v11499_v36, %v6888_v1  ;;  %v6864_v57 = vmul.f32 %v8360_v24, %v6863_v10 }
0x2386   :  { %6980 = vmatpush.msra.mxu3 %v8004_v7 }
0x2387   :  { %v6865_v56 = vmul.f32 0.5, %v6864_v57  ;;  %7995 = vmatmul.msk.f32.vlgmr.msra.gmra.mxu1 %vm113_vm2, %v11505_v42 }
0x2388   :  { %6981 = vmatpush.msra.mxu3 %v8003_v25 }
0x2389   :  { %v6866_v62 = vsub.f32 1.5, %v6865_v56 }
0x238a   :  { %6982 = vmatpush.msra.mxu3 %v8002_v51  ;;  %v8084_v51 = vld [vmem:[%s11606_s18 + $0x1] ss:$0 sm:$0xff] }
0x238b   :  { %v6867_v8 = vmul.f32 %v8360_v24, %v6866_v62 }
0x238c   :  { %6983 = vmatpush.msra.mxu3 %v8001_v19 }
0x238d   :  { %v6871_v53 = vsel %vm6870_vm8, %v8360_v24, %v6867_v8 }
0x238e   :  { %v6883_v16 = vmul.f32 %v6871_v53, %v11434_v26  ;;  %6984 = vmatpush.msra.mxu3 %v8000_v40  ;;  %v7999_v26 = vld [vmem:[%s11601_s13 + $0x88] sm:$0xff] }
0x2390   :  { %v6889_v59 = vmul.f32 %v11492_v21, %v6883_v16  ;;  %6985 = vmatpush.msra.mxu3 %v7999_v26 }
0x2392   :  { %v6895_v6 = vadd.f32 %v11499_v36, %v6889_v59  ;;  %6986 = vmatpush.msra.mxu3 %v7998_v11 }
0x2394   :  { %7996 = vmatmul.msk.f32.gmra.mxu1 %vm113_vm2, %v6895_v6 }
0x23f5   :  { %v6845_v14 = vpop.xlane.xlu1 %6844 }
0x23f6   :  { %v6848_v58 = vmul.f32 %v6845_v14, %v9876_v13 }
0x23f8   :  { %v6851_v49 = vadd.f32 1e-05, %v6848_v58 }
0x23fa   :  { %8361 = vrsqrt.f32 %v6851_v49  ;;  %vm6878_vm10 = vweird.f32 %v6851_v49 }
0x2400   :  { %v8362_v17 = vpop.eup %8361 }
0x2401   :  { %v6873_v35 = vmul.f32 %v8362_v17, %v6851_v49  ;;  %vm6879_vm9 = vweird.f32 %v8362_v17 }
0x2402   :  { %vm6880_vm0 = vmor %vm6878_vm10, %vm6879_vm9 }
0x2403   :  { %v6874_v46 = vmul.f32 %v8362_v17, %v6873_v35 }
0x2404   :  { %v6937_v34 = vpop.f32.mrf.mxu1 }
0x2405   :  { %v6938_v39 = vadd.f32 %v8081_v45, %v6937_v34  ;;  %v6875_v18 = vmul.f32 0.5, %v6874_v46 }
0x2407   :  { %v6946_v4 = vmax.f32 %v6938_v39, 0.0  ;;  %v6876_v2 = vsub.f32 1.5, %v6875_v18 }
0x2409   :  { %6987 = vmatmul.f32.vlgmr.msra.gmra.mxu3 %v6946_v4  ;;  %v6877_v9 = vmul.f32 %v8362_v17, %v6876_v2 }
0x240b   :  { %v6881_v3 = vsel %vm6880_vm0, %v8362_v17, %v6877_v9 }
0x240c   :  { %v6884_v29 = vmul.f32 %v6881_v3, %v11487_v15 }
0x240e   :  { %v6890_v41 = vmul.f32 %v11492_v21, %v6884_v29 }
0x2410   :  { %v6896_v50 = vadd.f32 %v11499_v36, %v6890_v41 }
0x2411   :  { %v6940_v22 = vpop.f32.mrf.mxu1 }
0x2412   :  { %v6941_v27 = vadd.f32 %v8081_v45, %v6940_v22  ;;  %7997 = vmatmul.msk.f32.gmra.mxu1 %vm113_vm2, %v6896_v50 }
0x2414   :  { %v6947_v60 = vmax.f32 %v6941_v27, 0.0 }
0x2416   :  { %6990 = vmatmul.f32.gmra.mxu3 %v6947_v60 }
0x248c   :  { %v6988_v54 = vpop.f32.mrf.mxu3 }
0x248d   :  { %v6989_v44 = vadd.f32 %v8082_v12, %v6988_v54 }
0x248f   :  { %v6996_v61 = vadd.f32 %v6989_v44, %v11505_v42  ;;  %v6943_v32 = vpop.f32.mrf.mxu1 }
0x2490   :  { %v6944_v31 = vadd.f32 %v8081_v45, %v6943_v32 }
0x2491   :  { %v7002_v55 = vsel %vm113_vm2, %v6996_v61, 0.0 }
0x2492   :  { %7003 = vadd.xlane.f32.xlu2 %v7002_v55  ;;  %v6948_v0 = vmax.f32 %v6944_v31, 0.0 }
0x2494   :  { %6993 = vmatmul.f32.gmra.mxu3 %v6948_v0 }
0x2499   :  { %v6991_v5 = vpop.f32.mrf.mxu3 }
0x249a   :  { %v6992_v37 = vadd.f32 %v8082_v12, %v6991_v5 }
0x249c   :  { %v6997_v63 = vadd.f32 %v6992_v37, %v6895_v6 }
0x249e   :  { %v7005_v30 = vsel %vm113_vm2, %v6997_v63, 0.0 }
0x249f   :  { %7006 = vadd.xlane.f32.xlu0 %v7005_v30 }
0x2505   :  { %v7004_v48 = vpop.xlane.xlu2 %7003 }
0x2506   :  { %v7008_v23 = vmul.f32 %v7004_v48, %v9876_v13 }
0x2508   :  { %v7010_v15 = vsub.f32 %v6996_v61, %v7008_v23 }
0x250a   :  { %v7012_v21 = vmul.f32 %v7010_v15, %v7010_v15 }
0x250c   :  { %v7014_v38 = vsel %vm113_vm2, %v7012_v21, 0.0 }
0x250d   :  { %7015 = vadd.xlane.f32.xlu1 %v7014_v38 }
0x2512   :  { %v7007_v52 = vpop.xlane.xlu0 %7006 }
0x2513   :  { %v7009_v36 = vmul.f32 %v7007_v52, %v9876_v13 }
0x2515   :  { %v7011_v43 = vsub.f32 %v6997_v63, %v7009_v36 }
0x2517   :  { %v7013_v24 = vmul.f32 %v7011_v43, %v7011_v43  ;;  %v6994_v47 = vpop.f32.mrf.mxu3 }
0x2519   :  { %v7017_v1 = vsel %vm113_vm2, %v7013_v24, 0.0 }
0x251a   :  { %7018 = vadd.xlane.f32.xlu2 %v7017_v1 }
0x2580   :  { %v7016_v10 = vpop.xlane.xlu1 %7015 }
0x2581   :  { %v7020_v42 = vmul.f32 %v7016_v10, %v9876_v13  ;;  %v8086_v10 = vld [vmem:[%s11608_s20] ss:$0 sm:$0xff] }
0x2583   :  { %v7022_v57 = vadd.f32 1e-05, %v7020_v42 }
0x2585   :  { %8363 = vrsqrt.f32 %v7022_v57  ;;  %vm7030_vm11 = vweird.f32 %v7022_v57 }
0x258b   :  { %v8364_v56 = vpop.eup %8363 }
0x258c   :  { %v7025_v62 = vmul.f32 %v8364_v56, %v7022_v57  ;;  %vm7031_vm4 = vweird.f32 %v8364_v56 }
0x258d   :  { %v7019_v8 = vpop.xlane.xlu2 %7018  ;;  %vm7032_vm12 = vmor %vm7030_vm11, %vm7031_vm4 }
0x258e   :  { %v7026_v53 = vmul.f32 %v8364_v56, %v7025_v62  ;;  %v7021_v16 = vmul.f32 %v7019_v8, %v9876_v13 }
0x2590   :  { %v7027_v59 = vmul.f32 0.5, %v7026_v53  ;;  %v7023_v6 = vadd.f32 1e-05, %v7021_v16 }
0x2592   :  { %v7028_v33 = vsub.f32 1.5, %v7027_v59  ;;  %8365 = vrsqrt.f32 %v7023_v6  ;;  %vm7040_vm5 = vweird.f32 %v7023_v6 }
0x2594   :  { %v7029_v28 = vmul.f32 %v8364_v56, %v7028_v33 }
0x2596   :  { %v7033_v7 = vsel %vm7032_vm12, %v8364_v56, %v7029_v28 }
0x2597   :  { %v7044_v25 = vmul.f32 %v7033_v7, %v7010_v15 }
0x2598   :  { %v8366_v19 = vpop.eup %8365 }
0x2599   :  { %v7035_v40 = vmul.f32 %v8366_v19, %v7023_v6  ;;  %v7049_v26 = vmul.f32 %v8083_v20, %v7044_v25  ;;  %vm7041_vm13 = vweird.f32 %v8366_v19 }
0x259a   :  { %vm7042_vm6 = vmor %vm7040_vm5, %vm7041_vm13 }
0x259b   :  { %v7036_v11 = vmul.f32 %v8366_v19, %v7035_v40  ;;  %v7054_v14 = vadd.f32 %v8084_v51, %v7049_v26 }
0x259d   :  { %v7037_v58 = vmul.f32 0.5, %v7036_v11  ;;  %v7067_v49 = vsel %vm113_vm2, %v7054_v14, 0.0 }
0x259e   :  { %7068 = vadd.xlane.f32.xlu0 %v7067_v49 }
0x259f   :  { %v7038_v17 = vsub.f32 1.5, %v7037_v58 }
0x25a1   :  { %v7039_v45 = vmul.f32 %v8366_v19, %v7038_v17 }
0x25a3   :  { %v7043_v35 = vsel %vm7042_vm6, %v8366_v19, %v7039_v45 }
0x25a4   :  { %v7045_v46 = vmul.f32 %v7043_v35, %v7011_v43 }
0x25a6   :  { %v7050_v34 = vmul.f32 %v8083_v20, %v7045_v46 }
0x25a8   :  { %v7055_v39 = vadd.f32 %v8084_v51, %v7050_v34 }
0x25aa   :  { %v7070_v18 = vsel %vm113_vm2, %v7055_v39, 0.0 }
0x25ab   :  { %7071 = vadd.xlane.f32.xlu1 %v7070_v18 }
0x2611   :  { %v7069_v4 = vpop.xlane.xlu0 %7068 }
0x2612   :  { %v7073_v2 = vmul.f32 %v7069_v4, %v9876_v13 }
0x2614   :  { %v7075_v9 = vsub.f32 %v7054_v14, %v7073_v2 }
0x2616   :  { %v7077_v3 = vmul.f32 %v7075_v9, %v7075_v9 }
0x2618   :  { %v7079_v29 = vsel %vm113_vm2, %v7077_v3, 0.0 }
0x2619   :  { %7080 = vadd.xlane.f32.xlu2 %v7079_v29 }
0x261e   :  { %v7072_v41 = vpop.xlane.xlu1 %7071 }
0x261f   :  { %v7074_v22 = vmul.f32 %v7072_v41, %v9876_v13 }
0x2621   :  { %v7076_v50 = vsub.f32 %v7055_v39, %v7074_v22 }
0x2623   :  { %v7078_v27 = vmul.f32 %v7076_v50, %v7076_v50 }
0x2625   :  { %v7082_v60 = vsel %vm113_vm2, %v7078_v27, 0.0 }
0x2626   :  { %7083 = vadd.xlane.f32.xlu0 %v7082_v60 }
0x268c   :  { %v7081_v12 = vpop.xlane.xlu2 %7080 }
0x268d   :  { %v7085_v54 = vmul.f32 %v7081_v12, %v9876_v13 }
0x268f   :  { %v7087_v44 = vadd.f32 1e-05, %v7085_v54 }
0x2691   :  { %8367 = vrsqrt.f32 %v7087_v44  ;;  %vm7095_vm2 = vweird.f32 %v7087_v44 }
0x2697   :  { %v8368_v61 = vpop.eup %8367 }
0x2698   :  { %v7090_v32 = vmul.f32 %v8368_v61, %v7087_v44  ;;  %vm7096_vm14 = vweird.f32 %v8368_v61 }
0x2699   :  { %v7084_v31 = vpop.xlane.xlu0 %7083  ;;  %vm7097_vm3 = vmor %vm7095_vm2, %vm7096_vm14 }
0x269a   :  { %v7091_v55 = vmul.f32 %v8368_v61, %v7090_v32  ;;  %v7086_v0 = vmul.f32 %v7084_v31, %v9876_v13  ;;  %v8085_v13 = vld [vmem:[%s11607_s19] ss:$0 sm:$0xff] }
0x269c   :  { %v7088_v5 = vadd.f32 1e-05, %v7086_v0  ;;  %v7092_v37 = vmul.f32 0.5, %v7091_v55 }
0x269e   :  { %8369 = vrsqrt.f32 %v7088_v5  ;;  %v7093_v63 = vsub.f32 1.5, %v7092_v37  ;;  %vm7105_vm8 = vweird.f32 %v7088_v5 }
0x26a0   :  { %v7094_v48 = vmul.f32 %v8368_v61, %v7093_v63 }
0x26a2   :  { %v7098_v21 = vsel %vm7097_vm3, %v8368_v61, %v7094_v48 }
0x26a3   :  { %v7109_v36 = vmul.f32 %v7098_v21, %v7075_v9 }
0x26a4   :  { %v8370_v30 = vpop.eup %8369 }
0x26a5   :  { %v7100_v23 = vmul.f32 %v8370_v30, %v7088_v5  ;;  %vm7106_vm7 = vweird.f32 %v8370_v30  ;;  %v7114_v1 = vmul.f32 %v8085_v13, %v7109_v36 }
0x26a6   :  { %vm7107_vm9 = vmor %vm7105_vm8, %vm7106_vm7 }
0x26a7   :  { %v7101_v15 = vmul.f32 %v8370_v30, %v7100_v23  ;;  %v7119_v57 = vadd.f32 %v8086_v10, %v7114_v1 }
0x26a9   :  { %v7102_v38 = vmul.f32 0.5, %v7101_v15 }
0x26ab   :  { %v7103_v52 = vsub.f32 1.5, %v7102_v38 }
0x26ad   :  { %v7104_v43 = vmul.f32 %v8370_v30, %v7103_v52 }
0x26af   :  { %v7108_v24 = vsel %vm7107_vm9, %v8370_v30, %v7104_v43 }
0x26b0   :  { %v7110_v47 = vmul.f32 %v7108_v24, %v7076_v50 }
0x26b2   :  { %v7115_v42 = vmul.f32 %v8085_v13, %v7110_v47 }
0x26b4   :  { %v7120_v56 = vadd.f32 %v8086_v10, %v7115_v42 }
0x26b6   :  { %v7121_v62 = vsel %vm96_vm1, %v7119_v57, %v7120_v56 }
0x26b7   :  { %7122 = vst.msk [vmem:[#allocation2] sm:$0x3] %vm3316_vm15, %v7121_v62 }
0x26b8   :  { %7133 = dma.vmem_to_hbm [thread:$0]  %s7129_s0, 32, %s7131_s7, [#allocation3]  }
0x26b9   :  { %8395 = dma.done.wait [#allocation3], 32  }
0x26ba   :  { %8396 = vsyncadd [#allocation3], 4294967264 }
0x26bb   :  { %7142 = vsyncpa [#allocation3], 1 }

</bundles_post_ra>
